<compile_context>
chip_gen: v5e
topology: v5e:2x2
jax: 0.10.0
libtpu: 0.0.40
codegen_flags: <defaults>
</compile_context>

<pallas_src>
import functools

import jax
import jax.numpy as jnp
from jax import lax
from jax.experimental import pallas as pl
from jax.experimental.pallas import tpu as pltpu

_BN_EPS = 1e-5


# ======================================================================================
# Fused Pallas kernel: one grid program per `nb` images, whole ResBlock in VMEM.
# ======================================================================================
def _resblock_kernel(
    patches_ref,   # (nb, m, 9*Cin)  bf16  im2col of x[0] for the stride-2 conv0
    cond_ref,      # (nb, m, 128)    bf16  UV condition map, flattened H/2 x W/2
    w0_ref,        # (9*Cin, 2*C)    bf16  [conv0 | downsample (BN folded), centre tap]
    b0_ref,        # (1, 2*C)        f32   [conv0 bias | downsample bias (BN folded)]
    bn0_ref,       # (2, C)          f32   conv0 BN affine (row0 = scale, row1 = bias)
    sfa_ref,       # (128, 128)      bf16  fused SFT stage-A  [s0_ws0|s0_wt0|s1_ws0|s1_wt0]
    sba_ref,       # (1, 128)        f32
    sfb_ref,       # (128, 4*C)      bf16  fused SFT stage-B block diagonal
    sbb_ref,       # (1, 4*C)        f32
    w1_ref,        # (9*C, C)        bf16  conv1
    b1_ref,        # (1, C)          f32
    bn1_ref,       # (2, C)          f32   conv1 BN affine
    w2_ref,        # (9*C, C)        bf16  conv2 (BN folded)
    b2_ref,        # (1, C)          f32   conv2 bias (BN folded)
    o_ref,         # (nb, m, C)      bf16  identity + fea
    pad_ref,       # VMEM scratch (nb, h+2, w+2, C) bf16 : padded feature for 3x3 convs
    *, nb, h, w, cin, cmid,
):
    m = h * w
    bigm = nb * m

    # ---- stage 1: conv0 (3x3 s2) + downsample (1x1 s2) as one wide matmul ----------
    pat = patches_ref[...].reshape(bigm, 9 * cin)
    y = jnp.dot(pat, w0_ref[...], preferred_element_type=jnp.float32) + b0_ref[...]
    bn0 = bn0_ref[...]
    fea = jnp.maximum(y[:, :cmid], 0.0) * bn0[0:1, :] + bn0[1:2, :]   # Conv -> ReLU -> BN
    # identity (BN already folded): store now to shorten its live range.
    o_ref[...] = y[:, cmid:].reshape(nb, m, cmid).astype(o_ref.dtype)

    # ---- both SFT_UV layers' scale/shift, computed ONCE from cond --------------------
    cond = cond_ref[...].reshape(bigm, 128)
    hid = jnp.dot(cond, sfa_ref[...], preferred_element_type=jnp.float32) + sba_ref[...]
    hid = jnp.where(hid >= 0, hid, 0.1 * hid)                         # leaky_relu(0.1)
    ss = jnp.dot(hid.astype(jnp.bfloat16), sfb_ref[...],
                 preferred_element_type=jnp.float32) + sbb_ref[...]
    # ss columns = [scale0 | shift0 | scale1 | shift1], lane-split at 128 boundaries.

    # ---- zero the pad scratch ONCE per program ---------------------------------------
    # Invariant: the interior [1:h+1, 1:w+1] is fully overwritten before every conv3x3,
    # so the zero border stays valid between conv1 and conv2 (and per image, since each
    # packed image has its own padded plane).
    pad_ref[...] = jnp.zeros((nb, h + 2, w + 2, cmid), jnp.bfloat16)

    # ---- 3x3 stride-1 conv: bf16 pad scratch + 9 per-tap accumulating matmuls --------
    def conv3x3(f, w_ref):
        pad_ref[:, 1:h + 1, 1:w + 1, :] = f.reshape(nb, h, w, cmid).astype(jnp.bfloat16)
        acc = jnp.zeros((bigm, cmid), jnp.float32)
        t = 0
        for dy in range(3):
            for dx in range(3):
                tap = pad_ref[:, dy:dy + h, dx:dx + w, :].reshape(bigm, cmid)
                acc = acc + jnp.dot(tap, w_ref[t * cmid:(t + 1) * cmid, :],
                                    preferred_element_type=jnp.float32)
                t += 1
        return acc

    # ---- sft0 -> conv1 -> sft1 -> conv2 ----------------------------------------------
    fea = fea * (ss[:, 0 * cmid:1 * cmid] + 1.0) + ss[:, 1 * cmid:2 * cmid]   # sft0
    fea = conv3x3(fea, w1_ref) + b1_ref[...]                                  # conv1
    bn1 = bn1_ref[...]
    fea = jnp.maximum(fea, 0.0) * bn1[0:1, :] + bn1[1:2, :]                   # ReLU -> BN
    fea = fea * (ss[:, 2 * cmid:3 * cmid] + 1.0) + ss[:, 3 * cmid:4 * cmid]   # sft1
    fea = conv3x3(fea, w2_ref) + b2_ref[...]                                  # conv2 (BN folded)

    # ---- residual add (f32 accumulate, bf16 store) -----------------------------------
    o_ref[...] = (o_ref[...].astype(jnp.float32)
                  + fea.reshape(nb, m, cmid)).astype(o_ref.dtype)


# ======================================================================================
# Wrapper: NCHW in/out, im2col glue for the stride-2 front end, one pallas_call.
# ======================================================================================
def resblock_strided2_uv_sft(packed, x0_nchw, cond_nchw, *, images_per_block=None):
    """Fused forward. Returns (identity + fea, cond) like the PyTorch module."""
    x0 = jnp.transpose(x0_nchw.astype(jnp.bfloat16), (0, 2, 3, 1))      # (N, H, W, Cin)
    cond = jnp.transpose(cond_nchw.astype(jnp.bfloat16), (0, 2, 3, 1))  # (N, h, w, 128)
    N, H, W, cin = x0.shape
    h, w = H // 2, W // 2
    m = h * w
    cmid = 2 * cin

    # Pack images per program so matmul M >= 256 at small spatial sizes, while keeping
    # at least 2 "parallel" grid programs (v7x has 2 TensorCores per chip).
    if images_per_block is None:
        images_per_block = 1
        while (images_per_block * 2 <= N
               and N % (images_per_block * 2) == 0
               and images_per_block * m < 256
               and N // (images_per_block * 2) >= 2):
            images_per_block *= 2
    nb = images_per_block
    assert N % nb == 0, (N, nb)

    # im2col for the stride-2 conv0 (bf16 end-to-end); its centre tap also feeds the
    # stride-2 1x1 downsample.  Tap-major (ky, kx, cin) ordering matches the packed
    # weight layout.
    # TODO(synk): fold this stride-2 patch extraction into the kernel as well (pass x0
    # NHWC and extract the strided taps in VMEM) to cut the 2.25x HBM expansion.
    xp = jnp.pad(x0, ((0, 0), (1, 1), (1, 1), (0, 0)))
    taps = [xp[:, dy:dy + 2 * h:2, dx:dx + 2 * w:2, :]
            for dy in range(3) for dx in range(3)]
    patches = jnp.concatenate(taps, axis=-1).reshape(N, m, 9 * cin)
    cond_flat = cond.reshape(N, m, 128)

    def data_spec(trail):
        return pl.BlockSpec((nb,) + trail, lambda n: (n, 0, 0))

    def const_spec(shape):
        return pl.BlockSpec(shape, lambda n, _nd=len(shape): (0,) * _nd)

    weights = [packed[k] for k in (
        "w0", "b0", "bn0", "sfa", "sba", "sfb", "sbb",
        "w1", "b1", "bn1", "w2", "b2")]

    out_flat = pl.pallas_call(
        functools.partial(_resblock_kernel, nb=nb, h=h, w=w, cin=cin, cmid=cmid),
        out_shape=jax.ShapeDtypeStruct((N, m, cmid), jnp.bfloat16),
        grid=(N // nb,),
        in_specs=[data_spec((m, 9 * cin)), data_spec((m, 128))]
                 + [const_spec(a.shape) for a in weights],
        out_specs=pl.BlockSpec((nb, m, cmid), lambda n: (n, 0, 0)),
        scratch_shapes=[pltpu.VMEM((nb, h + 2, w + 2, cmid), jnp.bfloat16)],
        compiler_params=pltpu.CompilerParams(
            dimension_semantics=("parallel",),
            vmem_limit_bytes=64 * 1024 * 1024),
    )(patches, cond_flat, *weights)

    out = jnp.transpose(out_flat.reshape(N, h, w, cmid), (0, 3, 1, 2))
    return out, cond_nchw


# ======================================================================================
# Synthetic parameters (mirror the nn.Module's shapes) and kernel-layout packing.
# ======================================================================================
def init_params(seed, inplanes):
    """Conv weights stored as (kh*kw*Cin, Cout) with tap-major (ky, kx, cin) rows.
    NOTE: PyTorch Conv2d weights are (Cout, Cin, kh, kw) -- real checkpoints must be
    permuted to this layout before use."""
    cmid = 2 * inplanes
    keys = iter(jax.random.split(jax.random.PRNGKey(seed), 64))
    nk = lambda: next(keys)

    def u(shape, bound):
        return jax.random.uniform(nk(), shape, jnp.float32, -bound, bound)

    def conv(ci, co, k):
        bound = float(ci * k * k) ** -0.5
        return dict(w=u((k * k * ci, co), bound), b=u((co,), bound))

    def bn(c):
        return dict(gamma=jax.random.uniform(nk(), (c,), jnp.float32, 0.8, 1.2),
                    beta=jax.random.uniform(nk(), (c,), jnp.float32, -0.1, 0.1),
                    mean=0.1 * jax.random.normal(nk(), (c,), jnp.float32),
                    var=jax.random.uniform(nk(), (c,), jnp.float32, 0.8, 1.2))

    def sft():
        b128, b32 = 128.0 ** -0.5, 32.0 ** -0.5
        return dict(ws0=u((128, 32), b128), bs0=u((32,), b128),
                    ws1=u((32, cmid), b32), bs1=u((cmid,), b32),
                    wt0=u((128, 32), b128), bt0=u((32,), b128),
                    wt1=u((32, cmid), b32), bt1=u((cmid,), b32))

    return dict(conv0=conv(inplanes, cmid, 3), bn0=bn(cmid), sft0=sft(),
                conv1=conv(cmid, cmid, 3), bn1=bn(cmid), sft1=sft(),
                conv2=conv(cmid, cmid, 3), bn2=bn(cmid),
                down=conv(inplanes, cmid, 1), bnd=bn(cmid))


def pack_params(p, inplanes):
    """Fold/concatenate module parameters into the layout the fused kernel consumes."""
    cmid = 2 * inplanes
    bf16 = lambda a: a.astype(jnp.bfloat16)

    def bn_affine(q):
        s = q["gamma"] / jnp.sqrt(q["var"] + _BN_EPS)
        return s, q["beta"] - q["mean"] * s

    # conv0: Conv -> ReLU -> BN, so BN stays a separate (post-ReLU) affine epilogue.
    s0, t0 = bn_affine(p["bn0"])
    # downsample: Conv -> BN (no ReLU) -> fold BN into the weight & bias.
    sd, td = bn_affine(p["bnd"])
    wd = p["down"]["w"] * sd[None, :]
    bd = p["down"]["b"] * sd + td
    # Concatenate conv0 and downsample into one (9*Cin, 2*C) weight; the downsample's
    # stride-2 1x1 input is exactly the centre tap (ky=kx=1) of conv0's im2col patches.
    w0 = jnp.zeros((9 * inplanes, 2 * cmid), jnp.float32)
    w0 = w0.at[:, :cmid].set(p["conv0"]["w"])
    w0 = w0.at[4 * inplanes:5 * inplanes, cmid:].set(wd)
    b0 = jnp.concatenate([p["conv0"]["b"], bd]).reshape(1, 2 * cmid)

    s1, t1 = bn_affine(p["bn1"])                 # conv1: Conv -> ReLU -> BN (keep)
    s2, t2 = bn_affine(p["bn2"])                 # conv2: Conv -> BN         (fold)
    w2 = p["conv2"]["w"] * s2[None, :]
    b2 = (p["conv2"]["b"] * s2 + t2).reshape(1, cmid)

    # Fused SFT weights for BOTH layers (they only depend on cond):
    #   stage A: cond @ [s0_ws0 | s0_wt0 | s1_ws0 | s1_wt0]  -> (M, 128), lane dense
    #   stage B: block-diagonal (128, 4*C) -> [scale0 | shift0 | scale1 | shift1]
    sp0, sp1 = p["sft0"], p["sft1"]
    sfa = jnp.concatenate([sp0["ws0"], sp0["wt0"], sp1["ws0"], sp1["wt0"]], axis=1)
    sba = jnp.concatenate([sp0["bs0"], sp0["bt0"], sp1["bs0"], sp1["bt0"]]).reshape(1, 128)
    sfb = jnp.zeros((128, 4 * cmid), jnp.float32)
    sfb = sfb.at[0:32,   0 * cmid:1 * cmid].set(sp0["ws1"])
    sfb = sfb.at[32:64,  1 * cmid:2 * cmid].set(sp0["wt1"])
    sfb = sfb.at[64:96,  2 * cmid:3 * cmid].set(sp1["ws1"])
    sfb = sfb.at[96:128, 3 * cmid:4 * cmid].set(sp1["wt1"])
    sbb = jnp.concatenate([sp0["bs1"], sp0["bt1"],
                           sp1["bs1"], sp1["bt1"]]).reshape(1, 4 * cmid)

    return dict(
        w0=bf16(w0), b0=b0, bn0=jnp.stack([s0, t0]),
        sfa=bf16(sfa), sba=sba, sfb=bf16(sfb), sbb=sbb,
        w1=bf16(p["conv1"]["w"]), b1=p["conv1"]["b"].reshape(1, cmid),
        bn1=jnp.stack([s1, t1]),
        w2=bf16(w2), b2=b2,
    )


# ======================================================================================
# Independent pure-JAX/XLA reference (inference-mode BN, same bf16 matmul precision).
# ======================================================================================
def reference_forward(p, x0_nchw, cond_nchw):
    x0 = jnp.transpose(x0_nchw, (0, 2, 3, 1)).astype(jnp.float32)
    cond = jnp.transpose(cond_nchw, (0, 2, 3, 1)).astype(jnp.float32)
    bf16 = lambda a: a.astype(jnp.bfloat16)

    def conv2d(x, wmat, b, k, stride):
        w4 = wmat.reshape(k, k, x.shape[-1], -1)
        padding = ((1, 1), (1, 1)) if k == 3 else ((0, 0), (0, 0))
        y = lax.conv_general_dilated(bf16(x), bf16(w4), (stride, stride), padding,
                                     dimension_numbers=("NHWC", "HWIO", "NHWC"),
                                     preferred_element_type=jnp.float32)
        return y + b

    def bn(x, q):
        return (x - q["mean"]) / jnp.sqrt(q["var"] + _BN_EPS) * q["gamma"] + q["beta"]

    def sft_uv(f, sp):
        def branch(w0k, b0k, w1k, b1k):
            t = jnp.dot(bf16(cond), bf16(sp[w0k]),
                        preferred_element_type=jnp.float32) + sp[b0k]
            t = jnp.where(t >= 0, t, 0.1 * t)
            return jnp.dot(bf16(t), bf16(sp[w1k]),
                           preferred_element_type=jnp.float32) + sp[b1k]
        scale = branch("ws0", "bs0", "ws1", "bs1")
        shift = branch("wt0", "bt0", "wt1", "bt1")
        return f * (scale + 1.0) + shift

    fea = bn(jnp.maximum(conv2d(x0, p["conv0"]["w"], p["conv0"]["b"], 3, 2), 0.0), p["bn0"])
    fea = sft_uv(fea, p["sft0"])
    fea = bn(jnp.maximum(conv2d(fea, p["conv1"]["w"], p["conv1"]["b"], 3, 1), 0.0), p["bn1"])
    fea = sft_uv(fea, p["sft1"])
    fea = bn(conv2d(fea, p["conv2"]["w"], p["conv2"]["b"], 3, 1), p["bn2"])
    identity = bn(conv2d(x0, p["down"]["w"], p["down"]["b"], 1, 2), p["bnd"])
    return jnp.transpose(identity + fea, (0, 3, 1, 2))


# ======================================================================================
if __name__ == "__main__":
    INPLANES = 64                       # block channels = 2*inplanes = 128 (lane-dense)
    N, H, W = 4, 16, 16                 # 4 images, 2 packed per program -> 2 programs

    params = init_params(seed=42, inplanes=INPLANES)
    packed = pack_params(params, INPLANES)

    k1, k2 = jax.random.split(jax.random.PRNGKey(0))
    x0 = jax.random.normal(k1, (N, INPLANES, H, W), jnp.float32)          # x[0]
    cond = jax.random.normal(k2, (N, 128, H // 2, W // 2), jnp.float32)   # x[1]

    fwd = jax.jit(resblock_strided2_uv_sft)
    out, cond_out = fwd(packed, x0, cond)
    out = jax.block_until_ready(out)

    assert out.shape == (N, 2 * INPLANES, H // 2, W // 2), out.shape
    assert cond_out.shape == cond.shape
    assert bool(jnp.all(jnp.isfinite(out.astype(jnp.float32))))

    # sanity check against an independent XLA implementation
    # (loose tol: bf16 MXU operands + bf16 output store)
    ref = reference_forward(params, x0, cond)
    err = float(jnp.max(jnp.abs(out.astype(jnp.float32) - ref)))
    assert err < 0.25, f"mismatch vs reference: max abs err = {err}"

    print("KERNEL_OK")
</pallas_src>

<mosaic_0001>
module attributes {stable_mosaic.version = 11 : i64} {
  func.func @_resblock_kernel(%arg0: i32, %arg1: memref<2x64x576xbf16, #tpu.memory_space<vmem>>, %arg2: memref<2x64x128xbf16, #tpu.memory_space<vmem>>, %arg3: memref<576x256xbf16, #tpu.memory_space<vmem>>, %arg4: memref<1x256xf32, #tpu.memory_space<vmem>>, %arg5: memref<2x128xf32, #tpu.memory_space<vmem>>, %arg6: memref<128x128xbf16, #tpu.memory_space<vmem>>, %arg7: memref<1x128xf32, #tpu.memory_space<vmem>>, %arg8: memref<128x512xbf16, #tpu.memory_space<vmem>>, %arg9: memref<1x512xf32, #tpu.memory_space<vmem>>, %arg10: memref<1152x128xbf16, #tpu.memory_space<vmem>>, %arg11: memref<1x128xf32, #tpu.memory_space<vmem>>, %arg12: memref<2x128xf32, #tpu.memory_space<vmem>>, %arg13: memref<1152x128xbf16, #tpu.memory_space<vmem>>, %arg14: memref<1x128xf32, #tpu.memory_space<vmem>>, %arg15: memref<2x64x128xbf16, #tpu.memory_space<vmem>>, %arg16: memref<2x10x10x128xbf16, #tpu.memory_space<vmem>>) attributes {dimension_semantics = [#tpu.dimension_semantics<parallel>], iteration_bounds = array<i64: 2>, scalar_prefetch = 0 : i64, scratch_operands = 1 : i64, tpu.core_type = #tpu.core_type<tc>, window_params = [{transform_indices = @transform_0, window_bounds = array<i64: 2, 64, 576>}, {transform_indices = @transform_1, window_bounds = array<i64: 2, 64, 128>}, {pipeline_mode = #tpu.pipeline_mode<synchronous>, transform_indices = @transform_2, window_bounds = array<i64: 576, 256>}, {pipeline_mode = #tpu.pipeline_mode<synchronous>, transform_indices = @transform_3, window_bounds = array<i64: 1, 256>}, {pipeline_mode = #tpu.pipeline_mode<synchronous>, transform_indices = @transform_4, window_bounds = array<i64: 2, 128>}, {pipeline_mode = #tpu.pipeline_mode<synchronous>, transform_indices = @transform_5, window_bounds = array<i64: 128, 128>}, {pipeline_mode = #tpu.pipeline_mode<synchronous>, transform_indices = @transform_6, window_bounds = array<i64: 1, 128>}, {pipeline_mode = #tpu.pipeline_mode<synchronous>, transform_indices = @transform_7, window_bounds = array<i64: 128, 512>}, {pipeline_mode = #tpu.pipeline_mode<synchronous>, transform_indices = @transform_8, window_bounds = array<i64: 1, 512>}, {pipeline_mode = #tpu.pipeline_mode<synchronous>, transform_indices = @transform_9, window_bounds = array<i64: 1152, 128>}, {pipeline_mode = #tpu.pipeline_mode<synchronous>, transform_indices = @transform_10, window_bounds = array<i64: 1, 128>}, {pipeline_mode = #tpu.pipeline_mode<synchronous>, transform_indices = @transform_11, window_bounds = array<i64: 2, 128>}, {pipeline_mode = #tpu.pipeline_mode<synchronous>, transform_indices = @transform_12, window_bounds = array<i64: 1152, 128>}, {pipeline_mode = #tpu.pipeline_mode<synchronous>, transform_indices = @transform_13, window_bounds = array<i64: 1, 128>}, {transform_indices = @transform_14, window_bounds = array<i64: 2, 64, 128>}]} {
    %c0 = arith.constant 0 : index
    %c0_0 = arith.constant 0 : index
    %c0_1 = arith.constant 0 : index
    %0 = vector.load %arg1[%c0, %c0_0, %c0_1] : memref<2x64x576xbf16, #tpu.memory_space<vmem>>, vector<2x64x576xbf16>
    %1 = vector.shape_cast %0 : vector<2x64x576xbf16> to vector<128x576xbf16>
    %c0_2 = arith.constant 0 : index
    %c0_3 = arith.constant 0 : index
    %2 = vector.load %arg3[%c0_2, %c0_3] : memref<576x256xbf16, #tpu.memory_space<vmem>>, vector<576x256xbf16>
    %cst = arith.constant dense<0.000000e+00> : vector<128x256xf32>
    %3 = tpu.matmul %1, %2, %cst {dimension_numbers = #tpu.dot_dimension_numbers<[1], [0], [0], [1], [0, 0, 1, 1], [], []>} : vector<128x576xbf16>, vector<576x256xbf16>, vector<128x256xf32> -> vector<128x256xf32>
    %c0_4 = arith.constant 0 : index
    %c0_5 = arith.constant 0 : index
    %4 = vector.load %arg4[%c0_4, %c0_5] : memref<1x256xf32, #tpu.memory_space<vmem>>, vector<1x256xf32>
    %5 = vector.broadcast %4 : vector<1x256xf32> to vector<128x256xf32>
    %6 = arith.addf %3, %5 : vector<128x256xf32>
    %c0_6 = arith.constant 0 : index
    %c0_7 = arith.constant 0 : index
    %7 = vector.load %arg5[%c0_6, %c0_7] : memref<2x128xf32, #tpu.memory_space<vmem>>, vector<2x128xf32>
    %8 = vector.extract_strided_slice %6 {offsets = [0, 0], sizes = [128, 128], strides = [1, 1]} : vector<128x256xf32> to vector<128x128xf32>
    %cst_8 = arith.constant 0.000000e+00 : f32
    %9 = vector.broadcast %cst_8 : f32 to vector<128x128xf32>
    %10 = arith.maximumf %8, %9 : vector<128x128xf32>
    %11 = vector.extract_strided_slice %7 {offsets = [0, 0], sizes = [1, 128], strides = [1, 1]} : vector<2x128xf32> to vector<1x128xf32>
    %12 = vector.broadcast %11 : vector<1x128xf32> to vector<128x128xf32>
    %13 = arith.mulf %10, %12 : vector<128x128xf32>
    %14 = vector.extract_strided_slice %7 {offsets = [1, 0], sizes = [1, 128], strides = [1, 1]} : vector<2x128xf32> to vector<1x128xf32>
    %15 = vector.broadcast %14 : vector<1x128xf32> to vector<128x128xf32>
    %16 = arith.addf %13, %15 : vector<128x128xf32>
    %17 = vector.extract_strided_slice %6 {offsets = [0, 128], sizes = [128, 128], strides = [1, 1]} : vector<128x256xf32> to vector<128x128xf32>
    %18 = vector.shape_cast %17 : vector<128x128xf32> to vector<2x64x128xf32>
    %19 = arith.truncf %18 : vector<2x64x128xf32> to vector<2x64x128xbf16>
    %c0_9 = arith.constant 0 : index
    %c0_10 = arith.constant 0 : index
    %c0_11 = arith.constant 0 : index
    %20 = vector.load %arg15[%c0_9, %c0_10, %c0_11] : memref<2x64x128xbf16, #tpu.memory_space<vmem>>, vector<2x64x128xbf16>
    tpu.vector_store %arg15[%c0_9, %c0_10, %c0_11], %19 {strides = array<i32>} : memref<2x64x128xbf16, #tpu.memory_space<vmem>>, vector<2x64x128xbf16>,
    %c0_12 = arith.constant 0 : index
    %c0_13 = arith.constant 0 : index
    %c0_14 = arith.constant 0 : index
    %21 = vector.load %arg2[%c0_12, %c0_13, %c0_14] : memref<2x64x128xbf16, #tpu.memory_space<vmem>>, vector<2x64x128xbf16>
    %22 = vector.shape_cast %21 : vector<2x64x128xbf16> to vector<128x128xbf16>
    %c0_15 = arith.constant 0 : index
    %c0_16 = arith.constant 0 : index
    %23 = vector.load %arg6[%c0_15, %c0_16] : memref<128x128xbf16, #tpu.memory_space<vmem>>, vector<128x128xbf16>
    %cst_17 = arith.constant dense<0.000000e+00> : vector<128x128xf32>
    %24 = tpu.matmul %22, %23, %cst_17 {dimension_numbers = #tpu.dot_dimension_numbers<[1], [0], [0], [1], [0, 0, 1, 1], [], []>} : vector<128x128xbf16>, vector<128x128xbf16>, vector<128x128xf32> -> vector<128x128xf32>
    %c0_18 = arith.constant 0 : index
    %c0_19 = arith.constant 0 : index
    %25 = vector.load %arg7[%c0_18, %c0_19] : memref<1x128xf32, #tpu.memory_space<vmem>>, vector<1x128xf32>
    %26 = vector.broadcast %25 : vector<1x128xf32> to vector<128x128xf32>
    %27 = arith.addf %24, %26 : vector<128x128xf32>
    %cst_20 = arith.constant 0.000000e+00 : f32
    %28 = vector.broadcast %cst_20 : f32 to vector<128x128xf32>
    %29 = arith.cmpf oge, %27, %28 : vector<128x128xf32>
    %cst_21 = arith.constant 1.000000e-01 : f32
    %30 = vector.broadcast %cst_21 : f32 to vector<128x128xf32>
    %31 = arith.mulf %30, %27 : vector<128x128xf32>
    %32 = arith.select %29, %27, %31 : vector<128x128xi1>, vector<128x128xf32>
    %33 = arith.truncf %32 : vector<128x128xf32> to vector<128x128xbf16>
    %c0_22 = arith.constant 0 : index
    %c0_23 = arith.constant 0 : index
    %34 = vector.load %arg8[%c0_22, %c0_23] : memref<128x512xbf16, #tpu.memory_space<vmem>>, vector<128x512xbf16>
    %cst_24 = arith.constant dense<0.000000e+00> : vector<128x512xf32>
    %35 = tpu.matmul %33, %34, %cst_24 {dimension_numbers = #tpu.dot_dimension_numbers<[1], [0], [0], [1], [0, 0, 1, 1], [], []>} : vector<128x128xbf16>, vector<128x512xbf16>, vector<128x512xf32> -> vector<128x512xf32>
    %c0_25 = arith.constant 0 : index
    %c0_26 = arith.constant 0 : index
    %36 = vector.load %arg9[%c0_25, %c0_26] : memref<1x512xf32, #tpu.memory_space<vmem>>, vector<1x512xf32>
    %37 = vector.broadcast %36 : vector<1x512xf32> to vector<128x512xf32>
    %38 = arith.addf %35, %37 : vector<128x512xf32>
    %cst_27 = arith.constant 0.000000e+00 : bf16
    %39 = vector.broadcast %cst_27 : bf16 to vector<2x10x10x128xbf16>
    %c0_28 = arith.constant 0 : index
    %c0_29 = arith.constant 0 : index
    %c0_30 = arith.constant 0 : index
    %c0_31 = arith.constant 0 : index
    %40 = vector.load %arg16[%c0_28, %c0_29, %c0_30, %c0_31] : memref<2x10x10x128xbf16, #tpu.memory_space<vmem>>, vector<2x10x10x128xbf16>
    tpu.vector_store %arg16[%c0_28, %c0_29, %c0_30, %c0_31], %39 {strides = array<i32>} : memref<2x10x10x128xbf16, #tpu.memory_space<vmem>>, vector<2x10x10x128xbf16>,
    %41 = vector.extract_strided_slice %38 {offsets = [0, 0], sizes = [128, 128], strides = [1, 1]} : vector<128x512xf32> to vector<128x128xf32>
    %cst_32 = arith.constant 1.000000e+00 : f32
    %42 = vector.broadcast %cst_32 : f32 to vector<128x128xf32>
    %43 = arith.addf %41, %42 : vector<128x128xf32>
    %44 = arith.mulf %16, %43 : vector<128x128xf32>
    %45 = vector.extract_strided_slice %38 {offsets = [0, 128], sizes = [128, 128], strides = [1, 1]} : vector<128x512xf32> to vector<128x128xf32>
    %46 = arith.addf %44, %45 : vector<128x128xf32>
    %47 = vector.shape_cast %46 : vector<128x128xf32> to vector<2x8x8x128xf32>
    %48 = arith.truncf %47 : vector<2x8x8x128xf32> to vector<2x8x8x128xbf16>
    %c0_33 = arith.constant 0 : index
    %c1 = arith.constant 1 : index
    %c1_34 = arith.constant 1 : index
    %c0_35 = arith.constant 0 : index
    %49 = vector.load %arg16[%c0_33, %c1, %c1_34, %c0_35] : memref<2x10x10x128xbf16, #tpu.memory_space<vmem>>, vector<2x8x8x128xbf16>
    tpu.vector_store %arg16[%c0_33, %c1, %c1_34, %c0_35], %48 {strides = array<i32>} : memref<2x10x10x128xbf16, #tpu.memory_space<vmem>>, vector<2x8x8x128xbf16>,
    %cst_36 = arith.constant 0.000000e+00 : f32
    %50 = vector.broadcast %cst_36 : f32 to vector<128x128xf32>
    %c0_37 = arith.constant 0 : index
    %c0_38 = arith.constant 0 : index
    %c0_39 = arith.constant 0 : index
    %c0_40 = arith.constant 0 : index
    %51 = vector.load %arg16[%c0_37, %c0_38, %c0_39, %c0_40] : memref<2x10x10x128xbf16, #tpu.memory_space<vmem>>, vector<2x8x8x128xbf16>
    %52 = vector.shape_cast %51 : vector<2x8x8x128xbf16> to vector<128x128xbf16>
    %c0_41 = arith.constant 0 : index
    %c0_42 = arith.constant 0 : index
    %53 = vector.load %arg10[%c0_41, %c0_42] : memref<1152x128xbf16, #tpu.memory_space<vmem>>, vector<128x128xbf16>
    %cst_43 = arith.constant dense<0.000000e+00> : vector<128x128xf32>
    %54 = tpu.matmul %52, %53, %cst_43 {dimension_numbers = #tpu.dot_dimension_numbers<[1], [0], [0], [1], [0, 0, 1, 1], [], []>} : vector<128x128xbf16>, vector<128x128xbf16>, vector<128x128xf32> -> vector<128x128xf32>
    %55 = arith.addf %50, %54 : vector<128x128xf32>
    %c0_44 = arith.constant 0 : index
    %c0_45 = arith.constant 0 : index
    %c1_46 = arith.constant 1 : index
    %c0_47 = arith.constant 0 : index
    %56 = vector.load %arg16[%c0_44, %c0_45, %c1_46, %c0_47] : memref<2x10x10x128xbf16, #tpu.memory_space<vmem>>, vector<2x8x8x128xbf16>
    %57 = vector.shape_cast %56 : vector<2x8x8x128xbf16> to vector<128x128xbf16>
    %c128 = arith.constant 128 : index
    %c0_48 = arith.constant 0 : index
    %58 = vector.load %arg10[%c128, %c0_48] : memref<1152x128xbf16, #tpu.memory_space<vmem>>, vector<128x128xbf16>
    %cst_49 = arith.constant dense<0.000000e+00> : vector<128x128xf32>
    %59 = tpu.matmul %57, %58, %cst_49 {dimension_numbers = #tpu.dot_dimension_numbers<[1], [0], [0], [1], [0, 0, 1, 1], [], []>} : vector<128x128xbf16>, vector<128x128xbf16>, vector<128x128xf32> -> vector<128x128xf32>
    %60 = arith.addf %55, %59 : vector<128x128xf32>
    %c0_50 = arith.constant 0 : index
    %c0_51 = arith.constant 0 : index
    %c2 = arith.constant 2 : index
    %c0_52 = arith.constant 0 : index
    %61 = vector.load %arg16[%c0_50, %c0_51, %c2, %c0_52] : memref<2x10x10x128xbf16, #tpu.memory_space<vmem>>, vector<2x8x8x128xbf16>
    %62 = vector.shape_cast %61 : vector<2x8x8x128xbf16> to vector<128x128xbf16>
    %c256 = arith.constant 256 : index
    %c0_53 = arith.constant 0 : index
    %63 = vector.load %arg10[%c256, %c0_53] : memref<1152x128xbf16, #tpu.memory_space<vmem>>, vector<128x128xbf16>
    %cst_54 = arith.constant dense<0.000000e+00> : vector<128x128xf32>
    %64 = tpu.matmul %62, %63, %cst_54 {dimension_numbers = #tpu.dot_dimension_numbers<[1], [0], [0], [1], [0, 0, 1, 1], [], []>} : vector<128x128xbf16>, vector<128x128xbf16>, vector<128x128xf32> -> vector<128x128xf32>
    %65 = arith.addf %60, %64 : vector<128x128xf32>
    %c0_55 = arith.constant 0 : index
    %c1_56 = arith.constant 1 : index
    %c0_57 = arith.constant 0 : index
    %c0_58 = arith.constant 0 : index
    %66 = vector.load %arg16[%c0_55, %c1_56, %c0_57, %c0_58] : memref<2x10x10x128xbf16, #tpu.memory_space<vmem>>, vector<2x8x8x128xbf16>
    %67 = vector.shape_cast %66 : vector<2x8x8x128xbf16> to vector<128x128xbf16>
    %c384 = arith.constant 384 : index
    %c0_59 = arith.constant 0 : index
    %68 = vector.load %arg10[%c384, %c0_59] : memref<1152x128xbf16, #tpu.memory_space<vmem>>, vector<128x128xbf16>
    %cst_60 = arith.constant dense<0.000000e+00> : vector<128x128xf32>
    %69 = tpu.matmul %67, %68, %cst_60 {dimension_numbers = #tpu.dot_dimension_numbers<[1], [0], [0], [1], [0, 0, 1, 1], [], []>} : vector<128x128xbf16>, vector<128x128xbf16>, vector<128x128xf32> -> vector<128x128xf32>
    %70 = arith.addf %65, %69 : vector<128x128xf32>
    %c0_61 = arith.constant 0 : index
    %c1_62 = arith.constant 1 : index
    %c1_63 = arith.constant 1 : index
    %c0_64 = arith.constant 0 : index
    %71 = vector.load %arg16[%c0_61, %c1_62, %c1_63, %c0_64] : memref<2x10x10x128xbf16, #tpu.memory_space<vmem>>, vector<2x8x8x128xbf16>
    %72 = vector.shape_cast %71 : vector<2x8x8x128xbf16> to vector<128x128xbf16>
    %c512 = arith.constant 512 : index
    %c0_65 = arith.constant 0 : index
    %73 = vector.load %arg10[%c512, %c0_65] : memref<1152x128xbf16, #tpu.memory_space<vmem>>, vector<128x128xbf16>
    %cst_66 = arith.constant dense<0.000000e+00> : vector<128x128xf32>
    %74 = tpu.matmul %72, %73, %cst_66 {dimension_numbers = #tpu.dot_dimension_numbers<[1], [0], [0], [1], [0, 0, 1, 1], [], []>} : vector<128x128xbf16>, vector<128x128xbf16>, vector<128x128xf32> -> vector<128x128xf32>
    %75 = arith.addf %70, %74 : vector<128x128xf32>
    %c0_67 = arith.constant 0 : index
    %c1_68 = arith.constant 1 : index
    %c2_69 = arith.constant 2 : index
    %c0_70 = arith.constant 0 : index
    %76 = vector.load %arg16[%c0_67, %c1_68, %c2_69, %c0_70] : memref<2x10x10x128xbf16, #tpu.memory_space<vmem>>, vector<2x8x8x128xbf16>
    %77 = vector.shape_cast %76 : vector<2x8x8x128xbf16> to vector<128x128xbf16>
    %c640 = arith.constant 640 : index
    %c0_71 = arith.constant 0 : index
    %78 = vector.load %arg10[%c640, %c0_71] : memref<1152x128xbf16, #tpu.memory_space<vmem>>, vector<128x128xbf16>
    %cst_72 = arith.constant dense<0.000000e+00> : vector<128x128xf32>
    %79 = tpu.matmul %77, %78, %cst_72 {dimension_numbers = #tpu.dot_dimension_numbers<[1], [0], [0], [1], [0, 0, 1, 1], [], []>} : vector<128x128xbf16>, vector<128x128xbf16>, vector<128x128xf32> -> vector<128x128xf32>
    %80 = arith.addf %75, %79 : vector<128x128xf32>
    %c0_73 = arith.constant 0 : index
    %c2_74 = arith.constant 2 : index
    %c0_75 = arith.constant 0 : index
    %c0_76 = arith.constant 0 : index
    %81 = vector.load %arg16[%c0_73, %c2_74, %c0_75, %c0_76] : memref<2x10x10x128xbf16, #tpu.memory_space<vmem>>, vector<2x8x8x128xbf16>
    %82 = vector.shape_cast %81 : vector<2x8x8x128xbf16> to vector<128x128xbf16>
    %c768 = arith.constant 768 : index
    %c0_77 = arith.constant 0 : index
    %83 = vector.load %arg10[%c768, %c0_77] : memref<1152x128xbf16, #tpu.memory_space<vmem>>, vector<128x128xbf16>
    %cst_78 = arith.constant dense<0.000000e+00> : vector<128x128xf32>
    %84 = tpu.matmul %82, %83, %cst_78 {dimension_numbers = #tpu.dot_dimension_numbers<[1], [0], [0], [1], [0, 0, 1, 1], [], []>} : vector<128x128xbf16>, vector<128x128xbf16>, vector<128x128xf32> -> vector<128x128xf32>
    %85 = arith.addf %80, %84 : vector<128x128xf32>
    %c0_79 = arith.constant 0 : index
    %c2_80 = arith.constant 2 : index
    %c1_81 = arith.constant 1 : index
    %c0_82 = arith.constant 0 : index
    %86 = vector.load %arg16[%c0_79, %c2_80, %c1_81, %c0_82] : memref<2x10x10x128xbf16, #tpu.memory_space<vmem>>, vector<2x8x8x128xbf16>
    %87 = vector.shape_cast %86 : vector<2x8x8x128xbf16> to vector<128x128xbf16>
    %c896 = arith.constant 896 : index
    %c0_83 = arith.constant 0 : index
    %88 = vector.load %arg10[%c896, %c0_83] : memref<1152x128xbf16, #tpu.memory_space<vmem>>, vector<128x128xbf16>
    %cst_84 = arith.constant dense<0.000000e+00> : vector<128x128xf32>
    %89 = tpu.matmul %87, %88, %cst_84 {dimension_numbers = #tpu.dot_dimension_numbers<[1], [0], [0], [1], [0, 0, 1, 1], [], []>} : vector<128x128xbf16>, vector<128x128xbf16>, vector<128x128xf32> -> vector<128x128xf32>
    %90 = arith.addf %85, %89 : vector<128x128xf32>
    %c0_85 = arith.constant 0 : index
    %c2_86 = arith.constant 2 : index
    %c2_87 = arith.constant 2 : index
    %c0_88 = arith.constant 0 : index
    %91 = vector.load %arg16[%c0_85, %c2_86, %c2_87, %c0_88] : memref<2x10x10x128xbf16, #tpu.memory_space<vmem>>, vector<2x8x8x128xbf16>
    %92 = vector.shape_cast %91 : vector<2x8x8x128xbf16> to vector<128x128xbf16>
    %c1024 = arith.constant 1024 : index
    %c0_89 = arith.constant 0 : index
    %93 = vector.load %arg10[%c1024, %c0_89] : memref<1152x128xbf16, #tpu.memory_space<vmem>>, vector<128x128xbf16>
    %cst_90 = arith.constant dense<0.000000e+00> : vector<128x128xf32>
    %94 = tpu.matmul %92, %93, %cst_90 {dimension_numbers = #tpu.dot_dimension_numbers<[1], [0], [0], [1], [0, 0, 1, 1], [], []>} : vector<128x128xbf16>, vector<128x128xbf16>, vector<128x128xf32> -> vector<128x128xf32>
    %95 = arith.addf %90, %94 : vector<128x128xf32>
    %c0_91 = arith.constant 0 : index
    %c0_92 = arith.constant 0 : index
    %96 = vector.load %arg11[%c0_91, %c0_92] : memref<1x128xf32, #tpu.memory_space<vmem>>, vector<1x128xf32>
    %97 = vector.broadcast %96 : vector<1x128xf32> to vector<128x128xf32>
    %98 = arith.addf %95, %97 : vector<128x128xf32>
    %c0_93 = arith.constant 0 : index
    %c0_94 = arith.constant 0 : index
    %99 = vector.load %arg12[%c0_93, %c0_94] : memref<2x128xf32, #tpu.memory_space<vmem>>, vector<2x128xf32>
    %cst_95 = arith.constant 0.000000e+00 : f32
    %100 = vector.broadcast %cst_95 : f32 to vector<128x128xf32>
    %101 = arith.maximumf %98, %100 : vector<128x128xf32>
    %102 = vector.extract_strided_slice %99 {offsets = [0, 0], sizes = [1, 128], strides = [1, 1]} : vector<2x128xf32> to vector<1x128xf32>
    %103 = vector.broadcast %102 : vector<1x128xf32> to vector<128x128xf32>
    %104 = arith.mulf %101, %103 : vector<128x128xf32>
    %105 = vector.extract_strided_slice %99 {offsets = [1, 0], sizes = [1, 128], strides = [1, 1]} : vector<2x128xf32> to vector<1x128xf32>
    %106 = vector.broadcast %105 : vector<1x128xf32> to vector<128x128xf32>
    %107 = arith.addf %104, %106 : vector<128x128xf32>
    %108 = vector.extract_strided_slice %38 {offsets = [0, 256], sizes = [128, 128], strides = [1, 1]} : vector<128x512xf32> to vector<128x128xf32>
    %cst_96 = arith.constant 1.000000e+00 : f32
    %109 = vector.broadcast %cst_96 : f32 to vector<128x128xf32>
    %110 = arith.addf %108, %109 : vector<128x128xf32>
    %111 = arith.mulf %107, %110 : vector<128x128xf32>
    %112 = vector.extract_strided_slice %38 {offsets = [0, 384], sizes = [128, 128], strides = [1, 1]} : vector<128x512xf32> to vector<128x128xf32>
    %113 = arith.addf %111, %112 : vector<128x128xf32>
    %114 = vector.shape_cast %113 : vector<128x128xf32> to vector<2x8x8x128xf32>
    %115 = arith.truncf %114 : vector<2x8x8x128xf32> to vector<2x8x8x128xbf16>
    %c0_97 = arith.constant 0 : index
    %c1_98 = arith.constant 1 : index
    %c1_99 = arith.constant 1 : index
    %c0_100 = arith.constant 0 : index
    %116 = vector.load %arg16[%c0_97, %c1_98, %c1_99, %c0_100] : memref<2x10x10x128xbf16, #tpu.memory_space<vmem>>, vector<2x8x8x128xbf16>
    tpu.vector_store %arg16[%c0_97, %c1_98, %c1_99, %c0_100], %115 {strides = array<i32>} : memref<2x10x10x128xbf16, #tpu.memory_space<vmem>>, vector<2x8x8x128xbf16>,
    %cst_101 = arith.constant 0.000000e+00 : f32
    %117 = vector.broadcast %cst_101 : f32 to vector<128x128xf32>
    %c0_102 = arith.constant 0 : index
    %c0_103 = arith.constant 0 : index
    %c0_104 = arith.constant 0 : index
    %c0_105 = arith.constant 0 : index
    %118 = vector.load %arg16[%c0_102, %c0_103, %c0_104, %c0_105] : memref<2x10x10x128xbf16, #tpu.memory_space<vmem>>, vector<2x8x8x128xbf16>
    %119 = vector.shape_cast %118 : vector<2x8x8x128xbf16> to vector<128x128xbf16>
    %c0_106 = arith.constant 0 : index
    %c0_107 = arith.constant 0 : index
    %120 = vector.load %arg13[%c0_106, %c0_107] : memref<1152x128xbf16, #tpu.memory_space<vmem>>, vector<128x128xbf16>
    %cst_108 = arith.constant dense<0.000000e+00> : vector<128x128xf32>
    %121 = tpu.matmul %119, %120, %cst_108 {dimension_numbers = #tpu.dot_dimension_numbers<[1], [0], [0], [1], [0, 0, 1, 1], [], []>} : vector<128x128xbf16>, vector<128x128xbf16>, vector<128x128xf32> -> vector<128x128xf32>
    %122 = arith.addf %117, %121 : vector<128x128xf32>
    %c0_109 = arith.constant 0 : index
    %c0_110 = arith.constant 0 : index
    %c1_111 = arith.constant 1 : index
    %c0_112 = arith.constant 0 : index
    %123 = vector.load %arg16[%c0_109, %c0_110, %c1_111, %c0_112] : memref<2x10x10x128xbf16, #tpu.memory_space<vmem>>, vector<2x8x8x128xbf16>
    %124 = vector.shape_cast %123 : vector<2x8x8x128xbf16> to vector<128x128xbf16>
    %c128_113 = arith.constant 128 : index
    %c0_114 = arith.constant 0 : index
    %125 = vector.load %arg13[%c128_113, %c0_114] : memref<1152x128xbf16, #tpu.memory_space<vmem>>, vector<128x128xbf16>
    %cst_115 = arith.constant dense<0.000000e+00> : vector<128x128xf32>
    %126 = tpu.matmul %124, %125, %cst_115 {dimension_numbers = #tpu.dot_dimension_numbers<[1], [0], [0], [1], [0, 0, 1, 1], [], []>} : vector<128x128xbf16>, vector<128x128xbf16>, vector<128x128xf32> -> vector<128x128xf32>
    %127 = arith.addf %122, %126 : vector<128x128xf32>
    %c0_116 = arith.constant 0 : index
    %c0_117 = arith.constant 0 : index
    %c2_118 = arith.constant 2 : index
    %c0_119 = arith.constant 0 : index
    %128 = vector.load %arg16[%c0_116, %c0_117, %c2_118, %c0_119] : memref<2x10x10x128xbf16, #tpu.memory_space<vmem>>, vector<2x8x8x128xbf16>
    %129 = vector.shape_cast %128 : vector<2x8x8x128xbf16> to vector<128x128xbf16>
    %c256_120 = arith.constant 256 : index
    %c0_121 = arith.constant 0 : index
    %130 = vector.load %arg13[%c256_120, %c0_121] : memref<1152x128xbf16, #tpu.memory_space<vmem>>, vector<128x128xbf16>
    %cst_122 = arith.constant dense<0.000000e+00> : vector<128x128xf32>
    %131 = tpu.matmul %129, %130, %cst_122 {dimension_numbers = #tpu.dot_dimension_numbers<[1], [0], [0], [1], [0, 0, 1, 1], [], []>} : vector<128x128xbf16>, vector<128x128xbf16>, vector<128x128xf32> -> vector<128x128xf32>
    %132 = arith.addf %127, %131 : vector<128x128xf32>
    %c0_123 = arith.constant 0 : index
    %c1_124 = arith.constant 1 : index
    %c0_125 = arith.constant 0 : index
    %c0_126 = arith.constant 0 : index
    %133 = vector.load %arg16[%c0_123, %c1_124, %c0_125, %c0_126] : memref<2x10x10x128xbf16, #tpu.memory_space<vmem>>, vector<2x8x8x128xbf16>
    %134 = vector.shape_cast %133 : vector<2x8x8x128xbf16> to vector<128x128xbf16>
    %c384_127 = arith.constant 384 : index
    %c0_128 = arith.constant 0 : index
    %135 = vector.load %arg13[%c384_127, %c0_128] : memref<1152x128xbf16, #tpu.memory_space<vmem>>, vector<128x128xbf16>
    %cst_129 = arith.constant dense<0.000000e+00> : vector<128x128xf32>
    %136 = tpu.matmul %134, %135, %cst_129 {dimension_numbers = #tpu.dot_dimension_numbers<[1], [0], [0], [1], [0, 0, 1, 1], [], []>} : vector<128x128xbf16>, vector<128x128xbf16>, vector<128x128xf32> -> vector<128x128xf32>
    %137 = arith.addf %132, %136 : vector<128x128xf32>
    %c0_130 = arith.constant 0 : index
    %c1_131 = arith.constant 1 : index
    %c1_132 = arith.constant 1 : index
    %c0_133 = arith.constant 0 : index
    %138 = vector.load %arg16[%c0_130, %c1_131, %c1_132, %c0_133] : memref<2x10x10x128xbf16, #tpu.memory_space<vmem>>, vector<2x8x8x128xbf16>
    %139 = vector.shape_cast %138 : vector<2x8x8x128xbf16> to vector<128x128xbf16>
    %c512_134 = arith.constant 512 : index
    %c0_135 = arith.constant 0 : index
    %140 = vector.load %arg13[%c512_134, %c0_135] : memref<1152x128xbf16, #tpu.memory_space<vmem>>, vector<128x128xbf16>
    %cst_136 = arith.constant dense<0.000000e+00> : vector<128x128xf32>
    %141 = tpu.matmul %139, %140, %cst_136 {dimension_numbers = #tpu.dot_dimension_numbers<[1], [0], [0], [1], [0, 0, 1, 1], [], []>} : vector<128x128xbf16>, vector<128x128xbf16>, vector<128x128xf32> -> vector<128x128xf32>
    %142 = arith.addf %137, %141 : vector<128x128xf32>
    %c0_137 = arith.constant 0 : index
    %c1_138 = arith.constant 1 : index
    %c2_139 = arith.constant 2 : index
    %c0_140 = arith.constant 0 : index
    %143 = vector.load %arg16[%c0_137, %c1_138, %c2_139, %c0_140] : memref<2x10x10x128xbf16, #tpu.memory_space<vmem>>, vector<2x8x8x128xbf16>
    %144 = vector.shape_cast %143 : vector<2x8x8x128xbf16> to vector<128x128xbf16>
    %c640_141 = arith.constant 640 : index
    %c0_142 = arith.constant 0 : index
    %145 = vector.load %arg13[%c640_141, %c0_142] : memref<1152x128xbf16, #tpu.memory_space<vmem>>, vector<128x128xbf16>
    %cst_143 = arith.constant dense<0.000000e+00> : vector<128x128xf32>
    %146 = tpu.matmul %144, %145, %cst_143 {dimension_numbers = #tpu.dot_dimension_numbers<[1], [0], [0], [1], [0, 0, 1, 1], [], []>} : vector<128x128xbf16>, vector<128x128xbf16>, vector<128x128xf32> -> vector<128x128xf32>
    %147 = arith.addf %142, %146 : vector<128x128xf32>
    %c0_144 = arith.constant 0 : index
    %c2_145 = arith.constant 2 : index
    %c0_146 = arith.constant 0 : index
    %c0_147 = arith.constant 0 : index
    %148 = vector.load %arg16[%c0_144, %c2_145, %c0_146, %c0_147] : memref<2x10x10x128xbf16, #tpu.memory_space<vmem>>, vector<2x8x8x128xbf16>
    %149 = vector.shape_cast %148 : vector<2x8x8x128xbf16> to vector<128x128xbf16>
    %c768_148 = arith.constant 768 : index
    %c0_149 = arith.constant 0 : index
    %150 = vector.load %arg13[%c768_148, %c0_149] : memref<1152x128xbf16, #tpu.memory_space<vmem>>, vector<128x128xbf16>
    %cst_150 = arith.constant dense<0.000000e+00> : vector<128x128xf32>
    %151 = tpu.matmul %149, %150, %cst_150 {dimension_numbers = #tpu.dot_dimension_numbers<[1], [0], [0], [1], [0, 0, 1, 1], [], []>} : vector<128x128xbf16>, vector<128x128xbf16>, vector<128x128xf32> -> vector<128x128xf32>
    %152 = arith.addf %147, %151 : vector<128x128xf32>
    %c0_151 = arith.constant 0 : index
    %c2_152 = arith.constant 2 : index
    %c1_153 = arith.constant 1 : index
    %c0_154 = arith.constant 0 : index
    %153 = vector.load %arg16[%c0_151, %c2_152, %c1_153, %c0_154] : memref<2x10x10x128xbf16, #tpu.memory_space<vmem>>, vector<2x8x8x128xbf16>
    %154 = vector.shape_cast %153 : vector<2x8x8x128xbf16> to vector<128x128xbf16>
    %c896_155 = arith.constant 896 : index
    %c0_156 = arith.constant 0 : index
    %155 = vector.load %arg13[%c896_155, %c0_156] : memref<1152x128xbf16, #tpu.memory_space<vmem>>, vector<128x128xbf16>
    %cst_157 = arith.constant dense<0.000000e+00> : vector<128x128xf32>
    %156 = tpu.matmul %154, %155, %cst_157 {dimension_numbers = #tpu.dot_dimension_numbers<[1], [0], [0], [1], [0, 0, 1, 1], [], []>} : vector<128x128xbf16>, vector<128x128xbf16>, vector<128x128xf32> -> vector<128x128xf32>
    %157 = arith.addf %152, %156 : vector<128x128xf32>
    %c0_158 = arith.constant 0 : index
    %c2_159 = arith.constant 2 : index
    %c2_160 = arith.constant 2 : index
    %c0_161 = arith.constant 0 : index
    %158 = vector.load %arg16[%c0_158, %c2_159, %c2_160, %c0_161] : memref<2x10x10x128xbf16, #tpu.memory_space<vmem>>, vector<2x8x8x128xbf16>
    %159 = vector.shape_cast %158 : vector<2x8x8x128xbf16> to vector<128x128xbf16>
    %c1024_162 = arith.constant 1024 : index
    %c0_163 = arith.constant 0 : index
    %160 = vector.load %arg13[%c1024_162, %c0_163] : memref<1152x128xbf16, #tpu.memory_space<vmem>>, vector<128x128xbf16>
    %cst_164 = arith.constant dense<0.000000e+00> : vector<128x128xf32>
    %161 = tpu.matmul %159, %160, %cst_164 {dimension_numbers = #tpu.dot_dimension_numbers<[1], [0], [0], [1], [0, 0, 1, 1], [], []>} : vector<128x128xbf16>, vector<128x128xbf16>, vector<128x128xf32> -> vector<128x128xf32>
    %162 = arith.addf %157, %161 : vector<128x128xf32>
    %c0_165 = arith.constant 0 : index
    %c0_166 = arith.constant 0 : index
    %163 = vector.load %arg14[%c0_165, %c0_166] : memref<1x128xf32, #tpu.memory_space<vmem>>, vector<1x128xf32>
    %164 = vector.broadcast %163 : vector<1x128xf32> to vector<128x128xf32>
    %165 = arith.addf %162, %164 : vector<128x128xf32>
    %c0_167 = arith.constant 0 : index
    %c0_168 = arith.constant 0 : index
    %c0_169 = arith.constant 0 : index
    %166 = vector.load %arg15[%c0_167, %c0_168, %c0_169] : memref<2x64x128xbf16, #tpu.memory_space<vmem>>, vector<2x64x128xbf16>
    %167 = arith.extf %166 : vector<2x64x128xbf16> to vector<2x64x128xf32>
    %168 = vector.shape_cast %165 : vector<128x128xf32> to vector<2x64x128xf32>
    %169 = arith.addf %167, %168 : vector<2x64x128xf32>
    %170 = arith.truncf %169 : vector<2x64x128xf32> to vector<2x64x128xbf16>
    %c0_170 = arith.constant 0 : index
    %c0_171 = arith.constant 0 : index
    %c0_172 = arith.constant 0 : index
    %171 = vector.load %arg15[%c0_170, %c0_171, %c0_172] : memref<2x64x128xbf16, #tpu.memory_space<vmem>>, vector<2x64x128xbf16>
    tpu.vector_store %arg15[%c0_170, %c0_171, %c0_172], %170 {strides = array<i32>} : memref<2x64x128xbf16, #tpu.memory_space<vmem>>, vector<2x64x128xbf16>,
    return
  }
  func.func @transform_0(%arg0: i32) -> (i32, i32, i32) {
    %c0_i32 = arith.constant 0 : i32
    %c0_i32_0 = arith.constant 0 : i32
    %c0_i32_1 = arith.constant 0 : i32
    return %arg0, %c0_i32, %c0_i32_0 : i32, i32, i32
  }
  func.func @transform_1(%arg0: i32) -> (i32, i32, i32) {
    %c0_i32 = arith.constant 0 : i32
    %c0_i32_0 = arith.constant 0 : i32
    %c0_i32_1 = arith.constant 0 : i32
    return %arg0, %c0_i32, %c0_i32_0 : i32, i32, i32
  }
  func.func @transform_2(%arg0: i32) -> (i32, i32) {
    %c0_i32 = arith.constant 0 : i32
    %c0_i32_0 = arith.constant 0 : i32
    %c0_i32_1 = arith.constant 0 : i32
    return %c0_i32, %c0_i32_0 : i32, i32
  }
  func.func @transform_3(%arg0: i32) -> (i32, i32) {
    %c0_i32 = arith.constant 0 : i32
    %c0_i32_0 = arith.constant 0 : i32
    %c0_i32_1 = arith.constant 0 : i32
    return %c0_i32, %c0_i32_0 : i32, i32
  }
  func.func @transform_4(%arg0: i32) -> (i32, i32) {
    %c0_i32 = arith.constant 0 : i32
    %c0_i32_0 = arith.constant 0 : i32
    %c0_i32_1 = arith.constant 0 : i32
    return %c0_i32, %c0_i32_0 : i32, i32
  }
  func.func @transform_5(%arg0: i32) -> (i32, i32) {
    %c0_i32 = arith.constant 0 : i32
    %c0_i32_0 = arith.constant 0 : i32
    %c0_i32_1 = arith.constant 0 : i32
    return %c0_i32, %c0_i32_0 : i32, i32
  }
  func.func @transform_6(%arg0: i32) -> (i32, i32) {
    %c0_i32 = arith.constant 0 : i32
    %c0_i32_0 = arith.constant 0 : i32
    %c0_i32_1 = arith.constant 0 : i32
    return %c0_i32, %c0_i32_0 : i32, i32
  }
  func.func @transform_7(%arg0: i32) -> (i32, i32) {
    %c0_i32 = arith.constant 0 : i32
    %c0_i32_0 = arith.constant 0 : i32
    %c0_i32_1 = arith.constant 0 : i32
    return %c0_i32, %c0_i32_0 : i32, i32
  }
  func.func @transform_8(%arg0: i32) -> (i32, i32) {
    %c0_i32 = arith.constant 0 : i32
    %c0_i32_0 = arith.constant 0 : i32
    %c0_i32_1 = arith.constant 0 : i32
    return %c0_i32, %c0_i32_0 : i32, i32
  }
  func.func @transform_9(%arg0: i32) -> (i32, i32) {
    %c0_i32 = arith.constant 0 : i32
    %c0_i32_0 = arith.constant 0 : i32
    %c0_i32_1 = arith.constant 0 : i32
    return %c0_i32, %c0_i32_0 : i32, i32
  }
  func.func @transform_10(%arg0: i32) -> (i32, i32) {
    %c0_i32 = arith.constant 0 : i32
    %c0_i32_0 = arith.constant 0 : i32
    %c0_i32_1 = arith.constant 0 : i32
    return %c0_i32, %c0_i32_0 : i32, i32
  }
  func.func @transform_11(%arg0: i32) -> (i32, i32) {
    %c0_i32 = arith.constant 0 : i32
    %c0_i32_0 = arith.constant 0 : i32
    %c0_i32_1 = arith.constant 0 : i32
    return %c0_i32, %c0_i32_0 : i32, i32
  }
  func.func @transform_12(%arg0: i32) -> (i32, i32) {
    %c0_i32 = arith.constant 0 : i32
    %c0_i32_0 = arith.constant 0 : i32
    %c0_i32_1 = arith.constant 0 : i32
    return %c0_i32, %c0_i32_0 : i32, i32
  }
  func.func @transform_13(%arg0: i32) -> (i32, i32) {
    %c0_i32 = arith.constant 0 : i32
    %c0_i32_0 = arith.constant 0 : i32
    %c0_i32_1 = arith.constant 0 : i32
    return %c0_i32, %c0_i32_0 : i32, i32
  }
  func.func @transform_14(%arg0: i32) -> (i32, i32, i32) {
    %c0_i32 = arith.constant 0 : i32
    %c0_i32_0 = arith.constant 0 : i32
    %c0_i32_1 = arith.constant 0 : i32
    return %arg0, %c0_i32, %c0_i32_0 : i32, i32, i32
  }
}

</mosaic_0001>

<bundles_post_ra>
// kernel: resblock_strided2_uv_sft.1
= control target key start
LH: loop header
LB: loop body
LE: loop exit
PB: predicated region body
PF: predicated region fallthrough
CT: control target
= control target key end

     0   :  { %s14343_s0 = inlined_call_operand.vmem [shape: bf16[4,64,576], index: 0, kind: input, shape index: {}]   ;;  %s14344_s1 = inlined_call_operand.vmem [shape: bf16[4,64,128], index: 1, kind: input, shape index: {}]   ;;  %s14345_s2 = inlined_call_operand.vmem [shape: bf16[576,256], index: 2, kind: input, shape index: {}]   ;;  %s14346_s3 = inlined_call_operand.vmem [shape: f32[1,256], index: 3, kind: input, shape index: {}]   ;;  %s14347_s4 = inlined_call_operand.vmem [shape: f32[2,128], index: 4, kind: input, shape index: {}]   ;;  %s14348_s5 = inlined_call_operand.vmem [shape: bf16[128,128], index: 5, kind: input, shape index: {}]   ;;  %s14349_s6 = inlined_call_operand.vmem [shape: f32[1,128], index: 6, kind: input, shape index: {}]   ;;  %s14350_s7 = inlined_call_operand.vmem [shape: bf16[128,512], index: 7, kind: input, shape index: {}]   ;;  %s14351_s8 = inlined_call_operand.vmem [shape: f32[1,512], index: 8, kind: input, shape index: {}]   ;;  %s14352_s9 = inlined_call_operand.vmem [shape: bf16[1152,128], index: 9, kind: input, shape index: {}]   ;;  %s14353_s10 = inlined_call_operand.vmem [shape: f32[1,128], index: 10, kind: input, shape index: {}]   ;;  %s14354_s11 = inlined_call_operand.vmem [shape: f32[2,128], index: 11, kind: input, shape index: {}]   ;;  %s14355_s12 = inlined_call_operand.vmem [shape: bf16[1152,128], index: 12, kind: input, shape index: {}]   ;;  %s14356_s13 = inlined_call_operand.vmem [shape: f32[1,128], index: 13, kind: input, shape index: {}]   ;;  %s14357_s14 = inlined_call_operand.hbm [shape: bf16[4,64,128], index: 14, kind: output, shape index: {}]  }
   0x1   :  { %14378 = sst [smem:[#allocation54_spill]] %s14343_s0 }
   0x2   :  { %19 = vsyncpa [#allocation4], 0 }
   0x3   :  { %21 = vsyncpa [#allocation4 + $0x1], 0  ;;  %s10825_s29 = smov 0   ;;  %s10827_s30 = smov 0  }
   0x4   :  { %s10829_s15 = smov 0   ;;  %s10831_s16 = smov 0  }
   0x5 LB: > { %14379 = sst [smem:[#allocation6_spill]] %s10733_s29  ;;  %s10846_s17 = sadd.s32 4294967295, %s10745_s16   ;;  %s10745_s16 = sphi %s10831_s16, %s14551_s16   ;;  %s10741_s15 = sphi %s10829_s15, %s14553_s15   ;;  %s10737_s30 = sphi %s10827_s30, %s14555_s30   ;;  %s10733_s29 = sphi %s10825_s29, %s14554_s29  }
   0x6   : > { %14380 = sst [smem:[#allocation7_spill]] %s10741_s15  ;;  %s8574_s18 = sadd.s32 4294967294, %s10745_s16  }
   0x7   : > { %14381 = sst [smem:[#allocation8_spill]] %s10745_s16  ;;  %s10850_s19 = sadd.s32 1, %s10745_s16  }
   0x8   : > { %14382 = sst [smem:[#allocation9_spill]] %s10850_s19  ;;  %s338_s20 = sadd.s32 1, %s10741_s15 }
   0x9   : > { %s335_s21 = ssub.s32 %s10745_s16, %s10850_s19  ;;  %p348_p0 = scmp.ne.s32.totalorder %s10741_s15, %s10737_s30 }
   0xa   : > { %p336_p1 = scmp.eq.s32.totalorder %s335_s21, 0  ;;  %p349_p2 = scmp.eq.s32.totalorder %s10846_s17, 1 }
   0xb   : > { %p354_p3 = scmp.ne.s32.totalorder %s10737_s30, %s10733_s29  ;;  %p355_p4 = scmp.eq.s32.totalorder %s8574_s18, 1 }
   0xc   : > { %s10861_s22 = scalar_select %p336_p1, %s10741_s15, %s338_s20  }
   0xd   : > { %p10863_p5 = por %p349_p2, %p348_p0  ;;  %p10867_p6 = por %p355_p4, %p354_p3 }
   0xe   : > { %14383 = sst [smem:[#allocation10_spill]] %s10861_s22  ;;  %p8577_p7 = scmp.ge.s32.totalorder %s10745_s16, 1 }
   0xf   : > { %s14385_s24 = scalar_select %p10867_p6, 1, 0 }
  0x10   : > { %p429_p8 = scmp.lt.s32.totalorder %s10745_s16, 3 }
  0x11   : > { %14386 = sst [smem:[#allocation11_spill]] %s14385_s24 }
  0x12   : > { %p430_p9 = pnand %p8577_p7, %p429_p8 }
  0x14   : > { %433 = sbr.rel (%p430_p9) target bundleno = 1628 (0x65c), region = 76 }
  0x19   : > { %v8802_v0 = vld [vmem:[%s14345_s2 + $0x70] sm:$0xf]  ;;  %v10166_v1 = vld [vmem:[%s14345_s2 + $0x74] sm:$0xf0]  ;;  %v8794_v2 = vld [vmem:[%s14345_s2 + $0x60] sm:$0xf] }
  0x1a   : > { %v8803_v3 = vor.u32 %v10166_v1, %v8802_v0  ;;  %v10164_v4 = vld [vmem:[%s14345_s2 + $0x64] sm:$0xf0]  ;;  %v8786_v6 = vld [vmem:[%s14345_s2 + $0x50] sm:$0xf]  ;;  %v10162_v7 = vld [vmem:[%s14345_s2 + $0x54] sm:$0xf0] }
  0x1b   : > { %v8795_v5 = vor.u32 %v10164_v4, %v8794_v2  ;;  %v8787_v8 = vor.u32 %v10162_v7, %v8786_v6  ;;  %v8778_v9 = vld [vmem:[%s14345_s2 + $0x40] sm:$0xf]  ;;  %v10160_v10 = vld [vmem:[%s14345_s2 + $0x44] sm:$0xf0]  ;;  %s8579_s25 = sshll.u32 %s10846_s17, 1  ;;  %s14387_s0 = sld [smem:[#allocation54_spill]] }
  0x1c   : > { %10598 = vmatpush.bf16.msra.mxu1 %v8803_v3  ;;  %10599 = vmatpush.bf16.msra.mxu2 %v8803_v3  ;;  %v8779_v11 = vor.u32 %v10160_v10, %v8778_v9  ;;  %p483_p10 = scmp.lt.s32.totalorder %s8579_s25, 3  ;;  %v8770_v12 = vld [vmem:[%s14345_s2 + $0x30] sm:$0xf]  ;;  %v10158_v13 = vld [vmem:[%s14345_s2 + $0x34] sm:$0xf0]  ;;  %vm1184_vm0 = vcmask 523264  }
  0x1d   : > { %10600 = vmatpush.bf16.msra.mxu3 %v8803_v3  ;;  %1209 = vmatpush.bf16.msra.mxu0 %v8803_v3  ;;  %v8771_v14 = vor.u32 %v10158_v13, %v8770_v12  ;;  %v8762_v15 = vld [vmem:[%s14345_s2 + $0x20] sm:$0xf]  ;;  %v10156_v16 = vld [vmem:[%s14345_s2 + $0x24] sm:$0xf0]  ;;  %v8754_v18 = vld [vmem:[%s14345_s2 + $0x10] sm:$0xf] }
  0x1e   : > { %s14557_s25 = smov (!%p483_p10, %s8579_s25), 3  ;;  %v8763_v17 = vor.u32 %v10156_v16, %v8762_v15  ;;  %v10154_v19 = vld [vmem:[%s14345_s2 + $0x14] sm:$0xf0]  ;;  %v8746_v21 = vld [vmem:[%s14345_s2] sm:$0xf]  ;;  %s479_s16 = sand.u32 1, %s10737_s30  }
  0x1f   : > { %s10622_s15 = smul.u32 160, %s14557_s25  ;;  %v8755_v20 = vor.u32 %v10154_v19, %v8754_v18  ;;  %v10152_v22 = vld [vmem:[%s14345_s2 + $0x4] sm:$0xf0]  ;;  %v8930_v23 = vld [vmem:[%s14345_s2 + $0x170] sm:$0xf]  ;;  %s10110_s21 = sshll.u32 %s14557_s25, 5 }
  0x20   : > { %10601 = vmatpush.bf16.msra.mxu1 %v8795_v5  ;;  %10602 = vmatpush.bf16.msra.mxu2 %v8795_v5  ;;  %v10198_v24 = vld [vmem:[%s14345_s2 + $0x174] sm:$0xf0]  ;;  %v8866_v25 = vld [vmem:[%s14345_s2 + $0xf0] sm:$0xf]  ;;  %v8747_v31 = vor.u32 %v10152_v22, %v8746_v21  ;;  %v8922_v34 = vld [vmem:[%s14345_s2 + $0x160] sm:$0xf]  ;;  %s11690_s28 = scalar_lea.vmem %s14344_s1, %s10110_s21 }
  0x21   : > { %10603 = vmatpush.bf16.msra.mxu3 %v8795_v5  ;;  %1210 = vmatpush.bf16.msra.mxu0 %v8795_v5  ;;  %s10928_s26 = scalar_lea.vmem %s14387_s0, %s10622_s15  ;;  %v10182_v26 = vld [vmem:[%s14345_s2 + $0xf4] sm:$0xf0]  ;;  %v8994_v27 = vld [vmem:[%s14345_s2 + $0x1f0] sm:$0xf]  ;;  %v10196_v35 = vld [vmem:[%s14345_s2 + $0x164] sm:$0xf0]  ;;  %v8931_v36 = vor.u32 %v10198_v24, %v8930_v23 }
  0x22   : > { %v8626_v28 = vld [vmem:[%s10928_s26 + $0x50] sm:$0xf]  ;;  %v10123_v29 = vld [vmem:[%s10928_s26 + $0x60] sm:$0xf0]  ;;  %v10214_v30 = vld [vmem:[%s14345_s2 + $0x1f4] sm:$0xf0]  ;;  %v8867_v39 = vor.u32 %v10182_v26, %v8866_v25  ;;  %v8923_v52 = vor.u32 %v10196_v35, %v8922_v34 }
  0x23   : > { %v8666_v32 = vld [vmem:[%s10928_s26 + $0xa0] sm:$0xf]  ;;  %v10133_v33 = vld [vmem:[%s10928_s26 + $0xb0] sm:$0xf0]  ;;  %v8706_v37 = vld [vmem:[%s10928_s26 + $0xf0] sm:$0xf]  ;;  %v8995_v40 = vor.u32 %v10214_v30, %v8994_v27  ;;  %v10969_v44 = vor.u32 %v10123_v29, %v8626_v28 }
  0x24   : > { %10604 = vmatpush.bf16.msra.mxu1 %v8787_v8  ;;  %10605 = vmatpush.bf16.msra.mxu2 %v8787_v8  ;;  %v10143_v38 = vld [vmem:[%s10928_s26 + $0x100] sm:$0xf0]  ;;  %v8858_v41 = vld [vmem:[%s14345_s2 + $0xe0] sm:$0xf]  ;;  %v9026_v42 = vld [vmem:[%s14345_s2 + $0x230] sm:$0xf]  ;;  %v10971_v45 = vor.u32 %v10133_v33, %v8666_v32 }
  0x25   : > { %10606 = vmatpush.bf16.msra.mxu3 %v8787_v8  ;;  %1211 = vmatpush.bf16.msra.mxu0 %v8787_v8  ;;  %v10222_v43 = vld [vmem:[%s14345_s2 + $0x234] sm:$0xf0]  ;;  %v10180_v46 = vld [vmem:[%s14345_s2 + $0xe4] sm:$0xf0]  ;;  %v8986_v47 = vld [vmem:[%s14345_s2 + $0x1e0] sm:$0xf]  ;;  %v10982_v49 = vor.u32 %v10143_v38, %v8706_v37 }
  0x26   : > { %v10212_v48 = vld [vmem:[%s14345_s2 + $0x1e4] sm:$0xf0]  ;;  %v8586_v50 = vld [vmem:[%s10928_s26] sm:$0xf]  ;;  %v10113_v51 = vld [vmem:[%s10928_s26 + $0x10] sm:$0xf0]  ;;  %v9027_v55 = vor.u32 %v10222_v43, %v9026_v42  ;;  %v8859_v56 = vor.u32 %v10180_v46, %v8858_v41 }
  0x27   : > { %v8914_v53 = vld [vmem:[%s14345_s2 + $0x150] sm:$0xf]  ;;  %v10194_v54 = vld [vmem:[%s14345_s2 + $0x154] sm:$0xf0]  ;;  %v8987_v57 = vor.u32 %v10212_v48, %v8986_v47  ;;  %v9018_v59 = vld [vmem:[%s14345_s2 + $0x220] sm:$0xf]  ;;  %v11006_v62 = vor.u32 %v10113_v51, %v8586_v50 }
  0x28   : > { %10607 = vmatpush.bf16.msra.mxu1 %v8779_v11  ;;  %10608 = vmatpush.bf16.msra.mxu2 %v8779_v11  ;;  %v8850_v58 = vld [vmem:[%s14345_s2 + $0xd0] sm:$0xf]  ;;  %v10220_v60 = vld [vmem:[%s14345_s2 + $0x224] sm:$0xf0]  ;;  %v10178_v61 = vld [vmem:[%s14345_s2 + $0xd4] sm:$0xf0]  ;;  %v8915_v1 = vor.u32 %v10194_v54, %v8914_v53 }
  0x29   : > { %10609 = vmatpush.bf16.msra.mxu3 %v8779_v11  ;;  %1212 = vmatpush.bf16.msra.mxu0 %v8779_v11  ;;  %v8978_v63 = vld [vmem:[%s14345_s2 + $0x1d0] sm:$0xf]  ;;  %v10210_v0 = vld [vmem:[%s14345_s2 + $0x1d4] sm:$0xf0]  ;;  %v8906_v2 = vld [vmem:[%s14345_s2 + $0x140] sm:$0xf]  ;;  %v9019_v4 = vor.u32 %v10220_v60, %v9018_v59  ;;  %v8851_v5 = vor.u32 %v10178_v61, %v8850_v58 }
  0x2a   : > { %v10192_v3 = vld [vmem:[%s14345_s2 + $0x144] sm:$0xf0]  ;;  %v8979_v6 = vor.u32 %v10210_v0, %v8978_v63  ;;  %v8842_v7 = vld [vmem:[%s14345_s2 + $0xc0] sm:$0xf]  ;;  %v9010_v8 = vld [vmem:[%s14345_s2 + $0x210] sm:$0xf] }
  0x2b   : > { %v10218_v9 = vld [vmem:[%s14345_s2 + $0x214] sm:$0xf0]  ;;  %v10176_v10 = vld [vmem:[%s14345_s2 + $0xc4] sm:$0xf0]  ;;  %v8970_v11 = vld [vmem:[%s14345_s2 + $0x1c0] sm:$0xf]  ;;  %v8907_v13 = vor.u32 %v10192_v3, %v8906_v2 }
  0x2c   : > { %10610 = vmatpush.bf16.msra.mxu1 %v8771_v14  ;;  %10611 = vmatpush.bf16.msra.mxu2 %v8771_v14  ;;  %v10208_v12 = vld [vmem:[%s14345_s2 + $0x1c4] sm:$0xf0]  ;;  %v10190_v15 = vld [vmem:[%s14345_s2 + $0x134] sm:$0xf0]  ;;  %v9011_v16 = vor.u32 %v10218_v9, %v9010_v8  ;;  %v9002_v21 = vld [vmem:[%s14345_s2 + $0x200] sm:$0xf] }
  0x2d   : > { %10612 = vmatpush.bf16.msra.mxu3 %v8771_v14  ;;  %1213 = vmatpush.bf16.msra.mxu0 %v8771_v14  ;;  %v8898_v14 = vld [vmem:[%s14345_s2 + $0x130] sm:$0xf]  ;;  %v8971_v18 = vor.u32 %v10208_v12, %v8970_v11  ;;  %v8646_v19 = vld [vmem:[%s10928_s26 + $0x78] sm:$0xf]  ;;  %v10216_v22 = vld [vmem:[%s14345_s2 + $0x204] sm:$0xf0] }
  0x2e   : > { %v10174_v23 = vld [vmem:[%s14345_s2 + $0xb4] sm:$0xf0]  ;;  %v8962_v24 = vld [vmem:[%s14345_s2 + $0x1b0] sm:$0xf]  ;;  %v10128_v26 = vld [vmem:[%s10928_s26 + $0x88] sm:$0xf0]  ;;  %v8899_v29 = vor.u32 %v10190_v15, %v8898_v14  ;;  %v9003_v32 = vor.u32 %v10216_v22, %v9002_v21 }
  0x2f   : > { %v10206_v25 = vld [vmem:[%s14345_s2 + $0x1b4] sm:$0xf0]  ;;  %v8686_v27 = vld [vmem:[%s10928_s26 + $0xc8] sm:$0xf]  ;;  %v10138_v28 = vld [vmem:[%s10928_s26 + $0xd8] sm:$0xf0]  ;;  %v11079_v38 = vor.u32 %v10128_v26, %v8646_v19 }
  0x30   : > { %10613 = vmatpush.bf16.msra.mxu1 %v8763_v17  ;;  %10614 = vmatpush.bf16.msra.mxu2 %v8763_v17  ;;  %v8726_v30 = vld [vmem:[%s10928_s26 + $0x118] sm:$0xf]  ;;  %v8963_v34 = vor.u32 %v10206_v25, %v8962_v24  ;;  %v8890_v35 = vld [vmem:[%s14345_s2 + $0x120] sm:$0xf]  ;;  %v10204_v42 = vld [vmem:[%s14345_s2 + $0x1a4] sm:$0xf0] }
  0x31   : > { %10615 = vmatpush.bf16.msra.mxu3 %v8763_v17  ;;  %1214 = vmatpush.bf16.msra.mxu0 %v8763_v17  ;;  %v8843_v17 = vor.u32 %v10176_v10, %v8842_v7  ;;  %v8826_v37 = vld [vmem:[%s14345_s2 + $0xa0] sm:$0xf]  ;;  %v8606_v46 = vld [vmem:[%s10928_s26 + $0x28] sm:$0xf]  ;;  %v10118_v47 = vld [vmem:[%s10928_s26 + $0x38] sm:$0xf0] }
  0x32   : > { %v8954_v41 = vld [vmem:[%s14345_s2 + $0x1a0] sm:$0xf]  ;;  %v10186_v53 = vld [vmem:[%s14345_s2 + $0x114] sm:$0xf0]  ;;  %v8818_v54 = vld [vmem:[%s14345_s2 + $0x90] sm:$0xf] }
  0x33   : > { %v8955_v51 = vor.u32 %v10204_v42, %v8954_v41  ;;  %v10202_v58 = vld [vmem:[%s14345_s2 + $0x194] sm:$0xf0]  ;;  %v8874_v63 = vld [vmem:[%s14345_s2 + $0x100] sm:$0xf]  ;;  %v10184_v0 = vld [vmem:[%s14345_s2 + $0x104] sm:$0xf0] }
  0x34   : > { %10616 = vmatpush.bf16.msra.mxu1 %v8755_v20  ;;  %10617 = vmatpush.bf16.msra.mxu2 %v8755_v20  ;;  %v10168_v2 = vld [vmem:[%s14345_s2 + $0x84] sm:$0xf0]  ;;  %v8938_v3 = vld [vmem:[%s14345_s2 + $0x180] sm:$0xf]  ;;  %v8875_v7 = vor.u32 %v10184_v0, %v8874_v63  ;;  %v10111_v10 = vld [vmem:[%s10928_s26 + $0x4] sm:$0xf] }
  0x35   : > { %10618 = vmatpush.bf16.msra.mxu3 %v8755_v20  ;;  %1215 = vmatpush.bf16.msra.mxu0 %v8755_v20  ;;  %v8834_v20 = vld [vmem:[%s14345_s2 + $0xb0] sm:$0xf]  ;;  %v8588_v11 = vld [vmem:[%s10928_s26 + $0x14] sm:$0xf0]  ;;  %v10114_v14 = vld [vmem:[%s10928_s26 + $0x18] sm:$0xf0] }
  0x36   : > { %v8835_v33 = vor.u32 %v10174_v23, %v8834_v20  ;;  %v10112_v15 = vld [vmem:[%s10928_s26 + $0xc] sm:$0xf]  ;;  %v11156_v19 = vor.u32 %v10111_v10, %v8588_v11  ;;  %v8602_v22 = vld [vmem:[%s10928_s26 + $0x10] sm:$0xf]  ;;  %v10115_v23 = vld [vmem:[%s10928_s26 + $0x20] sm:$0xf0] }
  0x37   : > { %v11166_v25 = vor.u32 %v10115_v23, %v8602_v22  ;;  %v10177_v26 = vld [vmem:[%s14345_s2 + $0xd4] sm:$0xf]  ;;  %v10120_v41 = vld [vmem:[%s10928_s26 + $0x48] sm:$0xf0]  ;;  %v8668_v22 = vld [vmem:[%s10928_s26 + $0xb4] sm:$0xf0] }
  0x38   : > { %10619 = vmatpush.bf16.msra.mxu1 %v8747_v31  ;;  %10620 = vmatpush.bf16.msra.mxu2 %v8747_v31  ;;  %v10173_v0 = vld [vmem:[%s14345_s2 + $0xb4] sm:$0xf]  ;;  %v8674_v23 = vld [vmem:[%s10928_s26 + $0xa8] sm:$0xf]  ;;  %s8578_s15 = sshll.u32 %s479_s16, 6  ;;  %s10464_s22 = sshll.u32 %s10846_s17, 6 }
  0x39   : > { %10621 = vmatpush.bf16.msra.mxu3 %v8747_v31  ;;  %1216 = vmatpush.bf16.msra.mxu0 %v8747_v31  ;;  %v10148_v31 = vld [vmem:[%s10928_s26 + $0x128] sm:$0xf0]  ;;  %s11983_s21 = scalar_lea.vmem [#allocation3], %s8578_s15  ;;  %s10703_s19 = scalar_lea.hbm %s14357_s14, 128 }
  0x3a   : > { %v11092_v43 = vor.u32 %v10148_v31, %v8726_v30  ;;  %v8608_v30 = vld [vmem:[%s10928_s26 + $0x3c] sm:$0xf0]  ;;  %v8614_v31 = vld [vmem:[%s10928_s26 + $0x30] sm:$0xf]  ;;  %s8497_s20 = sshll.u32 %s11983_s21, 4  ;;  %s8498_s20 = int_to_ptr.vmem [resolvable:$true] %s8497_s20 }
  0x3b   : > { %1227 = vmatmul.bf16.vlgmr.msra.gmra.mxu1 %v10969_v44  ;;  %1237 = vmatmul.bf16.vlgmr.msra.gmra.mxu2 %v10971_v45 }
  0x3c   : > { %1307 = vmatpush.bf16.msrb.mxu2 %v8931_v36  ;;  %1258 = vmatpush.bf16.msrb.mxu1 %v8867_v39  ;;  %v10188_v36 = vld [vmem:[%s14345_s2 + $0x124] sm:$0xf0]  ;;  %v11081_v39 = vor.u32 %v10138_v28, %v8686_v27  ;;  %v8852_v27 = vld [vmem:[%s14345_s2 + $0xd8] sm:$0xf0] }
  0x3d   : > { %1356 = vmatpush.bf16.msrb.mxu3 %v8995_v40  ;;  %1409 = vmatpush.bf16.msrb.mxu0 %v9027_v55  ;;  %v10172_v40 = vld [vmem:[%s14345_s2 + $0xa4] sm:$0xf0]  ;;  %v8891_v48 = vor.u32 %v10188_v36, %v8890_v35  ;;  %v10170_v55 = vld [vmem:[%s14345_s2 + $0x94] sm:$0xf0]  ;;  %v8855_v28 = vor.u32 %v10177_v26, %v8852_v27  ;;  %v10132_v26 = vld [vmem:[%s10928_s26 + $0xac] sm:$0xf] }
  0x3e   : > { %1247 = vmatmul.bf16.vlgmr.msra.gmra.mxu3 %v10982_v49  ;;  %1217 = vmatmul.bf16.vlgmr.msra.gmra.mxu0 %v11006_v62  ;;  %v8827_v50 = vor.u32 %v10172_v40, %v8826_v37  ;;  %v8819_v60 = vor.u32 %v10170_v55, %v8818_v54  ;;  %v8622_v40 = vld [vmem:[%s10928_s26 + $0x38] sm:$0xf]  ;;  %v10122_v54 = vld [vmem:[%s10928_s26 + $0x5c] sm:$0xf]  ;;  %v8636_v55 = vld [vmem:[%s10928_s26 + $0x6c] sm:$0xf0] }
  0x3f   : > { %v11193_v42 = vor.u32 %v10120_v41, %v8622_v40  ;;  %v8676_v27 = vld [vmem:[%s10928_s26 + $0xbc] sm:$0xf0] }
  0x40   : > { %1308 = vmatpush.bf16.msrb.mxu2 %v8923_v52  ;;  %1259 = vmatpush.bf16.msrb.mxu1 %v8859_v56  ;;  %v8882_v52 = vld [vmem:[%s14345_s2 + $0x110] sm:$0xf]  ;;  %v11110_v56 = vor.u32 %v10118_v47, %v8606_v46  ;;  %v10175_v46 = vld [vmem:[%s14345_s2 + $0xc4] sm:$0xf]  ;;  %v8844_v47 = vld [vmem:[%s14345_s2 + $0xc8] sm:$0xf0] }
  0x41   : > { %1357 = vmatpush.bf16.msrb.mxu3 %v8987_v57  ;;  %1410 = vmatpush.bf16.msrb.mxu0 %v9019_v4  ;;  %v8946_v57 = vld [vmem:[%s14345_s2 + $0x190] sm:$0xf]  ;;  %v8883_v59 = vor.u32 %v10186_v53, %v8882_v52  ;;  %v10200_v4 = vld [vmem:[%s14345_s2 + $0x184] sm:$0xf0]  ;;  %v8634_v52 = vld [vmem:[%s10928_s26 + $0x58] sm:$0xf] }
  0x42   : > { %v8947_v61 = vor.u32 %v10202_v58, %v8946_v57  ;;  %v8939_v9 = vor.u32 %v10200_v4, %v8938_v3  ;;  %v10124_v53 = vld [vmem:[%s10928_s26 + $0x68] sm:$0xf0]  ;;  %v10126_v3 = vld [vmem:[%s10928_s26 + $0x7c] sm:$0xf]  ;;  %v8648_v4 = vld [vmem:[%s10928_s26 + $0x8c] sm:$0xf0] }
  0x43   : > { %v11212_v58 = vor.u32 %v10124_v53, %v8634_v52  ;;  %v10163_v53 = vld [vmem:[%s14345_s2 + $0x64] sm:$0xf] }
  0x44   : > { %1309 = vmatpush.bf16.msrb.mxu2 %v8915_v1  ;;  %1260 = vmatpush.bf16.msrb.mxu1 %v8851_v5  ;;  %v8810_v1 = vld [vmem:[%s14345_s2 + $0x80] sm:$0xf]  ;;  %v10181_v5 = vld [vmem:[%s14345_s2 + $0xf4] sm:$0xf] }
  0x45   : > { %1358 = vmatpush.bf16.msrb.mxu3 %v8979_v6  ;;  %1411 = vmatpush.bf16.msrb.mxu0 %v9011_v16  ;;  %v8868_v6 = vld [vmem:[%s14345_s2 + $0xf8] sm:$0xf0]  ;;  %v8811_v8 = vor.u32 %v10168_v2, %v8810_v1  ;;  %v8596_v16 = vld [vmem:[%s10928_s26 + $0x1c] sm:$0xf0] }
  0x46   : > { %v8871_v12 = vor.u32 %v10181_v5, %v8868_v6  ;;  %v11160_v21 = vor.u32 %v10112_v15, %v8596_v16  ;;  %v8836_v1 = vld [vmem:[%s14345_s2 + $0xb8] sm:$0xf0]  ;;  %v8654_v5 = vld [vmem:[%s10928_s26 + $0x80] sm:$0xf]  ;;  %v10129_v6 = vld [vmem:[%s10928_s26 + $0x90] sm:$0xf0] }
  0x47   : > { %v8839_v2 = vor.u32 %v10173_v0, %v8836_v1  ;;  %v11239_v10 = vor.u32 %v10129_v6, %v8654_v5  ;;  %v10171_v15 = vld [vmem:[%s14345_s2 + $0xa4] sm:$0xf]  ;;  %v8828_v16 = vld [vmem:[%s14345_s2 + $0xa8] sm:$0xf0]  ;;  %v10161_v1 = vld [vmem:[%s14345_s2 + $0x54] sm:$0xf] }
  0x48   : > { %1310 = vmatpush.bf16.msrb.mxu2 %v8907_v13  ;;  %1261 = vmatpush.bf16.msrb.mxu1 %v8843_v17  ;;  %v8594_v13 = vld [vmem:[%s10928_s26 + $0x8] sm:$0xf]  ;;  %v10179_v17 = vld [vmem:[%s14345_s2 + $0xe4] sm:$0xf]  ;;  %v8694_v5 = vld [vmem:[%s10928_s26 + $0xd0] sm:$0xf] }
  0x49   : > { %1359 = vmatpush.bf16.msrb.mxu3 %v8971_v18  ;;  %1412 = vmatpush.bf16.msrb.mxu0 %v9003_v32  ;;  %v8860_v18 = vld [vmem:[%s14345_s2 + $0xe8] sm:$0xf0]  ;;  %v11158_v20 = vor.u32 %v10114_v14, %v8594_v13  ;;  %v10119_v32 = vld [vmem:[%s10928_s26 + $0x40] sm:$0xf0]  ;;  %v10130_v13 = vld [vmem:[%s10928_s26 + $0x98] sm:$0xf0] }
  0x4a   : > { %v8863_v24 = vor.u32 %v10179_v17, %v8860_v18  ;;  %v11185_v36 = vor.u32 %v10119_v32, %v8614_v31  ;;  %v8831_v17 = vor.u32 %v10171_v15, %v8828_v16  ;;  %v10131_v18 = vld [vmem:[%s10928_s26 + $0xa4] sm:$0xf]  ;;  %v8682_v31 = vld [vmem:[%s10928_s26 + $0xb0] sm:$0xf]  ;;  %v10137_v15 = vld [vmem:[%s10928_s26 + $0xd4] sm:$0xf] }
  0x4b   : > { %1232 = vmatmul.bf16.gmra.mxu1 %v11079_v38  ;;  %1242 = vmatmul.bf16.gmra.mxu2 %v11081_v39  ;;  %v10135_v32 = vld [vmem:[%s10928_s26 + $0xc0] sm:$0xf0] }
  0x4c   : > { %1311 = vmatpush.bf16.msrb.mxu2 %v8899_v29  ;;  %1262 = vmatpush.bf16.msrb.mxu1 %v8835_v33  ;;  %v10116_v29 = vld [vmem:[%s10928_s26 + $0x2c] sm:$0xf]  ;;  %v10117_v33 = vld [vmem:[%s10928_s26 + $0x34] sm:$0xf]  ;;  %v11280_v41 = vor.u32 %v10135_v32, %v8682_v31  ;;  %v10191_v32 = vld [vmem:[%s14345_s2 + $0x144] sm:$0xf] }
  0x4d   : > { %1360 = vmatpush.bf16.msrb.mxu3 %v8963_v34  ;;  %v8616_v34 = vld [vmem:[%s10928_s26 + $0x44] sm:$0xf0]  ;;  %v11183_v35 = vor.u32 %v10116_v29, %v8608_v30  ;;  %v11268_v30 = vor.u32 %v10132_v26, %v8676_v27 }
  0x4e   : > { %1252 = vmatmul.bf16.gmra.mxu3 %v11092_v43  ;;  %1222 = vmatmul.bf16.gmra.mxu0 %v11110_v56  ;;  %v11187_v37 = vor.u32 %v10117_v33, %v8616_v34  ;;  %v10165_v33 = vld [vmem:[%s14345_s2 + $0x74] sm:$0xf]  ;;  %v8804_v34 = vld [vmem:[%s14345_s2 + $0x78] sm:$0xf0]  ;;  %14390 = vst [vmem:[#allocation14_spill] sm:$0xff] %v11280_v41 }
  0x4f   : > { %v8807_v40 = vor.u32 %v10165_v33, %v8804_v34  ;;  %v8908_v33 = vld [vmem:[%s14345_s2 + $0x148] sm:$0xf0]  ;;  %v10211_v34 = vld [vmem:[%s14345_s2 + $0x1e4] sm:$0xf] }
  0x50   : > { %1312 = vmatpush.bf16.msrb.mxu2 %v8891_v48  ;;  %1263 = vmatpush.bf16.msrb.mxu1 %v8827_v50  ;;  %v8847_v48 = vor.u32 %v10175_v46, %v8844_v47  ;;  %v10121_v50 = vld [vmem:[%s10928_s26 + $0x54] sm:$0xf]  ;;  %v8820_v47 = vld [vmem:[%s14345_s2 + $0x98] sm:$0xf0] }
  0x51   : > { %1361 = vmatpush.bf16.msrb.mxu3 %v8955_v51  ;;  %v8628_v51 = vld [vmem:[%s10928_s26 + $0x64] sm:$0xf0]  ;;  %v10169_v46 = vld [vmem:[%s14345_s2 + $0x94] sm:$0xf] }
  0x52   : > { %v11210_v57 = vor.u32 %v10121_v50, %v8628_v51  ;;  %v8823_v50 = vor.u32 %v10169_v46, %v8820_v47  ;;  %v8932_v51 = vld [vmem:[%s14345_s2 + $0x178] sm:$0xf0]  ;;  %v8702_v46 = vld [vmem:[%s10928_s26 + $0xd8] sm:$0xf]  ;;  %v10140_v47 = vld [vmem:[%s10928_s26 + $0xe8] sm:$0xf0] }
  0x54   : > { %1313 = vmatpush.bf16.msrb.mxu2 %v8883_v59  ;;  %1264 = vmatpush.bf16.msrb.mxu1 %v8819_v60  ;;  %v11214_v59 = vor.u32 %v10122_v54, %v8636_v55  ;;  %v8642_v60 = vld [vmem:[%s10928_s26 + $0x60] sm:$0xf]  ;;  %v8796_v54 = vld [vmem:[%s14345_s2 + $0x68] sm:$0xf0] }
  0x55   : > { %1362 = vmatpush.bf16.msrb.mxu3 %v8947_v61  ;;  %v10125_v61 = vld [vmem:[%s10928_s26 + $0x70] sm:$0xf0]  ;;  %v8799_v55 = vor.u32 %v10163_v53, %v8796_v54  ;;  %v8772_v53 = vld [vmem:[%s14345_s2 + $0x38] sm:$0xf0]  ;;  %v11367_v54 = vor.u32 %v10140_v47, %v8702_v46 }
  0x56   : > { %v11220_v63 = vor.u32 %v10125_v61, %v8642_v60  ;;  %v10195_v60 = vld [vmem:[%s14345_s2 + $0x164] sm:$0xf]  ;;  %v8924_v61 = vld [vmem:[%s14345_s2 + $0x168] sm:$0xf0]  ;;  %v10185_v46 = vld [vmem:[%s14345_s2 + $0x114] sm:$0xf] }
  0x57   : > { %v8927_v0 = vor.u32 %v10195_v60, %v8924_v61  ;;  %14391 = vst [vmem:[#allocation15_spill] sm:$0xff] %v11367_v54  ;;  %v8812_v60 = vld [vmem:[%s14345_s2 + $0x88] sm:$0xf0]  ;;  %v8884_v47 = vld [vmem:[%s14345_s2 + $0x118] sm:$0xf0] }
  0x58   : > { %1314 = vmatpush.bf16.msrb.mxu2 %v8875_v7  ;;  %1265 = vmatpush.bf16.msrb.mxu1 %v8811_v8  ;;  %14388 = vst [vmem:[#allocation12_spill] sm:$0xff] %v11220_v63  ;;  %v10127_v7 = vld [vmem:[%s10928_s26 + $0x84] sm:$0xf]  ;;  %v8656_v8 = vld [vmem:[%s10928_s26 + $0x94] sm:$0xf0] }
  0x59   : > { %1363 = vmatpush.bf16.msrb.mxu3 %v8939_v9  ;;  %v11237_v9 = vor.u32 %v10126_v3, %v8648_v4  ;;  %v11241_v11 = vor.u32 %v10127_v7, %v8656_v8  ;;  %v10136_v3 = vld [vmem:[%s10928_s26 + $0xcc] sm:$0xf]  ;;  %v8688_v4 = vld [vmem:[%s10928_s26 + $0xdc] sm:$0xf0]  ;;  %v10193_v7 = vld [vmem:[%s14345_s2 + $0x154] sm:$0xf] }
  0x5a   : > { %v8916_v8 = vld [vmem:[%s14345_s2 + $0x158] sm:$0xf0]  ;;  %v11339_v27 = vor.u32 %v10136_v3, %v8688_v4  ;;  %v10209_v3 = vld [vmem:[%s14345_s2 + $0x1d4] sm:$0xf] }
  0x5b   : > { %1266 = vmatmul.bf16.vlgmr.msrb.gmra.mxu1 %v11156_v19  ;;  %1315 = vmatmul.bf16.vlgmr.msrb.gmra.mxu2 %v11158_v20  ;;  %v8919_v16 = vor.u32 %v10193_v7, %v8916_v8  ;;  %v8980_v4 = vld [vmem:[%s14345_s2 + $0x1d8] sm:$0xf0]  ;;  %v10155_v7 = vld [vmem:[%s14345_s2 + $0x24] sm:$0xf]  ;;  %v8764_v8 = vld [vmem:[%s14345_s2 + $0x28] sm:$0xf0] }
  0x5c   : > { %1503 = vmatpush.bf16.msra.mxu2 %v8871_v12  ;;  %v8662_v12 = vld [vmem:[%s10928_s26 + $0x88] sm:$0xf]  ;;  %1454 = vmatpush.bf16.msra.mxu1 %v8807_v40 }
  0x5d   : > { %v11247_v14 = vor.u32 %v10130_v13, %v8662_v12  ;;  %v10213_v12 = vld [vmem:[%s14345_s2 + $0x1f4] sm:$0xf]  ;;  %v10139_v13 = vld [vmem:[%s10928_s26 + $0xe0] sm:$0xf0] }
  0x5e   : > { %1364 = vmatmul.bf16.vlgmr.msrb.gmra.mxu3 %v11160_v21  ;;  %9032 = vmatmul.msk.bf16.vlgmr.msrb.gmra.mxu0 %vm1184_vm0, %v11166_v25  ;;  %v11341_v31 = vor.u32 %v10139_v13, %v8694_v5  ;;  %v10187_v13 = vld [vmem:[%s14345_s2 + $0x124] sm:$0xf] }
  0x5f   : > { %14389 = vst [vmem:[#allocation13_spill] sm:$0xff] %v11247_v14 }
  0x60   : > { %1504 = vmatpush.bf16.msra.mxu2 %v8863_v24  ;;  %v10134_v24 = vld [vmem:[%s10928_s26 + $0xb8] sm:$0xf0]  ;;  %1455 = vmatpush.bf16.msra.mxu1 %v8799_v55  ;;  %v10167_v55 = vld [vmem:[%s14345_s2 + $0x84] sm:$0xf] }
  0x61   : > { %v11266_v29 = vor.u32 %v10134_v24, %v8674_v23  ;;  %v10159_v23 = vld [vmem:[%s14345_s2 + $0x44] sm:$0xf]  ;;  %v8780_v24 = vld [vmem:[%s14345_s2 + $0x48] sm:$0xf0] }
  0x62   : > { %v8783_v26 = vor.u32 %v10159_v23, %v8780_v24  ;;  %v10153_v23 = vld [vmem:[%s14345_s2 + $0x14] sm:$0xf]  ;;  %v8756_v24 = vld [vmem:[%s14345_s2 + $0x18] sm:$0xf0] }
  0x64   : > { %1505 = vmatpush.bf16.msra.mxu2 %v8855_v28  ;;  %v11264_v28 = vor.u32 %v10131_v18, %v8668_v22  ;;  %v8696_v18 = vld [vmem:[%s10928_s26 + $0xe4] sm:$0xf0] }
  0x65   : > { %v11352_v40 = vor.u32 %v10137_v15, %v8696_v18  ;;  %v8892_v15 = vld [vmem:[%s14345_s2 + $0x128] sm:$0xf0] }
  0x66   : > { %v8895_v18 = vor.u32 %v10187_v13, %v8892_v15  ;;  %v8722_v13 = vld [vmem:[%s10928_s26 + $0x100] sm:$0xf]  ;;  %v10145_v15 = vld [vmem:[%s10928_s26 + $0x110] sm:$0xf0] }
  0x68   : > { %1506 = vmatpush.bf16.msra.mxu2 %v8847_v48  ;;  %v10197_v48 = vld [vmem:[%s14345_s2 + $0x174] sm:$0xf] }
  0x69   : > { %v8935_v52 = vor.u32 %v10197_v48, %v8932_v51  ;;  %v8988_v48 = vld [vmem:[%s14345_s2 + $0x1e8] sm:$0xf0] }
  0x6a   : > { %v8991_v51 = vor.u32 %v10211_v34, %v8988_v48  ;;  %v8759_v34 = vor.u32 %v10153_v23, %v8756_v24  ;;  %v10205_v48 = vld [vmem:[%s14345_s2 + $0x1b4] sm:$0xf]  ;;  %v11470_v23 = vor.u32 %v10145_v15, %v8722_v13  ;;  %v10238_v24 = vld [vmem:[%s14348_s5 + $0x38] sm:$0xff] }
  0x6b   : > { %1271 = vmatmul.bf16.gmra.mxu1 %v11183_v35  ;;  %1320 = vmatmul.bf16.gmra.mxu2 %v11185_v36 }
  0x6c   : > { %1507 = vmatpush.bf16.msra.mxu2 %v8839_v2  ;;  %1552 = vmatpush.bf16.msra.mxu3 %v8935_v52  ;;  %v8788_v2 = vld [vmem:[%s14345_s2 + $0x58] sm:$0xf0]  ;;  %v10157_v52 = vld [vmem:[%s14345_s2 + $0x34] sm:$0xf]  ;;  %14392 = vst [vmem:[#allocation16_spill] sm:$0xff] %v11470_v23 }
  0x6d   : > { %v8791_v6 = vor.u32 %v10161_v1, %v8788_v2  ;;  %v8775_v61 = vor.u32 %v10157_v52, %v8772_v53  ;;  %v8815_v1 = vor.u32 %v10167_v55, %v8812_v60  ;;  %v8900_v2 = vld [vmem:[%s14345_s2 + $0x138] sm:$0xf0]  ;;  %v8716_v53 = vld [vmem:[%s10928_s26 + $0x10c] sm:$0xf0]  ;;  %v8887_v55 = vor.u32 %v10185_v46, %v8884_v47 }
  0x6e   : > { %1369 = vmatmul.bf16.gmra.mxu3 %v11187_v37  ;;  %9033 = vmatmul.msk.bf16.gmra.mxu0 %vm1184_vm0, %v11193_v42  ;;  %v8964_v52 = vld [vmem:[%s14345_s2 + $0x1b8] sm:$0xf0] }
  0x6f   : > { %1456 = vmatpush.bf16.msra.mxu1 %v8791_v6  ;;  %v8983_v6 = vor.u32 %v10209_v3, %v8980_v4  ;;  %v8967_v60 = vor.u32 %v10205_v48, %v8964_v52 }
  0x70   : > { %1508 = vmatpush.bf16.msra.mxu2 %v8831_v17  ;;  %1553 = vmatpush.bf16.msra.mxu3 %v8927_v0  ;;  %v8996_v17 = vld [vmem:[%s14345_s2 + $0x1f8] sm:$0xf0]  ;;  %v10189_v0 = vld [vmem:[%s14345_s2 + $0x134] sm:$0xf] }
  0x71   : > { %v8999_v22 = vor.u32 %v10213_v12, %v8996_v17  ;;  %v8903_v5 = vor.u32 %v10189_v0, %v8900_v2  ;;  %v8767_v12 = vor.u32 %v10155_v7, %v8764_v8  ;;  %v8972_v17 = vld [vmem:[%s14345_s2 + $0x1c8] sm:$0xf0]  ;;  %v10203_v7 = vld [vmem:[%s14345_s2 + $0x1a4] sm:$0xf] }
  0x72   : > { %v8748_v0 = vld [vmem:[%s14345_s2 + $0x8] sm:$0xf0] }
  0x73   : > { %1601 = vmatpush.bf16.msra.mxu0 %v8999_v22  ;;  %1457 = vmatpush.bf16.msra.mxu1 %v8783_v26  ;;  %v10141_v26 = vld [vmem:[%s10928_s26 + $0xf4] sm:$0xf] }
  0x74   : > { %1509 = vmatpush.bf16.msra.mxu2 %v8823_v50  ;;  %1554 = vmatpush.bf16.msra.mxu3 %v8919_v16  ;;  %v8911_v50 = vor.u32 %v10191_v32, %v8908_v33  ;;  %v10207_v16 = vld [vmem:[%s14345_s2 + $0x1c4] sm:$0xf]  ;;  %v8708_v32 = vld [vmem:[%s10928_s26 + $0x104] sm:$0xf0]  ;;  %v8714_v33 = vld [vmem:[%s10928_s26 + $0xf8] sm:$0xf] }
  0x75   : > { %v8975_v22 = vor.u32 %v10207_v16, %v8972_v17  ;;  %v11443_v3 = vor.u32 %v10141_v26, %v8708_v32  ;;  %v8956_v16 = vld [vmem:[%s14345_s2 + $0x1a8] sm:$0xf0]  ;;  %v10201_v26 = vld [vmem:[%s14345_s2 + $0x194] sm:$0xf]  ;;  %v8948_v32 = vld [vmem:[%s14345_s2 + $0x198] sm:$0xf0] }
  0x77   : > { %1602 = vmatpush.bf16.msra.mxu0 %v8991_v51  ;;  %1458 = vmatpush.bf16.msra.mxu1 %v8775_v61  ;;  %v10142_v51 = vld [vmem:[%s10928_s26 + $0xfc] sm:$0xf]  ;;  %v10151_v61 = vld [vmem:[%s14345_s2 + $0x4] sm:$0xf] }
  0x78   : > { %1555 = vmatpush.bf16.msra.mxu3 %v8911_v50  ;;  %1510 = vmatpush.bf16.msra.mxu2 %v8815_v1  ;;  %v10144_v50 = vld [vmem:[%s10928_s26 + $0x108] sm:$0xf0]  ;;  %v11441_v1 = vld [vmem:[%s14346_s3] sm:$0x3]  ;;  %v8751_v2 = vor.u32 %v10151_v61, %v8748_v0  ;;  %v8728_v0 = vld [vmem:[%s10928_s26 + $0x12c] sm:$0xf0] }
  0x79   : > { %v11445_v4 = vor.u32 %v10144_v50, %v8714_v33  ;;  %v10199_v50 = vld [vmem:[%s14345_s2 + $0x184] sm:$0xf] }
  0x7b   : > { %1276 = vmatmul.bf16.gmra.mxu1 %v11210_v57  ;;  %1325 = vmatmul.bf16.gmra.mxu2 %v11212_v58 }
  0x7c   : > { %1603 = vmatpush.bf16.msra.mxu0 %v8983_v6  ;;  %1556 = vmatpush.bf16.msra.mxu3 %v8903_v5  ;;  %v10183_v5 = vld [vmem:[%s14345_s2 + $0x104] sm:$0xf]  ;;  %v8876_v6 = vld [vmem:[%s14345_s2 + $0x108] sm:$0xf0] }
  0x7d   : > { %1459 = vmatpush.bf16.msra.mxu1 %v8767_v12  ;;  %v11458_v12 = vor.u32 %v10142_v51, %v8716_v53  ;;  %v8879_v17 = vor.u32 %v10183_v5, %v8876_v6  ;;  %1914 = vmatpush.bf16.msrb.mxu2 %v10238_v24  ;;  %v8940_v51 = vld [vmem:[%s14345_s2 + $0x188] sm:$0xf0]  ;;  %v10149_v5 = vld [vmem:[%s10928_s26 + $0x130] sm:$0xf0]  ;;  %v10147_v6 = vld [vmem:[%s10928_s26 + $0x124] sm:$0xf] }
  0x7e   : > { %1374 = vmatmul.bf16.gmra.mxu3 %v11214_v59  ;;  %9034 = vmatmul.msk.bf16.gmra.mxu0 %vm1184_vm0, %v11220_v63 }
  0x80   : > { %1604 = vmatpush.bf16.msra.mxu0 %v8975_v22  ;;  %1557 = vmatpush.bf16.msra.mxu3 %v8895_v18  ;;  %v8959_v18 = vor.u32 %v10203_v7, %v8956_v16  ;;  %v11466_v22 = vperm.slane %v11441_v1, 0  ;;  %v8736_v7 = vld [vmem:[%s10928_s26 + $0x134] sm:$0xf0] }
  0x81   : > { %1460 = vmatpush.bf16.msra.mxu1 %v8759_v34  ;;  %v8951_v34 = vor.u32 %v10201_v26, %v8948_v32  ;;  %v11516_v32 = vor.u32 %v10147_v6, %v8736_v7 }
  0x84   : > { %1605 = vmatpush.bf16.msra.mxu0 %v8967_v60  ;;  %1558 = vmatpush.bf16.msra.mxu3 %v8887_v55  ;;  %v8943_v55 = vor.u32 %v10199_v50, %v8940_v51  ;;  %v10146_v60 = vld [vmem:[%s10928_s26 + $0x11c] sm:$0xf] }
  0x85   : > { %1461 = vmatpush.bf16.msra.mxu1 %v8751_v2  ;;  %v8734_v2 = vld [vmem:[%s10928_s26 + $0x120] sm:$0xf] }
  0x88   : > { %1606 = vmatpush.bf16.msra.mxu0 %v8959_v18  ;;  %1559 = vmatpush.bf16.msra.mxu3 %v8879_v17  ;;  %v11507_v17 = vor.u32 %v10146_v60, %v8728_v0  ;;  %v11509_v18 = vor.u32 %v10149_v5, %v8734_v2  ;;  %v10237_v0 = vld [vmem:[%s14348_s5 + $0x30] sm:$0xff] }
  0x89   : > { %1915 = vmatpush.bf16.msrb.mxu2 %v10237_v0 }
  0x8b   : > { %1281 = vmatmul.bf16.gmra.mxu1 %v11237_v9  ;;  %1330 = vmatmul.bf16.gmra.mxu2 %v11239_v10 }
  0x8c   : > { %1607 = vmatpush.bf16.msra.mxu0 %v8951_v34  ;;  %v8742_v34 = vld [vmem:[%s10928_s26 + $0x128] sm:$0xf] }
  0x8e   : > { %1379 = vmatmul.bf16.gmra.mxu3 %v11241_v11  ;;  %9035 = vmatmul.msk.bf16.gmra.mxu0 %vm1184_vm0, %v11247_v14 }
  0x90   : > { %1608 = vmatpush.bf16.msra.mxu0 %v8943_v55 }
  0x9b   : > { %1286 = vmatmul.bf16.gmra.mxu1 %v11264_v28  ;;  %1335 = vmatmul.bf16.gmra.mxu2 %v11266_v29 }
  0x9e   : > { %1384 = vmatmul.bf16.gmra.mxu3 %v11268_v30  ;;  %9036 = vmatmul.msk.bf16.gmra.mxu0 %vm1184_vm0, %v11280_v41 }
  0xab   : > { %1291 = vmatmul.bf16.gmra.mxu1 %v11339_v27  ;;  %1340 = vmatmul.bf16.gmra.mxu2 %v11341_v31 }
  0xae   : > { %1389 = vmatmul.bf16.gmra.mxu3 %v11352_v40  ;;  %9037 = vmatmul.msk.bf16.gmra.mxu0 %vm1184_vm0, %v11367_v54 }
  0xb8   : > { %v11456_v8 = vpop.f32.mrf.mxu1 }
  0xbb   : > { %1296 = vmatmul.bf16.gmra.mxu1 %v11443_v3  ;;  %1345 = vmatmul.bf16.gmra.mxu2 %v11445_v4  ;;  %v1218_v33 = vpop.f32.mrf.mxu0 }
  0xbc   : > { %v1219_v7 = vadd.f32 %v1218_v33, %v11466_v22 }
  0xbe   : > { %1394 = vmatmul.bf16.gmra.mxu3 %v11458_v12  ;;  %v1238_v46 = vpop.f32.mrf.mxu2  ;;  %9038 = vmatmul.msk.bf16.gmra.mxu0 %vm1184_vm0, %v11470_v23 }
  0xbf   : > { %v11483_v47 = vadd.f32 %v1238_v46, %v11466_v22  ;;  %v10150_v46 = vld [vmem:[%s10928_s26 + $0x138] sm:$0xf0]  ;;  %s8484_s26 = scalar_lea.sflag [#allocation4], %s479_s16 }
  0xc0   : > { %v11493_v52 = vpop.f32.mrf.mxu1 }
  0xc1   : > { %v1248_v48 = vpop.f32.mrf.mxu3 }
  0xc2   : > { %v11496_v53 = vadd.f32 %v1248_v48, %v11466_v22  ;;  %v11522_v48 = vor.u32 %v10150_v46, %v8742_v34 }
  0xc3   : > { %v1220_v61 = vpop.f32.mrf.mxu0 }
  0xc4   : > { %14393 = vst [vmem:[#allocation17_spill] sm:$0xff] %v11522_v48  ;;  %v1221_v0 = vadd.f32 %v1220_v61, %v11466_v22 }
  0xc6   : > { %v1240_v13 = vpop.f32.mrf.mxu2 }
  0xc7   : > { %v11505_v15 = vadd.f32 %v1240_v13, %v11466_v22 }
  0xc8   : > { %v11511_v24 = vpop.f32.mrf.mxu1 }
  0xc9   : > { %v1250_v16 = vpop.f32.mrf.mxu3 }
  0xca   : > { %v11514_v26 = vadd.f32 %v1250_v16, %v11466_v22 }
  0xcb   : > { %1301 = vmatmul.bf16.gmra.mxu1 %v11507_v17  ;;  %1350 = vmatmul.bf16.gmra.mxu2 %v11509_v18  ;;  %v1223_v50 = vpop.f32.mrf.mxu0 }
  0xce   : > { %1399 = vmatmul.bf16.gmra.mxu3 %v11516_v32  ;;  %v1243_v51 = vpop.f32.mrf.mxu2  ;;  %9039 = vmatmul.msk.bf16.gmra.mxu0 %vm1184_vm0, %v11522_v48 }
  0xcf   : > { %v11526_v55 = vadd.f32 %v1243_v51, %v11466_v22 }
  0xd0   : > { %v11533_v2 = vpop.f32.mrf.mxu1 }
  0xd1   : > { %v1253_v60 = vpop.f32.mrf.mxu3 }
  0xd2   : > { %v11536_v5 = vadd.f32 %v1253_v60, %v11466_v22 }
  0xd3   : > { %v1225_v6 = vpop.f32.mrf.mxu0 }
  0xd6   : > { %v1245_v13 = vpop.f32.mrf.mxu2 }
  0xd7   : > { %v11540_v16 = vadd.f32 %v1245_v13, %v11466_v22  ;;  %v10236_v13 = vld [vmem:[%s14348_s5 + $0x28] sm:$0xff] }
  0xd8   : > { %v1267_v51 = vpop.f32.mrf.mxu1  ;;  %1916 = vmatpush.bf16.msrb.mxu2 %v10236_v13 }
  0xd9   : > { %v1255_v34 = vpop.f32.mrf.mxu3  ;;  %v1268_v48 = vadd.f32 %v1267_v51, %v1219_v7 }
  0xda   : > { %v11543_v46 = vadd.f32 %v1255_v34, %v11466_v22 }
  0xdb   : > { %1462 = vmatmul.bf16.vlgmr.msra.gmra.mxu1 %v11006_v62  ;;  %1511 = vmatmul.bf16.vlgmr.msra.gmra.mxu2 %v11156_v19  ;;  %v1414_v60 = vpop.f32.mrf.mxu0 }
  0xde   : > { %1560 = vmatmul.bf16.vlgmr.msra.gmra.mxu3 %v11158_v20  ;;  %v1316_v33 = vpop.f32.mrf.mxu2  ;;  %1609 = vmatmul.bf16.vlgmr.msra.gmra.mxu0 %v11160_v21  ;;  %v1224_v20 = vadd.f32 %v1223_v50, %v11466_v22 }
  0xdf   : > { %v1317_v23 = vadd.f32 %v1316_v33, %v1268_v48 }
  0xe0   : > { %v1269_v34 = vpop.f32.mrf.mxu1 }
  0xe1   : > { %v1365_v54 = vpop.f32.mrf.mxu3  ;;  %v1270_v7 = vadd.f32 %v1269_v34, %v1221_v0 }
  0xe2   : > { %v1366_v51 = vadd.f32 %v1365_v54, %v1317_v23  ;;  %v1226_v23 = vadd.f32 %v1225_v6, %v11466_v22 }
  0xe3   : > { %v1416_v19 = vpop.f32.mrf.mxu0 }
  0xe4   : > { %v11553_v62 = vadd.f32 %v1414_v60, %v1366_v51 }
  0xe6   : > { %v1318_v41 = vpop.f32.mrf.mxu2 }
  0xe7   : > { %v1319_v61 = vadd.f32 %v1318_v41, %v1270_v7 }
  0xe8   : > { %v1272_v48 = vpop.f32.mrf.mxu1 }
  0xe9   : > { %v1367_v14 = vpop.f32.mrf.mxu3  ;;  %v1273_v33 = vadd.f32 %v1272_v48, %v1224_v20  ;;  %v1231_v48 = vadd.f32 %v11493_v52, %v11466_v22 }
  0xea   : > { %v1368_v63 = vadd.f32 %v1367_v14, %v1319_v61  ;;  %v10235_v14 = vld [vmem:[%s14348_s5 + $0x20] sm:$0xff] }
  0xeb   : > { %1467 = vmatmul.bf16.gmra.mxu1 %v11110_v56  ;;  %1516 = vmatmul.bf16.gmra.mxu2 %v11183_v35  ;;  %v1419_v54 = vpop.f32.mrf.mxu0 }
  0xec   : > { %v11556_v21 = vadd.f32 %v1416_v19, %v1368_v63  ;;  %1917 = vmatpush.bf16.msrb.mxu2 %v10235_v14 }
  0xee   : > { %1565 = vmatmul.bf16.gmra.mxu3 %v11185_v36  ;;  %v1321_v60 = vpop.f32.mrf.mxu2  ;;  %1614 = vmatmul.bf16.gmra.mxu0 %v11187_v37  ;;  %v1229_v36 = vadd.f32 %v11456_v8, %v11466_v22 }
  0xef   : > { %v1322_v0 = vadd.f32 %v1321_v60, %v1273_v33 }
  0xf0   : > { %v1274_v63 = vpop.f32.mrf.mxu1 }
  0xf1   : > { %v1370_v50 = vpop.f32.mrf.mxu3  ;;  %v1275_v41 = vadd.f32 %v1274_v63, %v1226_v23  ;;  %v10234_v23 = vld [vmem:[%s14348_s5 + $0x18] sm:$0xff] }
  0xf2   : > { %v1371_v13 = vadd.f32 %v1370_v50, %v1322_v0  ;;  %1918 = vmatpush.bf16.msrb.mxu2 %v10234_v23  ;;  %v1234_v50 = vadd.f32 %v11511_v24, %v11466_v22 }
  0xf3   : > { %v1421_v35 = vpop.f32.mrf.mxu0 }
  0xf4   : > { %v11566_v56 = vadd.f32 %v1419_v54, %v1371_v13 }
  0xf6   : > { %v1323_v6 = vpop.f32.mrf.mxu2 }
  0xf7   : > { %v1324_v34 = vadd.f32 %v1323_v6, %v1275_v41  ;;  %v1236_v6 = vadd.f32 %v11533_v2, %v11466_v22 }
  0xf8   : > { %v1277_v51 = vpop.f32.mrf.mxu1 }
  0xf9   : > { %v1372_v7 = vpop.f32.mrf.mxu3  ;;  %v1278_v19 = vadd.f32 %v1277_v51, %v1229_v36  ;;  %v10233_v51 = vld [vmem:[%s14348_s5 + $0x10] sm:$0xff] }
  0xfa   : > { %v1373_v37 = vadd.f32 %v1372_v7, %v1324_v34  ;;  %1919 = vmatpush.bf16.msrb.mxu2 %v10233_v51 }
  0xfb   : > { %1472 = vmatmul.bf16.gmra.mxu1 %v10969_v44  ;;  %1521 = vmatmul.bf16.gmra.mxu2 %v11210_v57  ;;  %v1424_v61 = vpop.f32.mrf.mxu0 }
  0xfc   : > { %v11570_v20 = vadd.f32 %v1421_v35, %v1373_v37 }
  0xfe   : > { %1570 = vmatmul.bf16.gmra.mxu3 %v11212_v58  ;;  %v1326_v33 = vpop.f32.mrf.mxu2  ;;  %1619 = vmatmul.bf16.gmra.mxu0 %v11214_v59 }
  0xff   : > { %v1327_v8 = vadd.f32 %v1326_v33, %v1278_v19 }
 0x100   : > { %v1279_v60 = vpop.f32.mrf.mxu1 }
 0x101   : > { %v1375_v54 = vpop.f32.mrf.mxu3  ;;  %v1280_v0 = vadd.f32 %v1279_v60, %v1231_v48 }
 0x102   : > { %v1376_v44 = vadd.f32 %v1375_v54, %v1327_v8 }
 0x103   : > { %v1426_v58 = vpop.f32.mrf.mxu0 }
 0x104   : > { %v11581_v57 = vadd.f32 %v1424_v61, %v1376_v44  ;;  %v10232_v44 = vld [vmem:[%s14348_s5 + $0x8] sm:$0xff] }
 0x105   : > { %1920 = vmatpush.bf16.msrb.mxu2 %v10232_v44 }
 0x106   : > { %v1328_v52 = vpop.f32.mrf.mxu2 }
 0x107   : > { %v1329_v14 = vadd.f32 %v1328_v52, %v1280_v0 }
 0x108   : > { %v1282_v41 = vpop.f32.mrf.mxu1 }
 0x109   : > { %v1377_v63 = vpop.f32.mrf.mxu3  ;;  %v1283_v13 = vadd.f32 %v1282_v41, %v1234_v50  ;;  %v10221_v41 = vld [vmem:[%s14345_s2 + $0x234] sm:$0xf] }
 0x10a   : > { %v1378_v59 = vadd.f32 %v1377_v63, %v1329_v14 }
 0x10b   : > { %1477 = vmatmul.bf16.gmra.mxu1 %v11079_v38  ;;  %1526 = vmatmul.bf16.gmra.mxu2 %v11237_v9  ;;  %v1429_v36 = vpop.f32.mrf.mxu0 }
 0x10c   : > { %v11585_v35 = vadd.f32 %v1426_v58, %v1378_v59 }
 0x10e   : > { %1575 = vmatmul.bf16.gmra.mxu3 %v11239_v10  ;;  %v1331_v34 = vpop.f32.mrf.mxu2  ;;  %1624 = vmatmul.bf16.gmra.mxu0 %v11241_v11 }
 0x10f   : > { %v1332_v24 = vadd.f32 %v1331_v34, %v1283_v13 }
 0x110   : > { %v1284_v19 = vpop.f32.mrf.mxu1 }
 0x111   : > { %v1380_v7 = vpop.f32.mrf.mxu3  ;;  %v1285_v37 = vadd.f32 %v1284_v19, %v1236_v6  ;;  %v10217_v19 = vld [vmem:[%s14345_s2 + $0x214] sm:$0xf] }
 0x112   : > { %v1381_v38 = vadd.f32 %v1380_v7, %v1332_v24 }
 0x113   : > { %v1431_v10 = vpop.f32.mrf.mxu0 }
 0x114   : > { %v11596_v9 = vadd.f32 %v1429_v36, %v1381_v38  ;;  %v9020_v36 = vld [vmem:[%s14345_s2 + $0x228] sm:$0xf0] }
 0x116   : > { %v1333_v61 = vpop.f32.mrf.mxu2 }
 0x117   : > { %v1334_v48 = vadd.f32 %v1333_v61, %v1285_v37  ;;  %v9012_v37 = vld [vmem:[%s14345_s2 + $0x218] sm:$0xf0]  ;;  %v9004_v61 = vld [vmem:[%s14345_s2 + $0x208] sm:$0xf0] }
 0x118   : > { %v1287_v22 = vpop.f32.mrf.mxu1  ;;  %v9015_v38 = vor.u32 %v10217_v19, %v9012_v37  ;;  %v10265_v19 = vld [vmem:[%s14350_s7 + $0xcc] sm:$0xf0] }
 0x119   : > { %v1382_v33 = vpop.f32.mrf.mxu3  ;;  %v1288_v2 = vadd.f32 %v1287_v22, %v11483_v47 }
 0x11a   : > { %v1383_v8 = vadd.f32 %v1382_v33, %v1334_v48 }
 0x11b   : > { %1482 = vmatmul.bf16.gmra.mxu1 %v10971_v45  ;;  %1531 = vmatmul.bf16.gmra.mxu2 %v11264_v28  ;;  %v1434_v11 = vpop.f32.mrf.mxu0 }
 0x11c   : > { %v11599_v54 = vadd.f32 %v1431_v10, %v1383_v8 }
 0x11e   : > { %1580 = vmatmul.bf16.gmra.mxu3 %v11266_v29  ;;  %v1336_v23 = vpop.f32.mrf.mxu2  ;;  %1629 = vmatmul.bf16.gmra.mxu0 %v11268_v30 }
 0x11f   : > { %v1337_v60 = vadd.f32 %v1336_v23, %v1288_v2 }
 0x120   : > { %v1289_v47 = vpop.f32.mrf.mxu1 }
 0x121   : > { %v1385_v0 = vpop.f32.mrf.mxu3  ;;  %v1290_v58 = vadd.f32 %v1289_v47, %v11505_v15  ;;  %v9028_v15 = vld [vmem:[%s14345_s2 + $0x238] sm:$0xf0] }
 0x122   : > { %v1386_v50 = vadd.f32 %v1385_v0, %v1337_v60  ;;  %v9031_v13 = vor.u32 %v10221_v41, %v9028_v15  ;;  %v9226_v15 = vld [vmem:[%s14350_s7 + $0xe0] sm:$0xf] }
 0x123   : > { %v11611_v28 = vpop.f32.mrf.mxu0 }
 0x124   : > { %v11609_v45 = vadd.f32 %v1434_v11, %v1386_v50  ;;  %1654 = vmatpush.bf16.msrb.mxu1 %v9031_v13  ;;  %v10269_v13 = vld [vmem:[%s14350_s7 + $0xec] sm:$0xf0] }
 0x126   : > { %v1338_v29 = vpop.f32.mrf.mxu2 }
 0x127   : > { %v11613_v52 = vadd.f32 %v1338_v29, %v1290_v58 }
 0x128   : > { %v1292_v63 = vpop.f32.mrf.mxu1 }
 0x129   : > { %v11615_v14 = vpop.f32.mrf.mxu3  ;;  %v1293_v30 = vadd.f32 %v1292_v63, %v11526_v55  ;;  %v10219_v55 = vld [vmem:[%s14345_s2 + $0x224] sm:$0xf] }
 0x12a   : > { %v9023_v34 = vor.u32 %v10219_v55, %v9020_v36 }
 0x12b   : > { %1487 = vmatmul.bf16.gmra.mxu1 %v11081_v39  ;;  %1536 = vmatmul.bf16.gmra.mxu2 %v11339_v27  ;;  %v1439_v59 = vpop.f32.mrf.mxu0  ;;  %v10231_v39 = vld [vmem:[%s14348_s5] sm:$0xff] }
 0x12c   : > { %1655 = vmatpush.bf16.msrb.mxu1 %v9023_v34  ;;  %1921 = vmatpush.bf16.msrb.mxu2 %v10231_v39  ;;  %v10223_v34 = vld [vmem:[%s11690_s28] sm:$0xff] }
 0x12e   : > { %1585 = vmatmul.bf16.gmra.mxu3 %v11341_v31  ;;  %v1341_v6 = vpop.f32.mrf.mxu2  ;;  %1634 = vmatmul.bf16.gmra.mxu0 %v11352_v40 }
 0x12f   : > { %v1342_v24 = vadd.f32 %v1341_v6, %v1293_v30  ;;  %v11695_v6 = vperm.slane %v11441_v1, 1 }
 0x130   : > { %v1294_v27 = vpop.f32.mrf.mxu1  ;;  %1656 = vmatpush.bf16.msrb.mxu1 %v9015_v38 }
 0x131   : > { %v1390_v7 = vpop.f32.mrf.mxu3  ;;  %v1295_v31 = vadd.f32 %v1294_v27, %v11540_v16  ;;  %v10215_v16 = vld [vmem:[%s14345_s2 + $0x204] sm:$0xf] }
 0x132   : > { %v1391_v51 = vadd.f32 %v1390_v7, %v1342_v24  ;;  %v9007_v33 = vor.u32 %v10215_v16, %v9004_v61  ;;  %v9228_v7 = vld [vmem:[%s14350_s7 + $0xf0] sm:$0xf0] }
 0x133   : > { %v11646_v10 = vpop.f32.mrf.mxu0 }
 0x134   : > { %v11644_v40 = vadd.f32 %v1439_v59, %v1391_v51  ;;  %1657 = vmatpush.bf16.msrb.mxu1 %v9007_v33  ;;  %v9210_v51 = vld [vmem:[%s14350_s7 + $0xc0] sm:$0xf] }
 0x135   : > { %v9211_v38 = vor.u32 %v10265_v19, %v9210_v51  ;;  %v10255_v51 = vld [vmem:[%s14350_s7 + $0x84] sm:$0xf]  ;;  %v9180_v19 = vld [vmem:[%s14350_s7 + $0x90] sm:$0xf0] }
 0x136   : > { %v1343_v48 = vpop.f32.mrf.mxu2 }
 0x137   : > { %v11654_v22 = vadd.f32 %v1343_v48, %v1295_v31  ;;  %v10224_v48 = vld [vmem:[%s11690_s28 + $0x8] sm:$0xff] }
 0x138   : > { %v1297_v8 = vpop.f32.mrf.mxu1 }
 0x139   : > { %v11656_v2 = vpop.f32.mrf.mxu3  ;;  %v1298_v11 = vadd.f32 %v1297_v8, %v11496_v53  ;;  %v10263_v8 = vld [vmem:[%s14350_s7 + $0xc4] sm:$0xf] }
 0x13b   : > { %1492 = vmatmul.bf16.gmra.mxu1 %v10982_v49  ;;  %1541 = vmatmul.bf16.gmra.mxu2 %v11443_v3  ;;  %v1444_v23 = vpop.f32.mrf.mxu0 }
 0x13e   : > { %1590 = vmatmul.bf16.gmra.mxu3 %v11445_v4  ;;  %v1346_v60 = vpop.f32.mrf.mxu2  ;;  %1639 = vmatmul.bf16.gmra.mxu0 %v11458_v12 }
 0x13f   : > { %v1347_v0 = vadd.f32 %v1346_v60, %v1298_v11  ;;  %v9212_v11 = vld [vmem:[%s14350_s7 + $0xd0] sm:$0xf0] }
 0x140   : > { %v1299_v47 = vpop.f32.mrf.mxu1 }
 0x141   : > { %v1395_v44 = vpop.f32.mrf.mxu3  ;;  %v1300_v58 = vadd.f32 %v1299_v47, %v11514_v26  ;;  %v9194_v47 = vld [vmem:[%s14350_s7 + $0xa0] sm:$0xf] }
 0x142   : > { %v1396_v50 = vadd.f32 %v1395_v44, %v1347_v0 }
 0x143   : > { %v11666_v53 = vpop.f32.mrf.mxu0 }
 0x144   : > { %v11664_v29 = vadd.f32 %v1444_v23, %v1396_v50  ;;  %14394 = vst [vmem:[#allocation18_spill] sm:$0xff] %v11666_v53  ;;  %v9215_v23 = vor.u32 %v10263_v8, %v9212_v11  ;;  %v10253_v8 = vld [vmem:[%s14350_s7 + $0x6c] sm:$0xf0] }
 0x146   : > { %v1348_v63 = vpop.f32.mrf.mxu2 }
 0x147   : > { %v11668_v49 = vadd.f32 %v1348_v63, %v1300_v58  ;;  %v10261_v58 = vld [vmem:[%s14350_s7 + $0xac] sm:$0xf0] }
 0x148   : > { %v1302_v4 = vpop.f32.mrf.mxu1  ;;  %v9195_v63 = vor.u32 %v10261_v58, %v9194_v47  ;;  %v10227_v58 = vld [vmem:[%s11690_s28 + $0x20] sm:$0xff] }
 0x149   : > { %v11670_v3 = vpop.f32.mrf.mxu3  ;;  %v1303_v30 = vadd.f32 %v1302_v4, %v11536_v5 }
 0x14a   : > { %14395 = vst [vmem:[#allocation19_spill] sm:$0xff] %v11670_v3 }
 0x14b   : > { %1497 = vmatmul.bf16.gmra.mxu1 %v11092_v43  ;;  %1546 = vmatmul.bf16.gmra.mxu2 %v11507_v17  ;;  %v1449_v59 = vpop.f32.mrf.mxu0  ;;  %v9227_v43 = vor.u32 %v10269_v13, %v9226_v15  ;;  %v9196_v15 = vld [vmem:[%s14350_s7 + $0xb0] sm:$0xf0] }
 0x14d   : > { %2221 = vmatpush.bf16.msrb.mxu3 %v9227_v43 }
 0x14e   : > { %1595 = vmatmul.bf16.gmra.mxu3 %v11509_v18  ;;  %v1351_v12 = vpop.f32.mrf.mxu2  ;;  %1644 = vmatmul.bf16.gmra.mxu0 %v11516_v32 }
 0x14f   : > { %v1352_v26 = vadd.f32 %v1351_v12, %v1303_v30  ;;  %v10225_v12 = vld [vmem:[%s11690_s28 + $0x10] sm:$0xff] }
 0x150   : > { %v1304_v5 = vpop.f32.mrf.mxu1 }
 0x151   : > { %v1400_v41 = vpop.f32.mrf.mxu3  ;;  %v1305_v17 = vadd.f32 %v1304_v5, %v11543_v46  ;;  %v10267_v46 = vld [vmem:[%s14350_s7 + $0xe4] sm:$0xf]  ;;  %2222 = vmatpush.bf16.msrb.mxu3 %v9211_v38 }
 0x152   : > { %v1401_v55 = vadd.f32 %v1400_v41, %v1352_v26  ;;  %v9231_v39 = vor.u32 %v10267_v46, %v9228_v7  ;;  %v10259_v41 = vld [vmem:[%s14350_s7 + $0xa4] sm:$0xf] }
 0x153   : > { %v9199_v13 = vor.u32 %v10259_v41, %v9196_v15 }
 0x154   : > { %v11685_v18 = vadd.f32 %v1449_v59, %v1401_v55  ;;  %2270 = vmatpush.bf16.msrb.mxu0 %v9231_v39  ;;  %v14398_v59 = vld [vmem:[#allocation12_spill] sm:$0xff] }
 0x155   : > { %2223 = vmatpush.bf16.msrb.mxu3 %v9195_v63  ;;  %v9178_v55 = vld [vmem:[%s14350_s7 + $0x80] sm:$0xf]  ;;  %v10251_v63 = vld [vmem:[%s14350_s7 + $0x64] sm:$0xf] }
 0x156   : > { %14396 = vst [vmem:[#allocation20_spill] sm:$0xff] %v11685_v18  ;;  %v1353_v32 = vpop.f32.mrf.mxu2 }
 0x157   : > { %v11692_v36 = vadd.f32 %v1353_v32, %v1305_v17  ;;  %v10257_v32 = vld [vmem:[%s14350_s7 + $0x8c] sm:$0xf0] }
 0x158   : > { %v1463_v24 = vpop.f32.mrf.mxu1  ;;  %2271 = vmatpush.bf16.msrb.mxu0 %v9215_v23 }
 0x159   : > { %14397 = vst [vmem:[#allocation21_spill] sm:$0xff] %v11692_v36  ;;  %v1464_v27 = vadd.f32 %v1463_v24, %v11695_v6  ;;  %v9179_v24 = vor.u32 %v10257_v32, %v9178_v55  ;;  %v10228_v32 = vld [vmem:[%s11690_s28 + $0x28] sm:$0xff] }
 0x15b   : > { %9040 = vmatmul.msk.bf16.vlgmr.msrb.gmra.mxu1 %vm1184_vm0, %v11166_v25  ;;  %1922 = vmatmul.bf16.vlgmr.msrb.gmra.mxu2 %v10223_v34 }
 0x15c   : > { %2272 = vmatpush.bf16.msrb.mxu0 %v9199_v13  ;;  %2224 = vmatpush.bf16.msrb.mxu3 %v9179_v24  ;;  %v9146_v13 = vld [vmem:[%s14350_s7 + $0x40] sm:$0xf] }
 0x15e   : > { %v1512_v1 = vpop.f32.mrf.mxu2 }
 0x15f   : > { %v11707_v31 = vadd.f32 %v1512_v1, %v1464_v27  ;;  %v10226_v27 = vld [vmem:[%s11690_s28 + $0x18] sm:$0xff] }
 0x160   : > { %v1465_v37 = vpop.f32.mrf.mxu1 }
 0x161   : > { %v1466_v16 = vadd.f32 %v1465_v37, %v11695_v6  ;;  %v9183_v37 = vor.u32 %v10255_v51, %v9180_v19  ;;  %v14402_v51 = vld [vmem:[#allocation15_spill] sm:$0xff]  ;;  %v11815_v19 = vpop.f32.mrf.mxu0 }
 0x163   : > { %2273 = vmatpush.bf16.msrb.mxu0 %v9183_v37  ;;  %v9234_v37 = vld [vmem:[%s14350_s7 + $0xe8] sm:$0xf] }
 0x166   : > { %v1514_v61 = vpop.f32.mrf.mxu2 }
 0x167   : > { %v11716_v25 = vadd.f32 %v1514_v61, %v1466_v16  ;;  %v14399_v16 = vld [vmem:[#allocation13_spill] sm:$0xff] }
 0x168   : > { %v1468_v33 = vpop.f32.mrf.mxu1  ;;  %14403 = vst [vmem:[#allocation13_spill] sm:$0xff] %v11815_v19 }
 0x169   : > { %v1469_v60 = vadd.f32 %v1468_v33, %v11695_v6  ;;  %v9162_v33 = vld [vmem:[%s14350_s7 + $0x60] sm:$0xf] }
 0x16a   : > { %v9163_v23 = vor.u32 %v10253_v8, %v9162_v33  ;;  %v9236_v33 = vld [vmem:[%s14350_s7 + $0xf8] sm:$0xf0] }
 0x16b   : > { %9041 = vmatmul.msk.bf16.gmra.mxu1 %vm1184_vm0, %v11193_v42  ;;  %1927 = vmatmul.bf16.gmra.mxu2 %v10224_v48 }
 0x16c   : > { %2225 = vmatpush.bf16.msrb.mxu3 %v9163_v23 }
 0x16e   : > { %v1517_v0 = vpop.f32.mrf.mxu2 }
 0x16f   : > { %v11728_v44 = vadd.f32 %v1517_v0, %v1469_v60 }
 0x170   : > { %v1470_v50 = vpop.f32.mrf.mxu1 }
 0x171   : > { %v1471_v4 = vadd.f32 %v1470_v50, %v11695_v6 }
 0x176   : > { %v1519_v30 = vpop.f32.mrf.mxu2 }
 0x177   : > { %v11737_v42 = vadd.f32 %v1519_v30, %v1471_v4  ;;  %v9164_v4 = vld [vmem:[%s14350_s7 + $0x70] sm:$0xf0] }
 0x178   : > { %v1473_v26 = vpop.f32.mrf.mxu1  ;;  %v9167_v30 = vor.u32 %v10251_v63, %v9164_v4  ;;  %v9218_v63 = vld [vmem:[%s14350_s7 + $0xc8] sm:$0xf]  ;;  %v10266_v4 = vld [vmem:[%s14350_s7 + $0xd4] sm:$0xf0] }
 0x179   : > { %v1474_v5 = vadd.f32 %v1473_v26, %v11695_v6  ;;  %v14400_v26 = vld [vmem:[#allocation14_spill] sm:$0xff] }
 0x17a   : > { %2274 = vmatpush.bf16.msrb.mxu0 %v9167_v30  ;;  %v10264_v30 = vld [vmem:[%s14350_s7 + $0xcc] sm:$0xf] }
 0x17b   : > { %9042 = vmatmul.msk.bf16.gmra.mxu1 %vm1184_vm0, %v14398_v59  ;;  %1932 = vmatmul.bf16.gmra.mxu2 %v10225_v12 }
 0x17e   : > { %v1522_v43 = vpop.f32.mrf.mxu2 }
 0x17f   : > { %v11749_v17 = vadd.f32 %v1522_v43, %v1474_v5  ;;  %v10249_v5 = vld [vmem:[%s14350_s7 + $0x4c] sm:$0xf0] }
 0x180   : > { %v1475_v34 = vpop.f32.mrf.mxu1  ;;  %v9147_v43 = vor.u32 %v10249_v5, %v9146_v13  ;;  %v9202_v5 = vld [vmem:[%s14350_s7 + $0xa8] sm:$0xf] }
 0x181   : > { %v1476_v46 = vadd.f32 %v1475_v34, %v11695_v6  ;;  %v11804_v34 = vpop.f32.mrf.mxu3 }
 0x182   : > { %2226 = vmatpush.bf16.msrb.mxu3 %v9147_v43  ;;  %14401 = vst [vmem:[#allocation12_spill] sm:$0xff] %v11804_v34  ;;  %v10262_v43 = vld [vmem:[%s14350_s7 + $0xb4] sm:$0xf0] }
 0x186   : > { %v1524_v7 = vpop.f32.mrf.mxu2 }
 0x187   : > { %v11758_v39 = vadd.f32 %v1524_v7, %v1476_v46  ;;  %v10247_v46 = vld [vmem:[%s14350_s7 + $0x44] sm:$0xf]  ;;  %v9148_v7 = vld [vmem:[%s14350_s7 + $0x50] sm:$0xf0] }
 0x188   : > { %v1478_v1 = vpop.f32.mrf.mxu1 }
 0x189   : > { %v1479_v38 = vadd.f32 %v1478_v1, %v11695_v6 }
 0x18b   : > { %9043 = vmatmul.msk.bf16.gmra.mxu1 %vm1184_vm0, %v14399_v16  ;;  %1937 = vmatmul.bf16.gmra.mxu2 %v10226_v27  ;;  %v9151_v27 = vor.u32 %v10247_v46, %v9148_v7  ;;  %v10268_v16 = vld [vmem:[%s14350_s7 + $0xec] sm:$0xf]  ;;  %v9204_v46 = vld [vmem:[%s14350_s7 + $0xb8] sm:$0xf0]  ;;  %v11865_v7 = vpop.f32.mrf.mxu0 }
 0x18d   : > { %2275 = vmatpush.bf16.msrb.mxu0 %v9151_v27 }
 0x18e   : > { %v1527_v61 = vpop.f32.mrf.mxu2 }
 0x18f   : > { %v11770_v48 = vadd.f32 %v1527_v61, %v1479_v38  ;;  %v10270_v38 = vld [vmem:[%s14350_s7 + $0xf4] sm:$0xf0] }
 0x190   : > { %v1480_v11 = vpop.f32.mrf.mxu1  ;;  %v9235_v61 = vor.u32 %v10270_v38, %v9234_v37  ;;  %v9186_v38 = vld [vmem:[%s14350_s7 + $0x88] sm:$0xf] }
 0x191   : > { %v1481_v60 = vadd.f32 %v1480_v11, %v11695_v6  ;;  %v9239_v11 = vor.u32 %v10268_v16, %v9236_v33  ;;  %v10258_v16 = vld [vmem:[%s14350_s7 + $0x94] sm:$0xf0]  ;;  %v10243_v33 = vld [vmem:[%s14350_s7 + $0x24] sm:$0xf] }
 0x192   : > { %2319 = vmatpush.bf16.msra.mxu1 %v9235_v61  ;;  %v10256_v61 = vld [vmem:[%s14350_s7 + $0x8c] sm:$0xf] }
 0x193   : > { %2368 = vmatpush.bf16.msra.mxu2 %v9239_v11  ;;  %v9187_v11 = vor.u32 %v10258_v16, %v9186_v38  ;;  %v10250_v38 = vld [vmem:[%s14350_s7 + $0x54] sm:$0xf0]  ;;  %v10248_v16 = vld [vmem:[%s14350_s7 + $0x4c] sm:$0xf] }
 0x196   : > { %v1529_v0 = vpop.f32.mrf.mxu2 }
 0x197   : > { %v11779_v47 = vadd.f32 %v1529_v0, %v1481_v60  ;;  %v9130_v60 = vld [vmem:[%s14350_s7 + $0x20] sm:$0xf]  ;;  %v10245_v0 = vld [vmem:[%s14350_s7 + $0x2c] sm:$0xf0] }
 0x198   : > { %v1483_v50 = vpop.f32.mrf.mxu1 }
 0x199   : > { %v1484_v12 = vadd.f32 %v1483_v50, %v11695_v6  ;;  %v9131_v50 = vor.u32 %v10245_v0, %v9130_v60  ;;  %v9188_v60 = vld [vmem:[%s14350_s7 + $0x98] sm:$0xf0] }
 0x19b   : > { %9044 = vmatmul.msk.bf16.gmra.mxu1 %vm1184_vm0, %v14400_v26  ;;  %1942 = vmatmul.bf16.gmra.mxu2 %v10227_v58  ;;  %v9220_v26 = vld [vmem:[%s14350_s7 + $0xd8] sm:$0xf0] }
 0x19c   : > { %2227 = vmatpush.bf16.msrb.mxu3 %v9131_v50  ;;  %v9223_v13 = vor.u32 %v10264_v30, %v9220_v26  ;;  %v9191_v50 = vor.u32 %v10256_v61, %v9188_v60  ;;  %v10254_v26 = vld [vmem:[%s14350_s7 + $0x74] sm:$0xf0]  ;;  %v10241_v60 = vld [vmem:[%s14350_s7 + $0xc] sm:$0xf0] }
 0x19e   : > { %v1532_v41 = vpop.f32.mrf.mxu2  ;;  %2369 = vmatpush.bf16.msra.mxu2 %v9223_v13  ;;  %v10252_v13 = vld [vmem:[%s14350_s7 + $0x6c] sm:$0xf] }
 0x19f   : > { %v11791_v15 = vadd.f32 %v1532_v41, %v1484_v12  ;;  %v9219_v12 = vor.u32 %v10266_v4, %v9218_v63  ;;  %v11851_v41 = vpop.f32.mrf.mxu3  ;;  %v14404_v4 = vld [vmem:[#allocation16_spill] sm:$0xff] }
 0x1a0   : > { %v11799_v59 = vpop.f32.mrf.mxu1 }
 0x1a1   : > { %2320 = vmatpush.bf16.msra.mxu1 %v9219_v12  ;;  %v9170_v12 = vld [vmem:[%s14350_s7 + $0x68] sm:$0xf] }
 0x1a6   : > { %v11801_v55 = vpop.f32.mrf.mxu2 }
 0x1a7   : > { %v11891_v30 = vpop.f32.mrf.mxu3 }
 0x1a8   : > { %v1488_v24 = vpop.f32.mrf.mxu1 }
 0x1a9   : > { %v1489_v1 = vadd.f32 %v1488_v24, %v11695_v6  ;;  %v9203_v24 = vor.u32 %v10262_v43, %v9202_v5  ;;  %v9171_v5 = vor.u32 %v10254_v26, %v9170_v12  ;;  %v9172_v43 = vld [vmem:[%s14350_s7 + $0x78] sm:$0xf0] }
 0x1aa   : > { %v9140_v26 = vld [vmem:[%s14350_s7 + $0x38] sm:$0xf0] }
 0x1ab   : > { %9045 = vmatmul.msk.bf16.gmra.mxu1 %vm1184_vm0, %v14402_v51  ;;  %1947 = vmatmul.bf16.gmra.mxu2 %v10228_v32  ;;  %v10260_v32 = vld [vmem:[%s14350_s7 + $0xac] sm:$0xf]  ;;  %v10229_v51 = vld [vmem:[%s11690_s28 + $0x30] sm:$0xff] }
 0x1ac   : > { %2321 = vmatpush.bf16.msra.mxu1 %v9203_v24  ;;  %v9175_v24 = vor.u32 %v10252_v13, %v9172_v43 }
 0x1ae   : > { %v1537_v8 = vpop.f32.mrf.mxu2 }
 0x1af   : > { %v11829_v23 = vadd.f32 %v1537_v8, %v1489_v1  ;;  %v9207_v1 = vor.u32 %v10260_v32, %v9204_v46  ;;  %v9132_v8 = vld [vmem:[%s14350_s7 + $0x30] sm:$0xf0]  ;;  %v1566_v13 = vpop.f32.mrf.mxu3 }
 0x1b0   : > { %v11837_v58 = vpop.f32.mrf.mxu1  ;;  %v9135_v0 = vor.u32 %v10243_v33, %v9132_v8  ;;  %2322 = vmatpush.bf16.msra.mxu1 %v9187_v11  ;;  %v9156_v33 = vld [vmem:[%s14350_s7 + $0x58] sm:$0xf0]  ;;  %v9114_v11 = vld [vmem:[%s14350_s7] sm:$0xf] }
 0x1b1   : > { %2370 = vmatpush.bf16.msra.mxu2 %v9207_v1  ;;  %v1612_v1 = vpop.f32.mrf.mxu0  ;;  %v9159_v8 = vor.u32 %v10248_v16, %v9156_v33  ;;  %v9122_v16 = vld [vmem:[%s14350_s7 + $0x8] sm:$0xf]  ;;  %v10242_v33 = vld [vmem:[%s14350_s7 + $0x14] sm:$0xf0] }
 0x1b2   : > { %2276 = vmatpush.bf16.msrb.mxu0 %v9135_v0  ;;  %v9115_v0 = vor.u32 %v10241_v60, %v9114_v11  ;;  %v9124_v11 = vld [vmem:[%s14350_s7 + $0x18] sm:$0xf0] }
 0x1b4   : > { %2323 = vmatpush.bf16.msra.mxu1 %v9171_v5  ;;  %2228 = vmatpush.bf16.msrb.mxu3 %v9115_v0  ;;  %v9123_v0 = vor.u32 %v10242_v33, %v9122_v16 }
 0x1b5   : > { %2371 = vmatpush.bf16.msra.mxu2 %v9191_v50  ;;  %v9138_v50 = vld [vmem:[%s14350_s7 + $0x28] sm:$0xf] }
 0x1b6   : > { %v11867_v27 = vpop.f32.mrf.mxu2 }
 0x1b8   : > { %v1493_v37 = vpop.f32.mrf.mxu1 }
 0x1b9   : > { %v1494_v63 = vadd.f32 %v1493_v37, %v11695_v6  ;;  %v9154_v37 = vld [vmem:[%s14350_s7 + $0x48] sm:$0xf]  ;;  %2372 = vmatpush.bf16.msra.mxu2 %v9175_v24  ;;  %v1615_v60 = vpop.f32.mrf.mxu0 }
 0x1ba   : > { %v9155_v61 = vor.u32 %v10250_v38, %v9154_v37  ;;  %v10239_v37 = vld [vmem:[%s14350_s7 + $0x4] sm:$0xf]  ;;  %v9116_v38 = vld [vmem:[%s14350_s7 + $0x10] sm:$0xf0] }
 0x1bb   : > { %9046 = vmatmul.msk.bf16.gmra.mxu1 %vm1184_vm0, %v14404_v4  ;;  %1952 = vmatmul.bf16.gmra.mxu2 %v10229_v51  ;;  %v10244_v4 = vld [vmem:[%s14350_s7 + $0x2c] sm:$0xf] }
 0x1bc   : > { %2324 = vmatpush.bf16.msra.mxu1 %v9155_v61  ;;  %v9143_v43 = vor.u32 %v10244_v4, %v9140_v26  ;;  %v9119_v61 = vor.u32 %v10239_v37, %v9116_v38  ;;  %v14405_v4 = vld [vmem:[#allocation17_spill] sm:$0xff] }
 0x1bd   : > { %2373 = vmatpush.bf16.msra.mxu2 %v9159_v8  ;;  %v10240_v8 = vld [vmem:[%s14350_s7 + $0xc] sm:$0xf] }
 0x1be   : > { %v1542_v32 = vpop.f32.mrf.mxu2  ;;  %2277 = vmatpush.bf16.msrb.mxu0 %v9119_v61 }
 0x1bf   : > { %v11905_v46 = vadd.f32 %v1542_v32, %v1494_v63  ;;  %v10246_v63 = vld [vmem:[%s14350_s7 + $0x34] sm:$0xf0] }
 0x1c0   : > { %v11907_v51 = vpop.f32.mrf.mxu1  ;;  %v9139_v12 = vor.u32 %v10246_v63, %v9138_v50  ;;  %v10230_v32 = vld [vmem:[%s11690_s28 + $0x38] sm:$0xff]  ;;  %v9127_v50 = vor.u32 %v10240_v8, %v9124_v11  ;;  %v1562_v8 = vadd.f32 %v11851_v41, %v11707_v31  ;;  %s8496_s28 = scalar_lea.hbm %s14357_s14, %s10464_s22 }
 0x1c1   : > { %2374 = vmatpush.bf16.msra.mxu2 %v9143_v43  ;;  %v1568_v43 = vpop.f32.mrf.mxu3  ;;  %v1617_v38 = vpop.f32.mrf.mxu0  ;;  %s8499_s17 = sshll.u32 %s8496_s28, 4  ;;  %s8500_s17 = int_to_ptr.hbm [resolvable:$true] %s8499_s17 }
 0x1c2   : > { %2325 = vmatpush.bf16.msra.mxu1 %v9139_v12  ;;  %s10697_s0 = sshra.s32 %s8500_s17, 4  ;;  %s10698_s0 = int_to_ptr.hbm [resolvable:$true] %s10697_s0 }
 0x1c3   : > { %s10699_s29 = scalar_lea.hbm %s10698_s0, 64  ;;  %p10704_p0 = scmp.lt.s32.totalorder %s10698_s0, %s14357_s14 }
 0x1c4   : > { %p10700_p11 = scmp.ne.s32.totalorder %s10698_s0, %s10699_s29  ;;  %p10705_p1 = scmp.lt.s32.totalorder %s10703_s19, %s10699_s29 }
 0x1c5   : > { %2375 = vmatpush.bf16.msra.mxu2 %v9127_v50 }
 0x1c6   : > { %v11939_v5 = vpop.f32.mrf.mxu2  ;;  %2326 = vmatpush.bf16.msra.mxu1 %v9123_v0  ;;  %v1611_v0 = vadd.f32 %v11865_v7, %v1562_v8  ;;  %p10701_p12 = pnand %p10700_p11, %p10863_p5  ;;  %p10706_p2 = por %p10705_p1, %p10704_p0 }
 0x1c8   : > { %v1498_v24 = vpop.f32.mrf.mxu1  ;;  %p10702_p13 = pneg %p10701_p12 }
 0x1c9   : > { %v1499_v63 = vadd.f32 %v1498_v24, %v11695_v6  ;;  %v1571_v24 = vpop.f32.mrf.mxu3  ;;  %v1620_v61 = vpop.f32.mrf.mxu0 }
 0x1ca   : > { %p10707_p3 = pnand %p10706_p2, %p10702_p13 }
 0x1cb   : > { %9047 = vmatmul.msk.bf16.gmra.mxu1 %vm1184_vm0, %v14405_v4  ;;  %1957 = vmatmul.bf16.gmra.mxu2 %v10230_v32  ;;  %v1564_v32 = vadd.f32 %v11891_v30, %v11716_v25 }
 0x1cd   : > { %v1613_v50 = vadd.f32 %v1612_v1, %v1564_v32 }
 0x1ce   : > { %v1547_v12 = vpop.f32.mrf.mxu2 }
 0x1cf   : > { %v11963_v26 = vadd.f32 %v1547_v12, %v1499_v63  ;;  %v11978_v63 = vld [vmem:[%s14349_s6] ss:$0 sm:$0xff] }
 0x1d0   : > { %v11965_v37 = vpop.f32.mrf.mxu1 }
 0x1d1   : > { %v1573_v25 = vpop.f32.mrf.mxu3  ;;  %v1622_v8 = vpop.f32.mrf.mxu0 }
 0x1d6   : > { %v11967_v16 = vpop.f32.mrf.mxu2 }
 0x1d8   : > { %v1659_v33 = vpop.f32.mrf.mxu1 }
 0x1d9   : > { %v1660_v12 = vadd.f32 %v1659_v33, %v1611_v0  ;;  %v1567_v33 = vadd.f32 %v1566_v13, %v11728_v44  ;;  %v1569_v0 = vadd.f32 %v1568_v43, %v11737_v42  ;;  %v1625_v3 = vpop.f32.mrf.mxu0 }
 0x1db   : > { %v1618_v34 = vadd.f32 %v1617_v38, %v1569_v0  ;;  %v1572_v38 = vadd.f32 %v1571_v24, %v11749_v17 }
 0x1de   : > { %v1923_v11 = vpop.f32.mrf.mxu2 }
 0x1df   : > { %v1924_v31 = vadd.f32 %v11978_v63, %v1923_v11 }
 0x1e0   : > { %v1661_v4 = vpop.f32.mrf.mxu1 }
 0x1e1   : > { %v1662_v18 = vadd.f32 %v1661_v4, %v1613_v50  ;;  %v1979_v30 = vmul.f32 0.1, %v1924_v31  ;;  %vm1963_vm1 = vcmp.ge.f32.partialorder %v1924_v31, 0.0  ;;  %v1576_v4 = vpop.f32.mrf.mxu3 }
 0x1e3   : > { %v10468_v41 = vpack.c.bf16 %v1662_v18, %v1660_v12  ;;  %v1995_v11 = vsel %vm1963_vm1, %v1924_v31, %v1979_v30  ;;  %vm2682_vm1 = vcmask 1043456  }
 0x1e5   : > { %10469 = vst [vmem:[%s11983_s21] sm:$0xff] %v10468_v41   ;;  %v1616_v41 = vadd.f32 %v1615_v60, %v1567_v33  ;;  %v1627_v33 = vpop.f32.mrf.mxu0 }
 0x1e6   : > { %v1925_v7 = vpop.f32.mrf.mxu2 }
 0x1e7   : > { %v1926_v1 = vadd.f32 %v11978_v63, %v1925_v7 }
 0x1e8   : > { %v1664_v32 = vpop.f32.mrf.mxu1 }
 0x1e9   : > { %vm1964_vm2 = vcmp.ge.f32.partialorder %v1926_v1, 0.0  ;;  %v1980_v19 = vmul.f32 0.1, %v1926_v1  ;;  %v1665_v36 = vadd.f32 %v1664_v32, %v1616_v41  ;;  %v1578_v31 = vpop.f32.mrf.mxu3 }
 0x1eb   : > { %v1996_v18 = vsel %vm1964_vm2, %v1926_v1, %v1980_v19  ;;  %v1574_v1 = vadd.f32 %v1573_v25, %v11758_v39  ;;  %vm2683_vm2 = vsmask.f32 7938 }
 0x1ec   : > { %v2011_v50 = vpack.c.bf16 %v1996_v18, %v1995_v11  ;;  %v1621_v11 = vadd.f32 %v1620_v61, %v1572_v38 }
 0x1ed   : > { %v1623_v18 = vadd.f32 %v1622_v8, %v1574_v1  ;;  %v1630_v41 = vpop.f32.mrf.mxu0  ;;  %v1577_v8 = vadd.f32 %v1576_v4, %v11770_v48  ;;  %v10293_v1 = vld [vmem:[%s14352_s9 + $0x70] sm:$0xff] }
 0x1ee   : > { %v1928_v12 = vpop.f32.mrf.mxu2  ;;  %2229 = vmatmul.bf16.vlgmr.msrb.gmra.mxu3 %v2011_v50  ;;  %2278 = vmatmul.bf16.vlgmr.msrb.gmra.mxu0 %v2011_v50 }
 0x1ef   : > { %2327 = vmatmul.bf16.vlgmr.msra.gmra.mxu1 %v2011_v50  ;;  %2376 = vmatmul.bf16.vlgmr.msra.gmra.mxu2 %v2011_v50  ;;  %v1929_v44 = vadd.f32 %v11978_v63, %v1928_v12 }
 0x1f0   : > { %v1666_v7 = vpop.f32.mrf.mxu1 }
 0x1f1   : > { %v1667_v53 = vadd.f32 %v1666_v7, %v1618_v34  ;;  %v1981_v19 = vmul.f32 0.1, %v1929_v44  ;;  %vm1965_vm3 = vcmp.ge.f32.partialorder %v1929_v44, 0.0  ;;  %v1581_v24 = vpop.f32.mrf.mxu3 }
 0x1f3   : > { %v10473_v13 = vpack.c.bf16 %v1667_v53, %v1665_v36  ;;  %v1997_v32 = vsel %vm1965_vm3, %v1929_v44, %v1981_v19  ;;  %v10294_v53 = vld [vmem:[%s14352_s9 + $0x78] sm:$0xff]  ;;  %v1579_v19 = vadd.f32 %v1578_v31, %v11779_v47  ;;  %v1486_v31 = vadd.f32 %v11799_v59, %v11695_v6 }
 0x1f4   : > { %3155 = vmatpush.bf16.msra.mxu3 %v10294_v53  ;;  %vm2688_vm3 = vcmask 1040384  }
 0x1f5   : > { %10577 = vst [vmem:[%s11983_s21 + $0x8] sm:$0xff] %v10473_v13   ;;  %v1632_v53 = vpop.f32.mrf.mxu0 }
 0x1f6   : > { %v1930_v42 = vpop.f32.mrf.mxu2 }
 0x1f7   : > { %v1931_v43 = vadd.f32 %v11978_v63, %v1930_v42 }
 0x1f8   : > { %v1669_v30 = vpop.f32.mrf.mxu1  ;;  %3156 = vmatpush.bf16.msra.mxu3 %v10293_v1 }
 0x1f9   : > { %vm1966_vm4 = vcmp.ge.f32.partialorder %v1931_v43, 0.0  ;;  %v1982_v60 = vmul.f32 0.1, %v1931_v43  ;;  %v1670_v17 = vadd.f32 %v1669_v30, %v1621_v11 }
 0x1fb   : > { %v1998_v34 = vsel %vm1966_vm4, %v1931_v43, %v1982_v60  ;;  %v1583_v60 = vpop.f32.mrf.mxu3  ;;  %vm2689_vm4 = vsmask.f32 256 }
 0x1fc   : > { %v2012_v0 = vpack.c.bf16 %v1998_v34, %v1997_v32  ;;  %v1626_v34 = vadd.f32 %v1625_v3, %v1577_v8 }
 0x1fe   : > { %v1933_v36 = vpop.f32.mrf.mxu2  ;;  %2234 = vmatmul.bf16.gmra.mxu3 %v2012_v0  ;;  %2283 = vmatmul.bf16.gmra.mxu0 %v2012_v0 }
 0x1ff   : > { %2332 = vmatmul.bf16.gmra.mxu1 %v2012_v0  ;;  %2381 = vmatmul.bf16.gmra.mxu2 %v2012_v0  ;;  %v1934_v25 = vadd.f32 %v11978_v63, %v1933_v36  ;;  %v1628_v0 = vadd.f32 %v1627_v33, %v1579_v19 }
 0x200   : > { %v1671_v50 = vpop.f32.mrf.mxu1 }
 0x201   : > { %v1672_v39 = vadd.f32 %v1671_v50, %v1623_v18  ;;  %v1983_v44 = vmul.f32 0.1, %v1934_v25  ;;  %vm1967_vm5 = vcmp.ge.f32.partialorder %v1934_v25, 0.0 }
 0x203   : > { %v10478_v12 = vpack.c.bf16 %v1672_v39, %v1670_v17  ;;  %v1999_v43 = vsel %vm1967_vm5, %v1934_v25, %v1983_v44  ;;  %v1586_v18 = vpop.f32.mrf.mxu3  ;;  %v1535_v17 = vadd.f32 %v11801_v55, %v1486_v31  ;;  %vm12192_vm5 = vmand %vm2682_vm1, %vm2683_vm2 }
 0x204   : > { %v1587_v31 = vadd.f32 %v1586_v18, %v11829_v23 }
 0x205   : > { %10578 = vst [vmem:[%s11983_s21 + $0x10] sm:$0xff] %v10478_v12   ;;  %v1635_v12 = vpop.f32.mrf.mxu0  ;;  %v1584_v44 = vadd.f32 %v1583_v60, %v1535_v17  ;;  %v1491_v60 = vadd.f32 %v11837_v58, %v11695_v6  ;;  %v10291_v17 = vld [vmem:[%s14352_s9 + $0x60] sm:$0xff] }
 0x206   : > { %v1935_v7 = vpop.f32.mrf.mxu2 }
 0x207   : > { %v1936_v13 = vadd.f32 %v11978_v63, %v1935_v7  ;;  %v1582_v7 = vadd.f32 %v1581_v24, %v11791_v15  ;;  %v1633_v19 = vadd.f32 %v1632_v53, %v1584_v44 }
 0x208   : > { %v1674_v42 = vpop.f32.mrf.mxu1 }
 0x209   : > { %vm1968_vm6 = vcmp.ge.f32.partialorder %v1936_v13, 0.0  ;;  %v1984_v61 = vmul.f32 0.1, %v1936_v13  ;;  %v1675_v47 = vadd.f32 %v1674_v42, %v1626_v34  ;;  %v1631_v55 = vadd.f32 %v1630_v41, %v1582_v7 }
 0x20a   : > { %v1496_v7 = vadd.f32 %v11907_v51, %v11695_v6 }
 0x20b   : > { %v2000_v30 = vsel %vm1968_vm6, %v1936_v13, %v1984_v61  ;;  %v10292_v61 = vld [vmem:[%s14352_s9 + $0x68] sm:$0xff]  ;;  %vm12200_vm6 = vmand %vm2688_vm3, %vm2689_vm4 }
 0x20c   : > { %v2013_v38 = vpack.c.bf16 %v2000_v30, %v1999_v43  ;;  %v1588_v43 = vpop.f32.mrf.mxu3  ;;  %3157 = vmatpush.bf16.msra.mxu3 %v10292_v61  ;;  %v1545_v61 = vadd.f32 %v11939_v5, %v1496_v7 }
 0x20e   : > { %v1938_v32 = vpop.f32.mrf.mxu2  ;;  %2239 = vmatmul.bf16.gmra.mxu3 %v2013_v38  ;;  %2288 = vmatmul.bf16.gmra.mxu0 %v2013_v38 }
 0x20f   : > { %2337 = vmatmul.bf16.gmra.mxu1 %v2013_v38  ;;  %2386 = vmatmul.bf16.gmra.mxu2 %v2013_v38  ;;  %v1939_v36 = vadd.f32 %v11978_v63, %v1938_v32  ;;  %v1637_v32 = vpop.f32.mrf.mxu0 }
 0x210   : > { %v1676_v48 = vpop.f32.mrf.mxu1  ;;  %3158 = vmatpush.bf16.msra.mxu3 %v10291_v17 }
 0x211   : > { %v1677_v4 = vadd.f32 %v1676_v48, %v1628_v0  ;;  %v1985_v3 = vmul.f32 0.1, %v1939_v36  ;;  %vm1969_vm7 = vcmp.ge.f32.partialorder %v1939_v36, 0.0  ;;  %v1540_v0 = vadd.f32 %v11867_v27, %v1491_v60 }
 0x213   : > { %v10483_v11 = vpack.c.bf16 %v1677_v4, %v1675_v47  ;;  %v2001_v59 = vsel %vm1969_vm7, %v1939_v36, %v1985_v3  ;;  %v1589_v36 = vadd.f32 %v1588_v43, %v1540_v0  ;;  %vm3397_vm7 = vcmask 1042432  }
 0x214   : > { %v1591_v4 = vpop.f32.mrf.mxu3 }
 0x215   : > { %10579 = vst [vmem:[%s11983_s21 + $0x18] sm:$0xff] %v10483_v11  }
 0x216   : > { %v1940_v50 = vpop.f32.mrf.mxu2 }
 0x217   : > { %v1941_v33 = vadd.f32 %v11978_v63, %v1940_v50  ;;  %v1640_v3 = vpop.f32.mrf.mxu0 }
 0x218   : > { %v1679_v39 = vpop.f32.mrf.mxu1 }
 0x219   : > { %vm1970_vm8 = vcmp.ge.f32.partialorder %v1941_v33, 0.0  ;;  %v1986_v25 = vmul.f32 0.1, %v1941_v33  ;;  %v1680_v15 = vadd.f32 %v1679_v39, %v1631_v55  ;;  %v1638_v39 = vadd.f32 %v1637_v32, %v1589_v36 }
 0x21b   : > { %v2002_v13 = vsel %vm1970_vm8, %v1941_v33, %v1986_v25  ;;  %v1636_v33 = vadd.f32 %v1635_v12, %v1587_v31  ;;  %vm3398_vm8 = vcmask 1046532  }
 0x21c   : > { %v2014_v42 = vpack.c.bf16 %v2002_v13, %v2001_v59  ;;  %v1593_v13 = vpop.f32.mrf.mxu3 }
 0x21e   : > { %v1943_v8 = vpop.f32.mrf.mxu2  ;;  %2244 = vmatmul.bf16.gmra.mxu3 %v2014_v42  ;;  %2293 = vmatmul.bf16.gmra.mxu0 %v2014_v42 }
 0x21f   : > { %2342 = vmatmul.bf16.gmra.mxu1 %v2014_v42  ;;  %2391 = vmatmul.bf16.gmra.mxu2 %v2014_v42  ;;  %v1944_v38 = vadd.f32 %v11978_v63, %v1943_v8  ;;  %v1642_v55 = vpop.f32.mrf.mxu0 }
 0x220   : > { %v1681_v30 = vpop.f32.mrf.mxu1 }
 0x221   : > { %v1682_v24 = vadd.f32 %v1681_v30, %v1633_v19  ;;  %v1987_v41 = vmul.f32 0.1, %v1944_v38  ;;  %vm1971_vm9 = vcmp.ge.f32.partialorder %v1944_v38, 0.0  ;;  %v1592_v30 = vadd.f32 %v1591_v4, %v11905_v46  ;;  %v10289_v46 = vld [vmem:[%s14352_s9 + $0x50] sm:$0xff] }
 0x223   : > { %v10488_v1 = vpack.c.bf16 %v1682_v24, %v1680_v15  ;;  %v2003_v58 = vsel %vm1971_vm9, %v1944_v38, %v1987_v41  ;;  %v1594_v15 = vadd.f32 %v1593_v13, %v1545_v61  ;;  %v10290_v38 = vld [vmem:[%s14352_s9 + $0x58] sm:$0xff]  ;;  %v1641_v32 = vadd.f32 %v1640_v3, %v1592_v30  ;;  %vm12225_vm9 = vmor %vm3397_vm7, %vm3398_vm8 }
 0x224   : > { %3159 = vmatpush.bf16.msra.mxu3 %v10290_v38  ;;  %v10302_v61 = vld [vmem:[%s14352_s9 + $0xb8] sm:$0xff]  ;;  %v10283_v38 = vld [vmem:[%s14352_s9 + $0x20] sm:$0xff] }
 0x225   : > { %10580 = vst [vmem:[%s11983_s21 + $0x20] sm:$0xff] %v10488_v1   ;;  %v1596_v1 = vpop.f32.mrf.mxu3  ;;  %3560 = vmatpush.bf16.msrb.mxu1 %v10302_v61 }
 0x226   : > { %v1945_v34 = vpop.f32.mrf.mxu2 }
 0x227   : > { %v1946_v53 = vadd.f32 %v11978_v63, %v1945_v34  ;;  %v1643_v34 = vadd.f32 %v1642_v55, %v1594_v15  ;;  %v10747_v55 = vmov 0   ;;  %v10301_v15 = vld [vmem:[%s14352_s9 + $0xb0] sm:$0xff] }
 0x228   : > { %v1684_v48 = vpop.f32.mrf.mxu1  ;;  %3160 = vmatpush.bf16.msra.mxu3 %v10289_v46  ;;  %2419 = vst [vmem:[#allocation2 + $0x8] sm:$0xf] %v10747_v55  ;;  %v10316_v46 = vld [vmem:[%s14352_s9 + $0xe8] sm:$0xff] }
 0x229   : > { %vm1972_vm10 = vcmp.ge.f32.partialorder %v1946_v53, 0.0  ;;  %v1988_v47 = vmul.f32 0.1, %v1946_v53  ;;  %v1685_v23 = vadd.f32 %v1684_v48, %v1636_v33  ;;  %v1645_v48 = vpop.f32.mrf.mxu0  ;;  %v1597_v33 = vadd.f32 %v1596_v1, %v11963_v26  ;;  %2420 = vst [vmem:[#allocation2 + $0xc] sm:$0x1] %v10747_v55  ;;  %3561 = vmatpush.bf16.msrb.mxu1 %v10301_v15  ;;  %v10300_v1 = vld [vmem:[%s14352_s9 + $0xa8] sm:$0xff] }
 0x22a   : > { %2417 = vst [vmem:[#allocation2] sm:$0xf] %v10747_v55 }
 0x22b   : > { %v2004_v11 = vsel %vm1972_vm10, %v1946_v53, %v1988_v47  ;;  %v1501_v47 = vadd.f32 %v11965_v37, %v11695_v6  ;;  %v1646_v7 = vadd.f32 %v1645_v48, %v1597_v33  ;;  %2418 = vst [vmem:[#allocation2 + $0x4] sm:$0x1] %v10747_v55  ;;  %v10315_v48 = vld [vmem:[%s14352_s9 + $0xe0] sm:$0xff]  ;;  %v1700_v33 = vmax.f32 %v11553_v62, 0.0 }
 0x22c   : > { %v2015_v50 = vpack.c.bf16 %v2004_v11, %v2003_v58  ;;  %2421 = vst [vmem:[#allocation2 + $0x10] sm:$0xf] %v10747_v55  ;;  %v10295_v62 = vld [vmem:[%s14352_s9 + $0x80] sm:$0xff]  ;;  %vm2832_vm10 = vsmask.f32 3328 }
 0x22d   : > { %v1550_v58 = vadd.f32 %v11967_v16, %v1501_v47  ;;  %v1598_v17 = vpop.f32.mrf.mxu3  ;;  %2422 = vst [vmem:[#allocation2 + $0x14] sm:$0x1] %v10747_v55  ;;  %3562 = vmatpush.bf16.msrb.mxu1 %v10300_v1  ;;  %v10298_v47 = vld [vmem:[%s14352_s9 + $0x98] sm:$0xff] }
 0x22e   : > { %v1948_v27 = vpop.f32.mrf.mxu2  ;;  %2249 = vmatmul.bf16.gmra.mxu3 %v2015_v50  ;;  %2298 = vmatmul.bf16.gmra.mxu0 %v2015_v50  ;;  %2423 = vst [vmem:[#allocation2 + $0x18] sm:$0xf] %v10747_v55 }
 0x22f   : > { %2347 = vmatmul.bf16.gmra.mxu1 %v2015_v50  ;;  %2396 = vmatmul.bf16.gmra.mxu2 %v2015_v50  ;;  %v1949_v44 = vadd.f32 %v11978_v63, %v1948_v27  ;;  %2424 = vst [vmem:[#allocation2 + $0x1c] sm:$0x1] %v10747_v55 }
 0x230   : > { %v1686_v25 = vpop.f32.mrf.mxu1  ;;  %2425 = vst [vmem:[#allocation2 + $0x20] sm:$0xf] %v10747_v55 }
 0x231   : > { %v1687_v18 = vadd.f32 %v1686_v25, %v1638_v39  ;;  %v1989_v8 = vmul.f32 0.1, %v1949_v44  ;;  %vm1973_vm11 = vcmp.ge.f32.partialorder %v1949_v44, 0.0  ;;  %v1599_v39 = vadd.f32 %v1598_v17, %v1550_v58  ;;  %v1647_v25 = vpop.f32.mrf.mxu0  ;;  %2426 = vst [vmem:[#allocation2 + $0x24] sm:$0x1] %v10747_v55  ;;  %v10297_v58 = vld [vmem:[%s14352_s9 + $0x90] sm:$0xff] }
 0x232   : > { %2427 = vst [vmem:[#allocation2 + $0x28] sm:$0xf] %v10747_v55  ;;  %v10313_v17 = vld [vmem:[%s14352_s9 + $0xd0] sm:$0xff] }
 0x233   : > { %v10493_v59 = vpack.c.bf16 %v1687_v18, %v1685_v23  ;;  %v2005_v51 = vsel %vm1973_vm11, %v1949_v44, %v1989_v8  ;;  %v10286_v18 = vld [vmem:[%s14352_s9 + $0x38] sm:$0xff]  ;;  %v1648_v44 = vadd.f32 %v1647_v25, %v1599_v39  ;;  %2428 = vst [vmem:[#allocation2 + $0x2c] sm:$0x1] %v10747_v55  ;;  %vm2833_vm11 = vsmask.f32 7440 }
 0x234   : > { %3300 = vmatpush.bf16.msra.mxu0 %v10286_v18  ;;  %2429 = vst [vmem:[#allocation2 + $0x30] sm:$0xf] %v10747_v55 }
 0x235   : > { %10581 = vst [vmem:[%s11983_s21 + $0x28] sm:$0xff] %v10493_v59  }
 0x236   : > { %v1950_v42 = vpop.f32.mrf.mxu2  ;;  %2430 = vst [vmem:[#allocation2 + $0x34] sm:$0x1] %v10747_v55 }
 0x237   : > { %v1951_v12 = vadd.f32 %v11978_v63, %v1950_v42  ;;  %v10285_v42 = vld [vmem:[%s14352_s9 + $0x30] sm:$0xff]  ;;  %2431 = vst [vmem:[#allocation2 + $0x38] sm:$0xf] %v10747_v55 }
 0x238   : > { %v1689_v19 = vpop.f32.mrf.mxu1  ;;  %3301 = vmatpush.bf16.msra.mxu0 %v10285_v42  ;;  %2432 = vst [vmem:[#allocation2 + $0x3c] sm:$0x1] %v10747_v55 }
 0x239   : > { %vm1974_vm12 = vcmp.ge.f32.partialorder %v1951_v12, 0.0  ;;  %v1990_v43 = vmul.f32 0.1, %v1951_v12  ;;  %v1690_v41 = vadd.f32 %v1689_v19, %v1641_v32  ;;  %v10284_v19 = vld [vmem:[%s14352_s9 + $0x28] sm:$0xff]  ;;  %2433 = vst [vmem:[#allocation2 + $0x40] sm:$0xf] %v10747_v55 }
 0x23a   : > { %2434 = vst [vmem:[#allocation2 + $0x44] sm:$0x1] %v10747_v55 }
 0x23b   : > { %v2006_v24 = vsel %vm1974_vm12, %v1951_v12, %v1990_v43  ;;  %v10318_v43 = vld [vmem:[%s14352_s9 + $0xf8] sm:$0xff]  ;;  %2435 = vst [vmem:[#allocation2 + $0x48] sm:$0xf] %v10747_v55  ;;  %vm12240_vm12 = vmor %vm2832_vm10, %vm2833_vm11 }
 0x23c   : > { %v2016_v60 = vpack.c.bf16 %v2006_v24, %v2005_v51  ;;  %3753 = vmatpush.bf16.msrb.mxu2 %v10318_v43  ;;  %3302 = vmatpush.bf16.msra.mxu0 %v10284_v19  ;;  %2436 = vst [vmem:[#allocation2 + $0x4c] sm:$0x1] %v10747_v55 }
 0x23d   : > { %2437 = vst [vmem:[#allocation2 + $0x50] sm:$0xf] %v10747_v55 }
 0x23e   : > { %v1953_v5 = vpop.f32.mrf.mxu2  ;;  %2254 = vmatmul.bf16.gmra.mxu3 %v2016_v60  ;;  %2303 = vmatmul.bf16.gmra.mxu0 %v2016_v60  ;;  %2438 = vst [vmem:[#allocation2 + $0x54] sm:$0x1] %v10747_v55 }
 0x23f   : > { %2352 = vmatmul.bf16.gmra.mxu1 %v2016_v60  ;;  %2401 = vmatmul.bf16.gmra.mxu2 %v2016_v60  ;;  %v1954_v4 = vadd.f32 %v11978_v63, %v1953_v5  ;;  %2439 = vst [vmem:[#allocation2 + $0x58] sm:$0xf] %v10747_v55 }
 0x240   : > { %v1691_v0 = vpop.f32.mrf.mxu1  ;;  %3303 = vmatpush.bf16.msra.mxu0 %v10283_v38  ;;  %2440 = vst [vmem:[#allocation2 + $0x5c] sm:$0x1] %v10747_v55  ;;  %v2784_v38 = vld [vmem:[#allocation2] sm:$0xf] }
 0x241   : > { %v1692_v53 = vadd.f32 %v1691_v0, %v1643_v34  ;;  %v1991_v11 = vmul.f32 0.1, %v1954_v4  ;;  %vm1975_vm13 = vcmp.ge.f32.partialorder %v1954_v4, 0.0  ;;  %v10282_v0 = vld [vmem:[%s14352_s9 + $0x18] sm:$0xff]  ;;  %2441 = vst [vmem:[#allocation2 + $0x60] sm:$0xf] %v10747_v55 }
 0x242   : > { %2442 = vst [vmem:[#allocation2 + $0x64] sm:$0x1] %v10747_v55 }
 0x243   : > { %v10498_v31 = vpack.c.bf16 %v1692_v53, %v1690_v41  ;;  %v2007_v6 = vsel %vm1975_vm13, %v1954_v4, %v1991_v11  ;;  %v10299_v41 = vld [vmem:[%s14352_s9 + $0xa0] sm:$0xff]  ;;  %v10281_v53 = vld [vmem:[%s14352_s9 + $0x10] sm:$0xff]  ;;  %v10288_v4 = vld [vmem:[%s14352_s9 + $0x48] sm:$0xff]  ;;  %2443 = vst [vmem:[#allocation2 + $0x68] sm:$0xf] %v10747_v55 }
 0x244   : > { %3304 = vmatpush.bf16.msra.mxu0 %v10282_v0  ;;  %3563 = vmatpush.bf16.msrb.mxu1 %v10299_v41  ;;  %v1699_v11 = vld [vmem:[%s14347_s4] sm:$0x3]  ;;  %2444 = vst [vmem:[#allocation2 + $0x6c] sm:$0x1] %v10747_v55  ;;  %v14406_v41 = vmov 0 }
 0x245   : > { %10582 = vst [vmem:[%s11983_s21 + $0x30] sm:$0xff] %v10498_v31   ;;  %v10280_v31 = vld [vmem:[%s14352_s9 + $0x8] sm:$0xff]  ;;  %3161 = vmatpush.bf16.msra.mxu3 %v10288_v4  ;;  %v12141_v39 = vperm.slane %v1699_v11, 0  ;;  %v12159_v18 = vperm.slane %v1699_v11, 1  ;;  %v14407_v41 = vsel %vm12192_vm5, 4294967295, %v14406_v41 }
 0x246   : > { %v1955_v36 = vpop.f32.mrf.mxu2  ;;  %2445 = vst [vmem:[#allocation2 + $0x70] sm:$0xf] %v10747_v55  ;;  %v2685_v4 = vld [vmem:[#allocation2 + $0x8] sm:$0xf] }
 0x247   : > { %v1956_v50 = vadd.f32 %v11978_v63, %v1955_v36  ;;  %v10314_v36 = vld [vmem:[%s14352_s9 + $0xd8] sm:$0xff]  ;;  %2446 = vst [vmem:[#allocation2 + $0x74] sm:$0x1] %v10747_v55 }
 0x248   : > { %v1694_v3 = vpop.f32.mrf.mxu1  ;;  %3305 = vmatpush.bf16.msra.mxu0 %v10281_v53  ;;  %3564 = vmatpush.bf16.msrb.mxu1 %v10298_v47  ;;  %2447 = vst [vmem:[#allocation2 + $0x78] sm:$0xf] %v10747_v55 }
 0x249   : > { %vm1976_vm14 = vcmp.ge.f32.partialorder %v1956_v50, 0.0  ;;  %v1992_v27 = vmul.f32 0.1, %v1956_v50  ;;  %v1695_v26 = vadd.f32 %v1694_v3, %v1646_v7  ;;  %v10296_v3 = vld [vmem:[%s14352_s9 + $0x88] sm:$0xff]  ;;  %2448 = vst [vmem:[#allocation2 + $0x7c] sm:$0x1] %v10747_v55 }
 0x24a   : > { %2449 = vst [vmem:[#allocation2 + $0x80] sm:$0xf] %v10747_v55 }
 0x24b   : > { %v2008_v37 = vsel %vm1976_vm14, %v1956_v50, %v1992_v27  ;;  %v10279_v50 = vld [vmem:[%s14352_s9] sm:$0xff]  ;;  %2450 = vst [vmem:[#allocation2 + $0x84] sm:$0x1] %v10747_v55 }
 0x24c   : > { %v2017_v23 = vpack.c.bf16 %v2008_v37, %v2007_v6  ;;  %3306 = vmatpush.bf16.msra.mxu0 %v10280_v31  ;;  %3565 = vmatpush.bf16.msrb.mxu1 %v10297_v58  ;;  %v2051_v6 = vld [vmem:[%s14351_s8] sm:$0xf]  ;;  %v10312_v37 = vld [vmem:[%s14352_s9 + $0xc8] sm:$0xff]  ;;  %2451 = vst [vmem:[#allocation2 + $0x88] sm:$0xf] %v10747_v55 }
 0x24d   : > { %v12151_v25 = vperm.slane %v2051_v6, 0  ;;  %v12163_v7 = vperm.slane %v2051_v6, 1  ;;  %2452 = vst [vmem:[#allocation2 + $0x8c] sm:$0x1] %v10747_v55  ;;  %v2691_v31 = vld [vmem:[#allocation2 + $0xc] sm:$0x1] }
 0x24e   : > { %v1958_v16 = vpop.f32.mrf.mxu2  ;;  %2259 = vmatmul.bf16.gmra.mxu3 %v2017_v23  ;;  %2308 = vmatmul.bf16.gmra.mxu0 %v2017_v23  ;;  %2453 = vst [vmem:[#allocation2 + $0x90] sm:$0xf] %v10747_v55 }
 0x24f   : > { %2357 = vmatmul.bf16.gmra.mxu1 %v2017_v23  ;;  %2406 = vmatmul.bf16.gmra.mxu2 %v2017_v23  ;;  %v1959_v8 = vadd.f32 %v11978_v63, %v1958_v16  ;;  %v1717_v23 = vmul.f32 %v12141_v39, %v1700_v33  ;;  %2454 = vst [vmem:[#allocation2 + $0x94] sm:$0x1] %v10747_v55 }
 0x250   : > { %v1696_v59 = vpop.f32.mrf.mxu1  ;;  %3307 = vmatpush.bf16.msra.mxu0 %v10279_v50  ;;  %3566 = vmatpush.bf16.msrb.mxu1 %v10296_v3  ;;  %2455 = vst [vmem:[#allocation2 + $0x98] sm:$0xf] %v10747_v55 }
 0x251   : > { %v1697_v13 = vadd.f32 %v1696_v59, %v1648_v44  ;;  %v1993_v51 = vmul.f32 0.1, %v1959_v8  ;;  %vm1977_vm15 = vcmp.ge.f32.partialorder %v1959_v8, 0.0  ;;  %v1734_v61 = vadd.f32 %v12159_v18, %v1717_v23  ;;  %2456 = vst [vmem:[#allocation2 + $0x9c] sm:$0x1] %v10747_v55 }
 0x252   : > { %14408 = vst [vmem:[#allocation14_spill] sm:$0xff] %v14407_v41  ;;  %v14409_v55 = vmov 0  ;;  %v1703_v23 = vmax.f32 %v11570_v20, 0.0 }
 0x253   : > { %v10503_v12 = vpack.c.bf16 %v1697_v13, %v1695_v26  ;;  %v2009_v5 = vsel %vm1977_vm15, %v1959_v8, %v1993_v51  ;;  %v10311_v26 = vld [vmem:[%s14352_s9 + $0xc0] sm:$0xff]  ;;  %v1701_v13 = vmax.f32 %v11556_v21, 0.0  ;;  %v1702_v51 = vmax.f32 %v11566_v56, 0.0 }
 0x254   : > { %3567 = vmatpush.bf16.msrb.mxu1 %v10295_v62  ;;  %v2836_v56 = vshrl.u32 %v2784_v38, 16  ;;  %v14410_v55 = vsel %vm12200_vm6, 4294967295, %v14409_v55 }
 0x255   : > { %10583 = vst [vmem:[%s11983_s21 + $0x38] sm:$0xff] %v10503_v12   ;;  %v10287_v12 = vld [vmem:[%s14352_s9 + $0x40] sm:$0xff]  ;;  %v1718_v21 = vmul.f32 %v12141_v39, %v1701_v13 }
 0x256   : > { %v1960_v30 = vpop.f32.mrf.mxu2  ;;  %3162 = vmatpush.bf16.msra.mxu3 %v10287_v12  ;;  %14411 = vst [vmem:[#allocation15_spill] sm:$0xff] %v14410_v55  ;;  %v2838_v3 = vrot.slane %v2836_v56, 4  ;;  %v1705_v12 = vmax.f32 %v11585_v35, 0.0 }
 0x257   : > { %v1961_v24 = vadd.f32 %v11978_v63, %v1960_v30  ;;  %v10317_v63 = vld [vmem:[%s14352_s9 + $0xf0] sm:$0xff] }
 0x258   : > { %3754 = vmatpush.bf16.msrb.mxu2 %v10317_v63 }
 0x259   : > { %vm1978_vm0 = vcmp.ge.f32.partialorder %v1961_v24, 0.0  ;;  %v1994_v60 = vmul.f32 0.1, %v1961_v24 }
 0x25b   : > { %v2010_v32 = vsel %vm1978_vm0, %v1961_v24, %v1994_v60 }
 0x25c   : > { %v2018_v34 = vpack.c.bf16 %v2010_v32, %v2009_v5  ;;  %3755 = vmatpush.bf16.msrb.mxu2 %v10316_v46  ;;  %v1735_v5 = vadd.f32 %v12159_v18, %v1718_v21 }
 0x25e   : > { %2264 = vmatmul.bf16.gmra.mxu3 %v2018_v34  ;;  %2313 = vmatmul.bf16.gmra.mxu0 %v2018_v34 }
 0x25f   : > { %2362 = vmatmul.bf16.gmra.mxu1 %v2018_v34  ;;  %2411 = vmatmul.bf16.gmra.mxu2 %v2018_v34  ;;  %v2839_v34 = vshll.u32 %v2784_v38, 16 }
 0x260   : > { %3756 = vmatpush.bf16.msrb.mxu2 %v10315_v48 }
 0x264   : > { %3757 = vmatpush.bf16.msrb.mxu2 %v10314_v36  ;;  %v1719_v36 = vmul.f32 %v12141_v39, %v1702_v51 }
 0x266   : > { %v1736_v13 = vadd.f32 %v12159_v18, %v1719_v36 }
 0x268   : > { %3758 = vmatpush.bf16.msrb.mxu2 %v10313_v17 }
 0x26b   : > { %v2279_v27 = vpop.f32.mrf.mxu0 }
 0x26c   : > { %3759 = vmatpush.bf16.msrb.mxu2 %v10312_v37  ;;  %v12172_v42 = vpop.f32.mrf.mxu1  ;;  %v2280_v19 = vadd.f32 %v2279_v27, %v12163_v7  ;;  %v2841_v27 = vrot.slane %v2839_v34, 5  ;;  %v9274_v34 = vld [vmem:[#allocation2] sm:$0xf] }
 0x26e   : > { %v2842_v20 = vor.u32 %v2841_v27, %v2838_v3 }
 0x270   : > { %3760 = vmatpush.bf16.msrb.mxu2 %v10311_v26 }
 0x271   : > { %v2230_v16 = vpop.f32.mrf.mxu3 }
 0x272   : > { %v2231_v44 = vadd.f32 %v2230_v16, %v12151_v25  ;;  %v1704_v16 = vmax.f32 %v11581_v57, 0.0 }
 0x273   : > { %v2281_v59 = vpop.f32.mrf.mxu0 }
 0x274   : > { %v2457_v8 = vadd.f32 1.0, %v2231_v44  ;;  %v2282_v53 = vadd.f32 %v2281_v59, %v12163_v7  ;;  %v12197_v48 = vpop.f32.mrf.mxu1  ;;  %v3349_v59 = vld [vmem:[#allocation2] sm:$0xe]  ;;  %v1721_v51 = vmul.f32 %v12141_v39, %v1704_v16 }
 0x275   : > { %v9336_v38 = vrot.slane %v3349_v59, 9 }
 0x276   : > { %v2473_v43 = vmul.f32 %v2457_v8, %v1734_v61  ;;  %v10326_v8 = vld [vmem:[%s14352_s9 + $0x138] sm:$0xff]  ;;  %v1738_v16 = vadd.f32 %v12159_v18, %v1721_v51 }
 0x277   : > { %4170 = vmatpush.bf16.msrb.mxu3 %v10326_v8 }
 0x278   : > { %v2489_v30 = vadd.f32 %v2473_v43, %v2280_v19  ;;  %v2816_v19 = vld [vmem:[#allocation2 + $0x4] sm:$0x1] }
 0x279   : > { %v2232_v15 = vpop.f32.mrf.mxu3 }
 0x27a   : > { %v2505_v24 = vpack.c.bf16 %v2489_v30, %v2489_v30  ;;  %v2233_v60 = vadd.f32 %v2232_v15, %v12151_v25  ;;  %v1720_v15 = vmul.f32 %v12141_v39, %v1703_v23 }
 0x27b   : > { %v2284_v63 = vpop.f32.mrf.mxu0 }
 0x27c   : > { %v2522_v1 = vshrl.u32 %v2505_v24, 16  ;;  %v2458_v32 = vadd.f32 1.0, %v2233_v60  ;;  %v2525_v46 = vshll.u32 %v2505_v24, 16  ;;  %v2285_v21 = vadd.f32 %v2284_v63, %v12163_v7  ;;  %v2694_v24 = vld [vmem:[#allocation2 + $0x10] sm:$0xf] }
 0x27d   : > { %v2697_v60 = vld [vmem:[#allocation2 + $0x14] sm:$0x1] }
 0x27e   : > { %v2524_v0 = vrot.slane %v2522_v1, 7  ;;  %v2474_v47 = vmul.f32 %v2458_v32, %v1735_v5  ;;  %v2845_v1 = vshll.u32 %v2816_v19, 16  ;;  %v12220_v32 = vpop.f32.mrf.mxu1 }
 0x280   : > { %v2527_v58 = vor.u32 %v2525_v46, %v2524_v0  ;;  %v2528_v11 = vrot.slane %v2524_v0, 4  ;;  %v2490_v50 = vadd.f32 %v2474_v47, %v2282_v53  ;;  %v3402_v0 = vrot.slane %v2816_v19, 5 }
 0x281   : > { %v2235_v17 = vpop.f32.mrf.mxu3  ;;  %v1722_v46 = vmul.f32 %v12141_v39, %v1705_v12  ;;  %v14412_v53 = vmov 0  ;;  %v2843_v47 = vrot.slane %v2842_v20, 4 }
 0x282   : > { %v2686_v33 = vsel %vm12192_vm5, %v2527_v58, %v2685_v4  ;;  %v2692_v6 = vsel %vm12200_vm6, %v2528_v11, %v2691_v31  ;;  %v2506_v37 = vpack.c.bf16 %v2490_v50, %v2490_v50  ;;  %v2236_v62 = vadd.f32 %v2235_v17, %v12151_v25 }
 0x283   : > { %2687 = vst [vmem:[#allocation2 + $0x8] sm:$0xf] %v2686_v33  ;;  %v2286_v44 = vpop.f32.mrf.mxu0  ;;  %v14413_v53 = vsel %vm12225_vm9, 4294967295, %v14412_v53  ;;  %v1737_v17 = vadd.f32 %v12159_v18, %v1720_v15  ;;  %v3403_v59 = vsel %vm12225_vm9, %v9336_v38, %v3402_v0  ;;  %v12246_v19 = vadd.f32 %v12159_v18, %v1722_v46  ;;  %v2703_v15 = vld [vmem:[#allocation2 + $0x1c] sm:$0x1] }
 0x284   : > { %2693 = vst [vmem:[#allocation2 + $0xc] sm:$0x1] %v2692_v6  ;;  %v2530_v26 = vshrl.u32 %v2506_v37, 16  ;;  %v2459_v61 = vadd.f32 1.0, %v2236_v62  ;;  %v2533_v57 = vshll.u32 %v2506_v37, 16  ;;  %v2847_v37 = vrot.slane %v2845_v1, 5 }
 0x285   : > { %14414 = vst [vmem:[#allocation16_spill] sm:$0xff] %v14413_v53  ;;  %v10384_v53 = vld [vmem:[%s14355_s12 + $0x48] sm:$0xff] }
 0x286   : > { %v2532_v43 = vrot.slane %v2530_v26, 7  ;;  %v2475_v30 = vmul.f32 %v2459_v61, %v1736_v13  ;;  %v14415_v26 = vmov 0  ;;  %v2287_v61 = vadd.f32 %v2286_v44, %v12163_v7 }
 0x287   : > { %v14416_v26 = vsel %vm12240_vm12, 4294967295, %v14415_v26 }
 0x288   : > { %v2535_v5 = vor.u32 %v2533_v57, %v2532_v43  ;;  %v2536_v35 = vrot.slane %v2532_v43, 4  ;;  %v2491_v56 = vadd.f32 %v2475_v30, %v2285_v21  ;;  %14417 = vst [vmem:[#allocation17_spill] sm:$0xff] %v14416_v26  ;;  %v2700_v30 = vld [vmem:[#allocation2 + $0x18] sm:$0xf] }
 0x289   : > { %v2237_v63 = vpop.f32.mrf.mxu3 }
 0x28a   : > { %v2695_v4 = vsel %vm12192_vm5, %v2535_v5, %v2694_v24  ;;  %v2698_v31 = vsel %vm12200_vm6, %v2536_v35, %v2697_v60  ;;  %v2507_v36 = vpack.c.bf16 %v2491_v56, %v2491_v56  ;;  %v2238_v58 = vadd.f32 %v2237_v63, %v12151_v25  ;;  %v10271_v11 = vld [vmem:[#allocation2 + $0x4] sm:$0xf0] }
 0x28b   : > { %v3350_v50 = vld [vmem:[#allocation2 + $0x8] sm:$0xe]  ;;  %2696 = vst [vmem:[#allocation2 + $0x10] sm:$0xf] %v2695_v4  ;;  %v2289_v3 = vpop.f32.mrf.mxu0  ;;  %v9275_v27 = vor.u32 %v10271_v11, %v9274_v34  ;;  %v2817_v33 = vld [vmem:[#allocation2 + $0xc] sm:$0x1]  ;;  %v3480_v24 = vunpack.c.l.b16 %v3403_v59  ;;  %v2848_v60 = vsel %vm12240_vm12, %v2843_v47, %v2847_v37 }
 0x28c   : > { %v9337_v6 = vrot.slane %v3350_v50, 9  ;;  %2699 = vst [vmem:[#allocation2 + $0x14] sm:$0x1] %v2698_v31  ;;  %v2538_v62 = vshrl.u32 %v2507_v36, 16  ;;  %v2460_v23 = vadd.f32 1.0, %v2238_v58  ;;  %v2541_v13 = vshll.u32 %v2507_v36, 16  ;;  %v12258_v36 = vpop.f32.mrf.mxu1 }
 0x28d   : > { %3308 = vmatmul.bf16.vlgmr.msra.gmra.mxu0 %v9275_v27  ;;  %v3406_v8 = vrot.slane %v2817_v33, 5  ;;  %v2785_v12 = vld [vmem:[#allocation2 + $0x8] sm:$0xf]  ;;  %v2859_v44 = vshll.u32 %v2817_v33, 16  ;;  %v1706_v56 = vmax.f32 %v11596_v9, 0.0  ;;  %v1707_v34 = vmax.f32 %v11599_v54, 0.0 }
 0x28e   : > { %v2540_v20 = vrot.slane %v2538_v62, 7  ;;  %v2476_v43 = vmul.f32 %v2460_v23, %v1737_v17  ;;  %v2850_v57 = vshrl.u32 %v2785_v12, 16  ;;  %v2853_v21 = vshll.u32 %v2785_v12, 16  ;;  %v9386_v11 = vld [vmem:[#allocation2 + $0x8] sm:$0xf] }
 0x28f   : > { %v3407_v51 = vsel %vm12225_vm9, %v9337_v6, %v3406_v8  ;;  %v3075_v6 = vunpack.c.l.b16 %v2848_v60  ;;  %v2290_v23 = vadd.f32 %v2289_v3, %v12163_v7  ;;  %v1723_v3 = vmul.f32 %v12141_v39, %v1706_v56 }
 0x290   : > { %v2543_v38 = vor.u32 %v2541_v13, %v2540_v20  ;;  %v2544_v1 = vrot.slane %v2540_v20, 4  ;;  %v2492_v5 = vadd.f32 %v2476_v43, %v2287_v61  ;;  %v3481_v35 = vunpack.c.l.b16 %v3407_v51  ;;  %v10325_v61 = vld [vmem:[%s14352_s9 + $0x130] sm:$0xff] }
 0x291   : > { %v2240_v0 = vpop.f32.mrf.mxu3  ;;  %v2852_v46 = vrot.slane %v2850_v57, 4  ;;  %v2855_v63 = vrot.slane %v2853_v21, 5  ;;  %v2861_v13 = vrot.slane %v2859_v44, 5  ;;  %4171 = vmatpush.bf16.msrb.mxu3 %v10325_v61  ;;  %v1388_v60 = vadd.f32 %v11615_v14, %v11613_v52  ;;  %v2706_v44 = vld [vmem:[#allocation2 + $0x20] sm:$0xf] }
 0x292   : > { %v2701_v4 = vsel %vm12192_vm5, %v2543_v38, %v2700_v30  ;;  %v2704_v31 = vsel %vm12200_vm6, %v2544_v1, %v2703_v15  ;;  %v2508_v47 = vpack.c.bf16 %v2492_v5, %v2492_v5  ;;  %v2241_v58 = vadd.f32 %v2240_v0, %v12151_v25  ;;  %v10303_v50 = vld [vmem:[#allocation2 + $0xc] sm:$0xf0]  ;;  %v2709_v38 = vld [vmem:[#allocation2 + $0x24] sm:$0x1] }
 0x293   : > { %v3351_v17 = vld [vmem:[#allocation2 + $0x10] sm:$0xe]  ;;  %2702 = vst [vmem:[#allocation2 + $0x18] sm:$0xf] %v2701_v4  ;;  %v3496_v9 = vpack.c.b16 %v3481_v35, %v3480_v24  ;;  %v2291_v54 = vpop.f32.mrf.mxu0  ;;  %v9387_v27 = vor.u32 %v10303_v50, %v9386_v11  ;;  %v2856_v33 = vor.u32 %v2855_v63, %v2852_v46  ;;  %v2818_v37 = vld [vmem:[#allocation2 + $0x14] sm:$0x1]  ;;  %v12267_v24 = vmul.f32 %v12141_v39, %v1707_v34 }
 0x294   : > { %2705 = vst [vmem:[#allocation2 + $0x1c] sm:$0x1] %v2704_v31  ;;  %v2546_v62 = vshrl.u32 %v2508_v47, 16  ;;  %v2461_v59 = vadd.f32 1.0, %v2241_v58  ;;  %v2549_v8 = vshll.u32 %v2508_v47, 16  ;;  %v9338_v20 = vrot.slane %v3351_v17, 9 }
 0x295   : > { %3568 = vmatmul.bf16.vlgmr.msrb.gmra.mxu1 %v3496_v9  ;;  %3761 = vmatmul.bf16.vlgmr.msrb.gmra.mxu2 %v9387_v27  ;;  %v2857_v12 = vrot.slane %v2856_v33, 4  ;;  %v3410_v43 = vrot.slane %v2818_v37, 5  ;;  %v2786_v57 = vld [vmem:[#allocation2 + $0x10] sm:$0xf]  ;;  %v2873_v34 = vshll.u32 %v2818_v37, 16  ;;  %v12280_v17 = vadd.f32 %v11611_v28, %v1388_v60 }
 0x296   : > { %v2548_v21 = vrot.slane %v2546_v62, 7  ;;  %v2477_v30 = vmul.f32 %v2461_v59, %v1738_v16  ;;  %v2864_v15 = vshrl.u32 %v2786_v57, 16  ;;  %v2867_v51 = vshll.u32 %v2786_v57, 16  ;;  %v9278_v58 = vld [vmem:[#allocation2 + $0x10] sm:$0xf] }
 0x297   : > { %v2862_v1 = vsel %vm12240_vm12, %v2857_v12, %v2861_v13  ;;  %v3411_v63 = vsel %vm12225_vm9, %v9338_v20, %v3410_v43  ;;  %v2292_v13 = vadd.f32 %v2291_v54, %v12163_v7  ;;  %v2875_v43 = vrot.slane %v2873_v34, 5  ;;  %v2715_v60 = vld [vmem:[#allocation2 + $0x2c] sm:$0x1] }
 0x298   : > { %v2551_v5 = vor.u32 %v2549_v8, %v2548_v21  ;;  %v2552_v35 = vrot.slane %v2548_v21, 4  ;;  %v2493_v0 = vadd.f32 %v2477_v30, %v2290_v23  ;;  %v3076_v16 = vunpack.c.l.b16 %v2862_v1  ;;  %v12283_v23 = vpop.f32.mrf.mxu1 }
 0x299   : > { %v2242_v46 = vpop.f32.mrf.mxu3  ;;  %v2866_v56 = vrot.slane %v2864_v15, 4  ;;  %v2869_v4 = vrot.slane %v2867_v51, 5  ;;  %14418 = vst [vmem:[#allocation22_spill] sm:$0xff] %v12283_v23  ;;  %v3482_v61 = vunpack.c.l.b16 %v3411_v63  ;;  %v2712_v51 = vld [vmem:[#allocation2 + $0x28] sm:$0xf]  ;;  %v1740_v63 = vadd.f32 %v12159_v18, %v1723_v3 }
 0x29a   : > { %v2707_v31 = vsel %vm12192_vm5, %v2551_v5, %v2706_v44  ;;  %v2710_v52 = vsel %vm12200_vm6, %v2552_v35, %v2709_v38  ;;  %v2509_v14 = vpack.c.bf16 %v2493_v0, %v2493_v0  ;;  %v3091_v47 = vpack.c.b16 %v3076_v16, %v3075_v6  ;;  %v10272_v11 = vld [vmem:[#allocation2 + $0x14] sm:$0xf0] }
 0x29b   : > { %v3352_v50 = vld [vmem:[#allocation2 + $0x18] sm:$0xe]  ;;  %2708 = vst [vmem:[#allocation2 + $0x20] sm:$0xf] %v2707_v31  ;;  %v2243_v9 = vadd.f32 %v2242_v46, %v12151_v25  ;;  %v2294_v27 = vpop.f32.mrf.mxu0  ;;  %v9279_v33 = vor.u32 %v10272_v11, %v9278_v58  ;;  %v2819_v37 = vld [vmem:[#allocation2 + $0x1c] sm:$0x1]  ;;  %v2870_v20 = vor.u32 %v2869_v4, %v2866_v56 }
 0x29c   : > { %v9339_v62 = vrot.slane %v3352_v50, 9  ;;  %2711 = vst [vmem:[#allocation2 + $0x24] sm:$0x1] %v2710_v52  ;;  %v2554_v59 = vshrl.u32 %v2509_v14, 16  ;;  %3163 = vmatmul.bf16.vlgmr.msra.gmra.mxu3 %v3091_v47  ;;  %v3414_v6 = vrot.slane %v2819_v37, 5  ;;  %v2557_v8 = vshll.u32 %v2509_v14, 16  ;;  %v12299_v50 = vpop.f32.mrf.mxu2 }
 0x29d   : > { %v2462_v12 = vadd.f32 1.0, %v2243_v9  ;;  %3313 = vmatmul.bf16.gmra.mxu0 %v9279_v33  ;;  %v2787_v28 = vld [vmem:[#allocation2 + $0x18] sm:$0xf]  ;;  %v2871_v38 = vrot.slane %v2870_v20, 4  ;;  %v2887_v1 = vshll.u32 %v2819_v37, 16  ;;  %v1708_v11 = vmax.f32 %v11609_v45, 0.0 }
 0x29e   : > { %v2556_v57 = vrot.slane %v2554_v59, 7  ;;  %v3415_v21 = vsel %vm12225_vm9, %v9339_v62, %v3414_v6  ;;  %v2878_v30 = vshrl.u32 %v2787_v28, 16  ;;  %v2881_v15 = vshll.u32 %v2787_v28, 16  ;;  %v9390_v14 = vld [vmem:[#allocation2 + $0x18] sm:$0xf]  ;;  %14419 = vst [vmem:[#allocation23_spill] sm:$0xff] %v12299_v50 }
 0x29f   : > { %v2478_v44 = vmul.f32 %v2462_v12, %v12246_v19  ;;  %v3483_v54 = vunpack.c.l.b16 %v3415_v21  ;;  %v2876_v34 = vsel %vm12240_vm12, %v2871_v38, %v2875_v43  ;;  %v1709_v3 = vmax.f32 %v12280_v17, 0.0  ;;  %v10324_v45 = vld [vmem:[%s14352_s9 + $0x128] sm:$0xff]  ;;  %v3822_v41 = vld [vmem:[#allocation2 + $0x18] sm:$0xf] }
 0x2a0   : > { %v2559_v5 = vor.u32 %v2557_v8, %v2556_v57  ;;  %v2560_v35 = vrot.slane %v2556_v57, 4  ;;  %v2880_v0 = vrot.slane %v2878_v30, 4  ;;  %v2883_v16 = vrot.slane %v2881_v15, 5  ;;  %v12311_v57 = vpop.f32.mrf.mxu1  ;;  %4172 = vmatpush.bf16.msrb.mxu3 %v10324_v45 }
 0x2a1   : > { %v2494_v46 = vadd.f32 %v2478_v44, %v2292_v13  ;;  %v2245_v56 = vpop.f32.mrf.mxu3  ;;  %v3497_v4 = vpack.c.b16 %v3483_v54, %v3482_v61  ;;  %v2889_v6 = vrot.slane %v2887_v1, 5  ;;  %v1741_v61 = vadd.f32 %v12159_v18, %v12267_v24  ;;  %14420 = vst [vmem:[#allocation24_spill] sm:$0xff] %v12311_v57  ;;  %v2721_v44 = vld [vmem:[#allocation2 + $0x34] sm:$0x1] }
 0x2a2   : > { %v2713_v31 = vsel %vm12192_vm5, %v2559_v5, %v2712_v51  ;;  %v2716_v19 = vsel %vm12200_vm6, %v2560_v35, %v2715_v60  ;;  %v2246_v52 = vadd.f32 %v2245_v56, %v12151_v25  ;;  %v10304_v47 = vld [vmem:[#allocation2 + $0x1c] sm:$0xf0]  ;;  %v2884_v58 = vor.u32 %v2883_v16, %v2880_v0 }
 0x2a3   : > { %2714 = vst [vmem:[#allocation2 + $0x28] sm:$0xf] %v2713_v31  ;;  %v2510_v9 = vpack.c.bf16 %v2494_v46, %v2494_v46  ;;  %v2296_v33 = vpop.f32.mrf.mxu0  ;;  %v9391_v37 = vor.u32 %v10304_v47, %v9390_v14  ;;  %v3353_v62 = vld [vmem:[#allocation2 + $0x20] sm:$0xe]  ;;  %v1393_v17 = vadd.f32 %v11656_v2, %v11654_v22  ;;  %v2295_v12 = vadd.f32 %v2294_v27, %v12163_v7  ;;  %v12309_v20 = vld [vmem:[#allocation2 + $0x24] sm:$0x1] }
 0x2a4   : > { %2717 = vst [vmem:[#allocation2 + $0x2c] sm:$0x1] %v2716_v19  ;;  %v2463_v59 = vadd.f32 1.0, %v2246_v52  ;;  %v2885_v13 = vrot.slane %v2884_v58, 4  ;;  %v3077_v28 = vunpack.c.l.b16 %v2876_v34  ;;  %v2788_v43 = vld [vmem:[#allocation2 + $0x20] sm:$0xf]  ;;  %v1725_v56 = vmul.f32 %v12141_v39, %v1708_v11 }
 0x2a5   : > { %v2562_v8 = vshrl.u32 %v2510_v9, 16  ;;  %3573 = vmatmul.bf16.gmra.mxu1 %v3497_v4  ;;  %3766 = vmatmul.bf16.gmra.mxu2 %v9391_v37  ;;  %v2892_v30 = vshrl.u32 %v2788_v43, 16  ;;  %v2895_v15 = vshll.u32 %v2788_v43, 16  ;;  %v2565_v22 = vshll.u32 %v2510_v9, 16  ;;  %v2718_v2 = vld [vmem:[#allocation2 + $0x30] sm:$0xf] }
 0x2a6   : > { %v2479_v21 = vmul.f32 %v2463_v59, %v1740_v63  ;;  %v2890_v24 = vsel %vm12240_vm12, %v2885_v13, %v2889_v6  ;;  %v9340_v27 = vrot.slane %v3353_v62, 9  ;;  %v3418_v38 = vrot.slane %v12309_v20, 5  ;;  %v9282_v19 = vld [vmem:[#allocation2 + $0x20] sm:$0xf] }
 0x2a7   : > { %v2564_v51 = vrot.slane %v2562_v8, 7  ;;  %v3078_v60 = vunpack.c.l.b16 %v2890_v24  ;;  %v2894_v1 = vrot.slane %v2892_v30, 4  ;;  %v2897_v5 = vrot.slane %v2895_v15, 5  ;;  %v12329_v8 = vpop.f32.mrf.mxu2  ;;  %v2724_v15 = vld [vmem:[#allocation2 + $0x38] sm:$0xf] }
 0x2a8   : > { %v2495_v54 = vadd.f32 %v2479_v21, %v2295_v12  ;;  %v1710_v35 = vmax.f32 %v11644_v40, 0.0  ;;  %v1726_v4 = vmul.f32 %v12141_v39, %v1709_v3  ;;  %v12325_v11 = vadd.f32 %v11646_v10, %v1393_v17  ;;  %14421 = vst [vmem:[#allocation25_spill] sm:$0xff] %v12329_v8 }
 0x2a9   : > { %v2567_v0 = vor.u32 %v2565_v22, %v2564_v51  ;;  %v2568_v16 = vrot.slane %v2564_v51, 4  ;;  %v3092_v46 = vpack.c.b16 %v3078_v60, %v3077_v28  ;;  %v2247_v63 = vpop.f32.mrf.mxu3  ;;  %v2898_v13 = vor.u32 %v2897_v5, %v2894_v1  ;;  %v2727_v51 = vld [vmem:[#allocation2 + $0x3c] sm:$0x1] }
 0x2aa   : > { %v2511_v34 = vpack.c.bf16 %v2495_v54, %v2495_v54  ;;  %v2248_v31 = vadd.f32 %v2247_v63, %v12151_v25  ;;  %v10273_v52 = vld [vmem:[#allocation2 + $0x24] sm:$0xf0]  ;;  %v3419_v45 = vsel %vm12225_vm9, %v9340_v27, %v3418_v38  ;;  %v2297_v12 = vadd.f32 %v2296_v33, %v12163_v7 }
 0x2ab   : > { %v3354_v14 = vld [vmem:[#allocation2 + $0x28] sm:$0xe]  ;;  %v2719_v47 = vsel %vm12192_vm5, %v2567_v0, %v2718_v2  ;;  %v2722_v58 = vsel %vm12200_vm6, %v2568_v16, %v2721_v44  ;;  %v2299_v9 = vpop.f32.mrf.mxu0  ;;  %v9283_v37 = vor.u32 %v10273_v52, %v9282_v19  ;;  %v2821_v62 = vld [vmem:[#allocation2 + $0x2c] sm:$0x1]  ;;  %v2901_v21 = vshll.u32 %v12309_v20, 16  ;;  %v12335_v44 = vpop.f32.mrf.mxu1 }
 0x2ac   : > { %v2789_v59 = vld [vmem:[#allocation2 + $0x28] sm:$0xf]  ;;  %2720 = vst [vmem:[#allocation2 + $0x30] sm:$0xf] %v2719_v47  ;;  %v2570_v3 = vshrl.u32 %v2511_v34, 16  ;;  %3168 = vmatmul.bf16.gmra.mxu3 %v3092_v46  ;;  %v2464_v6 = vadd.f32 1.0, %v2248_v31  ;;  %v3484_v2 = vunpack.c.l.b16 %v3419_v45  ;;  %v1742_v19 = vadd.f32 %v12159_v18, %v1725_v56 }
 0x2ad   : > { %2723 = vst [vmem:[#allocation2 + $0x34] sm:$0x1] %v2722_v58  ;;  %3318 = vmatmul.bf16.gmra.mxu0 %v9283_v37  ;;  %v9341_v28 = vrot.slane %v3354_v14, 9  ;;  %v3422_v43 = vrot.slane %v2821_v62, 5  ;;  %v2573_v10 = vshll.u32 %v2511_v34, 16  ;;  %v2906_v30 = vshrl.u32 %v2789_v59, 16 }
 0x2ae   : > { %v2572_v24 = vrot.slane %v2570_v3, 7  ;;  %v2480_v17 = vmul.f32 %v2464_v6, %v1741_v61  ;;  %v2899_v60 = vrot.slane %v2898_v13, 4  ;;  %v2909_v27 = vshll.u32 %v2789_v59, 16  ;;  %14422 = vst [vmem:[#allocation26_spill] sm:$0xff] %v12335_v44  ;;  %v9394_v47 = vld [vmem:[#allocation2 + $0x28] sm:$0xf] }
 0x2af   : > { %v3423_v22 = vsel %vm12225_vm9, %v9341_v28, %v3422_v43  ;;  %v2903_v20 = vrot.slane %v2901_v21, 5  ;;  %v2908_v0 = vrot.slane %v2906_v30, 4  ;;  %v2915_v61 = vshll.u32 %v2821_v62, 16  ;;  %v10323_v56 = vld [vmem:[%s14352_s9 + $0x120] sm:$0xff] }
 0x2b0   : > { %v2575_v33 = vor.u32 %v2573_v10, %v2572_v24  ;;  %v2576_v54 = vrot.slane %v2572_v24, 4  ;;  %v2496_v38 = vadd.f32 %v2480_v17, %v2297_v12  ;;  %v3485_v1 = vunpack.c.l.b16 %v3423_v22  ;;  %v2730_v45 = vld [vmem:[#allocation2 + $0x40] sm:$0xf]  ;;  %4173 = vmatpush.bf16.msrb.mxu3 %v10323_v56  ;;  %v2733_v22 = vld [vmem:[#allocation2 + $0x44] sm:$0x1] }
 0x2b1   : > { %v2250_v5 = vpop.f32.mrf.mxu3  ;;  %v2911_v16 = vrot.slane %v2909_v27, 5  ;;  %v2904_v37 = vsel %vm12240_vm12, %v2899_v60, %v2903_v20  ;;  %v1711_v59 = vmax.f32 %v12325_v11, 0.0  ;;  %v12347_v6 = vadd.f32 %v12159_v18, %v1726_v4 }
 0x2b2   : > { %v2725_v46 = vsel %vm12192_vm5, %v2575_v33, %v2724_v15  ;;  %v2728_v63 = vsel %vm12200_vm6, %v2576_v54, %v2727_v51  ;;  %v2512_v34 = vpack.c.bf16 %v2496_v38, %v2496_v38  ;;  %v2251_v31 = vadd.f32 %v2250_v5, %v12151_v25  ;;  %v12355_v51 = vpop.f32.mrf.mxu2 }
 0x2b3   : > { %2726 = vst [vmem:[#allocation2 + $0x38] sm:$0xf] %v2725_v46  ;;  %v3498_v52 = vpack.c.b16 %v3485_v1, %v3484_v2  ;;  %v2301_v14 = vpop.f32.mrf.mxu0  ;;  %v10305_v58 = vld [vmem:[#allocation2 + $0x2c] sm:$0xf0]  ;;  %v2912_v62 = vor.u32 %v2911_v16, %v2908_v0  ;;  %v2300_v12 = vadd.f32 %v2299_v9, %v12163_v7  ;;  %v2917_v21 = vrot.slane %v2915_v61, 5  ;;  %v12369_v46 = vpop.f32.mrf.mxu1 }
 0x2b4   : > { %2729 = vst [vmem:[#allocation2 + $0x3c] sm:$0x1] %v2728_v63  ;;  %v2578_v13 = vshrl.u32 %v2512_v34, 16  ;;  %v2465_v3 = vadd.f32 1.0, %v2251_v31  ;;  %v9395_v28 = vor.u32 %v10305_v58, %v9394_v47  ;;  %v12353_v24 = vld [vmem:[#allocation2 + $0x34] sm:$0x1]  ;;  %v3079_v30 = vunpack.c.l.b16 %v2904_v37 }
 0x2b5   : > { %3578 = vmatmul.bf16.gmra.mxu1 %v3498_v52  ;;  %v2913_v43 = vrot.slane %v2912_v62, 4  ;;  %v2581_v10 = vshll.u32 %v2512_v34, 16  ;;  %v3355_v15 = vld [vmem:[#allocation2 + $0x30] sm:$0xe]  ;;  %14423 = vst [vmem:[#allocation27_spill] sm:$0xff] %v12355_v51  ;;  %v3426_v60 = vrot.slane %v12353_v24, 5  ;;  %v12363_v5 = vmul.f32 %v12141_v39, %v1710_v35 }
 0x2b6   : > { %v2580_v11 = vrot.slane %v2578_v13, 7  ;;  %v2481_v17 = vmul.f32 %v2465_v3, %v1742_v19  ;;  %v2790_v4 = vld [vmem:[#allocation2 + $0x30] sm:$0xf]  ;;  %3771 = vmatmul.bf16.gmra.mxu2 %v9395_v28  ;;  %v9342_v2 = vrot.slane %v3355_v15, 9  ;;  %v12366_v20 = vmul.f32 %v12141_v39, %v1711_v59  ;;  %14424 = vst [vmem:[#allocation28_spill] sm:$0xff] %v12369_v46  ;;  %v14425_v3 = vld [vmem:[#allocation19_spill] sm:$0xff] }
 0x2b7   : > { %v2918_v9 = vsel %vm12240_vm12, %v2913_v43, %v2917_v21  ;;  %v2920_v27 = vshrl.u32 %v2790_v4, 16  ;;  %v1712_v0 = vmax.f32 %v11664_v29, 0.0  ;;  %v2923_v61 = vshll.u32 %v2790_v4, 16  ;;  %v9286_v19 = vld [vmem:[#allocation2 + $0x30] sm:$0xf] }
 0x2b8   : > { %v2583_v33 = vor.u32 %v2581_v10, %v2580_v11  ;;  %v2584_v54 = vrot.slane %v2580_v11, 4  ;;  %v2497_v38 = vadd.f32 %v2481_v17, %v2300_v12  ;;  %v3080_v1 = vunpack.c.l.b16 %v2918_v9  ;;  %v2739_v9 = vld [vmem:[#allocation2 + $0x5c] sm:$0x1] }
 0x2b9   : > { %v2252_v16 = vpop.f32.mrf.mxu3  ;;  %v2922_v13 = vrot.slane %v2920_v27, 4  ;;  %v1398_v56 = vadd.f32 %v14425_v3, %v11668_v49  ;;  %v3427_v12 = vsel %vm12225_vm9, %v9342_v2, %v3426_v60  ;;  %v2302_v43 = vadd.f32 %v2301_v14, %v12163_v7  ;;  %v14429_v3 = vld [vmem:[#allocation12_spill] sm:$0xff] }
 0x2ba   : > { %v2731_v63 = vsel %vm12192_vm5, %v2583_v33, %v2730_v45  ;;  %v2734_v34 = vsel %vm12200_vm6, %v2584_v54, %v2733_v22  ;;  %v2513_v31 = vpack.c.bf16 %v2497_v38, %v2497_v38  ;;  %v3093_v40 = vpack.c.b16 %v3080_v1, %v3079_v30  ;;  %v10274_v35 = vld [vmem:[#allocation2 + $0x34] sm:$0xf0] }
 0x2bb   : > { %v3356_v52 = vld [vmem:[#allocation2 + $0x38] sm:$0xe]  ;;  %2732 = vst [vmem:[#allocation2 + $0x40] sm:$0xf] %v2731_v63  ;;  %v2253_v47 = vadd.f32 %v2252_v16, %v12151_v25  ;;  %v2304_v58 = vpop.f32.mrf.mxu0  ;;  %v9287_v37 = vor.u32 %v10274_v35, %v9286_v19  ;;  %v12376_v62 = vld [vmem:[#allocation2 + $0x3c] sm:$0x1]  ;;  %v3486_v60 = vunpack.c.l.b16 %v3427_v12  ;;  %v12388_v16 = vpop.f32.mrf.mxu2 }
 0x2bc   : > { %v9343_v59 = vrot.slane %v3356_v52, 9  ;;  %2735 = vst [vmem:[#allocation2 + $0x44] sm:$0x1] %v2734_v34  ;;  %v2586_v45 = vshrl.u32 %v2513_v31, 16  ;;  %3173 = vmatmul.bf16.gmra.mxu3 %v3093_v40  ;;  %v3430_v28 = vrot.slane %v12376_v62, 5  ;;  %v2925_v10 = vrot.slane %v2923_v61, 5 }
 0x2bd   : > { %v2466_v21 = vadd.f32 1.0, %v2253_v47  ;;  %3323 = vmatmul.bf16.gmra.mxu0 %v9287_v37  ;;  %v2791_v11 = vld [vmem:[#allocation2 + $0x38] sm:$0xf]  ;;  %v2929_v17 = vshll.u32 %v12353_v24, 16  ;;  %v2589_v15 = vshll.u32 %v2513_v31, 16  ;;  %14426 = vst [vmem:[#allocation19_spill] sm:$0xff] %v12388_v16 }
 0x2be   : > { %v2588_v30 = vrot.slane %v2586_v45, 7  ;;  %v3431_v49 = vsel %vm12225_vm9, %v9343_v59, %v3430_v28  ;;  %v2934_v4 = vshrl.u32 %v2791_v11, 16  ;;  %v2736_v22 = vld [vmem:[#allocation2 + $0x58] sm:$0xf]  ;;  %v2926_v33 = vor.u32 %v2925_v10, %v2922_v13  ;;  %v14427_v37 = vld [vmem:[#allocation18_spill] sm:$0xff]  ;;  %v14428_v13 = vld [vmem:[#allocation21_spill] sm:$0xff] }
 0x2bf   : > { %v2482_v2 = vmul.f32 %v2466_v21, %v12347_v6  ;;  %v3487_v27 = vunpack.c.l.b16 %v3431_v49  ;;  %v2937_v1 = vshll.u32 %v2791_v11, 16  ;;  %v2943_v31 = vshll.u32 %v12376_v62, 16  ;;  %v9398_v35 = vld [vmem:[#allocation2 + $0x38] sm:$0xf] }
 0x2c0   : > { %v2591_v14 = vor.u32 %v2589_v15, %v2588_v30  ;;  %v2592_v54 = vrot.slane %v2588_v30, 4  ;;  %v2936_v38 = vrot.slane %v2934_v4, 4  ;;  %v2927_v34 = vrot.slane %v2926_v33, 4  ;;  %v14468_v26 = vld [vmem:[#allocation27_spill] sm:$0xff] }
 0x2c1   : > { %v2498_v24 = vadd.f32 %v2482_v2, %v2302_v43  ;;  %v2255_v61 = vpop.f32.mrf.mxu3  ;;  %v3499_v63 = vpack.c.b16 %v3487_v27, %v3486_v60  ;;  %v2939_v47 = vrot.slane %v2937_v1, 5  ;;  %v12397_v59 = vadd.f32 %v14427_v37, %v1398_v56  ;;  %v12401_v43 = vpop.f32.mrf.mxu1  ;;  %v10322_v56 = vld [vmem:[%s14352_s9 + $0x118] sm:$0xff] }
 0x2c2   : > { %v2737_v40 = vsel %vm12192_vm5, %v2591_v14, %v2736_v22  ;;  %v2740_v6 = vsel %vm12200_vm6, %v2592_v54, %v2739_v9  ;;  %v2256_v19 = vadd.f32 %v2255_v61, %v12151_v25  ;;  %v10306_v52 = vld [vmem:[#allocation2 + $0x3c] sm:$0xf0]  ;;  %v1403_v45 = vadd.f32 %v14429_v3, %v14428_v13  ;;  %14430 = vst [vmem:[#allocation18_spill] sm:$0xff] %v12401_v43  ;;  %v3357_v9 = vld [vmem:[#allocation2 + $0x50] sm:$0xe] }
 0x2c3   : > { %2738 = vst [vmem:[#allocation2 + $0x58] sm:$0xf] %v2737_v40  ;;  %v2514_v12 = vpack.c.bf16 %v2498_v24, %v2498_v24  ;;  %v2306_v62 = vpop.f32.mrf.mxu0  ;;  %v9399_v28 = vor.u32 %v10306_v52, %v9398_v35  ;;  %v1744_v21 = vadd.f32 %v12159_v18, %v12363_v5  ;;  %v2931_v10 = vrot.slane %v2929_v17, 5  ;;  %v2824_v5 = vld [vmem:[#allocation2 + $0x54] sm:$0x1]  ;;  %4174 = vmatpush.bf16.msrb.mxu3 %v10322_v56 }
 0x2c4   : > { %2741 = vst [vmem:[#allocation2 + $0x5c] sm:$0x1] %v2740_v6  ;;  %v2467_v11 = vadd.f32 1.0, %v2256_v19  ;;  %v2940_v30 = vor.u32 %v2939_v47, %v2936_v38  ;;  %v12411_v15 = vmul.f32 %v12141_v39, %v1712_v0  ;;  %v2305_v4 = vadd.f32 %v2304_v58, %v12163_v7  ;;  %v14431_v0 = vld [vmem:[#allocation13_spill] sm:$0xff]  ;;  %v2792_v54 = vld [vmem:[#allocation2 + $0x50] sm:$0xf] }
 0x2c5   : > { %v2594_v49 = vshrl.u32 %v2514_v12, 16  ;;  %3583 = vmatmul.bf16.gmra.mxu1 %v3499_v63  ;;  %v1745_v22 = vadd.f32 %v12159_v18, %v12366_v20  ;;  %v2932_v2 = vsel %vm12240_vm12, %v2927_v34, %v2931_v10  ;;  %v2945_v27 = vrot.slane %v2943_v31, 5  ;;  %v2742_v38 = vld [vmem:[#allocation2 + $0x60] sm:$0xf]  ;;  %v2745_v20 = vld [vmem:[#allocation2 + $0x64] sm:$0x1] }
 0x2c6   : > { %v2483_v17 = vmul.f32 %v2467_v11, %v1744_v21  ;;  %v2941_v60 = vrot.slane %v2940_v30, 4  ;;  %v1713_v29 = vmax.f32 %v12397_v59, 0.0  ;;  %v12420_v33 = vadd.f32 %v14431_v0, %v1403_v45  ;;  %3776 = vmatmul.bf16.gmra.mxu2 %v9399_v28  ;;  %v9290_v35 = vld [vmem:[#allocation2 + $0x50] sm:$0xf] }
 0x2c7   : > { %v2596_v14 = vrot.slane %v2594_v49, 7  ;;  %v2597_v58 = vshll.u32 %v2514_v12, 16  ;;  %v9344_v61 = vrot.slane %v3357_v9, 9  ;;  %v3434_v63 = vrot.slane %v2824_v5, 5  ;;  %v12425_v12 = vpop.f32.mrf.mxu2 }
 0x2c8   : > { %v2499_v1 = vadd.f32 %v2483_v17, %v2305_v4  ;;  %v2946_v24 = vsel %vm12240_vm12, %v2941_v60, %v2945_v27  ;;  %v3081_v40 = vunpack.c.l.b16 %v2932_v2  ;;  %v2948_v3 = vshrl.u32 %v2792_v54, 16  ;;  %14432 = vst [vmem:[#allocation21_spill] sm:$0xff] %v12425_v12 }
 0x2c9   : > { %v2599_v34 = vor.u32 %v2597_v58, %v2596_v14  ;;  %v2600_v31 = vrot.slane %v2596_v14, 4  ;;  %v3082_v6 = vunpack.c.l.b16 %v2946_v24  ;;  %v2257_v19 = vpop.f32.mrf.mxu3  ;;  %v2951_v45 = vshll.u32 %v2792_v54, 16  ;;  %v12439_v58 = vpop.f32.mrf.mxu1 }
 0x2ca   : > { %v2515_v52 = vpack.c.bf16 %v2499_v1, %v2499_v1  ;;  %v2258_v47 = vadd.f32 %v2257_v19, %v12151_v25  ;;  %v10275_v37 = vld [vmem:[#allocation2 + $0x54] sm:$0xf0]  ;;  %v2957_v56 = vshll.u32 %v2824_v5, 16  ;;  %v2307_v4 = vadd.f32 %v2306_v62, %v12163_v7  ;;  %14433 = vst [vmem:[#allocation12_spill] sm:$0xff] %v12439_v58  ;;  %v2748_v1 = vld [vmem:[#allocation2 + $0x68] sm:$0xf] }
 0x2cb   : > { %v3358_v13 = vld [vmem:[#allocation2 + $0x58] sm:$0xe]  ;;  %v2743_v28 = vsel %vm12192_vm5, %v2599_v34, %v2742_v38  ;;  %v2746_v21 = vsel %vm12200_vm6, %v2600_v31, %v2745_v20  ;;  %v3094_v11 = vpack.c.b16 %v3082_v6, %v3081_v40  ;;  %v12431_v10 = vpop.f32.mrf.mxu0  ;;  %v12433_v30 = vld [vmem:[#allocation2 + $0x5c] sm:$0x1]  ;;  %v3435_v17 = vsel %vm12225_vm9, %v9344_v61, %v3434_v63  ;;  %v2751_v62 = vld [vmem:[#allocation2 + $0x6c] sm:$0x1] }
 0x2cc   : > { %2744 = vst [vmem:[#allocation2 + $0x60] sm:$0xf] %v2743_v28  ;;  %v2602_v49 = vshrl.u32 %v2515_v52, 16  ;;  %v2468_v9 = vadd.f32 1.0, %v2258_v47  ;;  %v2793_v2 = vld [vmem:[#allocation2 + $0x58] sm:$0xf]  ;;  %v9291_v27 = vor.u32 %v10275_v37, %v9290_v35  ;;  %v3488_v61 = vunpack.c.l.b16 %v3435_v17 }
 0x2cd   : > { %2747 = vst [vmem:[#allocation2 + $0x64] sm:$0x1] %v2746_v21  ;;  %v2605_v60 = vshll.u32 %v2515_v52, 16  ;;  %3178 = vmatmul.bf16.gmra.mxu3 %v3094_v11  ;;  %v9345_v0 = vrot.slane %v3358_v13, 9  ;;  %v3438_v14 = vrot.slane %v12433_v30, 5  ;;  %v2950_v38 = vrot.slane %v2948_v3, 4 }
 0x2ce   : > { %v2604_v54 = vrot.slane %v2602_v49, 7  ;;  %v2484_v5 = vmul.f32 %v2468_v9, %v1745_v22  ;;  %v2953_v20 = vrot.slane %v2951_v45, 5  ;;  %3328 = vmatmul.bf16.gmra.mxu0 %v9291_v27  ;;  %v2959_v63 = vrot.slane %v2957_v56, 5  ;;  %v9402_v21 = vld [vmem:[#allocation2 + $0x58] sm:$0xf] }
 0x2cf   : > { %v3439_v24 = vsel %vm12225_vm9, %v9345_v0, %v3438_v14  ;;  %v2962_v34 = vshrl.u32 %v2793_v2, 16  ;;  %v2965_v37 = vshll.u32 %v2793_v2, 16  ;;  %v2971_v22 = vshll.u32 %v12433_v30, 16  ;;  %v14434_v2 = vld [vmem:[#allocation20_spill] sm:$0xff]  ;;  %v10321_v14 = vld [vmem:[%s14352_s9 + $0x110] sm:$0xff] }
 0x2d0   : > { %v2607_v31 = vor.u32 %v2605_v60, %v2604_v54  ;;  %v2608_v40 = vrot.slane %v2604_v54, 4  ;;  %v2500_v6 = vadd.f32 %v2484_v5, %v2307_v4  ;;  %v3489_v19 = vunpack.c.l.b16 %v3439_v24  ;;  %v12461_v54 = vpop.f32.mrf.mxu2  ;;  %v2754_v5 = vld [vmem:[#allocation2 + $0x70] sm:$0xf]  ;;  %4175 = vmatpush.bf16.msrb.mxu3 %v10321_v14 }
 0x2d1   : > { %v2260_v35 = vpop.f32.mrf.mxu3  ;;  %v2954_v52 = vor.u32 %v2953_v20, %v2950_v38  ;;  %v2964_v47 = vrot.slane %v2962_v34, 4  ;;  %v1746_v11 = vadd.f32 %v12159_v18, %v12411_v15  ;;  %v2967_v30 = vrot.slane %v2965_v37, 5  ;;  %14435 = vst [vmem:[#allocation13_spill] sm:$0xff] %v12461_v54 }
 0x2d2   : > { %v2749_v13 = vsel %vm12192_vm5, %v2607_v31, %v2748_v1  ;;  %v2752_v3 = vsel %vm12200_vm6, %v2608_v40, %v2751_v62  ;;  %v2516_v45 = vpack.c.bf16 %v2500_v6, %v2500_v6  ;;  %v2261_v28 = vadd.f32 %v2260_v35, %v12151_v25 }
 0x2d3   : > { %2750 = vst [vmem:[#allocation2 + $0x68] sm:$0xf] %v2749_v13  ;;  %v3500_v56 = vpack.c.b16 %v3489_v19, %v3488_v61  ;;  %v12451_v49 = vpop.f32.mrf.mxu0  ;;  %v10307_v4 = vld [vmem:[#allocation2 + $0x5c] sm:$0xf0]  ;;  %v2955_v9 = vrot.slane %v2954_v52, 4  ;;  %v1730_v17 = vmul.f32 %v12141_v39, %v1713_v29  ;;  %v1714_v60 = vmax.f32 %v14434_v2, 0.0  ;;  %v12472_v52 = vpop.f32.mrf.mxu1 }
 0x2d4   : > { %2753 = vst [vmem:[#allocation2 + $0x6c] sm:$0x1] %v2752_v3  ;;  %v2610_v27 = vshrl.u32 %v2516_v45, 16  ;;  %v2469_v0 = vadd.f32 1.0, %v2261_v28  ;;  %v1715_v15 = vmax.f32 %v12420_v33, 0.0  ;;  %v9403_v38 = vor.u32 %v10307_v4, %v9402_v21 }
 0x2d5   : > { %3588 = vmatmul.bf16.gmra.mxu1 %v3500_v56  ;;  %v2960_v59 = vsel %vm12240_vm12, %v2955_v9, %v2959_v63  ;;  %v2968_v29 = vor.u32 %v2967_v30, %v2964_v47  ;;  %v12465_v20 = vld [vmem:[#allocation2 + $0x64] sm:$0x1]  ;;  %v2613_v62 = vshll.u32 %v2516_v45, 16  ;;  %v2310_v24 = vadd.f32 %v12431_v10, %v12163_v7  ;;  %v3359_v34 = vld [vmem:[#allocation2 + $0x60] sm:$0xe]  ;;  %v10334_v63 = vld [vmem:[%s14352_s9 + $0x178] sm:$0xff] }
 0x2d6   : > { %v2612_v1 = vrot.slane %v2610_v27, 7  ;;  %v2485_v61 = vmul.f32 %v2469_v0, %v1746_v11  ;;  %v2794_v31 = vld [vmem:[#allocation2 + $0x60] sm:$0xf]  ;;  %v2757_v33 = vld [vmem:[#allocation2 + $0x74] sm:$0x1]  ;;  %3781 = vmatmul.bf16.gmra.mxu2 %v9403_v38  ;;  %v2973_v6 = vrot.slane %v2971_v22, 5  ;;  %v3083_v19 = vunpack.c.l.b16 %v2960_v59  ;;  %4443 = vmatpush.bf16.msrb.mxu0 %v10334_v63 }
 0x2d7   : > { %v2969_v40 = vrot.slane %v2968_v29, 4  ;;  %v9346_v35 = vrot.slane %v3359_v34, 9  ;;  %14436 = vst [vmem:[#allocation20_spill] sm:$0xff] %v12472_v52  ;;  %v3442_v10 = vrot.slane %v12465_v20, 5  ;;  %v1747_v45 = vadd.f32 %v12159_v18, %v1730_v17  ;;  %v9294_v30 = vld [vmem:[#allocation2 + $0x60] sm:$0xf] }
 0x2d8   : > { %v2615_v47 = vor.u32 %v2613_v62, %v2612_v1  ;;  %v2616_v37 = vrot.slane %v2612_v1, 4  ;;  %v2501_v13 = vadd.f32 %v2485_v61, %v2310_v24  ;;  %v2976_v22 = vshrl.u32 %v2794_v31, 16  ;;  %v10333_v29 = vld [vmem:[%s14352_s9 + $0x170] sm:$0xff]  ;;  %v2760_v34 = vld [vmem:[#allocation2 + $0x78] sm:$0xf] }
 0x2d9   : > { %v2974_v3 = vsel %vm12240_vm12, %v2969_v40, %v2973_v6  ;;  %v2262_v28 = vpop.f32.mrf.mxu3  ;;  %v2979_v21 = vshll.u32 %v2794_v31, 16  ;;  %v12483_v0 = vmul.f32 %v12141_v39, %v1714_v60  ;;  %v12494_v1 = vmul.f32 %v12141_v39, %v1715_v15  ;;  %v10350_v39 = vld [vmem:[%s14352_s9 + $0x1b8] sm:$0xff]  ;;  %v10332_v15 = vld [vmem:[%s14352_s9 + $0x168] sm:$0xff] }
 0x2da   : > { %v2755_v11 = vsel %vm12192_vm5, %v2615_v47, %v2754_v5  ;;  %v2758_v56 = vsel %vm12200_vm6, %v2616_v37, %v2757_v33  ;;  %v2517_v4 = vpack.c.bf16 %v2501_v13, %v2501_v13  ;;  %v3084_v9 = vunpack.c.l.b16 %v2974_v3  ;;  %v10276_v2 = vld [vmem:[#allocation2 + $0x64] sm:$0xf0]  ;;  %4444 = vmatpush.bf16.msrb.mxu0 %v10333_v29  ;;  %v12511_v37 = vpop.f32.mrf.mxu2  ;;  %4637 = vmatpush.bf16.msra.mxu1 %v10350_v39 }
 0x2db   : > { %v3360_v27 = vld [vmem:[#allocation2 + $0x68] sm:$0xe]  ;;  %2756 = vst [vmem:[#allocation2 + $0x70] sm:$0xf] %v2755_v11  ;;  %v2263_v17 = vadd.f32 %v2262_v28, %v12151_v25  ;;  %v12486_v14 = vpop.f32.mrf.mxu0  ;;  %v9295_v38 = vor.u32 %v10276_v2, %v9294_v30  ;;  %v12488_v59 = vld [vmem:[#allocation2 + $0x6c] sm:$0x1]  ;;  %v3443_v24 = vsel %vm12225_vm9, %v9346_v35, %v3442_v10  ;;  %v2312_v31 = vadd.f32 %v12451_v49, %v12163_v7  ;;  %v12527_v29 = vpop.f32.mrf.mxu1 }
 0x2dc   : > { %v9347_v5 = vrot.slane %v3360_v27, 9  ;;  %2759 = vst [vmem:[#allocation2 + $0x74] sm:$0x1] %v2758_v56  ;;  %v2618_v62 = vshrl.u32 %v2517_v4, 16  ;;  %v3095_v60 = vpack.c.b16 %v3084_v9, %v3083_v19  ;;  %v2795_v61 = vld [vmem:[#allocation2 + $0x68] sm:$0xf]  ;;  %v3490_v3 = vunpack.c.l.b16 %v3443_v24 }
 0x2dd   : > { %v2470_v33 = vadd.f32 1.0, %v2263_v17  ;;  %v3446_v40 = vrot.slane %v12488_v59, 5  ;;  %v2985_v6 = vshll.u32 %v12465_v20, 16  ;;  %v2621_v35 = vshll.u32 %v2517_v4, 16  ;;  %v10358_v49 = vld [vmem:[%s14352_s9 + $0x1f8] sm:$0xff]  ;;  %14437 = vst [vmem:[#allocation29_spill] sm:$0xff] %v12511_v37 }
 0x2de   : > { %v2620_v19 = vrot.slane %v2618_v62, 7  ;;  %3183 = vmatmul.bf16.gmra.mxu3 %v3095_v60  ;;  %v2978_v63 = vrot.slane %v2976_v22, 4  ;;  %v2981_v47 = vrot.slane %v2979_v21, 5  ;;  %v2763_v20 = vld [vmem:[#allocation2 + $0x7c] sm:$0x1]  ;;  %3333 = vmatmul.bf16.gmra.mxu0 %v9295_v38  ;;  %v2990_v28 = vshrl.u32 %v2795_v61, 16 }
 0x2df   : > { %v2486_v13 = vmul.f32 %v2470_v33, %v1747_v45  ;;  %v3447_v10 = vsel %vm12225_vm9, %v9347_v5, %v3446_v40  ;;  %v10349_v22 = vld [vmem:[%s14352_s9 + $0x1b0] sm:$0xff]  ;;  %v10320_v21 = vld [vmem:[%s14352_s9 + $0x108] sm:$0xff]  ;;  %5054 = vmatpush.bf16.msra.mxu2 %v10358_v49  ;;  %v2987_v27 = vrot.slane %v2985_v6, 5  ;;  %v2993_v38 = vshll.u32 %v2795_v61, 16  ;;  %4445 = vmatpush.bf16.msrb.mxu0 %v10332_v15  ;;  %v10331_v5 = vld [vmem:[%s14352_s9 + $0x160] sm:$0xff]  ;;  %14438 = vst [vmem:[#allocation30_spill] sm:$0xff] %v12527_v29 }
 0x2e0   : > { %v2623_v11 = vor.u32 %v2621_v35, %v2620_v19  ;;  %v2624_v56 = vrot.slane %v2620_v19, 4  ;;  %v3491_v4 = vunpack.c.l.b16 %v3447_v10  ;;  %v2982_v9 = vor.u32 %v2981_v47, %v2978_v63  ;;  %v10357_v45 = vld [vmem:[%s14352_s9 + $0x1f0] sm:$0xff]  ;;  %4176 = vmatpush.bf16.msrb.mxu3 %v10320_v21  ;;  %v9406_v33 = vld [vmem:[#allocation2 + $0x68] sm:$0xf]  ;;  %4638 = vmatpush.bf16.msra.mxu1 %v10349_v22  ;;  %v2766_v22 = vld [vmem:[#allocation2 + $0x80] sm:$0xf] }
 0x2e1   : > { %v2502_v30 = vadd.f32 %v2486_v13, %v2312_v31  ;;  %v2265_v2 = vpop.f32.mrf.mxu3  ;;  %v2992_v17 = vrot.slane %v2990_v28, 4  ;;  %v2999_v19 = vshll.u32 %v12488_v59, 16  ;;  %v10356_v35 = vld [vmem:[%s14352_s9 + $0x1e8] sm:$0xff]  ;;  %v1748_v63 = vadd.f32 %v12159_v18, %v12483_v0  ;;  %v10330_v0 = vld [vmem:[%s14352_s9 + $0x158] sm:$0xff] }
 0x2e2   : > { %v2761_v62 = vsel %vm12192_vm5, %v2623_v11, %v2760_v34  ;;  %v2764_v60 = vsel %vm12200_vm6, %v2624_v56, %v2763_v20  ;;  %v2266_v24 = vadd.f32 %v2265_v2, %v12151_v25  ;;  %v3501_v31 = vpack.c.b16 %v3491_v4, %v3490_v3  ;;  %v10308_v40 = vld [vmem:[#allocation2 + $0x6c] sm:$0xf0]  ;;  %v10348_v34 = vld [vmem:[%s14352_s9 + $0x1a8] sm:$0xff]  ;;  %v3834_v29 = vld [vmem:[#allocation2 + $0x58] sm:$0xf] }
 0x2e3   : > { %2762 = vst [vmem:[#allocation2 + $0x78] sm:$0xf] %v2761_v62  ;;  %v2518_v61 = vpack.c.bf16 %v2502_v30, %v2502_v30  ;;  %v2316_v6 = vpop.f32.mrf.mxu0  ;;  %v9407_v39 = vor.u32 %v10308_v40, %v9406_v33  ;;  %v2983_v15 = vrot.slane %v2982_v9, 4  ;;  %v2995_v49 = vrot.slane %v2993_v38, 5  ;;  %v3361_v20 = vld [vmem:[#allocation2 + $0x70] sm:$0xe]  ;;  %5055 = vmatpush.bf16.msra.mxu2 %v10357_v45  ;;  %4446 = vmatpush.bf16.msrb.mxu0 %v10331_v5 }
 0x2e4   : > { %2765 = vst [vmem:[#allocation2 + $0x7c] sm:$0x1] %v2764_v60  ;;  %v2471_v47 = vadd.f32 1.0, %v2266_v24  ;;  %v2315_v59 = vadd.f32 %v12486_v14, %v12163_v7  ;;  %v12547_v10 = vadd.f32 %v12159_v18, %v12494_v1  ;;  %v12549_v3 = vld [vmem:[#allocation2 + $0x74] sm:$0x1]  ;;  %v12555_v11 = vadd.f32 %v2316_v6, %v12163_v7  ;;  %4639 = vmatpush.bf16.msra.mxu1 %v10348_v34  ;;  %v10347_v45 = vld [vmem:[%s14352_s9 + $0x1a0] sm:$0xff] }
 0x2e5   : > { %v2626_v13 = vshrl.u32 %v2518_v61, 16  ;;  %3593 = vmatmul.bf16.gmra.mxu1 %v3501_v31  ;;  %v2796_v28 = vld [vmem:[#allocation2 + $0x70] sm:$0xf]  ;;  %v2988_v14 = vsel %vm12240_vm12, %v2983_v15, %v2987_v27  ;;  %v2996_v56 = vor.u32 %v2995_v49, %v2992_v17  ;;  %v2629_v18 = vshll.u32 %v2518_v61, 16  ;;  %v2769_v30 = vld [vmem:[#allocation2 + $0x84] sm:$0x1]  ;;  %v12566_v17 = vpop.f32.mrf.mxu2 }
 0x2e6   : > { %v2487_v21 = vmul.f32 %v2471_v47, %v1748_v63  ;;  %3786 = vmatmul.bf16.gmra.mxu2 %v9407_v39  ;;  %v3001_v1 = vrot.slane %v2999_v19, 5  ;;  %v3004_v9 = vshrl.u32 %v2796_v28, 16  ;;  %v9348_v5 = vrot.slane %v3361_v20, 9  ;;  %v10355_v27 = vld [vmem:[%s14352_s9 + $0x1e0] sm:$0xff]  ;;  %14439 = vst [vmem:[#allocation31_spill] sm:$0xff] %v12566_v17  ;;  %v10329_v61 = vld [vmem:[%s14352_s9 + $0x150] sm:$0xff] }
 0x2e7   : > { %v2628_v4 = vrot.slane %v2626_v13, 7  ;;  %v2997_v38 = vrot.slane %v2996_v56, 4  ;;  %v3450_v7 = vrot.slane %v12549_v3, 5  ;;  %5056 = vmatpush.bf16.msra.mxu2 %v10356_v35  ;;  %v3085_v24 = vunpack.c.l.b16 %v2988_v14  ;;  %v9298_v33 = vld [vmem:[#allocation2 + $0x70] sm:$0xf]  ;;  %4447 = vmatpush.bf16.msrb.mxu0 %v10330_v0  ;;  %v10354_v14 = vld [vmem:[%s14352_s9 + $0x1d8] sm:$0xff] }
 0x2e8   : > { %v2503_v2 = vadd.f32 %v2487_v21, %v2315_v59  ;;  %v3007_v40 = vshll.u32 %v2796_v28, 16  ;;  %v3013_v35 = vshll.u32 %v12549_v3, 16  ;;  %v3006_v59 = vrot.slane %v3004_v9, 4  ;;  %4640 = vmatpush.bf16.msra.mxu1 %v10347_v45  ;;  %v12581_v28 = vpop.f32.mrf.mxu1  ;;  %v10328_v9 = vld [vmem:[%s14352_s9 + $0x148] sm:$0xff] }
 0x2e9   : > { %v2631_v62 = vor.u32 %v2629_v18, %v2628_v4  ;;  %v2632_v60 = vrot.slane %v2628_v4, 4  ;;  %v2267_v31 = vpop.f32.mrf.mxu3  ;;  %v3002_v39 = vsel %vm12240_vm12, %v2997_v38, %v3001_v1  ;;  %14440 = vst [vmem:[#allocation32_spill] sm:$0xff] %v12581_v28  ;;  %v3451_v3 = vsel %vm12225_vm9, %v9348_v5, %v3450_v7  ;;  %v2772_v5 = vld [vmem:[#allocation2 + $0x88] sm:$0xf]  ;;  %v2775_v7 = vld [vmem:[#allocation2 + $0x8c] sm:$0x1] }
 0x2ea   : > { %v2519_v6 = vpack.c.bf16 %v2503_v2, %v2503_v2  ;;  %v2268_v15 = vadd.f32 %v2267_v31, %v12151_v25  ;;  %v10277_v19 = vld [vmem:[#allocation2 + $0x74] sm:$0xf0]  ;;  %v3086_v49 = vunpack.c.l.b16 %v3002_v39  ;;  %v3009_v1 = vrot.slane %v3007_v40, 5  ;;  %v10319_v31 = vld [vmem:[%s14352_s9 + $0x100] sm:$0xff]  ;;  %v10353_v39 = vld [vmem:[%s14352_s9 + $0x1d0] sm:$0xff] }
 0x2eb   : > { %v3362_v34 = vld [vmem:[#allocation2 + $0x78] sm:$0xe]  ;;  %v2767_v63 = vsel %vm12192_vm5, %v2631_v62, %v2766_v22  ;;  %v2770_v47 = vsel %vm12200_vm6, %v2632_v60, %v2769_v30  ;;  %v12579_v20 = vld [vmem:[#allocation2 + $0x7c] sm:$0x1]  ;;  %v9299_v21 = vor.u32 %v10277_v19, %v9298_v33  ;;  %5057 = vmatpush.bf16.msra.mxu2 %v10355_v27  ;;  %4448 = vmatpush.bf16.msrb.mxu0 %v10329_v61  ;;  %v3492_v62 = vunpack.c.l.b16 %v3451_v3 }
 0x2ec   : > { %v2797_v13 = vld [vmem:[#allocation2 + $0x78] sm:$0xf]  ;;  %2768 = vst [vmem:[#allocation2 + $0x80] sm:$0xf] %v2767_v63  ;;  %v2634_v25 = vshrl.u32 %v2519_v6, 16  ;;  %v2472_v0 = vadd.f32 1.0, %v2268_v15  ;;  %v3096_v56 = vpack.c.b16 %v3086_v49, %v3085_v24  ;;  %v3010_v60 = vor.u32 %v3009_v1, %v3006_v59  ;;  %4177 = vmatpush.bf16.msrb.mxu3 %v10319_v31 }
 0x2ed   : > { %v10346_v22 = vld [vmem:[%s14352_s9 + $0x198] sm:$0xff]  ;;  %2771 = vst [vmem:[#allocation2 + $0x84] sm:$0x1] %v2770_v47  ;;  %v9349_v4 = vrot.slane %v3362_v34, 9  ;;  %v3454_v18 = vrot.slane %v12579_v20, 5  ;;  %v2637_v30 = vshll.u32 %v2519_v6, 16 }
 0x2ee   : > { %v2636_v45 = vrot.slane %v2634_v25, 7  ;;  %v2488_v2 = vmul.f32 %v2472_v0, %v12547_v10  ;;  %v3018_v38 = vshrl.u32 %v2797_v13, 16  ;;  %3188 = vmatmul.bf16.gmra.mxu3 %v3096_v56  ;;  %3338 = vmatmul.bf16.gmra.mxu0 %v9299_v21  ;;  %v3021_v24 = vshll.u32 %v2797_v13, 16  ;;  %v10345_v6 = vld [vmem:[%s14352_s9 + $0x190] sm:$0xff]  ;;  %v9410_v25 = vld [vmem:[#allocation2 + $0x78] sm:$0xf]  ;;  %v12616_v0 = vpop.f32.mrf.mxu2 }
 0x2ef   : > { %v3455_v27 = vsel %vm12225_vm9, %v9349_v4, %v3454_v18  ;;  %4641 = vmatpush.bf16.msra.mxu1 %v10346_v22  ;;  %5058 = vmatpush.bf16.msra.mxu2 %v10354_v14  ;;  %v3011_v15 = vrot.slane %v3010_v60, 4  ;;  %v3027_v63 = vshll.u32 %v12579_v20, 16  ;;  %14441 = vst [vmem:[#allocation33_spill] sm:$0xff] %v12616_v0  ;;  %v3015_v20 = vrot.slane %v3013_v35, 5  ;;  %v10344_v22 = vld [vmem:[%s14352_s9 + $0x188] sm:$0xff] }
 0x2f0   : > { %v2639_v33 = vor.u32 %v2637_v30, %v2636_v45  ;;  %v2640_v40 = vrot.slane %v2636_v45, 4  ;;  %v2504_v61 = vadd.f32 %v2488_v2, %v12555_v11  ;;  %v3493_v10 = vunpack.c.l.b16 %v3455_v27  ;;  %4449 = vmatpush.bf16.msrb.mxu0 %v10328_v9  ;;  %v10327_v11 = vld [vmem:[%s14352_s9 + $0x140] sm:$0xff]  ;;  %v10352_v18 = vld [vmem:[%s14352_s9 + $0x1c8] sm:$0xff]  ;;  %v12628_v2 = vpop.f32.mrf.mxu1  ;;  %v2781_v60 = vld [vmem:[#allocation2 + $0x94] sm:$0x1] }
 0x2f1   : > { %v3020_v19 = vrot.slane %v3018_v38, 4  ;;  %v3023_v34 = vrot.slane %v3021_v24, 5  ;;  %v3016_v35 = vsel %vm12240_vm12, %v3011_v15, %v3015_v20  ;;  %v3029_v9 = vrot.slane %v3027_v63, 5  ;;  %14442 = vst [vmem:[#allocation34_spill] sm:$0xff] %v12628_v2 }
 0x2f2   : > { %v2773_v47 = vsel %vm12192_vm5, %v2639_v33, %v2772_v5  ;;  %v2776_v49 = vsel %vm12200_vm6, %v2640_v40, %v2775_v7  ;;  %v2520_v13 = vpack.c.bf16 %v2504_v61, %v2504_v61  ;;  %v3502_v59 = vpack.c.b16 %v3493_v10, %v3492_v62  ;;  %v2778_v62 = vld [vmem:[#allocation2 + $0x90] sm:$0xf] }
 0x2f3   : > { %2774 = vst [vmem:[#allocation2 + $0x88] sm:$0xf] %v2773_v47  ;;  %v10309_v21 = vld [vmem:[#allocation2 + $0x7c] sm:$0xf0]  ;;  %v3024_v3 = vor.u32 %v3023_v34, %v3020_v19  ;;  %4642 = vmatpush.bf16.msra.mxu1 %v10345_v6  ;;  %5059 = vmatpush.bf16.msra.mxu2 %v10353_v39  ;;  %v3087_v15 = vunpack.c.l.b16 %v3016_v35  ;;  %v4702_v34 = vld [vmem:[#allocation2 + $0x10] sm:$0xf] }
 0x2f4   : > { %2777 = vst [vmem:[#allocation2 + $0x8c] sm:$0x1] %v2776_v49  ;;  %v2642_v14 = vshrl.u32 %v2520_v13, 16  ;;  %v9411_v56 = vor.u32 %v10309_v21, %v9410_v25  ;;  %v12621_v4 = vld [vmem:[#allocation2 + $0x84] sm:$0x1]  ;;  %4450 = vmatpush.bf16.msrb.mxu0 %v10327_v11  ;;  %v2645_v5 = vshll.u32 %v2520_v13, 16 }
 0x2f5   : > { %3598 = vmatmul.bf16.gmra.mxu1 %v3502_v59  ;;  %v3025_v1 = vrot.slane %v3024_v3, 4  ;;  %v3363_v45 = vld [vmem:[#allocation2 + $0x80] sm:$0xe]  ;;  %v3458_v33 = vrot.slane %v12621_v4, 5 }
 0x2f6   : > { %v2798_v30 = vld [vmem:[#allocation2 + $0x80] sm:$0xf]  ;;  %v2644_v38 = vrot.slane %v2642_v14, 7  ;;  %3791 = vmatmul.bf16.gmra.mxu2 %v9411_v56  ;;  %v9350_v31 = vrot.slane %v3363_v45, 9  ;;  %v4236_v14 = vld [vmem:[#allocation2 + $0x10] sm:$0xe]  ;;  %v12645_v35 = vpop.f32.mrf.mxu2 }
 0x2f7   : > { %v3032_v7 = vshrl.u32 %v2798_v30, 16  ;;  %v3035_v27 = vshll.u32 %v2798_v30, 16  ;;  %v3030_v24 = vsel %vm12240_vm12, %v3025_v1, %v3029_v9  ;;  %4643 = vmatpush.bf16.msra.mxu1 %v10344_v22  ;;  %5060 = vmatpush.bf16.msra.mxu2 %v10352_v18  ;;  %v10343_v6 = vld [vmem:[%s14352_s9 + $0x180] sm:$0xff]  ;;  %14443 = vst [vmem:[#allocation35_spill] sm:$0xff] %v12645_v35  ;;  %v4704_v45 = vld [vmem:[#allocation2 + $0x18] sm:$0xf] }
 0x2f8   : > { %v2647_v40 = vor.u32 %v2645_v5, %v2644_v38  ;;  %v2648_v61 = vrot.slane %v2644_v38, 4  ;;  %v3088_v10 = vunpack.c.l.b16 %v3030_v24  ;;  %v10351_v39 = vld [vmem:[%s14352_s9 + $0x1c0] sm:$0xff]  ;;  %v3459_v3 = vsel %vm12225_vm9, %v9350_v31, %v3458_v33  ;;  %v3830_v35 = vld [vmem:[#allocation2 + $0x38] sm:$0xf] }
 0x2f9   : > { %v9302_v19 = vld [vmem:[#allocation2 + $0x80] sm:$0xf]  ;;  %v3034_v13 = vrot.slane %v3032_v7, 4  ;;  %v3037_v59 = vrot.slane %v3035_v27, 5  ;;  %v4735_v30 = vshrl.u32 %v4702_v34, 16  ;;  %v3494_v5 = vunpack.c.l.b16 %v3459_v3 }
 0x2fa   : > { %v2779_v63 = vsel %vm12192_vm5, %v2647_v40, %v2778_v62  ;;  %v2782_v11 = vsel %vm12200_vm6, %v2648_v61, %v2781_v60  ;;  %v10278_v47 = vld [vmem:[#allocation2 + $0x84] sm:$0xf0]  ;;  %v3097_v25 = vpack.c.b16 %v3088_v10, %v3087_v15  ;;  %v12649_v62 = vld [vmem:[#allocation2 + $0x14] sm:$0x1]  ;;  %v4738_v33 = vshll.u32 %v4702_v34, 16  ;;  %v10366_v40 = vld [vmem:[%s14352_s9 + $0x238] sm:$0xff]  ;;  %v12654_v61 = vpop.f32.mrf.mxu1 }
 0x2fb   : > { %v3364_v49 = vld [vmem:[#allocation2 + $0x88] sm:$0xe]  ;;  %2780 = vst [vmem:[#allocation2 + $0x90] sm:$0xf] %v2779_v63  ;;  %v9303_v21 = vor.u32 %v10278_v47, %v9302_v19  ;;  %v2831_v20 = vld [vmem:[#allocation2 + $0x8c] sm:$0x1]  ;;  %4644 = vmatpush.bf16.msra.mxu1 %v10343_v6  ;;  %5061 = vmatpush.bf16.msra.mxu2 %v10351_v39  ;;  %v3038_v7 = vor.u32 %v3037_v59, %v3034_v13 }
 0x2fc   : > { %v9351_v22 = vrot.slane %v3364_v49, 9  ;;  %2783 = vst [vmem:[#allocation2 + $0x94] sm:$0x1] %v2782_v11  ;;  %v3462_v56 = vrot.slane %v2831_v20, 5  ;;  %v2799_v18 = vld [vmem:[#allocation2 + $0x88] sm:$0xf]  ;;  %5327 = vmatpush.bf16.msra.mxu3 %v10366_v40 }
 0x2fd   : > { %v3046_v1 = vshrl.u32 %v2799_v18, 16  ;;  %v3049_v9 = vshll.u32 %v2799_v18, 16  ;;  %v3055_v27 = vshll.u32 %v2831_v20, 16  ;;  %14444 = vst [vmem:[#allocation36_spill] sm:$0xff] %v12654_v61  ;;  %v3041_v10 = vshll.u32 %v12621_v4, 16 }
 0x2fe   : > { %v3463_v38 = vsel %vm12225_vm9, %v9351_v22, %v3462_v56  ;;  %3193 = vmatmul.bf16.gmra.mxu3 %v3097_v25  ;;  %3343 = vmatmul.bf16.gmra.mxu0 %v9303_v21  ;;  %v12657_v6 = vld [vmem:[#allocation2 + $0xc] sm:$0x1]  ;;  %v9481_v39 = vrot.slane %v4236_v14, 9  ;;  %v4749_v15 = vshrl.u32 %v4704_v45, 16  ;;  %v9414_v63 = vld [vmem:[#allocation2 + $0x88] sm:$0xf] }
 0x2ff   : > { %v3495_v60 = vunpack.c.l.b16 %v3463_v38  ;;  %v3048_v24 = vrot.slane %v3046_v1, 4  ;;  %v3051_v31 = vrot.slane %v3049_v9, 5  ;;  %v4235_v47 = vld [vmem:[#allocation2 + $0x8] sm:$0xe]  ;;  %v4289_v49 = vrot.slane %v12649_v62, 5 }
 0x300   : > { %v4752_v13 = vshll.u32 %v4704_v45, 16  ;;  %v3039_v59 = vrot.slane %v3038_v7, 4  ;;  %v3057_v25 = vrot.slane %v3055_v27, 5  ;;  %v4737_v21 = vrot.slane %v4735_v30, 4  ;;  %v3820_v18 = vld [vmem:[#allocation2 + $0x10] sm:$0xf] }
 0x301   : > { %v3503_v19 = vpack.c.b16 %v3495_v60, %v3494_v5  ;;  %v3052_v11 = vor.u32 %v3051_v31, %v3048_v24  ;;  %v4751_v20 = vrot.slane %v4749_v15, 4  ;;  %v4740_v4 = vrot.slane %v4738_v33, 5  ;;  %v4705_v5 = vld [vmem:[#allocation2 + $0x1c] sm:$0x1]  ;;  %v3818_v7 = vld [vmem:[#allocation2 + $0x8] sm:$0xf]  ;;  %v12667_v33 = vpop.f32.mrf.mxu2 }
 0x302   : > { %v10310_v34 = vld [vmem:[#allocation2 + $0x8c] sm:$0xf0]  ;;  %v4754_v56 = vrot.slane %v4752_v13, 5  ;;  %v3043_v14 = vrot.slane %v3041_v10, 5  ;;  %v9480_v1 = vrot.slane %v4235_v47, 9  ;;  %v4285_v9 = vrot.slane %v12657_v6, 5  ;;  %v12671_v13 = vpop.f32.mrf.mxu1 }
 0x303   : > { %v9415_v3 = vor.u32 %v10310_v34, %v9414_v63  ;;  %v3053_v22 = vrot.slane %v3052_v11, 4  ;;  %v4290_v45 = vsel %vm12225_vm9, %v9481_v39, %v4289_v49  ;;  %v4703_v27 = vld [vmem:[#allocation2 + $0x14] sm:$0x1]  ;;  %v3865_v24 = vshrl.u32 %v3820_v18, 16  ;;  %14445 = vst [vmem:[#allocation37_spill] sm:$0xff] %v12667_v33 }
 0x304   : > { %v3044_v30 = vsel %vm12240_vm12, %v3039_v59, %v3043_v14  ;;  %v4755_v60 = vor.u32 %v4754_v56, %v4751_v20  ;;  %v3868_v31 = vshll.u32 %v3820_v18, 16  ;;  %v4741_v10 = vor.u32 %v4740_v4, %v4737_v21  ;;  %14446 = vst [vmem:[#allocation38_spill] sm:$0xff] %v12671_v13  ;;  %v4708_v21 = vld [vmem:[#allocation2 + $0x28] sm:$0xf]  ;;  %v4726_v16 = vld [vmem:[#allocation2 + $0x80] sm:$0xf] }
 0x305   : > { %3603 = vmatmul.bf16.gmra.mxu1 %v3503_v19  ;;  %v3058_v38 = vsel %vm12240_vm12, %v3053_v22, %v3057_v25  ;;  %v4286_v15 = vsel %vm12225_vm9, %v9480_v1, %v4285_v9  ;;  %v4758_v19 = vshll.u32 %v4705_v5, 16  ;;  %v3851_v63 = vshrl.u32 %v3818_v7, 16  ;;  %v4716_v33 = vld [vmem:[#allocation2 + $0x48] sm:$0xf]  ;;  %v12933_v8 = vld [vmem:[#allocation2 + $0x94] sm:$0x1] }
 0x306   : > { %3796 = vmatmul.bf16.gmra.mxu2 %v9415_v3  ;;  %v3090_v40 = vunpack.c.l.b16 %v3058_v38  ;;  %v3854_v39 = vshll.u32 %v3818_v7, 16  ;;  %v3089_v11 = vunpack.c.l.b16 %v3044_v30  ;;  %v4364_v47 = vunpack.c.l.b16 %v4290_v45  ;;  %v4706_v38 = vld [vmem:[#allocation2 + $0x20] sm:$0xf]  ;;  %v12677_v7 = vld [vmem:[#allocation2 + $0x24] sm:$0x1] }
 0x307   : > { %v4744_v49 = vshll.u32 %v4703_v27, 16  ;;  %v4756_v59 = vrot.slane %v4755_v60, 4  ;;  %v3867_v25 = vrot.slane %v3865_v24, 4  ;;  %v3870_v20 = vrot.slane %v3868_v31, 5  ;;  %v4238_v30 = vld [vmem:[#allocation2 + $0x20] sm:$0xe] }
 0x308   : > { %v3098_v22 = vpack.c.b16 %v3090_v40, %v3089_v11  ;;  %v4363_v3 = vunpack.c.l.b16 %v4286_v15  ;;  %v4742_v56 = vrot.slane %v4741_v10, 4  ;;  %v4760_v4 = vrot.slane %v4758_v19, 5  ;;  %v10335_v60 = vld [vmem:[#allocation2 + $0x14] sm:$0xf0]  ;;  %v12681_v31 = vld [vmem:[#allocation2 + $0x1c] sm:$0x1] }
 0x309   : > { %v3853_v18 = vrot.slane %v3851_v63, 4  ;;  %v3856_v14 = vrot.slane %v3854_v39, 5  ;;  %v4746_v9 = vrot.slane %v4744_v49, 5  ;;  %v3871_v5 = vor.u32 %v3870_v20, %v3867_v25  ;;  %v10365_v10 = vld [vmem:[%s14352_s9 + $0x230] sm:$0xff]  ;;  %v4237_v63 = vld [vmem:[#allocation2 + $0x18] sm:$0xe] }
 0x30a   : > { %v12673_v34 = vpop.f32.mrf.mxu0  ;;  %v4379_v1 = vpack.c.b16 %v4364_v47, %v4363_v3  ;;  %v4761_v45 = vsel %vm12240_vm12, %v4756_v59, %v4760_v4  ;;  %v4777_v27 = vshrl.u32 %v4708_v21, 16  ;;  %v4780_v40 = vshll.u32 %v4708_v21, 16  ;;  %v12687_v47 = vpop.f32.mrf.mxu2  ;;  %5328 = vmatpush.bf16.msra.mxu3 %v10365_v10  ;;  %v3848_v23 = vld [vmem:[#allocation2 + $0x90] sm:$0xf] }
 0x30b   : > { %v4747_v24 = vsel %vm12240_vm12, %v4742_v56, %v4746_v9  ;;  %v3857_v15 = vor.u32 %v3856_v14, %v3853_v18  ;;  %v3874_v19 = vshll.u32 %v12649_v62, 16  ;;  %v4763_v39 = vshrl.u32 %v4706_v38, 16  ;;  %14447 = vst [vmem:[#allocation39_spill] sm:$0xff] %v12687_v47  ;;  %v9530_v56 = vld [vmem:[#allocation2 + $0x10] sm:$0xf] }
 0x30c   : > { %v4766_v11 = vshll.u32 %v4706_v38, 16  ;;  %v4975_v49 = vunpack.c.l.b16 %v4761_v45  ;;  %v3860_v59 = vshll.u32 %v12657_v6, 16  ;;  %v9483_v25 = vrot.slane %v4238_v30, 9  ;;  %v3824_v38 = vld [vmem:[#allocation2 + $0x20] sm:$0xf] }
 0x30d   : > { %v4297_v20 = vrot.slane %v12677_v7, 5  ;;  %v3872_v21 = vrot.slane %v3871_v5, 4  ;;  %v4779_v4 = vrot.slane %v4777_v27, 4  ;;  %v4782_v62 = vrot.slane %v4780_v40, 5  ;;  %v4709_v5 = vld [vmem:[#allocation2 + $0x2c] sm:$0x1] }
 0x30e   : > { %3198 = vmatmul.bf16.gmra.mxu3 %v3098_v22  ;;  %4451 = vmatmul.bf16.vlgmr.msrb.gmra.mxu0 %v4379_v1  ;;  %v9531_v18 = vor.u32 %v10335_v60, %v9530_v56  ;;  %v4974_v14 = vunpack.c.l.b16 %v4747_v24  ;;  %v9482_v1 = vrot.slane %v4237_v63, 9  ;;  %v4293_v9 = vrot.slane %v12681_v31, 5  ;;  %v4707_v60 = vld [vmem:[#allocation2 + $0x24] sm:$0x1]  ;;  %v3826_v47 = vld [vmem:[#allocation2 + $0x28] sm:$0xf] }
 0x30f   : > { %v3858_v45 = vrot.slane %v3857_v15, 4  ;;  %v3876_v6 = vrot.slane %v3874_v19, 5  ;;  %v4765_v30 = vrot.slane %v4763_v39, 4  ;;  %v4768_v55 = vrot.slane %v4766_v11, 5 }
 0x310   : > { %v4990_v10 = vpack.c.b16 %v4975_v49, %v4974_v14  ;;  %v3862_v13 = vrot.slane %v3860_v59, 5  ;;  %v4298_v61 = vsel %vm12225_vm9, %v9483_v25, %v4297_v20  ;;  %v4783_v24 = vor.u32 %v4782_v62, %v4779_v4 }
 0x311   : > { %v3877_v27 = vsel %vm12240_vm12, %v3872_v21, %v3876_v6  ;;  %v3893_v40 = vshrl.u32 %v3824_v38, 16  ;;  %v3896_v63 = vshll.u32 %v3824_v38, 16  ;;  %v3879_v15 = vshrl.u32 %v3822_v41, 16 }
 0x312   : > { %v12691_v22 = vpop.f32.mrf.mxu1  ;;  %v12693_v3 = vpop.f32.mrf.mxu0  ;;  %v3882_v19 = vshll.u32 %v3822_v41, 16  ;;  %v3863_v39 = vsel %vm12240_vm12, %v3858_v45, %v3862_v13  ;;  %v4294_v11 = vsel %vm12225_vm9, %v9482_v1, %v4293_v9  ;;  %v4769_v49 = vor.u32 %v4768_v55, %v4765_v30 }
 0x313   : > { %v4786_v59 = vshll.u32 %v4709_v5, 16  ;;  %v4091_v25 = vunpack.c.l.b16 %v3877_v27  ;;  %v4366_v20 = vunpack.c.l.b16 %v4298_v61  ;;  %v4772_v56 = vshll.u32 %v4707_v60, 16  ;;  %v12708_v38 = vpop.f32.mrf.mxu2  ;;  %v10336_v61 = vld [vmem:[#allocation2 + $0x24] sm:$0xf0]  ;;  %v4710_v27 = vld [vmem:[#allocation2 + $0x30] sm:$0xf] }
 0x314   : > { %v4784_v4 = vrot.slane %v4783_v24, 4  ;;  %v3895_v62 = vrot.slane %v3893_v40, 4  ;;  %v3898_v14 = vrot.slane %v3896_v63, 5  ;;  %14448 = vst [vmem:[#allocation40_spill] sm:$0xff] %v12708_v38  ;;  %v4090_v41 = vunpack.c.l.b16 %v3863_v39  ;;  %v12712_v40 = vld [vmem:[#allocation2 + $0x34] sm:$0x1] }
 0x315   : > { %4645 = vmatmul.bf16.vlgmr.msra.gmra.mxu1 %v9531_v18  ;;  %v4365_v6 = vunpack.c.l.b16 %v4294_v11  ;;  %v3881_v13 = vrot.slane %v3879_v15, 4  ;;  %v3884_v45 = vrot.slane %v3882_v19, 5  ;;  %v4770_v1 = vrot.slane %v4769_v49, 4  ;;  %v4240_v63 = vld [vmem:[#allocation2 + $0x30] sm:$0xe] }
 0x316   : > { %5062 = vmatmul.bf16.vlgmr.msra.gmra.mxu2 %v4990_v10  ;;  %v4712_v10 = vld [vmem:[#allocation2 + $0x38] sm:$0xf]  ;;  %v4788_v55 = vrot.slane %v4786_v59, 5  ;;  %v4106_v9 = vpack.c.b16 %v4091_v25, %v4090_v41  ;;  %v4774_v5 = vrot.slane %v4772_v56, 5  ;;  %v3899_v24 = vor.u32 %v3898_v14, %v3895_v62  ;;  %v9534_v19 = vld [vmem:[#allocation2 + $0x20] sm:$0xf] }
 0x317   : > { %v4380_v30 = vpack.c.b16 %v4366_v20, %v4365_v6  ;;  %v4805_v38 = vshrl.u32 %v4712_v10, 16  ;;  %v4808_v39 = vshll.u32 %v4712_v10, 16  ;;  %v3885_v11 = vor.u32 %v3884_v45, %v3881_v13  ;;  %v10364_v25 = vld [vmem:[%s14352_s9 + $0x228] sm:$0xff] }
 0x318   : > { %v4789_v60 = vsel %vm12240_vm12, %v4784_v4, %v4788_v55  ;;  %v3888_v49 = vshll.u32 %v12681_v31, 16  ;;  %v3902_v59 = vshll.u32 %v12677_v7, 16  ;;  %v4775_v56 = vsel %vm12240_vm12, %v4770_v1, %v4774_v5  ;;  %v12722_v4 = vld [vmem:[#allocation2 + $0x2c] sm:$0x1]  ;;  %v4239_v62 = vld [vmem:[#allocation2 + $0x28] sm:$0xe]  ;;  %5329 = vmatpush.bf16.msra.mxu3 %v10364_v25 }
 0x319   : > { %v4791_v14 = vshrl.u32 %v4710_v27, 16  ;;  %v4794_v41 = vshll.u32 %v4710_v27, 16  ;;  %v9535_v6 = vor.u32 %v10336_v61, %v9534_v19  ;;  %v4977_v13 = vunpack.c.l.b16 %v4789_v60  ;;  %v3828_v1 = vld [vmem:[#allocation2 + $0x30] sm:$0xf] }
 0x31a   : > { %v12704_v18 = vpop.f32.mrf.mxu1  ;;  %v12706_v21 = vpop.f32.mrf.mxu0  ;;  %v9485_v45 = vrot.slane %v4240_v63, 9  ;;  %v4305_v31 = vrot.slane %v12712_v40, 5  ;;  %v4807_v55 = vrot.slane %v4805_v38, 4  ;;  %v3886_v5 = vrot.slane %v3885_v11, 4 }
 0x31b   : > { %v4301_v27 = vrot.slane %v12722_v4, 5  ;;  %v3890_v60 = vrot.slane %v3888_v49, 5  ;;  %v3904_v63 = vrot.slane %v3902_v59, 5  ;;  %v4793_v19 = vrot.slane %v4791_v14, 4 }
 0x31c   : > { %v4796_v25 = vrot.slane %v4794_v41, 5  ;;  %v4306_v38 = vsel %vm12225_vm9, %v9485_v45, %v4305_v31  ;;  %v3924_v11 = vshll.u32 %v3828_v1, 16  ;;  %v3907_v41 = vshrl.u32 %v3826_v47, 16 }
 0x31d   : > { %v3891_v59 = vsel %vm12240_vm12, %v3886_v5, %v3890_v60  ;;  %v4368_v45 = vunpack.c.l.b16 %v4306_v38 }
 0x31e   : > { %4178 = vmatmul.bf16.vlgmr.msrb.gmra.mxu3 %v4106_v9  ;;  %4456 = vmatmul.bf16.gmra.mxu0 %v4380_v30  ;;  %v4810_v9 = vrot.slane %v4808_v39, 5  ;;  %v4976_v30 = vunpack.c.l.b16 %v4775_v56  ;;  %v3921_v39 = vshrl.u32 %v3828_v1, 16  ;;  %v4797_v31 = vor.u32 %v4796_v25, %v4793_v19 }
 0x31f   : > { %v3164_v15 = vpop.f32.mrf.mxu3 }
 0x320   : > { %v3310_v20 = vadd.f32 %v12673_v34, %v3164_v15  ;;  %v3900_v34 = vrot.slane %v3899_v24, 4  ;;  %v9484_v15 = vrot.slane %v4239_v62, 9  ;;  %v4713_v24 = vld [vmem:[#allocation2 + $0x3c] sm:$0x1]  ;;  %v4711_v62 = vld [vmem:[#allocation2 + $0x34] sm:$0x1]  ;;  %v4811_v2 = vor.u32 %v4810_v9, %v4807_v55 }
 0x321   : > { %v4814_v1 = vshll.u32 %v4713_v24, 16  ;;  %v4798_v38 = vrot.slane %v4797_v31, 4 }
 0x322   : > { %v12726_v7 = vadd.f32 %v12691_v22, %v3310_v20  ;;  %v12728_v10 = vpop.f32.mrf.mxu1  ;;  %v12731_v61 = vpop.f32.mrf.mxu0  ;;  %v4991_v20 = vpack.c.b16 %v4977_v13, %v4976_v30  ;;  %v3905_v56 = vsel %vm12240_vm12, %v3900_v34, %v3904_v63  ;;  %v4302_v14 = vsel %vm12225_vm9, %v9484_v15, %v4301_v27 }
 0x323   : > { %v12733_v22 = vpop.f32.mrf.mxu2  ;;  %v4093_v30 = vunpack.c.l.b16 %v3905_v56  ;;  %v3923_v34 = vrot.slane %v3921_v39, 4  ;;  %v3926_v63 = vrot.slane %v3924_v11, 5  ;;  %v4367_v5 = vunpack.c.l.b16 %v4302_v14  ;;  %v4242_v39 = vld [vmem:[#allocation2 + $0x40] sm:$0xe] }
 0x324   : > { %14449 = vst [vmem:[#allocation41_spill] sm:$0xff] %v12733_v22  ;;  %v4800_v22 = vshll.u32 %v4711_v62, 16  ;;  %v4812_v60 = vrot.slane %v4811_v2, 4  ;;  %v4092_v15 = vunpack.c.l.b16 %v3891_v59  ;;  %v3909_v27 = vrot.slane %v3907_v41, 4 }
 0x325   : > { %4650 = vmatmul.bf16.gmra.mxu1 %v9535_v6  ;;  %v3910_v6 = vshll.u32 %v3826_v47, 16  ;;  %v4816_v19 = vrot.slane %v4814_v1, 5  ;;  %v3927_v56 = vor.u32 %v3926_v63, %v3923_v34  ;;  %v4833_v59 = vshrl.u32 %v4716_v33, 16  ;;  %v9538_v1 = vld [vmem:[#allocation2 + $0x30] sm:$0xf] }
 0x326   : > { %5067 = vmatmul.bf16.gmra.mxu2 %v4991_v20  ;;  %v4714_v20 = vld [vmem:[#allocation2 + $0x40] sm:$0xf]  ;;  %v4107_v25 = vpack.c.b16 %v4093_v30, %v4092_v15  ;;  %v4802_v24 = vrot.slane %v4800_v22, 5  ;;  %v4836_v14 = vshll.u32 %v4716_v33, 16  ;;  %v3916_v22 = vshll.u32 %v12722_v4, 16 }
 0x327   : > { %v3166_v49 = vpop.f32.mrf.mxu3  ;;  %v3912_v47 = vrot.slane %v3910_v6, 5  ;;  %v4819_v11 = vshrl.u32 %v4714_v20, 16  ;;  %v4822_v2 = vshll.u32 %v4714_v20, 16  ;;  %v10337_v30 = vld [vmem:[#allocation2 + $0x34] sm:$0xf0]  ;;  %v3930_v33 = vshll.u32 %v12712_v40, 16 }
 0x328   : > { %v3312_v13 = vadd.f32 %v12693_v3, %v3166_v49  ;;  %v4381_v3 = vpack.c.b16 %v4368_v45, %v4367_v5  ;;  %v12753_v49 = vld [vmem:[#allocation2 + $0x44] sm:$0x1]  ;;  %v4803_v34 = vsel %vm12240_vm12, %v4798_v38, %v4802_v24  ;;  %v12765_v63 = vld [vmem:[#allocation2 + $0x3c] sm:$0x1]  ;;  %v9487_v5 = vrot.slane %v4242_v39, 9 }
 0x329   : > { %v10363_v45 = vld [vmem:[%s14352_s9 + $0x220] sm:$0xff]  ;;  %v3928_v20 = vrot.slane %v3927_v56, 4  ;;  %v4241_v15 = vld [vmem:[#allocation2 + $0x38] sm:$0xe]  ;;  %v4313_v4 = vrot.slane %v12753_v49, 5  ;;  %v4838_v38 = vrot.slane %v4836_v14, 5  ;;  %v9539_v40 = vor.u32 %v10337_v30, %v9538_v1 }
 0x32a   : > { %v12745_v55 = vadd.f32 %v12704_v18, %v3312_v13  ;;  %v12747_v9 = vpop.f32.mrf.mxu1  ;;  %v12749_v62 = vpop.f32.mrf.mxu0  ;;  %v4817_v18 = vsel %vm12240_vm12, %v4812_v60, %v4816_v19  ;;  %v3913_v13 = vor.u32 %v3912_v47, %v3909_v27  ;;  %v4821_v27 = vrot.slane %v4819_v11, 4  ;;  %5330 = vmatpush.bf16.msra.mxu3 %v10363_v45  ;;  %v12776_v45 = vld [vmem:[#allocation2 + $0x44] sm:$0x1] }
 0x32b   : > { %v12755_v41 = vpop.f32.mrf.mxu2  ;;  %v4979_v60 = vunpack.c.l.b16 %v4817_v18  ;;  %v4835_v19 = vrot.slane %v4833_v59, 4  ;;  %v4978_v24 = vunpack.c.l.b16 %v4803_v34  ;;  %v3932_v18 = vrot.slane %v3930_v33, 5 }
 0x32c   : > { %14450 = vst [vmem:[#allocation42_spill] sm:$0xff] %v12755_v41  ;;  %v3914_v39 = vrot.slane %v3913_v13, 4  ;;  %v9486_v56 = vrot.slane %v4241_v15, 9  ;;  %v4309_v41 = vrot.slane %v12765_v63, 5  ;;  %v3935_v34 = vshrl.u32 %v3830_v35, 16 }
 0x32d   : > { %v4992_v11 = vpack.c.b16 %v4979_v60, %v4978_v24  ;;  %v3938_v33 = vshll.u32 %v3830_v35, 16 }
 0x32e   : > { %4183 = vmatmul.bf16.gmra.mxu3 %v4107_v25  ;;  %4461 = vmatmul.bf16.gmra.mxu0 %v4381_v3  ;;  %v4824_v3 = vrot.slane %v4822_v2, 5  ;;  %v3832_v25 = vld [vmem:[#allocation2 + $0x40] sm:$0xf]  ;;  %v12778_v2 = vld [vmem:[#allocation2 + $0x4c] sm:$0x1] }
 0x32f   : > { %v3169_v6 = vpop.f32.mrf.mxu3  ;;  %v3949_v59 = vshrl.u32 %v3832_v25, 16  ;;  %v3952_v14 = vshll.u32 %v3832_v25, 16  ;;  %v4842_v1 = vshll.u32 %v12778_v2, 16 }
 0x330   : > { %v3315_v31 = vadd.f32 %v12706_v21, %v3169_v6  ;;  %v3918_v6 = vrot.slane %v3916_v22, 5  ;;  %v3933_v22 = vsel %vm12240_vm12, %v3928_v20, %v3932_v18  ;;  %v4825_v13 = vor.u32 %v4824_v3, %v4821_v27 }
 0x331   : > { %v4828_v20 = vshll.u32 %v12776_v45, 16  ;;  %v4095_v3 = vunpack.c.l.b16 %v3933_v22  ;;  %v3954_v25 = vrot.slane %v3952_v14, 5  ;;  %v4844_v18 = vrot.slane %v4842_v1, 5  ;;  %v10338_v14 = vld [vmem:[#allocation2 + $0x44] sm:$0xf0] }
 0x332   : > { %v12769_v47 = vadd.f32 %v12728_v10, %v3315_v31  ;;  %v12771_v21 = vpop.f32.mrf.mxu1  ;;  %v4314_v10 = vsel %vm12225_vm9, %v9487_v5, %v4313_v4  ;;  %v4839_v31 = vor.u32 %v4838_v38, %v4835_v19  ;;  %v12783_v60 = vpop.f32.mrf.mxu0  ;;  %v3919_v15 = vsel %vm12240_vm12, %v3914_v39, %v3918_v6 }
 0x333   : > { %v4310_v4 = vsel %vm12225_vm9, %v9486_v56, %v4309_v41  ;;  %v12791_v27 = vpop.f32.mrf.mxu2  ;;  %v4370_v19 = vunpack.c.l.b16 %v4314_v10  ;;  %v3951_v38 = vrot.slane %v3949_v59, 4  ;;  %v4094_v6 = vunpack.c.l.b16 %v3919_v15  ;;  %v4720_v56 = vld [vmem:[#allocation2 + $0x68] sm:$0xf]  ;;  %v4718_v10 = vld [vmem:[#allocation2 + $0x60] sm:$0xf] }
 0x334   : > { %14451 = vst [vmem:[#allocation43_spill] sm:$0xff] %v12791_v27  ;;  %v4840_v24 = vrot.slane %v4839_v31, 4  ;;  %v4369_v39 = vunpack.c.l.b16 %v4310_v4  ;;  %v3940_v41 = vrot.slane %v3938_v33, 5  ;;  %v9542_v59 = vld [vmem:[#allocation2 + $0x40] sm:$0xf]  ;;  %v4861_v1 = vshrl.u32 %v4720_v56, 16 }
 0x335   : > { %4655 = vmatmul.bf16.gmra.mxu1 %v9539_v40  ;;  %v4108_v0 = vpack.c.b16 %v4095_v3, %v4094_v6  ;;  %v3955_v22 = vor.u32 %v3954_v25, %v3951_v38  ;;  %v4244_v31 = vld [vmem:[#allocation2 + $0x60] sm:$0xe]  ;;  %v3944_v15 = vshll.u32 %v12765_v63, 16  ;;  %v12803_v4 = vld [vmem:[#allocation2 + $0x5c] sm:$0x1]  ;;  %v3958_v38 = vshll.u32 %v12753_v49, 16 }
 0x336   : > { %5072 = vmatmul.bf16.gmra.mxu2 %v4992_v11  ;;  %v3937_v11 = vrot.slane %v3935_v34, 4  ;;  %v4382_v27 = vpack.c.b16 %v4370_v19, %v4369_v39  ;;  %v10362_v3 = vld [vmem:[%s14352_s9 + $0x218] sm:$0xff]  ;;  %v9489_v6 = vrot.slane %v4244_v31, 9  ;;  %v3836_v49 = vld [vmem:[#allocation2 + $0x60] sm:$0xf]  ;;  %v4317_v28 = vrot.slane %v12803_v4, 5 }
 0x337   : > { %v3171_v30 = vpop.f32.mrf.mxu3  ;;  %v4243_v25 = vld [vmem:[#allocation2 + $0x58] sm:$0xe]  ;;  %v3956_v63 = vrot.slane %v3955_v22, 4  ;;  %5331 = vmatpush.bf16.msra.mxu3 %v10362_v3  ;;  %v3960_v22 = vrot.slane %v3958_v38, 5  ;;  %v3977_v17 = vshrl.u32 %v3836_v49, 16 }
 0x338   : > { %v3317_v5 = vadd.f32 %v12731_v61, %v3171_v30  ;;  %v4826_v61 = vrot.slane %v4825_v13, 4  ;;  %v4830_v30 = vrot.slane %v4828_v20, 5  ;;  %v4845_v13 = vsel %vm12240_vm12, %v4840_v24, %v4844_v18  ;;  %v12805_v20 = vld [vmem:[#allocation2 + $0x64] sm:$0x1] }
 0x339   : > { %v3941_v33 = vor.u32 %v3940_v41, %v3937_v11  ;;  %v4981_v18 = vunpack.c.l.b16 %v4845_v13  ;;  %v4321_v41 = vrot.slane %v12805_v20, 5  ;;  %v12823_v13 = vld [vmem:[#allocation2 + $0x6c] sm:$0x1] }
 0x33a   : > { %v12794_v35 = vadd.f32 %v12747_v9, %v3317_v5  ;;  %v12796_v40 = vpop.f32.mrf.mxu1  ;;  %v4831_v9 = vsel %vm12240_vm12, %v4826_v61, %v4830_v30  ;;  %v4864_v5 = vshll.u32 %v4720_v56, 16  ;;  %v4847_v61 = vshrl.u32 %v4718_v10, 16  ;;  %v12814_v39 = vpop.f32.mrf.mxu0 }
 0x33b   : > { %v12812_v24 = vpop.f32.mrf.mxu2  ;;  %v9543_v30 = vor.u32 %v10338_v14, %v9542_v59  ;;  %v3961_v59 = vsel %vm12240_vm12, %v3956_v63, %v3960_v22  ;;  %v4322_v14 = vsel %vm12225_vm9, %v9489_v6, %v4321_v41  ;;  %v3966_v63 = vshll.u32 %v3834_v29, 16 }
 0x33c   : > { %v4866_v56 = vrot.slane %v4864_v5, 5  ;;  %v4849_v31 = vrot.slane %v4847_v61, 4  ;;  %v12833_v61 = vld [vmem:[#allocation2 + $0x64] sm:$0x1]  ;;  %v4372_v6 = vunpack.c.l.b16 %v4322_v14  ;;  %v3979_v41 = vrot.slane %v3977_v17, 4 }
 0x33e   : > { %4188 = vmatmul.bf16.gmra.mxu3 %v4108_v0  ;;  %4466 = vmatmul.bf16.gmra.mxu0 %v4382_v27  ;;  %v4850_v0 = vshll.u32 %v4718_v10, 16  ;;  %v4980_v27 = vunpack.c.l.b16 %v4831_v9  ;;  %v9488_v10 = vrot.slane %v4243_v25, 9 }
 0x33f   : > { %v3174_v34 = vpop.f32.mrf.mxu3 }
 0x340   : > { %v3320_v19 = vadd.f32 %v12749_v62, %v3174_v34  ;;  %v4863_v62 = vrot.slane %v4861_v1, 4  ;;  %v3942_v34 = vrot.slane %v3941_v33, 4  ;;  %v4852_v3 = vrot.slane %v4850_v0, 5 }
 0x341   : > { %v3980_v1 = vshll.u32 %v3836_v49, 16  ;;  %v4318_v25 = vsel %vm12225_vm9, %v9488_v10, %v4317_v28  ;;  %v4097_v49 = vunpack.c.l.b16 %v3961_v59  ;;  %v3968_v59 = vrot.slane %v3966_v63, 5  ;;  %v4246_v63 = vld [vmem:[#allocation2 + $0x70] sm:$0xe] }
 0x342   : > { %v12817_v11 = vadd.f32 %v12771_v21, %v3320_v19  ;;  %v12821_v9 = vpop.f32.mrf.mxu1  ;;  %v4993_v21 = vpack.c.b16 %v4981_v18, %v4980_v27  ;;  %v3946_v19 = vrot.slane %v3944_v15, 5  ;;  %v4867_v5 = vor.u32 %v4866_v56, %v4863_v62 }
 0x343   : > { %v4870_v15 = vshll.u32 %v12823_v13, 16  ;;  %v4853_v27 = vor.u32 %v4852_v3, %v4849_v31  ;;  %v3963_v18 = vshrl.u32 %v3834_v29, 16  ;;  %v3982_v62 = vrot.slane %v3980_v1, 5  ;;  %v12841_v28 = vpop.f32.mrf.mxu2 }
 0x344   : > { %v3947_v38 = vsel %vm12240_vm12, %v3942_v34, %v3946_v19  ;;  %v4868_v34 = vrot.slane %v4867_v5, 4  ;;  %v4371_v22 = vunpack.c.l.b16 %v4318_v25  ;;  %v12843_v19 = vpop.f32.mrf.mxu0  ;;  %v9546_v5 = vld [vmem:[#allocation2 + $0x60] sm:$0xf] }
 0x345   : > { %4660 = vmatmul.bf16.gmra.mxu1 %v9543_v30  ;;  %v4856_v30 = vshll.u32 %v12833_v61, 16  ;;  %v4096_v10 = vunpack.c.l.b16 %v3947_v38  ;;  %v4854_v31 = vrot.slane %v4853_v27, 4  ;;  %v4872_v29 = vrot.slane %v4870_v15, 5 }
 0x346   : > { %5077 = vmatmul.bf16.gmra.mxu2 %v4993_v21  ;;  %v4724_v21 = vld [vmem:[#allocation2 + $0x78] sm:$0xf]  ;;  %v3965_v3 = vrot.slane %v3963_v18, 4  ;;  %v4383_v1 = vpack.c.b16 %v4372_v6, %v4371_v22  ;;  %v3983_v14 = vor.u32 %v3982_v62, %v3979_v41  ;;  %v3972_v27 = vshll.u32 %v12803_v4, 16  ;;  %v12851_v18 = vld [vmem:[#allocation2 + $0x74] sm:$0x1] }
 0x347   : > { %v3176_v33 = vpop.f32.mrf.mxu3  ;;  %v4109_v17 = vpack.c.b16 %v4097_v49, %v4096_v10  ;;  %v4858_v52 = vrot.slane %v4856_v30, 5  ;;  %v4873_v38 = vsel %vm12240_vm12, %v4868_v34, %v4872_v29  ;;  %v4889_v25 = vshrl.u32 %v4724_v21, 16  ;;  %v12858_v62 = vld [vmem:[#allocation2 + $0x6c] sm:$0x1]  ;;  %v4245_v30 = vld [vmem:[#allocation2 + $0x68] sm:$0xe] }
 0x348   : > { %v3322_v0 = vadd.f32 %v12783_v60, %v3176_v33  ;;  %v10339_v60 = vld [vmem:[#allocation2 + $0x64] sm:$0xf0]  ;;  %v4722_v33 = vld [vmem:[#allocation2 + $0x70] sm:$0xf]  ;;  %v4892_v37 = vshll.u32 %v4724_v21, 16  ;;  %v3969_v41 = vor.u32 %v3968_v59, %v3965_v3  ;;  %v4983_v4 = vunpack.c.l.b16 %v4873_v38 }
 0x349   : > { %v9547_v15 = vor.u32 %v10339_v60, %v9546_v5  ;;  %v4859_v6 = vsel %vm12240_vm12, %v4854_v31, %v4858_v52  ;;  %v4875_v34 = vshrl.u32 %v4722_v33, 16  ;;  %v4878_v10 = vshll.u32 %v4722_v33, 16  ;;  %v3840_v59 = vld [vmem:[#allocation2 + $0x70] sm:$0xf]  ;;  %v3838_v38 = vld [vmem:[#allocation2 + $0x68] sm:$0xf] }
 0x34a   : > { %v12838_v56 = vadd.f32 %v12796_v40, %v3322_v0  ;;  %v3986_v40 = vshll.u32 %v12805_v20, 16  ;;  %v12846_v0 = vpop.f32.mrf.mxu1  ;;  %v10361_v20 = vld [vmem:[%s14352_s9 + $0x210] sm:$0xff]  ;;  %v3984_v21 = vrot.slane %v3983_v14, 4  ;;  %v9491_v29 = vrot.slane %v4246_v63, 9 }
 0x34b   : > { %5332 = vmatpush.bf16.msra.mxu3 %v10361_v20  ;;  %v4894_v5 = vrot.slane %v4892_v37, 5  ;;  %v4982_v52 = vunpack.c.l.b16 %v4859_v6  ;;  %v9490_v31 = vrot.slane %v4245_v30, 9  ;;  %v4325_v3 = vrot.slane %v12858_v62, 5  ;;  %v12866_v14 = vpop.f32.mrf.mxu2 }
 0x34c   : > { %v3988_v60 = vrot.slane %v3986_v40, 5  ;;  %v3970_v33 = vrot.slane %v3969_v41, 4  ;;  %v4877_v58 = vrot.slane %v4875_v34, 4  ;;  %v3974_v63 = vrot.slane %v3972_v27, 5 }
 0x34d   : > { %v4994_v40 = vpack.c.b16 %v4983_v4, %v4982_v52  ;;  %v4005_v41 = vshrl.u32 %v3840_v59, 16  ;;  %v4008_v30 = vshll.u32 %v3840_v59, 16  ;;  %v3991_v27 = vshrl.u32 %v3838_v38, 16 }
 0x34e   : > { %4193 = vmatmul.bf16.gmra.mxu3 %v4109_v17  ;;  %4471 = vmatmul.bf16.gmra.mxu0 %v4383_v1  ;;  %v4329_v17 = vrot.slane %v12851_v18, 5  ;;  %v4891_v1 = vrot.slane %v4889_v25, 4  ;;  %v3989_v37 = vsel %vm12240_vm12, %v3984_v21, %v3988_v60  ;;  %v12870_v25 = vld [vmem:[#allocation2 + $0x7c] sm:$0x1]  ;;  %v3994_v34 = vshll.u32 %v3838_v38, 16 }
 0x34f   : > { %v3975_v4 = vsel %vm12240_vm12, %v3970_v33, %v3974_v63  ;;  %v4898_v60 = vshll.u32 %v12870_v25, 16  ;;  %v3993_v43 = vrot.slane %v3991_v27, 4  ;;  %v4728_v33 = vld [vmem:[#allocation2 + $0x88] sm:$0xf] }
 0x350   : > { %v3179_v49 = vpop.f32.mrf.mxu3  ;;  %v4330_v20 = vsel %vm12225_vm9, %v9491_v29, %v4329_v17  ;;  %v4895_v6 = vor.u32 %v4894_v5, %v4891_v1  ;;  %v4099_v17 = vunpack.c.l.b16 %v3989_v37  ;;  %v3996_v12 = vrot.slane %v3994_v34, 5 }
 0x351   : > { %v3325_v22 = vadd.f32 %v12814_v39, %v3179_v49  ;;  %v4880_v39 = vrot.slane %v4878_v10, 5  ;;  %v12876_v49 = vld [vmem:[#allocation2 + $0x74] sm:$0x1]  ;;  %v4374_v1 = vunpack.c.l.b16 %v4330_v20  ;;  %v4900_v63 = vrot.slane %v4898_v60, 5 }
 0x352   : > { %v12880_v10 = vpop.f32.mrf.mxu1  ;;  %v4884_v5 = vshll.u32 %v12876_v49, 16  ;;  %v4896_v59 = vrot.slane %v4895_v6, 4  ;;  %v4917_v27 = vshrl.u32 %v4728_v33, 16  ;;  %v4920_v34 = vshll.u32 %v4728_v33, 16 }
 0x353   : > { %v12863_v54 = vadd.f32 %v12821_v9, %v3325_v22  ;;  %v12872_v9 = vpop.f32.mrf.mxu0  ;;  %v4881_v21 = vor.u32 %v4880_v39, %v4877_v58  ;;  %v10340_v58 = vld [vmem:[#allocation2 + $0x74] sm:$0xf0]  ;;  %v4000_v60 = vshll.u32 %v12858_v62, 16 }
 0x354   : > { %v4886_v20 = vrot.slane %v4884_v5, 5  ;;  %v4901_v6 = vsel %vm12240_vm12, %v4896_v59, %v4900_v63  ;;  %v4922_v46 = vrot.slane %v4920_v34, 5 }
 0x355   : > { %4665 = vmatmul.bf16.gmra.mxu1 %v9547_v15  ;;  %v4326_v15 = vsel %vm12225_vm9, %v9490_v31, %v4325_v3  ;;  %v4007_v31 = vrot.slane %v4005_v41, 4  ;;  %v4010_v3 = vrot.slane %v4008_v30, 5  ;;  %v4882_v39 = vrot.slane %v4881_v21, 4  ;;  %v4247_v30 = vld [vmem:[#allocation2 + $0x78] sm:$0xe] }
 0x356   : > { %5082 = vmatmul.bf16.gmra.mxu2 %v4994_v40  ;;  %v4373_v52 = vunpack.c.l.b16 %v4326_v15  ;;  %v4098_v40 = vunpack.c.l.b16 %v3975_v4  ;;  %v4248_v15 = vld [vmem:[#allocation2 + $0x80] sm:$0xe]  ;;  %v12896_v4 = vpop.f32.mrf.mxu2  ;;  %v3997_v21 = vor.u32 %v3996_v12, %v3993_v43  ;;  %v4985_v62 = vunpack.c.l.b16 %v4901_v6 }
 0x357   : > { %v4011_v41 = vor.u32 %v4010_v3, %v4007_v31  ;;  %v4887_v59 = vsel %vm12240_vm12, %v4882_v39, %v4886_v20  ;;  %v4014_v31 = vshll.u32 %v12851_v18, 16  ;;  %v9493_v3 = vrot.slane %v4248_v15, 9  ;;  %v3844_v39 = vld [vmem:[#allocation2 + $0x80] sm:$0xf] }
 0x358   : > { %v3181_v22 = vpop.f32.mrf.mxu3  ;;  %v4384_v37 = vpack.c.b16 %v4374_v1, %v4373_v52  ;;  %v10360_v1 = vld [vmem:[%s14352_s9 + $0x208] sm:$0xff]  ;;  %v9550_v52 = vld [vmem:[#allocation2 + $0x70] sm:$0xf]  ;;  %v9492_v33 = vrot.slane %v4247_v30, 9  ;;  %v4984_v20 = vunpack.c.l.b16 %v4887_v59  ;;  %v3998_v18 = vrot.slane %v3997_v21, 4 }
 0x359   : > { %v3327_v29 = vadd.f32 %v12843_v19, %v3181_v22  ;;  %v4110_v19 = vpack.c.b16 %v4099_v17, %v4098_v40  ;;  %v12890_v22 = vld [vmem:[#allocation2 + $0x84] sm:$0x1]  ;;  %v4906_v17 = vshll.u32 %v4726_v16, 16  ;;  %v9551_v12 = vor.u32 %v10340_v58, %v9550_v52  ;;  %5333 = vmatpush.bf16.msra.mxu3 %v10360_v1  ;;  %v3842_v1 = vld [vmem:[#allocation2 + $0x78] sm:$0xf] }
 0x35a   : > { %v4337_v40 = vrot.slane %v12890_v22, 5  ;;  %v12909_v63 = vpop.f32.mrf.mxu1  ;;  %v4002_v58 = vrot.slane %v4000_v60, 5  ;;  %v4016_v6 = vrot.slane %v4014_v31, 5  ;;  %v4995_v52 = vpack.c.b16 %v4985_v62, %v4984_v20 }
 0x35b   : > { %v12888_v38 = vadd.f32 %v12846_v0, %v3327_v29  ;;  %v12894_v0 = vld [vmem:[#allocation2 + $0x7c] sm:$0x1]  ;;  %v4903_v29 = vshrl.u32 %v4726_v16, 16  ;;  %v12902_v5 = vpop.f32.mrf.mxu0  ;;  %14453 = vst [vmem:[#allocation45_spill] sm:$0xff] %v12909_v63  ;;  %v4908_v44 = vrot.slane %v4906_v17, 5  ;;  %v4036_v34 = vshll.u32 %v3844_v39, 16 }
 0x35c   : > { %14452 = vst [vmem:[#allocation44_spill] sm:$0xff] %v12902_v5  ;;  %v4333_v16 = vrot.slane %v12894_v0, 5  ;;  %v4919_v5 = vrot.slane %v4917_v27, 4  ;;  %v4338_v30 = vsel %vm12225_vm9, %v9493_v3, %v4337_v40  ;;  %v4033_v27 = vshrl.u32 %v3844_v39, 16  ;;  %v4730_v39 = vld [vmem:[#allocation2 + $0x90] sm:$0xf] }
 0x35d   : > { %v4905_v15 = vrot.slane %v4903_v29, 4  ;;  %v4003_v29 = vsel %vm12240_vm12, %v3998_v18, %v4002_v58  ;;  %v4376_v17 = vunpack.c.l.b16 %v4338_v30  ;;  %v4019_v40 = vshrl.u32 %v3842_v1, 16 }
 0x35e   : > { %4198 = vmatmul.bf16.gmra.mxu3 %v4110_v19  ;;  %4476 = vmatmul.bf16.gmra.mxu0 %v4384_v37  ;;  %v4012_v37 = vrot.slane %v4011_v41, 4  ;;  %v12919_v41 = vld [vmem:[#allocation2 + $0x8c] sm:$0x1]  ;;  %v4923_v60 = vor.u32 %v4922_v46, %v4919_v5  ;;  %v4038_v46 = vrot.slane %v4036_v34, 5  ;;  %v4100_v20 = vunpack.c.l.b16 %v4003_v29 }
 0x35f   : > { %v4909_v59 = vor.u32 %v4908_v44, %v4905_v15  ;;  %v4926_v3 = vshll.u32 %v12919_v41, 16  ;;  %v4732_v15 = vld [vmem:[#allocation2 + $0x98] sm:$0xf] }
 0x360   : > { %v4017_v21 = vsel %vm12240_vm12, %v4012_v37, %v4016_v6  ;;  %v4948_v29 = vshll.u32 %v4732_v15, 16 }
 0x361   : > { %v3184_v43 = vpop.f32.mrf.mxu3  ;;  %v4910_v44 = vrot.slane %v4909_v59, 4  ;;  %v4928_v30 = vrot.slane %v4926_v3, 5  ;;  %v12940_v3 = vld [vmem:[#allocation2 + $0x8c] sm:$0x1] }
 0x362   : > { %v3330_v19 = vadd.f32 %v12872_v9, %v3184_v43  ;;  %v12917_v9 = vld [vmem:[#allocation2 + $0x84] sm:$0x1]  ;;  %v4022_v43 = vshll.u32 %v3842_v1, 16  ;;  %v3594_v58 = vpop.f32.mrf.mxu1 }
 0x363   : > { %v4912_v31 = vshll.u32 %v12917_v9, 16  ;;  %v3334_v5 = vpop.f32.mrf.mxu0 }
 0x364   : > { %v12913_v51 = vadd.f32 %v12880_v10, %v3330_v19  ;;  %v4334_v10 = vsel %vm12225_vm9, %v9492_v33, %v4333_v16  ;;  %v4101_v19 = vunpack.c.l.b16 %v4017_v21  ;;  %v4035_v33 = vrot.slane %v4033_v27, 4  ;;  %v4250_v21 = vld [vmem:[#allocation2 + $0x90] sm:$0xe] }
 0x365   : > { %4670 = vmatmul.bf16.gmra.mxu1 %v9551_v12  ;;  %v12929_v12 = vpop.f32.mrf.mxu2  ;;  %v4375_v37 = vunpack.c.l.b16 %v4334_v10  ;;  %v4924_v16 = vrot.slane %v4923_v60, 4  ;;  %v4914_v6 = vrot.slane %v4912_v31, 5  ;;  %v4024_v1 = vrot.slane %v4022_v43, 5 }
 0x366   : > { %5087 = vmatmul.bf16.gmra.mxu2 %v4995_v52  ;;  %v4021_v52 = vrot.slane %v4019_v40, 4  ;;  %v4111_v63 = vpack.c.b16 %v4101_v19, %v4100_v20  ;;  %v4039_v57 = vor.u32 %v4038_v46, %v4035_v33  ;;  %v4931_v10 = vshrl.u32 %v4730_v39, 16  ;;  %v10359_v40 = vld [vmem:[%s14352_s9 + $0x200] sm:$0xff] }
 0x367   : > { %v4385_v18 = vpack.c.b16 %v4376_v17, %v4375_v37  ;;  %v4934_v27 = vshll.u32 %v4730_v39, 16  ;;  %v4929_v34 = vsel %vm12240_vm12, %v4924_v16, %v4928_v30  ;;  %v4945_v60 = vshrl.u32 %v4732_v15, 16  ;;  %v10341_v17 = vld [vmem:[#allocation2 + $0x84] sm:$0xf0]  ;;  %v9554_v46 = vld [vmem:[#allocation2 + $0x80] sm:$0xf]  ;;  %5334 = vmatpush.bf16.msra.mxu3 %v10359_v40 }
 0x368   : > { %v4915_v59 = vsel %vm12240_vm12, %v4910_v44, %v4914_v6  ;;  %v4042_v31 = vshll.u32 %v12890_v22, 16  ;;  %v4025_v43 = vor.u32 %v4024_v1, %v4021_v52  ;;  %v4028_v19 = vshll.u32 %v12894_v0, 16  ;;  %v4249_v37 = vld [vmem:[#allocation2 + $0x88] sm:$0xe] }
 0x369   : > { %v12931_v62 = vpop.f32.mrf.mxu3  ;;  %v9495_v33 = vrot.slane %v4250_v21, 9  ;;  %v4987_v16 = vunpack.c.l.b16 %v4929_v34  ;;  %v4040_v39 = vrot.slane %v4039_v57, 4  ;;  %v4933_v20 = vrot.slane %v4931_v10, 4 }
 0x36a   : > { %14454 = vst [vmem:[#allocation46_spill] sm:$0xff] %v12931_v62  ;;  %v9555_v44 = vor.u32 %v10341_v17, %v9554_v46  ;;  %v4986_v15 = vunpack.c.l.b16 %v4915_v59  ;;  %v4947_v6 = vrot.slane %v4945_v60, 4  ;;  %v4950_v30 = vrot.slane %v4948_v29, 5  ;;  %v12960_v17 = vld [vmem:[#allocation2 + $0x9c] sm:$0x1]  ;;  %v12962_v40 = vpop.f32.mrf.mxu1 }
 0x36b   : > { %v4044_v1 = vrot.slane %v4042_v31, 5  ;;  %v9494_v0 = vrot.slane %v4249_v37, 9  ;;  %v4341_v21 = vrot.slane %v12940_v3, 5  ;;  %v12950_v50 = vpop.f32.mrf.mxu0  ;;  %v4026_v34 = vrot.slane %v4025_v43, 4  ;;  %v3846_v31 = vld [vmem:[#allocation2 + $0x88] sm:$0xf] }
 0x36c   : > { %14455 = vst [vmem:[#allocation47_spill] sm:$0xff] %v12950_v50  ;;  %v4030_v57 = vrot.slane %v4028_v19, 5  ;;  %v4996_v60 = vpack.c.b16 %v4987_v16, %v4986_v15  ;;  %v4951_v43 = vor.u32 %v4950_v30, %v4947_v6  ;;  %v4954_v19 = vshll.u32 %v12960_v17, 16 }
 0x36d   : > { %v12947_v62 = vpop.f32.mrf.mxu2  ;;  %v4045_v29 = vsel %vm12240_vm12, %v4040_v39, %v4044_v1  ;;  %14456 = vst [vmem:[#allocation48_spill] sm:$0xff] %v12962_v40  ;;  %v4061_v37 = vshrl.u32 %v3848_v23, 16  ;;  %v4047_v16 = vshrl.u32 %v3846_v31, 16  ;;  %v4050_v39 = vshll.u32 %v3846_v31, 16 }
 0x36e   : > { %4203 = vmatmul.bf16.gmra.mxu3 %v4111_v63  ;;  %4481 = vmatmul.bf16.gmra.mxu0 %v4385_v18  ;;  %v4345_v63 = vrot.slane %v12933_v8, 5  ;;  %v4936_v18 = vrot.slane %v4934_v27, 5  ;;  %v4952_v15 = vrot.slane %v4951_v43, 4  ;;  %v4956_v6 = vrot.slane %v4954_v19, 5  ;;  %v9558_v43 = vld [vmem:[#allocation2 + $0x90] sm:$0xf] }
 0x36f   : > { %v4063_v30 = vrot.slane %v4061_v37, 4  ;;  %v10342_v19 = vld [vmem:[#allocation2 + $0x94] sm:$0xf0] }
 0x370   : > { %v4346_v10 = vsel %vm12225_vm9, %v9495_v33, %v4345_v63  ;;  %v4937_v59 = vor.u32 %v4936_v18, %v4933_v20  ;;  %v4064_v33 = vshll.u32 %v3848_v23, 16  ;;  %v4031_v63 = vsel %vm12240_vm12, %v4026_v34, %v4030_v57 }
 0x371   : > { %v3189_v22 = vpop.f32.mrf.mxu3  ;;  %v4103_v20 = vunpack.c.l.b16 %v4045_v29  ;;  %v4378_v18 = vunpack.c.l.b16 %v4346_v10  ;;  %v4957_v29 = vsel %vm12240_vm12, %v4952_v15, %v4956_v6 }
 0x372   : > { %v3335_v52 = vadd.f32 %v3334_v5, %v3189_v22  ;;  %v12958_v5 = vld [vmem:[#allocation2 + $0x94] sm:$0x1]  ;;  %v4938_v22 = vrot.slane %v4937_v59, 4  ;;  %v4066_v23 = vrot.slane %v4064_v33, 5  ;;  %v3599_v31 = vpop.f32.mrf.mxu1  ;;  %v4070_v33 = vshll.u32 %v12933_v8, 16 }
 0x373   : > { %v4940_v46 = vshll.u32 %v12958_v5, 16  ;;  %v3339_v50 = vpop.f32.mrf.mxu0 }
 0x374   : > { %v12954_v27 = vadd.f32 %v3594_v58, %v3335_v52  ;;  %v4342_v58 = vsel %vm12225_vm9, %v9494_v0, %v4341_v21  ;;  %v4102_v52 = vunpack.c.l.b16 %v4031_v63  ;;  %v4049_v0 = vrot.slane %v4047_v16, 4 }
 0x375   : > { %4675 = vmatmul.bf16.gmra.mxu1 %v9555_v44  ;;  %v4377_v1 = vunpack.c.l.b16 %v4342_v58  ;;  %v4052_v21 = vrot.slane %v4050_v39, 5  ;;  %v12972_v40 = vpop.f32.mrf.mxu2  ;;  %v4067_v59 = vor.u32 %v4066_v23, %v4063_v30  ;;  %v4989_v63 = vunpack.c.l.b16 %v4957_v29 }
 0x376   : > { %5092 = vmatmul.bf16.gmra.mxu2 %v4996_v60  ;;  %v4942_v60 = vrot.slane %v4940_v46, 5  ;;  %v4112_v34 = vpack.c.b16 %v4103_v20, %v4102_v52  ;;  %v4056_v16 = vshll.u32 %v12940_v3, 16  ;;  %v4072_v52 = vrot.slane %v4070_v33, 5 }
 0x377   : > { %v4386_v57 = vpack.c.b16 %v4378_v18, %v4377_v1  ;;  %v4053_v37 = vor.u32 %v4052_v21, %v4049_v0  ;;  %v4068_v39 = vrot.slane %v4067_v59, 4  ;;  %v9559_v18 = vor.u32 %v10342_v19, %v9558_v43  ;;  %v10668_v43 = vld [vmem:[#allocation2 + $0x1c] sm:$0x1] }
 0x378   : > { %v4943_v10 = vsel %vm12240_vm12, %v4938_v22, %v4942_v60  ;;  %v4058_v30 = vrot.slane %v4056_v16, 5  ;;  %v5173_v19 = vrot.slane %v10668_v43, 5 }
 0x379   : > { %v12970_v44 = vpop.f32.mrf.mxu3  ;;  %v4988_v58 = vunpack.c.l.b16 %v4943_v10  ;;  %v4054_v22 = vrot.slane %v4053_v37, 4  ;;  %v4073_v23 = vsel %vm12240_vm12, %v4068_v39, %v4072_v52  ;;  %v5119_v10 = vld [vmem:[#allocation2 + $0x10] sm:$0xe] }
 0x37a   : > { %v12990_v60 = vpop.f32.mrf.mxu1 }
 0x37b   : > { %v4997_v6 = vpack.c.b16 %v4989_v63, %v4988_v58  ;;  %v12986_v8 = vpop.f32.mrf.mxu0  ;;  %v4059_v3 = vsel %vm12240_vm12, %v4054_v22, %v4058_v30  ;;  %v9624_v58 = vrot.slane %v5119_v10, 9  ;;  %v10669_v63 = vld [vmem:[#allocation2 + $0x14] sm:$0x1]  ;;  %v5122_v30 = vld [vmem:[#allocation2 + $0x28] sm:$0xe] }
 0x37c   : > { %v4104_v21 = vunpack.c.l.b16 %v4059_v3  ;;  %v5121_v3 = vld [vmem:[#allocation2 + $0x20] sm:$0xe] }
 0x37d   : > { %v12984_v1 = vpop.f32.mrf.mxu2 }
 0x37e   : > { %4208 = vmatmul.bf16.gmra.mxu3 %v4112_v34  ;;  %4486 = vmatmul.bf16.gmra.mxu0 %v4386_v57  ;;  %v5120_v57 = vld [vmem:[#allocation2 + $0x18] sm:$0xe] }
 0x381   : > { %v3194_v46 = vpop.f32.mrf.mxu3 }
 0x382   : > { %v3340_v20 = vadd.f32 %v3339_v50, %v3194_v46  ;;  %v4105_v50 = vunpack.c.l.b16 %v4073_v23  ;;  %v3604_v33 = vpop.f32.mrf.mxu1  ;;  %v5169_v46 = vrot.slane %v10669_v63, 5  ;;  %v3802_v23 = vadd.f32 %v12812_v24, %v12726_v7 }
 0x383   : > { %v3344_v29 = vpop.f32.mrf.mxu0 }
 0x384   : > { %v12980_v15 = vadd.f32 %v3599_v31, %v3340_v20  ;;  %v4113_v34 = vpack.c.b16 %v4105_v50, %v4104_v21  ;;  %v9625_v31 = vrot.slane %v5120_v57, 9  ;;  %v5170_v20 = vsel %vm12225_vm9, %v9624_v58, %v5169_v46 }
 0x385   : > { %4680 = vmatmul.bf16.gmra.mxu1 %v9559_v18  ;;  %v5247_v52 = vunpack.c.l.b16 %v5170_v20  ;;  %v9627_v21 = vrot.slane %v5122_v30, 9  ;;  %v5124_v20 = vld [vmem:[#allocation2 + $0x38] sm:$0xe]  ;;  %v10672_v30 = vld [vmem:[#allocation2 + $0x3c] sm:$0x1] }
 0x386   : > { %5097 = vmatmul.bf16.gmra.mxu2 %v4997_v6  ;;  %v5174_v39 = vsel %vm12225_vm9, %v9625_v31, %v5173_v19 }
 0x387   : > { %v5248_v18 = vunpack.c.l.b16 %v5174_v39  ;;  %v13016_v39 = vpop.f32.mrf.mxu2 }
 0x389   : > { %v12992_v0 = vpop.f32.mrf.mxu3  ;;  %v5263_v6 = vpack.c.b16 %v5248_v18, %v5247_v52  ;;  %v10390_v18 = vld [vmem:[%s14355_s12 + $0x78] sm:$0xff]  ;;  %v3804_v52 = vadd.f32 %v12866_v14, %v12769_v47  ;;  %v3805_v14 = vadd.f32 %v12896_v4, %v12794_v35 }
 0x38a   : > { %6150 = vmatpush.bf16.msra.mxu0 %v10390_v18  ;;  %v3806_v18 = vadd.f32 %v12929_v12, %v12817_v11  ;;  %v3807_v11 = vadd.f32 %v12947_v62, %v12838_v56 }
 0x38e   : > { %4213 = vmatmul.bf16.gmra.mxu3 %v4113_v34  ;;  %v10670_v34 = vld [vmem:[#allocation2 + $0x2c] sm:$0x1] }
 0x38f   : > { %v5181_v57 = vrot.slane %v10670_v34, 5  ;;  %v13031_v47 = vpop.f32.mrf.mxu2 }
 0x391   : > { %v3199_v59 = vpop.f32.mrf.mxu3  ;;  %v5182_v43 = vsel %vm12225_vm9, %v9627_v21, %v5181_v57  ;;  %v10673_v21 = vld [vmem:[#allocation2 + $0x34] sm:$0x1] }
 0x392   : > { %v3345_v37 = vadd.f32 %v3344_v29, %v3199_v59  ;;  %v9626_v29 = vrot.slane %v5121_v3, 9  ;;  %v10671_v59 = vld [vmem:[#allocation2 + $0x24] sm:$0x1]  ;;  %v5250_v7 = vunpack.c.l.b16 %v5182_v43  ;;  %v5185_v34 = vrot.slane %v10673_v21, 5 }
 0x393   : > { %v5177_v31 = vrot.slane %v10671_v59, 5 }
 0x394   : > { %v12994_v16 = vadd.f32 %v3604_v33, %v3345_v37  ;;  %v3803_v37 = vadd.f32 %v12841_v28, %v12745_v55  ;;  %v13012_v33 = vpop.f32.mrf.mxu0  ;;  %v5123_v55 = vld [vmem:[#allocation2 + $0x30] sm:$0xe] }
 0x395   : > { %v5178_v19 = vsel %vm12225_vm9, %v9626_v29, %v5177_v31 }
 0x396   : > { %v5249_v63 = vunpack.c.l.b16 %v5178_v19 }
 0x398   : > { %v5264_v46 = vpack.c.b16 %v5250_v7, %v5249_v63  ;;  %v5125_v63 = vld [vmem:[#allocation2 + $0x40] sm:$0xe] }
 0x399   : > { %v13000_v22 = vpop.f32.mrf.mxu3  ;;  %v9630_v4 = vrot.slane %v5125_v63, 9 }
 0x39c   : > { %v13025_v57 = vpop.f32.mrf.mxu0 }
 0x39e   : > { %5335 = vmatmul.bf16.vlgmr.msra.gmra.mxu3 %v5263_v6  ;;  %v9629_v6 = vrot.slane %v5124_v20, 9  ;;  %v10389_v20 = vld [vmem:[%s14355_s12 + $0x70] sm:$0xff] }
 0x39f   : > { %6151 = vmatpush.bf16.msra.mxu0 %v10389_v20 }
 0x3a1   : > { %v4179_v50 = vpop.f32.mrf.mxu3 }
 0x3a2   : > { %v13004_v10 = vadd.f32 %v4179_v50, %v3802_v23  ;;  %v5189_v23 = vrot.slane %v10672_v30, 5  ;;  %v9628_v50 = vrot.slane %v5123_v55, 9 }
 0x3a4   : > { %v5190_v29 = vsel %vm12225_vm9, %v9629_v6, %v5189_v23  ;;  %v5186_v59 = vsel %vm12225_vm9, %v9628_v50, %v5185_v34  ;;  %v3787_v6 = vpop.f32.mrf.mxu2 }
 0x3a5   : > { %v5252_v31 = vunpack.c.l.b16 %v5190_v29 }
 0x3a9   : > { %v4181_v24 = vpop.f32.mrf.mxu3 }
 0x3aa   : > { %v13014_v58 = vadd.f32 %v4181_v24, %v3803_v37  ;;  %v5251_v37 = vunpack.c.l.b16 %v5186_v59  ;;  %v13037_v24 = vpop.f32.mrf.mxu0 }
 0x3ac   : > { %v5265_v7 = vpack.c.b16 %v5252_v31, %v5251_v37  ;;  %v10388_v31 = vld [vmem:[%s14355_s12 + $0x68] sm:$0xff]  ;;  %v5127_v37 = vld [vmem:[#allocation2 + $0x60] sm:$0xe] }
 0x3ad   : > { %6152 = vmatpush.bf16.msra.mxu0 %v10388_v31  ;;  %v9632_v20 = vrot.slane %v5127_v37, 9 }
 0x3ae   : > { %5340 = vmatmul.bf16.gmra.mxu3 %v5264_v46  ;;  %v5126_v46 = vld [vmem:[#allocation2 + $0x48] sm:$0xe] }
 0x3af   : > { %v9631_v55 = vrot.slane %v5126_v46, 9 }
 0x3b1   : > { %v4184_v28 = vpop.f32.mrf.mxu3 }
 0x3b2   : > { %v13023_v3 = vadd.f32 %v4184_v28, %v3804_v52  ;;  %v5193_v52 = vrot.slane %v12776_v45, 5  ;;  %v5197_v28 = vrot.slane %v12778_v2, 5  ;;  %v13052_v21 = vpop.f32.mrf.mxu0  ;;  %v13058_v2 = vpop.f32.mrf.mxu2 }
 0x3b4   : > { %v5194_v23 = vsel %vm12225_vm9, %v9630_v4, %v5193_v52  ;;  %v5198_v50 = vsel %vm12225_vm9, %v9631_v55, %v5197_v28 }
 0x3b5   : > { %v5253_v12 = vunpack.c.l.b16 %v5194_v23  ;;  %v5254_v34 = vunpack.c.l.b16 %v5198_v50 }
 0x3b7   : > { %v5266_v59 = vpack.c.b16 %v5254_v34, %v5253_v12  ;;  %v3810_v34 = vadd.f32 %v13016_v39, %v12913_v51 }
 0x3b9   : > { %v4186_v43 = vpop.f32.mrf.mxu3 }
 0x3ba   : > { %v13035_v19 = vadd.f32 %v4186_v43, %v3805_v14  ;;  %v5128_v14 = vld [vmem:[#allocation2 + $0x68] sm:$0xe]  ;;  %v3808_v43 = vadd.f32 %v12972_v40, %v12863_v54  ;;  %v13066_v63 = vpop.f32.mrf.mxu0  ;;  %v3792_v4 = vpop.f32.mrf.mxu2  ;;  %v3809_v40 = vadd.f32 %v12984_v1, %v12888_v38  ;;  %v5129_v38 = vld [vmem:[#allocation2 + $0x70] sm:$0xe] }
 0x3bb   : > { %v9633_v62 = vrot.slane %v5128_v14, 9  ;;  %v9634_v31 = vrot.slane %v5129_v38, 9 }
 0x3be   : > { %5345 = vmatmul.bf16.gmra.mxu3 %v5265_v7  ;;  %v5205_v7 = vrot.slane %v12823_v13, 5 }
 0x3c1   : > { %v4189_v35 = vpop.f32.mrf.mxu3 }
 0x3c2   : > { %v13046_v30 = vadd.f32 %v4189_v35, %v3806_v18  ;;  %v5201_v18 = vrot.slane %v12833_v61, 5  ;;  %v5206_v35 = vsel %vm12225_vm9, %v9633_v62, %v5205_v7  ;;  %v13079_v23 = vpop.f32.mrf.mxu0  ;;  %v5130_v61 = vld [vmem:[#allocation2 + $0x78] sm:$0xe]  ;;  %v13084_v12 = vpop.f32.mrf.mxu2 }
 0x3c3   : > { %v5256_v52 = vunpack.c.l.b16 %v5206_v35 }
 0x3c4   : > { %v5202_v54 = vsel %vm12225_vm9, %v9632_v20, %v5201_v18 }
 0x3c5   : > { %v5255_v28 = vunpack.c.l.b16 %v5202_v54  ;;  %v3812_v54 = vadd.f32 %v3787_v6, %v12954_v27 }
 0x3c7   : > { %v5267_v50 = vpack.c.b16 %v5256_v52, %v5255_v28  ;;  %v13106_v52 = vpop.f32.mrf.mxu1 }
 0x3c9   : > { %v4191_v45 = vpop.f32.mrf.mxu3 }
 0x3ca   : > { %v13056_v29 = vadd.f32 %v4191_v45, %v3807_v11  ;;  %v10387_v11 = vld [vmem:[%s14355_s12 + $0x60] sm:$0xff]  ;;  %v9635_v45 = vrot.slane %v5130_v61, 9  ;;  %v3797_v7 = vpop.f32.mrf.mxu2 }
 0x3cb   : > { %6153 = vmatpush.bf16.msra.mxu0 %v10387_v11 }
 0x3ce   : > { %5350 = vmatmul.bf16.gmra.mxu3 %v5266_v59  ;;  %v5213_v59 = vrot.slane %v12870_v25, 5  ;;  %v5132_v25 = vld [vmem:[#allocation2 + $0x88] sm:$0xe] }
 0x3cf   : > { %v9637_v28 = vrot.slane %v5132_v25, 9 }
 0x3d0   : > { %v5214_v37 = vsel %vm12225_vm9, %v9635_v45, %v5213_v59 }
 0x3d1   : > { %v4194_v56 = vpop.f32.mrf.mxu3  ;;  %v5258_v51 = vunpack.c.l.b16 %v5214_v37 }
 0x3d2   : > { %v13068_v46 = vadd.f32 %v4194_v56, %v3808_v43  ;;  %v5209_v43 = vrot.slane %v12876_v49, 5  ;;  %v13094_v56 = vpop.f32.mrf.mxu0  ;;  %v10386_v49 = vld [vmem:[%s14355_s12 + $0x58] sm:$0xff]  ;;  %v13112_v38 = vpop.f32.mrf.mxu2 }
 0x3d3   : > { %6154 = vmatpush.bf16.msra.mxu0 %v10386_v49  ;;  %14457 = vst [vmem:[#allocation49_spill] sm:$0xff] %v13112_v38  ;;  %v5225_v49 = vrot.slane %v12958_v5, 5  ;;  %v14473_v38 = vld [vmem:[#allocation28_spill] sm:$0xff] }
 0x3d4   : > { %v5210_v62 = vsel %vm12225_vm9, %v9634_v31, %v5209_v43 }
 0x3d5   : > { %v5257_v20 = vunpack.c.l.b16 %v5210_v62  ;;  %v5133_v62 = vld [vmem:[#allocation2 + $0x90] sm:$0xe] }
 0x3d6   : > { %v9638_v25 = vrot.slane %v5133_v62, 9 }
 0x3d7   : > { %v5268_v18 = vpack.c.b16 %v5258_v51, %v5257_v20  ;;  %v5134_v51 = vld [vmem:[#allocation2 + $0x98] sm:$0xe]  ;;  %v3814_v20 = vadd.f32 %v3792_v4, %v12980_v15 }
 0x3d9   : > { %v4196_v55 = vpop.f32.mrf.mxu3 }
 0x3da   : > { %v13077_v13 = vadd.f32 %v4196_v55, %v3809_v40  ;;  %v13103_v35 = vpop.f32.mrf.mxu0  ;;  %v5131_v40 = vld [vmem:[#allocation2 + $0x80] sm:$0xe]  ;;  %v5063_v37 = vpop.f32.mrf.mxu2 }
 0x3db   : > { %v9636_v11 = vrot.slane %v5131_v40, 9  ;;  %v5229_v40 = vrot.slane %v12960_v17, 5 }
 0x3de   : > { %5355 = vmatmul.bf16.gmra.mxu3 %v5267_v50  ;;  %v5221_v50 = vrot.slane %v12919_v41, 5  ;;  %v4646_v41 = vpop.f32.mrf.mxu1 }
 0x3e1   : > { %v4199_v1 = vpop.f32.mrf.mxu3 }
 0x3e2   : > { %v13089_v14 = vadd.f32 %v4199_v1, %v3810_v34  ;;  %v5217_v34 = vrot.slane %v12917_v9, 5  ;;  %v5222_v1 = vsel %vm12225_vm9, %v9637_v28, %v5221_v50  ;;  %v13120_v59 = vpop.f32.mrf.mxu0  ;;  %v10385_v9 = vld [vmem:[%s14355_s12 + $0x50] sm:$0xff] }
 0x3e3   : > { %v5260_v6 = vunpack.c.l.b16 %v5222_v1  ;;  %6155 = vmatpush.bf16.msra.mxu0 %v10385_v9  ;;  %v13136_v1 = vpop.f32.mrf.mxu2 }
 0x3e4   : > { %v5218_v27 = vsel %vm12225_vm9, %v9636_v11, %v5217_v34  ;;  %v5226_v11 = vsel %vm12225_vm9, %v9638_v25, %v5225_v49 }
 0x3e5   : > { %v5259_v31 = vunpack.c.l.b16 %v5218_v27  ;;  %v5261_v15 = vunpack.c.l.b16 %v5226_v11 }
 0x3e6   : > { %v4648_v50 = vpop.f32.mrf.mxu1 }
 0x3e7   : > { %v5269_v43 = vpack.c.b16 %v5260_v6, %v5259_v31  ;;  %v3816_v31 = vadd.f32 %v3797_v7, %v12994_v16  ;;  %v10382_v16 = vld [vmem:[%s14355_s12 + $0x38] sm:$0xff]  ;;  %6156 = vmatpush.bf16.msra.mxu0 %v10384_v53  ;;  %v14484_v53 = vld [vmem:[#allocation29_spill] sm:$0xff] }
 0x3e8   : > { %6295 = vmatpush.bf16.msrb.mxu1 %v10382_v16  ;;  %v14465_v16 = vld [vmem:[#allocation24_spill] sm:$0xff] }
 0x3e9   : > { %v13098_v39 = vpop.f32.mrf.mxu3 }
 0x3ea   : > { %v13130_v28 = vpop.f32.mrf.mxu0 }
 0x3eb   : > { %v13145_v9 = vpop.f32.mrf.mxu2 }
 0x3ee   : > { %5360 = vmatmul.bf16.gmra.mxu3 %v5268_v18  ;;  %v13142_v17 = vpop.f32.mrf.mxu1 }
 0x3f1   : > { %v4204_v55 = vpop.f32.mrf.mxu3 }
 0x3f2   : > { %v13109_v61 = vadd.f32 %v4204_v55, %v3812_v54  ;;  %v9639_v54 = vrot.slane %v5134_v51, 9  ;;  %v13140_v6 = vpop.f32.mrf.mxu0  ;;  %v4492_v51 = vadd.f32 %v13025_v57, %v13004_v10  ;;  %v10381_v10 = vld [vmem:[%s14355_s12 + $0x30] sm:$0xff] }
 0x3f3   : > { %v13165_v7 = vpop.f32.mrf.mxu2  ;;  %6296 = vmatpush.bf16.msrb.mxu1 %v10381_v10 }
 0x3f4   : > { %v5230_v34 = vsel %vm12225_vm9, %v9639_v54, %v5229_v40  ;;  %v4686_v40 = vadd.f32 %v4646_v41, %v4492_v51  ;;  %v4493_v41 = vadd.f32 %v13037_v24, %v13014_v58  ;;  %v5412_v58 = vld [vmem:[%s14354_s11] sm:$0x3] }
 0x3f5   : > { %v5262_v4 = vunpack.c.l.b16 %v5230_v34 }
 0x3f6   : > { %v13158_v49 = vpop.f32.mrf.mxu1 }
 0x3f7   : > { %v5270_v5 = vpack.c.b16 %v5262_v4, %v5261_v15 }
 0x3f9   : > { %v13118_v45 = vpop.f32.mrf.mxu3 }
 0x3fe   : > { %5365 = vmatmul.bf16.gmra.mxu3 %v5269_v43 }
 0x401   : > { %v4209_v18 = vpop.f32.mrf.mxu3 }
 0x402   : > { %v13128_v55 = vadd.f32 %v4209_v18, %v3814_v20  ;;  %v13151_v20 = vpop.f32.mrf.mxu0  ;;  %v10674_v18 = vld [vmem:[%s14351_s8] sm:$0xf] }
 0x403   : > { %v13156_v25 = vperm.slane %v10674_v18, 2  ;;  %v13172_v11 = vperm.slane %v10674_v18, 3 }
 0x404   : > { %14458 = vst [vmem:[#allocation50_spill] sm:$0xff] %v13128_v55 }
 0x405   : > { %v2329_v57 = vadd.f32 %v12172_v42, %v13156_v25  ;;  %v2331_v34 = vadd.f32 %v12197_v48, %v13156_v25  ;;  %v2334_v15 = vadd.f32 %v12220_v32, %v13156_v25  ;;  %v2336_v4 = vadd.f32 %v12258_v36, %v13156_v25  ;;  %v14462_v48 = vld [vmem:[#allocation23_spill] sm:$0xff]  ;;  %v14463_v32 = vld [vmem:[#allocation22_spill] sm:$0xff] }
 0x406   : > { %v2339_v51 = vadd.f32 %v14463_v32, %v13156_v25  ;;  %v10380_v32 = vld [vmem:[%s14355_s12 + $0x28] sm:$0xff]  ;;  %v2346_v55 = vadd.f32 %v14473_v38, %v13156_v25 }
 0x407   : > { %v13187_v42 = vadd.f32 1.0, %v2329_v57  ;;  %v13198_v24 = vadd.f32 1.0, %v2331_v34  ;;  %v10414_v34 = vld [vmem:[%s14355_s12 + $0xf8] sm:$0xff]  ;;  %6297 = vmatpush.bf16.msrb.mxu1 %v10380_v32 }
 0x408   : > { %v13247_v38 = vadd.f32 1.0, %v2339_v51  ;;  %6745 = vmatpush.bf16.msrb.mxu3 %v10414_v34  ;;  %v13262_v51 = vpop.f32.mrf.mxu2 }
 0x409   : > { %v13138_v27 = vpop.f32.mrf.mxu3 }
 0x40a   : > { %14459 = vst [vmem:[#allocation51_spill] sm:$0xff] %v13138_v27  ;;  %v13206_v10 = vpop.f32.mrf.mxu0  ;;  %v13278_v27 = vadd.f32 1.0, %v2346_v55  ;;  %v14492_v55 = vld [vmem:[#allocation32_spill] sm:$0xff] }
 0x40b   : > { %14466 = vst [vmem:[#allocation23_spill] sm:$0xff] %v13206_v10  ;;  %v13235_v10 = vperm.slane %v5412_v58, 0 }
 0x40c   : > { %14476 = vst [vmem:[#allocation28_spill] sm:$0xff] %v13247_v38 }
 0x40e   : > { %5370 = vmatmul.bf16.gmra.mxu3 %v5270_v5  ;;  %v5103_v5 = vadd.f32 %v5063_v37, %v4686_v40  ;;  %v14464_v37 = vld [vmem:[#allocation25_spill] sm:$0xff]  ;;  %v2341_v40 = vadd.f32 %v14465_v16, %v13156_v25  ;;  %v13221_v16 = vadd.f32 %v14468_v26, %v13172_v11  ;;  %v4687_v26 = vadd.f32 %v4648_v50, %v4493_v41  ;;  %v14479_v50 = vld [vmem:[#allocation18_spill] sm:$0xff] }
 0x40f   : > { %v13202_v18 = vadd.f32 %v14464_v37, %v13172_v11  ;;  %v13217_v37 = vadd.f32 1.0, %v2334_v15  ;;  %v2349_v41 = vadd.f32 %v14479_v50, %v13156_v25  ;;  %v13274_v50 = vadd.f32 %v14484_v53, %v13172_v11 }
 0x410   : > { %14469 = vst [vmem:[#allocation25_spill] sm:$0xff] %v13221_v16  ;;  %v13258_v32 = vadd.f32 1.0, %v2341_v40  ;;  %v14486_v40 = vld [vmem:[#allocation20_spill] sm:$0xff] }
 0x411   : > { %v4214_v43 = vpop.f32.mrf.mxu3  ;;  %14467 = vst [vmem:[#allocation22_spill] sm:$0xff] %v13217_v37  ;;  %v13288_v53 = vadd.f32 1.0, %v2349_v41  ;;  %v10412_v41 = vld [vmem:[%s14355_s12 + $0xe8] sm:$0xff] }
 0x412   : > { %v13147_v62 = vadd.f32 %v4214_v43, %v3816_v31  ;;  %v13185_v31 = vld [vmem:[%s14353_s10] ss:$0 sm:$0xff]  ;;  %v13191_v43 = vadd.f32 %v14462_v48, %v13172_v11  ;;  %v10398_v48 = vld [vmem:[%s14355_s12 + $0xb8] sm:$0xff] }
 0x413   : > { %6552 = vmatpush.bf16.msrb.mxu2 %v10398_v48  ;;  %v10413_v48 = vld [vmem:[%s14355_s12 + $0xf0] sm:$0xff]  ;;  %14490 = vst [vmem:[#allocation20_spill] sm:$0xff] %v13288_v53 }
 0x414   : > { %14460 = vst [vmem:[#allocation52_spill] sm:$0xff] %v13147_v62  ;;  %v13227_v62 = vpop.f32.mrf.mxu1  ;;  %6746 = vmatpush.bf16.msrb.mxu3 %v10413_v48  ;;  %v14496_v48 = vld [vmem:[#allocation35_spill] sm:$0xff] }
 0x415   : > { %14472 = vst [vmem:[#allocation27_spill] sm:$0xff] %v13227_v62  ;;  %v13264_v62 = vperm.slane %v5412_v58, 1 }
 0x418   : > { %6747 = vmatpush.bf16.msrb.mxu3 %v10412_v41  ;;  %v3347_v41 = vadd.f32 %v13012_v33, %v13000_v22  ;;  %v14513_v22 = vld [vmem:[#allocation42_spill] sm:$0xff] }
 0x419   : > { %v13160_v54 = vpop.f32.mrf.mxu3  ;;  %v13378_v33 = vadd.f32 %v14513_v22, %v13172_v11 }
 0x41a   : > { %14461 = vst [vmem:[#allocation53_spill] sm:$0xff] %v13160_v54  ;;  %v13223_v54 = vadd.f32 1.0, %v2336_v4  ;;  %v10397_v4 = vld [vmem:[%s14355_s12 + $0xb0] sm:$0xff] }
 0x41b   : > { %6553 = vmatpush.bf16.msrb.mxu2 %v10397_v4 }
 0x41c   : > { %14470 = vst [vmem:[#allocation24_spill] sm:$0xff] %v13223_v54  ;;  %v14474_v54 = vld [vmem:[#allocation19_spill] sm:$0xff] }
 0x41d   : > { %v13245_v16 = vadd.f32 %v14474_v54, %v13172_v11  ;;  %v14481_v54 = vld [vmem:[#allocation12_spill] sm:$0xff] }
 0x41e   : > { %14485 = vst [vmem:[#allocation12_spill] sm:$0xff] %v13274_v50  ;;  %v14491_v50 = vld [vmem:[#allocation30_spill] sm:$0xff] }
 0x421   : > { %v5336_v36 = vpop.f32.mrf.mxu3 }
 0x422   : > { %v5376_v57 = vadd.f32 %v5336_v36, %v5103_v5  ;;  %v14471_v5 = vld [vmem:[#allocation26_spill] sm:$0xff] }
 0x423   : > { %v2344_v36 = vadd.f32 %v14471_v5, %v13156_v25  ;;  %v10379_v5 = vld [vmem:[%s14355_s12 + $0x20] sm:$0xff]  ;;  %14475 = vst [vmem:[#allocation26_spill] sm:$0xff] %v13245_v16  ;;  %v2351_v16 = vadd.f32 %v14481_v54, %v13156_v25  ;;  %v5104_v54 = vadd.f32 %v13136_v1, %v4687_v26 }
 0x424   : > { %v5396_v15 = vadd.f32 %v13185_v31, %v5376_v57  ;;  %v14477_v57 = vld [vmem:[#allocation21_spill] sm:$0xff]  ;;  %6298 = vmatpush.bf16.msrb.mxu1 %v10379_v5 }
 0x425   : > { %v13251_v37 = vadd.f32 %v14477_v57, %v13172_v11  ;;  %14480 = vst [vmem:[#allocation21_spill] sm:$0xff] %v13258_v32  ;;  %v14482_v57 = vld [vmem:[#allocation13_spill] sm:$0xff]  ;;  %v13270_v34 = vadd.f32 1.0, %v2344_v36  ;;  %v2354_v32 = vadd.f32 %v14486_v40, %v13156_v25  ;;  %v14488_v36 = vld [vmem:[#allocation31_spill] sm:$0xff]  ;;  %v2356_v40 = vadd.f32 %v14491_v50, %v13156_v25 }
 0x426   : > { %v5413_v38 = vmax.f32 %v5396_v15, 0.0  ;;  %14487 = vst [vmem:[#allocation13_spill] sm:$0xff] %v13278_v27  ;;  %v4494_v15 = vadd.f32 %v13052_v21, %v13023_v3  ;;  %v2359_v27 = vadd.f32 %v14492_v55, %v13156_v25  ;;  %v14493_v3 = vld [vmem:[#allocation33_spill] sm:$0xff]  ;;  %v13298_v1 = vadd.f32 1.0, %v2351_v16  ;;  %v14501_v55 = vld [vmem:[#allocation44_spill] sm:$0xff] }
 0x427   : > { %14478 = vst [vmem:[#allocation19_spill] sm:$0xff] %v13251_v37  ;;  %v13268_v37 = vadd.f32 %v14482_v57, %v13172_v11  ;;  %v13286_v57 = vadd.f32 %v14488_v36, %v13172_v11  ;;  %v13296_v21 = vadd.f32 %v14493_v3, %v13172_v11  ;;  %v10396_v5 = vld [vmem:[%s14355_s12 + $0xa8] sm:$0xff]  ;;  %v13312_v50 = vadd.f32 %v14496_v48, %v13172_v11  ;;  %v14500_v36 = vld [vmem:[#allocation46_spill] sm:$0xff] }
 0x428   : > { %14483 = vst [vmem:[#allocation18_spill] sm:$0xff] %v13270_v34  ;;  %v5430_v58 = vmul.f32 %v13235_v10, %v5413_v38  ;;  %v10378_v38 = vld [vmem:[%s14355_s12 + $0x18] sm:$0xff]  ;;  %v14497_v16 = vld [vmem:[#allocation37_spill] sm:$0xff]  ;;  %v3332_v3 = vadd.f32 %v14501_v55, %v14500_v36  ;;  %v4688_v48 = vadd.f32 %v13142_v17, %v4494_v15  ;;  %6554 = vmatpush.bf16.msrb.mxu2 %v10396_v5  ;;  %v14507_v17 = vld [vmem:[#allocation36_spill] sm:$0xff] }
 0x429   : > { %14489 = vst [vmem:[#allocation29_spill] sm:$0xff] %v13286_v57  ;;  %v5338_v34 = vpop.f32.mrf.mxu3  ;;  %6299 = vmatpush.bf16.msrb.mxu1 %v10378_v38  ;;  %v14504_v36 = vld [vmem:[#allocation39_spill] sm:$0xff]  ;;  %v2364_v15 = vadd.f32 %v14507_v17, %v13156_v25  ;;  %v14508_v5 = vld [vmem:[#allocation40_spill] sm:$0xff]  ;;  %v3342_v17 = vadd.f32 %v12986_v8, %v12992_v0 }
 0x42a   : > { %14494 = vst [vmem:[#allocation31_spill] sm:$0xff] %v13296_v21  ;;  %v5447_v26 = vadd.f32 %v13264_v62, %v5430_v58  ;;  %v5377_v4 = vadd.f32 %v5338_v34, %v5104_v54  ;;  %v13316_v58 = vadd.f32 %v14497_v16, %v13172_v11  ;;  %v14499_v34 = vld [vmem:[#allocation34_spill] sm:$0xff]  ;;  %v13324_v21 = vpop.f32.mrf.mxu0  ;;  %v10395_v16 = vld [vmem:[%s14355_s12 + $0xa0] sm:$0xff]  ;;  %v13339_v55 = vadd.f32 %v14504_v36, %v13172_v11  ;;  %v14510_v38 = vld [vmem:[#allocation47_spill] sm:$0xff] }
 0x42b   : > { %14495 = vst [vmem:[#allocation30_spill] sm:$0xff] %v13298_v1  ;;  %v2361_v54 = vadd.f32 %v14499_v34, %v13156_v25  ;;  %v13322_v1 = vadd.f32 1.0, %v2354_v32  ;;  %v10377_v34 = vld [vmem:[%s14355_s12 + $0x10] sm:$0xff]  ;;  %v13335_v32 = vadd.f32 1.0, %v2356_v40  ;;  %v13352_v40 = vadd.f32 %v14508_v5, %v13172_v11  ;;  %v13366_v5 = vpop.f32.mrf.mxu2 }
 0x42c   : > { %14498 = vst [vmem:[#allocation32_spill] sm:$0xff] %v13316_v58  ;;  %v5479_v53 = vmul.f32 %v13187_v42, %v5447_v26  ;;  %v5397_v57 = vadd.f32 %v13185_v31, %v5377_v4  ;;  %v13341_v42 = vadd.f32 1.0, %v2359_v27  ;;  %v13345_v26 = vpop.f32.mrf.mxu1  ;;  %v10411_v4 = vld [vmem:[%s14355_s12 + $0xe0] sm:$0xff]  ;;  %v3337_v36 = vadd.f32 %v14510_v38, %v12970_v44  ;;  %6555 = vmatpush.bf16.msrb.mxu2 %v10395_v16 }
 0x42d   : > { %14502 = vst [vmem:[#allocation33_spill] sm:$0xff] %v13322_v1  ;;  %v4495_v58 = vadd.f32 %v13066_v63, %v13035_v19  ;;  %v13364_v1 = vadd.f32 1.0, %v2361_v54  ;;  %6300 = vmatpush.bf16.msrb.mxu1 %v10377_v34  ;;  %v13374_v0 = vadd.f32 1.0, %v2364_v15  ;;  %v14514_v19 = vld [vmem:[#allocation38_spill] sm:$0xff]  ;;  %6748 = vmatpush.bf16.msrb.mxu3 %v10411_v4  ;;  %v14515_v54 = vld [vmem:[#allocation48_spill] sm:$0xff]  ;;  %v10394_v34 = vld [vmem:[%s14355_s12 + $0x98] sm:$0xff]  ;;  %v13395_v15 = vadd.f32 %v13106_v52, %v3347_v41 }
 0x42e   : > { %14503 = vst [vmem:[#allocation35_spill] sm:$0xff] %v13335_v32  ;;  %v5495_v27 = vadd.f32 %v5479_v53, %v13191_v43  ;;  %v5105_v43 = vadd.f32 %v13145_v9, %v4688_v48  ;;  %v2366_v63 = vadd.f32 %v14514_v19, %v13156_v25  ;;  %v10410_v25 = vld [vmem:[%s14355_s12 + $0xd8] sm:$0xff]  ;;  %v5689_v19 = vld [vmem:[#allocation2 + $0xc] sm:$0x1] }
 0x42f   : > { %14505 = vst [vmem:[#allocation37_spill] sm:$0xff] %v13339_v55  ;;  %v14511_v55 = vld [vmem:[#allocation45_spill] sm:$0xff]  ;;  %v4689_v38 = vadd.f32 %v13158_v49, %v4495_v58  ;;  %v13413_v49 = vadd.f32 %v13094_v56, %v13056_v29  ;;  %v13427_v56 = vadd.f32 %v13103_v35, %v13068_v46 }
 0x430   : > { %14506 = vst [vmem:[#allocation34_spill] sm:$0xff] %v13341_v42  ;;  %v5414_v42 = vmax.f32 %v5397_v57, 0.0  ;;  %v3618_v32 = vadd.f32 %v14511_v55, %v3332_v3  ;;  %v14512_v57 = vld [vmem:[#allocation41_spill] sm:$0xff]  ;;  %v3620_v3 = vadd.f32 %v14515_v54, %v3337_v36  ;;  %v10383_v36 = vld [vmem:[%s14355_s12 + $0x40] sm:$0xff]  ;;  %6556 = vmatpush.bf16.msrb.mxu2 %v10394_v34  ;;  %v13407_v52 = vadd.f32 1.0, %v2366_v63 }
 0x431   : > { %14509 = vst [vmem:[#allocation46_spill] sm:$0xff] %v13352_v40  ;;  %v5511_v40 = vpack.c.bf16 %v5495_v27, %v5495_v27  ;;  %v13372_v8 = vadd.f32 %v14512_v57, %v13172_v11  ;;  %v5341_v53 = vpop.f32.mrf.mxu3  ;;  %v10376_v55 = vld [vmem:[%s14355_s12 + $0x8] sm:$0xff]  ;;  %6749 = vmatpush.bf16.msrb.mxu3 %v10410_v25  ;;  %6157 = vmatpush.bf16.msra.mxu0 %v10383_v36  ;;  %v5814_v36 = vld [vmem:[#allocation2 + $0x4] sm:$0x1] }
 0x432   : > { %v5431_v44 = vmul.f32 %v13235_v10, %v5414_v42  ;;  %v5378_v16 = vadd.f32 %v5341_v53, %v5105_v43  ;;  %v3622_v42 = vadd.f32 %v12990_v60, %v3342_v17  ;;  %v3811_v4 = vadd.f32 %v13031_v47, %v3618_v32  ;;  %6301 = vmatpush.bf16.msrb.mxu1 %v10376_v55  ;;  %v10393_v60 = vld [vmem:[%s14355_s12 + $0x90] sm:$0xff]  ;;  %v10675_v53 = vld [vmem:[#allocation2 + $0x8] sm:$0xf] }
 0x433   : > { %v5528_v9 = vshrl.u32 %v5511_v40, 16  ;;  %v4496_v47 = vadd.f32 %v13079_v23, %v13046_v30  ;;  %v10409_v32 = vld [vmem:[%s14355_s12 + $0xd0] sm:$0xff]  ;;  %v3813_v22 = vadd.f32 %v13058_v2, %v3620_v3  ;;  %v5106_v63 = vadd.f32 %v13165_v7, %v4689_v38  ;;  %v13446_v7 = vpop.f32.mrf.mxu2 }
 0x434   : > { %v5448_v48 = vadd.f32 %v13264_v62, %v5431_v44  ;;  %v5531_v44 = vshll.u32 %v5511_v40, 16  ;;  %v5398_v57 = vadd.f32 %v13185_v31, %v5378_v16  ;;  %v4228_v58 = vadd.f32 %v13098_v39, %v3811_v4  ;;  %v4484_v40 = vpop.f32.mrf.mxu0  ;;  %v13423_v29 = vpop.f32.mrf.mxu1  ;;  %6557 = vmatpush.bf16.msrb.mxu2 %v10393_v60  ;;  %v14519_v4 = vld [vmem:[#allocation27_spill] sm:$0xff]  ;;  %v10391_v60 = vld [vmem:[%s14355_s12 + $0x80] sm:$0xff] }
 0x435   : > { %v5530_v27 = vrot.slane %v5528_v9, 7  ;;  %v13431_v39 = vadd.f32 %v13120_v59, %v13077_v13  ;;  %v13442_v13 = vadd.f32 %v13130_v28, %v13089_v14  ;;  %v4230_v2 = vadd.f32 %v13118_v45, %v3813_v22  ;;  %6750 = vmatpush.bf16.msrb.mxu3 %v10409_v32  ;;  %v10392_v14 = vld [vmem:[%s14355_s12 + $0x88] sm:$0xff]  ;;  %v14518_v28 = vld [vmem:[#allocation51_spill] sm:$0xff]  ;;  %v14522_v32 = vld [vmem:[#allocation50_spill] sm:$0xff] }
 0x436   : > { %v5480_v43 = vmul.f32 %v13198_v24, %v5448_v48  ;;  %v10375_v24 = vld [vmem:[%s14355_s12] sm:$0xff]  ;;  %v5415_v23 = vmax.f32 %v5398_v57, 0.0  ;;  %v3815_v35 = vadd.f32 %v13084_v12, %v3622_v42  ;;  %v13449_v3 = vadd.f32 %v13140_v6, %v4228_v58  ;;  %v10408_v12 = vld [vmem:[%s14355_s12 + $0xc8] sm:$0xff] }
 0x437   : > { %v5533_v17 = vor.u32 %v5531_v44, %v5530_v27  ;;  %v5534_v41 = vrot.slane %v5530_v27, 4  ;;  %6302 = vmatpush.bf16.msrb.mxu1 %v10375_v24  ;;  %v13460_v45 = vadd.f32 %v13151_v20, %v13109_v61  ;;  %v4690_v38 = vadd.f32 %v14519_v4, %v4496_v47  ;;  %v14520_v44 = vld [vmem:[#allocation22_spill] sm:$0xff]  ;;  %v6344_v58 = vld [vmem:[#allocation2] sm:$0xe]  ;;  %v14521_v61 = vld [vmem:[#allocation23_spill] sm:$0xff] }
 0x438   : > { %v5496_v30 = vadd.f32 %v5480_v43, %v13202_v18  ;;  %v5432_v46 = vmul.f32 %v13235_v10, %v5415_v23  ;;  %v4232_v6 = vadd.f32 %v14518_v28, %v3815_v35  ;;  %6558 = vmatpush.bf16.msrb.mxu2 %v10392_v14  ;;  %v6394_v24 = vrot.slane %v5814_v36, 5  ;;  %v14523_v47 = vld [vmem:[#allocation49_spill] sm:$0xff]  ;;  %v10407_v23 = vld [vmem:[%s14355_s12 + $0xc0] sm:$0xff] }
 0x439   : > { %v5687_v18 = vsel %vm12192_vm5, %v5533_v17, %v10675_v53  ;;  %v5690_v48 = vsel %vm12200_vm6, %v5534_v41, %v5689_v19  ;;  %v5343_v59 = vpop.f32.mrf.mxu3  ;;  %v13470_v20 = vadd.f32 %v14521_v61, %v4230_v2  ;;  %v13474_v17 = vadd.f32 %v13324_v21, %v14522_v32  ;;  %6751 = vmatpush.bf16.msrb.mxu3 %v10408_v12  ;;  %v5695_v21 = vld [vmem:[#allocation2 + $0x14] sm:$0x1]  ;;  %v14527_v4 = vld [vmem:[#allocation53_spill] sm:$0xff] }
 0x43a   : > { %v5512_v16 = vpack.c.bf16 %v5496_v30, %v5496_v30  ;;  %5688 = vst [vmem:[#allocation2 + $0x8] sm:$0xf] %v5687_v18  ;;  %v5449_v55 = vadd.f32 %v13264_v62, %v5432_v46  ;;  %v5379_v25 = vadd.f32 %v5343_v59, %v5106_v63  ;;  %v3817_v41 = vadd.f32 %v14523_v47, %v13395_v15  ;;  %v14524_v63 = vld [vmem:[#allocation25_spill] sm:$0xff]  ;;  %v5692_v46 = vld [vmem:[#allocation2 + $0x10] sm:$0xf] }
 0x43b   : > { %5691 = vst [vmem:[#allocation2 + $0xc] sm:$0x1] %v5690_v48  ;;  %v9768_v30 = vrot.slane %v6344_v58, 9  ;;  %v9706_v48 = vld [vmem:[#allocation2] sm:$0xf]  ;;  %v5107_v2 = vadd.f32 %v13262_v51, %v4690_v38  ;;  %v4691_v59 = vadd.f32 %v13345_v26, %v13413_v49 }
 0x43c   : > { %v5536_v34 = vshrl.u32 %v5512_v16, 16  ;;  %v5539_v42 = vshll.u32 %v5512_v16, 16  ;;  %v5481_v43 = vmul.f32 %v14520_v44, %v5449_v55  ;;  %v5399_v57 = vadd.f32 %v13185_v31, %v5379_v25  ;;  %6559 = vmatpush.bf16.msrb.mxu2 %v10391_v60  ;;  %v13494_v51 = vpop.f32.mrf.mxu1  ;;  %v5782_v47 = vld [vmem:[#allocation2] sm:$0xf] }
 0x43d   : > { %v13482_v16 = vadd.f32 %v4484_v40, %v4232_v6  ;;  %v6395_v15 = vsel %vm12225_vm9, %v9768_v30, %v6394_v24  ;;  %v14526_v6 = vld [vmem:[#allocation52_spill] sm:$0xff]  ;;  %v13500_v26 = vadd.f32 %v14527_v4, %v3817_v41  ;;  %6752 = vmatpush.bf16.msrb.mxu3 %v10407_v23  ;;  %v5108_v32 = vadd.f32 %v13366_v5, %v4691_v59  ;;  %v5698_v59 = vld [vmem:[#allocation2 + $0x18] sm:$0xf] }
 0x43e   : > { %v5538_v27 = vrot.slane %v5536_v34, 7  ;;  %v5497_v53 = vadd.f32 %v5481_v43, %v14524_v63  ;;  %v5416_v18 = vmax.f32 %v5399_v57, 0.0  ;;  %v4487_v34 = vpop.f32.mrf.mxu0  ;;  %v6472_v61 = vunpack.c.l.b16 %v6395_v15  ;;  %v14528_v63 = vld [vmem:[#allocation24_spill] sm:$0xff] }
 0x43f   : > { %v5840_v30 = vshll.u32 %v5814_v36, 16 }
 0x440   : > { %v5541_v22 = vor.u32 %v5539_v42, %v5538_v27  ;;  %v5542_v19 = vrot.slane %v5538_v27, 4  ;;  %v5513_v14 = vpack.c.bf16 %v5497_v53, %v5497_v53  ;;  %v5433_v40 = vmul.f32 %v13235_v10, %v5416_v18 }
 0x441   : > { %v10367_v12 = vld [vmem:[#allocation2 + $0x4] sm:$0xf0]  ;;  %v13497_v42 = vadd.f32 %v4487_v34, %v14526_v6  ;;  %v5346_v49 = vpop.f32.mrf.mxu3  ;;  %v5831_v18 = vshrl.u32 %v5782_v47, 16  ;;  %v5842_v5 = vrot.slane %v5840_v30, 5  ;;  %v14529_v34 = vld [vmem:[#allocation26_spill] sm:$0xff] }
 0x442   : > { %v5693_v55 = vsel %vm12192_vm5, %v5541_v22, %v5692_v46  ;;  %v5696_v25 = vsel %vm12200_vm6, %v5542_v19, %v5695_v21  ;;  %v6345_v28 = vld [vmem:[#allocation2 + $0x8] sm:$0xe]  ;;  %v9707_v38 = vor.u32 %v10367_v12, %v9706_v48  ;;  %v5815_v27 = vld [vmem:[#allocation2 + $0xc] sm:$0x1]  ;;  %v5544_v43 = vshrl.u32 %v5513_v14, 16  ;;  %v13504_v22 = vpop.f32.mrf.mxu2  ;;  %v10422_v48 = vld [vmem:[%s14355_s12 + $0x138] sm:$0xff] }
 0x443   : > { %5697 = vst [vmem:[#allocation2 + $0x14] sm:$0x1] %v5696_v25  ;;  %v9769_v44 = vrot.slane %v6345_v28, 9  ;;  %v5547_v57 = vshll.u32 %v5513_v14, 16  ;;  %v5450_v60 = vadd.f32 %v13264_v62, %v5433_v40  ;;  %v5380_v58 = vadd.f32 %v5346_v49, %v5107_v2  ;;  %v5783_v41 = vld [vmem:[#allocation2 + $0x8] sm:$0xf]  ;;  %7162 = vmatpush.bf16.msrb.mxu0 %v10422_v48 }
 0x444   : > { %5694 = vst [vmem:[#allocation2 + $0x10] sm:$0xf] %v5693_v55  ;;  %6303 = vmatmul.bf16.vlgmr.msrb.gmra.mxu1 %v9707_v38  ;;  %v6398_v24 = vrot.slane %v5815_v27, 5  ;;  %v5546_v19 = vrot.slane %v5544_v43, 7  ;;  %v5834_v21 = vshll.u32 %v5782_v47, 16  ;;  %v5845_v2 = vshrl.u32 %v5783_v41, 16 }
 0x445   : > { %v5482_v53 = vmul.f32 %v14528_v63, %v5450_v60  ;;  %v5400_v23 = vadd.f32 %v13185_v31, %v5380_v58  ;;  %v5701_v14 = vld [vmem:[#allocation2 + $0x1c] sm:$0x1]  ;;  %v5833_v12 = vrot.slane %v5831_v18, 4  ;;  %v5854_v47 = vshll.u32 %v5815_v27, 16  ;;  %v13522_v18 = vpop.f32.mrf.mxu1 }
 0x446   : > { %v6399_v46 = vsel %vm12225_vm9, %v9769_v44, %v6398_v24  ;;  %v5549_v15 = vor.u32 %v5547_v57, %v5546_v19  ;;  %v5550_v36 = vrot.slane %v5546_v19, 4  ;;  %v5836_v28 = vrot.slane %v5834_v21, 5 }
 0x447   : > { %v5498_v55 = vadd.f32 %v5482_v53, %v14529_v34  ;;  %v5417_v25 = vmax.f32 %v5400_v23, 0.0  ;;  %v6473_v40 = vunpack.c.l.b16 %v6399_v46  ;;  %v5847_v6 = vrot.slane %v5845_v2, 4  ;;  %v9818_v53 = vld [vmem:[#allocation2 + $0x8] sm:$0xf] }
 0x448   : > { %v5699_v4 = vsel %vm12192_vm5, %v5549_v15, %v5698_v59  ;;  %v5702_v49 = vsel %vm12200_vm6, %v5550_v36, %v5701_v14  ;;  %v5837_v58 = vor.u32 %v5836_v28, %v5833_v12  ;;  %v5848_v24 = vshll.u32 %v5783_v41, 16  ;;  %v14530_v15 = vld [vmem:[#allocation28_spill] sm:$0xff]  ;;  %v14532_v28 = vld [vmem:[#allocation19_spill] sm:$0xff] }
 0x449   : > { %v5514_v38 = vpack.c.bf16 %v5498_v55, %v5498_v55  ;;  %v5434_v44 = vmul.f32 %v13235_v10, %v5417_v25  ;;  %5703 = vst [vmem:[#allocation2 + $0x1c] sm:$0x1] %v5702_v49  ;;  %v6488_v43 = vpack.c.b16 %v6473_v40, %v6472_v61  ;;  %v5348_v57 = vpop.f32.mrf.mxu3  ;;  %v4692_v23 = vadd.f32 %v13423_v29, %v13427_v56 }
 0x44a   : > { %5700 = vst [vmem:[#allocation2 + $0x18] sm:$0xf] %v5699_v4  ;;  %v5381_v63 = vadd.f32 %v5348_v57, %v5108_v32  ;;  %v5838_v61 = vrot.slane %v5837_v58, 4  ;;  %v5850_v21 = vrot.slane %v5848_v24, 5  ;;  %v5856_v36 = vrot.slane %v5854_v47, 5  ;;  %v13531_v14 = vpop.f32.mrf.mxu2 }
 0x44b   : > { %v10399_v60 = vld [vmem:[#allocation2 + $0xc] sm:$0xf0]  ;;  %v5552_v30 = vshrl.u32 %v5514_v38, 16  ;;  %v5451_v19 = vadd.f32 %v13264_v62, %v5434_v44  ;;  %v5555_v48 = vshll.u32 %v5514_v38, 16  ;;  %6560 = vmatmul.bf16.vlgmr.msrb.gmra.mxu2 %v6488_v43  ;;  %v13526_v59 = vld [vmem:[#allocation2 + $0x14] sm:$0x1] }
 0x44c   : > { %v9819_v46 = vor.u32 %v10399_v60, %v9818_v53  ;;  %v5401_v27 = vadd.f32 %v13185_v31, %v5381_v63  ;;  %v6346_v32 = vld [vmem:[#allocation2 + $0x10] sm:$0xe]  ;;  %v5843_v29 = vsel %vm12240_vm12, %v5838_v61, %v5842_v5  ;;  %v5851_v56 = vor.u32 %v5850_v21, %v5847_v6  ;;  %v5704_v38 = vld [vmem:[#allocation2 + $0x20] sm:$0xf]  ;;  %v5707_v44 = vld [vmem:[#allocation2 + $0x24] sm:$0x1] }
 0x44d   : > { %v5554_v2 = vrot.slane %v5552_v30, 7  ;;  %v5483_v41 = vmul.f32 %v14530_v15, %v5451_v19  ;;  %v9770_v55 = vrot.slane %v6346_v32, 9  ;;  %v6402_v25 = vrot.slane %v13526_v59, 5 }
 0x44e   : > { %6753 = vmatmul.bf16.vlgmr.msrb.gmra.mxu3 %v9819_v46  ;;  %v5418_v49 = vmax.f32 %v5401_v27, 0.0  ;;  %v5852_v43 = vrot.slane %v5851_v56, 4  ;;  %v6070_v57 = vunpack.c.l.b16 %v5843_v29  ;;  %v4693_v5 = vadd.f32 %v13494_v51, %v13431_v39  ;;  %v5784_v56 = vld [vmem:[#allocation2 + $0x10] sm:$0xf] }
 0x44f   : > { %v5557_v40 = vor.u32 %v5555_v48, %v5554_v2  ;;  %v5558_v12 = vrot.slane %v5554_v2, 4  ;;  %v5499_v4 = vadd.f32 %v5483_v41, %v14532_v28  ;;  %v6403_v60 = vsel %vm12225_vm9, %v9770_v55, %v6402_v25  ;;  %v9710_v41 = vld [vmem:[#allocation2 + $0x10] sm:$0xf] }
 0x450   : > { %v5435_v47 = vmul.f32 %v13235_v10, %v5418_v49  ;;  %v13543_v30 = vld [vmem:[#allocation2 + $0x1c] sm:$0x1]  ;;  %v5857_v19 = vsel %vm12240_vm12, %v5852_v43, %v5856_v36  ;;  %v5109_v63 = vadd.f32 %v13446_v7, %v4692_v23  ;;  %v6474_v51 = vunpack.c.l.b16 %v6403_v60  ;;  %v14533_v23 = vld [vmem:[#allocation21_spill] sm:$0xff] }
 0x451   : > { %v5705_v6 = vsel %vm12192_vm5, %v5557_v40, %v5704_v38  ;;  %v5708_v58 = vsel %vm12200_vm6, %v5558_v12, %v5707_v44  ;;  %v5515_v24 = vpack.c.bf16 %v5499_v4, %v5499_v4  ;;  %v5351_v53 = vpop.f32.mrf.mxu3  ;;  %v10368_v48 = vld [vmem:[#allocation2 + $0x14] sm:$0xf0]  ;;  %v5110_v46 = vadd.f32 %v13504_v22, %v4693_v5  ;;  %v10421_v22 = vld [vmem:[%s14355_s12 + $0x130] sm:$0xff]  ;;  %v13555_v12 = vpop.f32.mrf.mxu1  ;;  %v5710_v60 = vld [vmem:[#allocation2 + $0x28] sm:$0xf] }
 0x452   : > { %5709 = vst [vmem:[#allocation2 + $0x24] sm:$0x1] %v5708_v58  ;;  %v6347_v39 = vld [vmem:[#allocation2 + $0x18] sm:$0xe]  ;;  %v5452_v2 = vadd.f32 %v13264_v62, %v5435_v47  ;;  %v6071_v15 = vunpack.c.l.b16 %v5857_v19  ;;  %v5382_v27 = vadd.f32 %v5351_v53, %v5109_v63  ;;  %v9711_v32 = vor.u32 %v10368_v48, %v9710_v41  ;;  %v5713_v58 = vld [vmem:[#allocation2 + $0x2c] sm:$0x1]  ;;  %7163 = vmatpush.bf16.msrb.mxu0 %v10421_v22  ;;  %v13562_v53 = vpop.f32.mrf.mxu2 }
 0x453   : > { %5706 = vst [vmem:[#allocation2 + $0x20] sm:$0xf] %v5705_v6  ;;  %v5560_v61 = vshrl.u32 %v5515_v24, 16  ;;  %v5563_v21 = vshll.u32 %v5515_v24, 16  ;;  %v9771_v29 = vrot.slane %v6347_v39, 9  ;;  %v6406_v36 = vrot.slane %v13543_v30, 5 }
 0x454   : > { %v5484_v55 = vmul.f32 %v14533_v23, %v5452_v2  ;;  %v6086_v25 = vpack.c.b16 %v6071_v15, %v6070_v57  ;;  %v5859_v40 = vshrl.u32 %v5784_v56, 16  ;;  %v5402_v28 = vadd.f32 %v13185_v31, %v5382_v27  ;;  %6308 = vmatmul.bf16.gmra.mxu1 %v9711_v32  ;;  %v5785_v6 = vld [vmem:[#allocation2 + $0x18] sm:$0xf] }
 0x455   : > { %v5562_v7 = vrot.slane %v5560_v61, 7  ;;  %v6407_v4 = vsel %vm12225_vm9, %v9771_v29, %v6406_v36  ;;  %v5862_v49 = vshll.u32 %v5784_v56, 16  ;;  %v5868_v38 = vshll.u32 %v13526_v59, 16 }
 0x456   : > { %v5500_v57 = vadd.f32 %v5484_v55, %v13268_v37  ;;  %6158 = vmatmul.bf16.vlgmr.msra.gmra.mxu0 %v6086_v25  ;;  %v6475_v5 = vunpack.c.l.b16 %v6407_v4  ;;  %v5419_v24 = vmax.f32 %v5402_v28, 0.0  ;;  %v5861_v47 = vrot.slane %v5859_v40, 4  ;;  %v9822_v37 = vld [vmem:[#allocation2 + $0x18] sm:$0xf]  ;;  %v4489_v40 = vpop.f32.mrf.mxu0 }
 0x457   : > { %v5565_v44 = vor.u32 %v5563_v21, %v5562_v7  ;;  %v5566_v43 = vrot.slane %v5562_v7, 4  ;;  %v5864_v19 = vrot.slane %v5862_v49, 5  ;;  %v5870_v63 = vrot.slane %v5868_v38, 5 }
 0x458   : > { %v5516_v39 = vpack.c.bf16 %v5500_v57, %v5500_v57  ;;  %v6489_v61 = vpack.c.b16 %v6475_v5, %v6474_v51  ;;  %v5436_v21 = vmul.f32 %v13235_v10, %v5419_v24  ;;  %v5873_v27 = vshrl.u32 %v5785_v6, 16 }
 0x459   : > { %v5711_v48 = vsel %vm12192_vm5, %v5565_v44, %v5710_v60  ;;  %v5714_v59 = vsel %vm12200_vm6, %v5566_v43, %v5713_v58  ;;  %v5353_v2 = vpop.f32.mrf.mxu3  ;;  %v5865_v41 = vor.u32 %v5864_v19, %v5861_v47  ;;  %v5876_v32 = vshll.u32 %v5785_v6, 16  ;;  %v13580_v5 = vld [vmem:[#allocation2 + $0x24] sm:$0x1]  ;;  %v13582_v47 = vpop.f32.mrf.mxu1 }
 0x45a   : > { %5715 = vst [vmem:[#allocation2 + $0x2c] sm:$0x1] %v5714_v59  ;;  %v10400_v15 = vld [vmem:[#allocation2 + $0x1c] sm:$0xf0]  ;;  %v5568_v29 = vshrl.u32 %v5516_v39, 16  ;;  %v5571_v36 = vshll.u32 %v5516_v39, 16  ;;  %v5383_v56 = vadd.f32 %v5353_v2, %v5110_v46  ;;  %v5453_v23 = vadd.f32 %v13264_v62, %v5436_v21 }
 0x45b   : > { %5712 = vst [vmem:[#allocation2 + $0x28] sm:$0xf] %v5711_v48  ;;  %v9823_v7 = vor.u32 %v10400_v15, %v9822_v37  ;;  %6565 = vmatmul.bf16.gmra.mxu2 %v6489_v61  ;;  %v5866_v55 = vrot.slane %v5865_v41, 4  ;;  %v5875_v25 = vrot.slane %v5873_v27, 4  ;;  %v5878_v51 = vrot.slane %v5876_v32, 5  ;;  %v14534_v46 = vld [vmem:[#allocation18_spill] sm:$0xff] }
 0x45c   : > { %v5570_v22 = vrot.slane %v5568_v29, 7  ;;  %v5403_v28 = vadd.f32 %v13185_v31, %v5383_v56  ;;  %v5882_v4 = vshll.u32 %v13543_v30, 16  ;;  %v4694_v49 = vadd.f32 %v13522_v18, %v13442_v13  ;;  %v6348_v38 = vld [vmem:[#allocation2 + $0x20] sm:$0xe]  ;;  %v5716_v13 = vld [vmem:[#allocation2 + $0x30] sm:$0xf] }
 0x45d   : > { %v13575_v44 = vadd.f32 %v4489_v40, %v13500_v26  ;;  %v5485_v43 = vmul.f32 %v14534_v46, %v5453_v23  ;;  %v5871_v60 = vsel %vm12240_vm12, %v5866_v55, %v5870_v63  ;;  %v5879_v57 = vor.u32 %v5878_v51, %v5875_v25  ;;  %v5719_v18 = vld [vmem:[#allocation2 + $0x34] sm:$0x1]  ;;  %v14535_v19 = vld [vmem:[#allocation12_spill] sm:$0xff] }
 0x45e   : > { %6758 = vmatmul.bf16.gmra.mxu3 %v9823_v7  ;;  %v5573_v6 = vor.u32 %v5571_v36, %v5570_v22  ;;  %v5574_v58 = vrot.slane %v5570_v22, 4  ;;  %v5420_v24 = vmax.f32 %v5403_v28, 0.0  ;;  %v9772_v30 = vrot.slane %v6348_v38, 9  ;;  %v9714_v21 = vld [vmem:[#allocation2 + $0x20] sm:$0xf]  ;;  %v13598_v7 = vpop.f32.mrf.mxu2  ;;  %v10420_v38 = vld [vmem:[%s14355_s12 + $0x128] sm:$0xff] }
 0x45f   : > { %v5501_v26 = vadd.f32 %v5485_v43, %v14535_v19  ;;  %v5880_v48 = vrot.slane %v5879_v57, 4  ;;  %v5884_v59 = vrot.slane %v5882_v4, 5  ;;  %v5111_v39 = vadd.f32 %v13531_v14, %v4694_v49  ;;  %v5786_v40 = vld [vmem:[#allocation2 + $0x20] sm:$0xf]  ;;  %7164 = vmatpush.bf16.msrb.mxu0 %v10420_v38 }
 0x460   : > { %v5717_v63 = vsel %vm12192_vm5, %v5573_v6, %v5716_v13  ;;  %v5720_v61 = vsel %vm12200_vm6, %v5574_v58, %v5719_v18  ;;  %v5437_v37 = vmul.f32 %v13235_v10, %v5420_v24  ;;  %v6410_v15 = vrot.slane %v13580_v5, 5 }
 0x461   : > { %v13591_v2 = vld [vmem:[#allocation2 + $0x2c] sm:$0x1]  ;;  %5721 = vst [vmem:[#allocation2 + $0x34] sm:$0x1] %v5720_v61  ;;  %v5517_v41 = vpack.c.bf16 %v5501_v26, %v5501_v26  ;;  %v5885_v27 = vsel %vm12240_vm12, %v5880_v48, %v5884_v59  ;;  %v6072_v32 = vunpack.c.l.b16 %v5871_v60  ;;  %v5356_v14 = vpop.f32.mrf.mxu3  ;;  %v4695_v56 = vadd.f32 %v13555_v12, %v13449_v3 }
 0x462   : > { %v10369_v29 = vld [vmem:[#allocation2 + $0x24] sm:$0xf0]  ;;  %5718 = vst [vmem:[#allocation2 + $0x30] sm:$0xf] %v5717_v63  ;;  %v5454_v23 = vadd.f32 %v13264_v62, %v5437_v37  ;;  %v6073_v55 = vunpack.c.l.b16 %v5885_v27  ;;  %v5384_v25 = vadd.f32 %v5356_v14, %v5111_v39  ;;  %v6411_v4 = vsel %vm12225_vm9, %v9772_v30, %v6410_v15  ;;  %v5722_v37 = vld [vmem:[#allocation2 + $0x38] sm:$0xf] }
 0x463   : > { %v6349_v36 = vld [vmem:[#allocation2 + $0x28] sm:$0xe]  ;;  %v9715_v51 = vor.u32 %v10369_v29, %v9714_v21  ;;  %v5576_v22 = vshrl.u32 %v5517_v41, 16  ;;  %v5579_v28 = vshll.u32 %v5517_v41, 16  ;;  %v6414_v60 = vrot.slane %v13591_v2, 5 }
 0x464   : > { %v9773_v49 = vrot.slane %v6349_v36, 9  ;;  %v14536_v3 = vld [vmem:[#allocation13_spill] sm:$0xff]  ;;  %v6087_v46 = vpack.c.b16 %v6073_v55, %v6072_v32  ;;  %v5404_v43 = vadd.f32 %v13185_v31, %v5384_v25  ;;  %v6476_v6 = vunpack.c.l.b16 %v6411_v4  ;;  %v5725_v21 = vld [vmem:[#allocation2 + $0x3c] sm:$0x1]  ;;  %v4673_v32 = vpop.f32.mrf.mxu1 }
 0x465   : > { %v5486_v12 = vmul.f32 %v14536_v3, %v5454_v23  ;;  %v5578_v57 = vrot.slane %v5576_v22, 7  ;;  %6313 = vmatmul.bf16.gmra.mxu1 %v9715_v51  ;;  %v5112_v58 = vadd.f32 %v13562_v53, %v4695_v56  ;;  %v5887_v24 = vshrl.u32 %v5786_v40, 16  ;;  %v14537_v30 = vld [vmem:[#allocation29_spill] sm:$0xff] }
 0x466   : > { %6163 = vmatmul.bf16.gmra.mxu0 %v6087_v46  ;;  %v5421_v18 = vmax.f32 %v5404_v43, 0.0  ;;  %v6415_v19 = vsel %vm12225_vm9, %v9773_v49, %v6414_v60  ;;  %v5787_v26 = vld [vmem:[#allocation2 + $0x28] sm:$0xf]  ;;  %v5890_v48 = vshll.u32 %v5786_v40, 16  ;;  %v5896_v27 = vshll.u32 %v13580_v5, 16  ;;  %v5090_v3 = vpop.f32.mrf.mxu2  ;;  %v14538_v46 = vld [vmem:[#allocation20_spill] sm:$0xff] }
 0x467   : > { %v5502_v13 = vadd.f32 %v5486_v12, %v14537_v30  ;;  %v5581_v59 = vor.u32 %v5579_v28, %v5578_v57  ;;  %v5582_v39 = vrot.slane %v5578_v57, 4  ;;  %v6477_v63 = vunpack.c.l.b16 %v6415_v19  ;;  %v9826_v28 = vld [vmem:[#allocation2 + $0x28] sm:$0xf] }
 0x468   : > { %v5889_v61 = vrot.slane %v5887_v24, 4  ;;  %v5438_v53 = vmul.f32 %v13235_v10, %v5421_v18  ;;  %v5892_v41 = vrot.slane %v5890_v48, 5  ;;  %v5901_v55 = vshrl.u32 %v5787_v26, 16  ;;  %v14539_v48 = vld [vmem:[#allocation31_spill] sm:$0xff] }
 0x469   : > { %v5518_v15 = vpack.c.bf16 %v5502_v13, %v5502_v13  ;;  %v5723_v14 = vsel %vm12192_vm5, %v5581_v59, %v5722_v37  ;;  %v5726_v29 = vsel %vm12200_vm6, %v5582_v39, %v5725_v21  ;;  %v6490_v36 = vpack.c.b16 %v6477_v63, %v6476_v6  ;;  %v5358_v56 = vpop.f32.mrf.mxu3  ;;  %v10401_v23 = vld [vmem:[#allocation2 + $0x2c] sm:$0xf0]  ;;  %v13626_v63 = vld [vmem:[#allocation2 + $0x34] sm:$0x1]  ;;  %v5731_v37 = vld [vmem:[#allocation2 + $0x44] sm:$0x1] }
 0x46a   : > { %5727 = vst [vmem:[#allocation2 + $0x3c] sm:$0x1] %v5726_v29  ;;  %v5455_v40 = vadd.f32 %v13264_v62, %v5438_v53  ;;  %v5385_v22 = vadd.f32 %v5358_v56, %v5112_v58  ;;  %v9827_v5 = vor.u32 %v10401_v23, %v9826_v28  ;;  %v5893_v4 = vor.u32 %v5892_v41, %v5889_v61  ;;  %v6350_v6 = vld [vmem:[#allocation2 + $0x30] sm:$0xe]  ;;  %v5728_v61 = vld [vmem:[#allocation2 + $0x40] sm:$0xf] }
 0x46b   : > { %v5584_v25 = vshrl.u32 %v5518_v15, 16  ;;  %v5587_v51 = vshll.u32 %v5518_v15, 16  ;;  %5724 = vst [vmem:[#allocation2 + $0x38] sm:$0xf] %v5723_v14  ;;  %6570 = vmatmul.bf16.gmra.mxu2 %v6490_v36  ;;  %v5898_v49 = vrot.slane %v5896_v27, 5  ;;  %v5903_v38 = vrot.slane %v5901_v55, 4 }
 0x46c   : > { %v5487_v43 = vmul.f32 %v14538_v46, %v5455_v40  ;;  %v5405_v60 = vadd.f32 %v13185_v31, %v5385_v22  ;;  %v5904_v57 = vshll.u32 %v5787_v26, 16  ;;  %v5894_v24 = vrot.slane %v5893_v4, 4  ;;  %v9718_v27 = vld [vmem:[#allocation2 + $0x30] sm:$0xf]  ;;  %v13641_v28 = vpop.f32.mrf.mxu1 }
 0x46d   : > { %v5586_v12 = vrot.slane %v5584_v25, 7  ;;  %v5910_v30 = vshll.u32 %v13591_v2, 16  ;;  %v4696_v58 = vadd.f32 %v13582_v47, %v13460_v45  ;;  %v9774_v13 = vrot.slane %v6350_v6, 9 }
 0x46e   : > { %6763 = vmatmul.bf16.gmra.mxu3 %v9827_v5  ;;  %v5503_v59 = vadd.f32 %v5487_v43, %v14539_v48  ;;  %v5422_v39 = vmax.f32 %v5405_v60, 0.0  ;;  %v5899_v26 = vsel %vm12240_vm12, %v5894_v24, %v5898_v49  ;;  %v5906_v21 = vrot.slane %v5904_v57, 5  ;;  %v14540_v43 = vld [vmem:[#allocation30_spill] sm:$0xff] }
 0x46f   : > { %v5589_v18 = vor.u32 %v5587_v51, %v5586_v12  ;;  %v5590_v19 = vrot.slane %v5586_v12, 4  ;;  %v5912_v15 = vrot.slane %v5910_v30, 5  ;;  %v5113_v2 = vadd.f32 %v13598_v7, %v4696_v58  ;;  %v5788_v57 = vld [vmem:[#allocation2 + $0x30] sm:$0xf] }
 0x470   : > { %v5519_v53 = vpack.c.bf16 %v5503_v59, %v5503_v59  ;;  %v5439_v41 = vmul.f32 %v13235_v10, %v5422_v39  ;;  %v5907_v14 = vor.u32 %v5906_v21, %v5903_v38  ;;  %v6074_v29 = vunpack.c.l.b16 %v5899_v26  ;;  %v5734_v59 = vld [vmem:[#allocation2 + $0x58] sm:$0xf] }
 0x471   : > { %v5729_v45 = vsel %vm12192_vm5, %v5589_v18, %v5728_v61  ;;  %v5732_v47 = vsel %vm12200_vm6, %v5590_v19, %v5731_v37  ;;  %v5361_v36 = vpop.f32.mrf.mxu3  ;;  %v13636_v56 = vld [vmem:[#allocation2 + $0x3c] sm:$0x1]  ;;  %v6418_v23 = vrot.slane %v13626_v63, 5  ;;  %v4697_v7 = vadd.f32 %v4673_v32, %v13470_v20  ;;  %v13653_v18 = vpop.f32.mrf.mxu2 }
 0x472   : > { %5733 = vst [vmem:[#allocation2 + $0x44] sm:$0x1] %v5732_v47  ;;  %v5592_v55 = vshrl.u32 %v5519_v53, 16  ;;  %v5595_v25 = vshll.u32 %v5519_v53, 16  ;;  %v5456_v51 = vadd.f32 %v13264_v62, %v5439_v41  ;;  %v5386_v40 = vadd.f32 %v5361_v36, %v5113_v2  ;;  %v10370_v22 = vld [vmem:[#allocation2 + $0x34] sm:$0xf0] }
 0x473   : > { %5730 = vst [vmem:[#allocation2 + $0x40] sm:$0xf] %v5729_v45  ;;  %v5908_v5 = vrot.slane %v5907_v14, 4  ;;  %v9719_v4 = vor.u32 %v10370_v22, %v9718_v27  ;;  %v6351_v49 = vld [vmem:[#allocation2 + $0x38] sm:$0xe]  ;;  %v6419_v38 = vsel %vm12225_vm9, %v9774_v13, %v6418_v23  ;;  %v6422_v12 = vrot.slane %v13636_v56, 5 }
 0x474   : > { %v5594_v46 = vrot.slane %v5592_v55, 7  ;;  %v5488_v20 = vmul.f32 %v14540_v43, %v5456_v51  ;;  %v5406_v32 = vadd.f32 %v13185_v31, %v5386_v40  ;;  %v9775_v60 = vrot.slane %v6351_v49, 9  ;;  %v10419_v13 = vld [vmem:[%s14355_s12 + $0x120] sm:$0xff]  ;;  %v5737_v61 = vld [vmem:[#allocation2 + $0x5c] sm:$0x1]  ;;  %v4678_v43 = vpop.f32.mrf.mxu1 }
 0x475   : > { %v5913_v6 = vsel %vm12240_vm12, %v5908_v5, %v5912_v15  ;;  %6318 = vmatmul.bf16.gmra.mxu1 %v9719_v4  ;;  %v6478_v24 = vunpack.c.l.b16 %v6419_v38  ;;  %v5114_v30 = vadd.f32 %v5090_v3, %v4697_v7  ;;  %v5915_v58 = vshrl.u32 %v5788_v57, 16  ;;  %7165 = vmatpush.bf16.msrb.mxu0 %v10419_v13  ;;  %v9830_v53 = vld [vmem:[#allocation2 + $0x38] sm:$0xf]  ;;  %v13668_v38 = vld [vmem:[%s14353_s10] ss:$0 sm:$0xff] }
 0x476   : > { %v5597_v19 = vor.u32 %v5595_v25, %v5594_v46  ;;  %v5598_v48 = vrot.slane %v5594_v46, 4  ;;  %v5504_v31 = vadd.f32 %v5488_v20, %v13312_v50  ;;  %v6075_v39 = vunpack.c.l.b16 %v5913_v6  ;;  %v5789_v41 = vld [vmem:[#allocation2 + $0x38] sm:$0xf]  ;;  %v5740_v20 = vld [vmem:[#allocation2 + $0x60] sm:$0xf] }
 0x477   : > { %v5423_v37 = vmax.f32 %v5406_v32, 0.0  ;;  %v6423_v26 = vsel %vm12225_vm9, %v9775_v60, %v6422_v12  ;;  %v5917_v21 = vrot.slane %v5915_v58, 4  ;;  %v5918_v3 = vshll.u32 %v5788_v57, 16  ;;  %v5743_v32 = vld [vmem:[#allocation2 + $0x64] sm:$0x1]  ;;  %v14541_v60 = vld [vmem:[#allocation33_spill] sm:$0xff] }
 0x478   : > { %v5735_v15 = vsel %vm12192_vm5, %v5597_v19, %v5734_v59  ;;  %v5738_v2 = vsel %vm12200_vm6, %v5598_v48, %v5737_v61  ;;  %v5520_v45 = vpack.c.bf16 %v5504_v31, %v5504_v31  ;;  %v6088_v47 = vpack.c.b16 %v6075_v39, %v6074_v29  ;;  %v9722_v59 = vld [vmem:[#allocation2 + $0x50] sm:$0xf]  ;;  %v14542_v31 = vld [vmem:[#allocation32_spill] sm:$0xff] }
 0x479   : > { %5739 = vst [vmem:[#allocation2 + $0x5c] sm:$0x1] %v5738_v2  ;;  %v5440_v50 = vmul.f32 %v13235_v10, %v5423_v37  ;;  %v6479_v27 = vunpack.c.l.b16 %v6423_v26  ;;  %v5363_v14 = vpop.f32.mrf.mxu3  ;;  %v5920_v23 = vrot.slane %v5918_v3, 5  ;;  %v5924_v7 = vshll.u32 %v13626_v63, 16  ;;  %v6352_v3 = vld [vmem:[#allocation2 + $0x50] sm:$0xe] }
 0x47a   : > { %v10402_v36 = vld [vmem:[#allocation2 + $0x3c] sm:$0xf0]  ;;  %5736 = vst [vmem:[#allocation2 + $0x58] sm:$0xf] %v5735_v15  ;;  %v5600_v55 = vshrl.u32 %v5520_v45, 16  ;;  %v5603_v25 = vshll.u32 %v5520_v45, 16  ;;  %6168 = vmatmul.bf16.gmra.mxu0 %v6088_v47  ;;  %v5387_v51 = vadd.f32 %v5363_v14, %v5114_v30  ;;  %v4698_v30 = vadd.f32 %v13641_v28, %v13474_v17  ;;  %v5095_v15 = vpop.f32.mrf.mxu2 }
 0x47b   : > { %v9831_v40 = vor.u32 %v10402_v36, %v9830_v53  ;;  %v5457_v22 = vadd.f32 %v13264_v62, %v5440_v50  ;;  %v6491_v29 = vpack.c.b16 %v6479_v27, %v6478_v24  ;;  %v5921_v5 = vor.u32 %v5920_v23, %v5917_v21  ;;  %v13678_v21 = vld [vmem:[#allocation2 + $0x54] sm:$0x1] }
 0x47c   : > { %v5926_v4 = vrot.slane %v5924_v7, 5  ;;  %v5602_v49 = vrot.slane %v5600_v55, 7  ;;  %v5407_v12 = vadd.f32 %v13668_v38, %v5387_v51  ;;  %v5929_v63 = vshrl.u32 %v5789_v41, 16 }
 0x47d   : > { %v5932_v46 = vshll.u32 %v5789_v41, 16  ;;  %v5489_v57 = vmul.f32 %v14541_v60, %v5457_v22  ;;  %6575 = vmatmul.bf16.gmra.mxu2 %v6491_v29  ;;  %v5922_v6 = vrot.slane %v5921_v5, 4  ;;  %v5938_v24 = vshll.u32 %v13636_v56, 16  ;;  %v14543_v5 = vld [vmem:[#allocation35_spill] sm:$0xff]  ;;  %v14544_v60 = vld [vmem:[#allocation37_spill] sm:$0xff] }
 0x47e   : > { %6768 = vmatmul.bf16.gmra.mxu3 %v9831_v40  ;;  %v5605_v58 = vor.u32 %v5603_v25, %v5602_v49  ;;  %v5606_v13 = vrot.slane %v5602_v49, 4  ;;  %v5424_v19 = vmax.f32 %v5407_v12, 0.0  ;;  %v5931_v48 = vrot.slane %v5929_v63, 4 }
 0x47f   : > { %v5505_v39 = vadd.f32 %v5489_v57, %v14542_v31  ;;  %v5927_v61 = vsel %vm12240_vm12, %v5922_v6, %v5926_v4  ;;  %v5934_v37 = vrot.slane %v5932_v46, 5  ;;  %v5940_v26 = vrot.slane %v5938_v24, 5  ;;  %v5746_v31 = vld [vmem:[#allocation2 + $0x68] sm:$0xf] }
 0x480   : > { %v5741_v56 = vsel %vm12192_vm5, %v5605_v58, %v5740_v20  ;;  %v5744_v17 = vsel %vm12200_vm6, %v5606_v13, %v5743_v32  ;;  %v5441_v28 = vmul.f32 %v13235_v10, %v5424_v19  ;;  %v6076_v2 = vunpack.c.l.b16 %v5927_v61  ;;  %v13685_v45 = vld [vmem:[#allocation2 + $0x5c] sm:$0x1]  ;;  %v5790_v32 = vld [vmem:[#allocation2 + $0x50] sm:$0xf]  ;;  %v4681_v58 = vpop.f32.mrf.mxu1 }
 0x481   : > { %5745 = vst [vmem:[#allocation2 + $0x64] sm:$0x1] %v5744_v17  ;;  %v5521_v47 = vpack.c.bf16 %v5505_v39, %v5505_v39  ;;  %v5935_v53 = vor.u32 %v5934_v37, %v5931_v48  ;;  %v5115_v41 = vadd.f32 %v13653_v18, %v4698_v30  ;;  %v5366_v50 = vpop.f32.mrf.mxu3  ;;  %v10371_v27 = vld [vmem:[#allocation2 + $0x54] sm:$0xf0]  ;;  %v4699_v36 = vadd.f32 %v4678_v43, %v13482_v16  ;;  %v5749_v39 = vld [vmem:[#allocation2 + $0x6c] sm:$0x1] }
 0x482   : > { %v6353_v14 = vld [vmem:[#allocation2 + $0x58] sm:$0xe]  ;;  %5742 = vst [vmem:[#allocation2 + $0x60] sm:$0xf] %v5741_v56  ;;  %v5458_v23 = vadd.f32 %v13264_v62, %v5441_v28  ;;  %v9723_v7 = vor.u32 %v10371_v27, %v9722_v59  ;;  %v9776_v55 = vrot.slane %v6352_v3, 9  ;;  %v6426_v25 = vrot.slane %v13678_v21, 5  ;;  %v5098_v27 = vpop.f32.mrf.mxu2 }
 0x483   : > { %v5608_v51 = vshrl.u32 %v5521_v47, 16  ;;  %v5611_v40 = vshll.u32 %v5521_v47, 16  ;;  %v5936_v22 = vrot.slane %v5935_v53, 4  ;;  %v5388_v29 = vadd.f32 %v5366_v50, %v5115_v41  ;;  %v10418_v18 = vld [vmem:[%s14355_s12 + $0x118] sm:$0xff] }
 0x484   : > { %v5490_v4 = vmul.f32 %v14543_v5, %v5458_v23  ;;  %v6427_v16 = vsel %vm12225_vm9, %v9776_v55, %v6426_v25  ;;  %v9777_v49 = vrot.slane %v6353_v14, 9  ;;  %v6430_v12 = vrot.slane %v13685_v45, 5  ;;  %7166 = vmatpush.bf16.msrb.mxu0 %v10418_v18  ;;  %v9834_v53 = vld [vmem:[#allocation2 + $0x58] sm:$0xf]  ;;  %v5752_v5 = vld [vmem:[#allocation2 + $0x70] sm:$0xf] }
 0x485   : > { %v5610_v63 = vrot.slane %v5608_v51, 7  ;;  %v5941_v46 = vsel %vm12240_vm12, %v5936_v22, %v5940_v26  ;;  %v5408_v43 = vadd.f32 %v13668_v38, %v5388_v29  ;;  %6323 = vmatmul.bf16.gmra.mxu1 %v9723_v7  ;;  %v6480_v20 = vunpack.c.l.b16 %v6427_v16  ;;  %v5791_v50 = vld [vmem:[#allocation2 + $0x58] sm:$0xf] }
 0x486   : > { %v5506_v57 = vadd.f32 %v5490_v4, %v14544_v60  ;;  %v6077_v6 = vunpack.c.l.b16 %v5941_v46  ;;  %v6431_v24 = vsel %vm12225_vm9, %v9777_v49, %v6430_v12  ;;  %v5116_v30 = vadd.f32 %v5095_v15, %v4699_v36  ;;  %v14545_v4 = vld [vmem:[#allocation34_spill] sm:$0xff] }
 0x487   : > { %v5613_v13 = vor.u32 %v5611_v40, %v5610_v63  ;;  %v5614_v19 = vrot.slane %v5610_v63, 4  ;;  %v5425_v48 = vmax.f32 %v5408_v43, 0.0  ;;  %v6481_v59 = vunpack.c.l.b16 %v6431_v24 }
 0x488   : > { %v5522_v61 = vpack.c.bf16 %v5506_v57, %v5506_v57  ;;  %v6089_v37 = vpack.c.b16 %v6077_v6, %v6076_v2  ;;  %v5943_v26 = vshrl.u32 %v5790_v32, 16  ;;  %v5946_v3 = vshll.u32 %v5790_v32, 16  ;;  %v14546_v57 = vld [vmem:[#allocation46_spill] sm:$0xff] }
 0x489   : > { %v5747_v56 = vsel %vm12192_vm5, %v5613_v13, %v5746_v31  ;;  %v5750_v17 = vsel %vm12200_vm6, %v5614_v19, %v5749_v39  ;;  %v5442_v28 = vmul.f32 %v13235_v10, %v5425_v48  ;;  %v6492_v15 = vpack.c.b16 %v6481_v59, %v6480_v20  ;;  %v5368_v47 = vpop.f32.mrf.mxu3  ;;  %v10403_v41 = vld [vmem:[#allocation2 + $0x5c] sm:$0xf0]  ;;  %v13721_v39 = vld [vmem:[#allocation2 + $0x64] sm:$0x1] }
 0x48a   : > { %5751 = vst [vmem:[#allocation2 + $0x6c] sm:$0x1] %v5750_v17  ;;  %v5616_v14 = vshrl.u32 %v5522_v61, 16  ;;  %v5619_v36 = vshll.u32 %v5522_v61, 16  ;;  %6173 = vmatmul.bf16.gmra.mxu0 %v6089_v37  ;;  %v5389_v2 = vadd.f32 %v5368_v47, %v5116_v30  ;;  %v9835_v23 = vor.u32 %v10403_v41, %v9834_v53  ;;  %v6354_v60 = vld [vmem:[#allocation2 + $0x60] sm:$0xe]  ;;  %v4683_v61 = vpop.f32.mrf.mxu1 }
 0x48b   : > { %5748 = vst [vmem:[#allocation2 + $0x68] sm:$0xf] %v5747_v56  ;;  %v5459_v7 = vadd.f32 %v13264_v62, %v5442_v28  ;;  %v5945_v55 = vrot.slane %v5943_v26, 4  ;;  %v5948_v25 = vrot.slane %v5946_v3, 5  ;;  %v5952_v51 = vshll.u32 %v13678_v21, 16 }
 0x48c   : > { %v5618_v40 = vrot.slane %v5616_v14, 7  ;;  %v5409_v22 = vadd.f32 %v13668_v38, %v5389_v2  ;;  %v5957_v29 = vshrl.u32 %v5791_v50, 16  ;;  %v5960_v18 = vshll.u32 %v5791_v50, 16  ;;  %v5755_v21 = vld [vmem:[#allocation2 + $0x74] sm:$0x1] }
 0x48d   : > { %v5491_v16 = vmul.f32 %v14545_v4, %v5459_v7  ;;  %6580 = vmatmul.bf16.gmra.mxu2 %v6492_v15  ;;  %v5949_v49 = vor.u32 %v5948_v25, %v5945_v55  ;;  %v5954_v12 = vrot.slane %v5952_v51, 5  ;;  %v5966_v63 = vshll.u32 %v13685_v45, 16  ;;  %v9726_v31 = vld [vmem:[#allocation2 + $0x60] sm:$0xf]  ;;  %v5100_v7 = vpop.f32.mrf.mxu2 }
 0x48e   : > { %6773 = vmatmul.bf16.gmra.mxu3 %v9835_v23  ;;  %v5621_v46 = vor.u32 %v5619_v36, %v5618_v40  ;;  %v5622_v43 = vrot.slane %v5618_v40, 4  ;;  %v5426_v20 = vmax.f32 %v5409_v22, 0.0  ;;  %v5959_v32 = vrot.slane %v5957_v29, 4  ;;  %v10417_v23 = vld [vmem:[%s14355_s12 + $0x110] sm:$0xff] }
 0x48f   : > { %v5507_v6 = vadd.f32 %v5491_v16, %v14546_v57  ;;  %v5950_v24 = vrot.slane %v5949_v49, 4  ;;  %v5962_v30 = vrot.slane %v5960_v18, 5  ;;  %v5968_v13 = vrot.slane %v5966_v63, 5  ;;  %7167 = vmatpush.bf16.msrb.mxu0 %v10417_v23  ;;  %v10430_v18 = vld [vmem:[%s14355_s12 + $0x178] sm:$0xff]  ;;  %v10416_v23 = vld [vmem:[%s14355_s12 + $0x108] sm:$0xff] }
 0x490   : > { %v5753_v19 = vsel %vm12192_vm5, %v5621_v46, %v5752_v5  ;;  %v5756_v48 = vsel %vm12200_vm6, %v5622_v43, %v5755_v21  ;;  %v5443_v59 = vmul.f32 %v13235_v10, %v5426_v20  ;;  %v4700_v45 = vadd.f32 %v4681_v58, %v13497_v42  ;;  %v10454_v63 = vld [vmem:[%s14355_s12 + $0x1f8] sm:$0xff]  ;;  %7435 = vmatpush.bf16.msra.mxu1 %v10430_v18 }
 0x491   : > { %5757 = vst [vmem:[#allocation2 + $0x74] sm:$0x1] %v5756_v48  ;;  %v5523_v37 = vpack.c.bf16 %v5507_v6, %v5507_v6  ;;  %v5955_v26 = vsel %vm12240_vm12, %v5950_v24, %v5954_v12  ;;  %v5963_v3 = vor.u32 %v5962_v30, %v5959_v32  ;;  %v5371_v56 = vpop.f32.mrf.mxu3  ;;  %v13725_v17 = vld [vmem:[#allocation2 + $0x6c] sm:$0x1]  ;;  %v9778_v28 = vrot.slane %v6354_v60, 9  ;;  %v10445_v60 = vld [vmem:[%s14355_s12 + $0x1b0] sm:$0xff]  ;;  %8045 = vmatpush.bf16.msra.mxu3 %v10454_v63 }
 0x492   : > { %5754 = vst [vmem:[#allocation2 + $0x70] sm:$0xf] %v5753_v19  ;;  %v5460_v15 = vadd.f32 %v13264_v62, %v5443_v59  ;;  %v6078_v47 = vunpack.c.l.b16 %v5955_v26  ;;  %v5117_v53 = vadd.f32 %v5098_v27, %v4700_v45  ;;  %v10372_v42 = vld [vmem:[#allocation2 + $0x64] sm:$0xf0]  ;;  %v4701_v41 = vadd.f32 %v4683_v61, %v13575_v44  ;;  %v5792_v12 = vld [vmem:[#allocation2 + $0x60] sm:$0xf] }
 0x493   : > { %v6355_v58 = vld [vmem:[#allocation2 + $0x68] sm:$0xe]  ;;  %v5624_v50 = vshrl.u32 %v5523_v37, 16  ;;  %v5627_v14 = vshll.u32 %v5523_v37, 16  ;;  %v5964_v36 = vrot.slane %v5963_v3, 4  ;;  %v9727_v2 = vor.u32 %v10372_v42, %v9726_v31  ;;  %7168 = vmatpush.bf16.msrb.mxu0 %v10416_v23  ;;  %v10427_v63 = vld [vmem:[%s14355_s12 + $0x160] sm:$0xff] }
 0x494   : > { %v5492_v55 = vmul.f32 %v13364_v1, %v5460_v15  ;;  %v5390_v25 = vadd.f32 %v5371_v56, %v5117_v53  ;;  %v6434_v51 = vrot.slane %v13721_v39, 5  ;;  %v9779_v40 = vrot.slane %v6355_v58, 9  ;;  %v10446_v1 = vld [vmem:[%s14355_s12 + $0x1b8] sm:$0xff]  ;;  %v5793_v31 = vld [vmem:[#allocation2 + $0x68] sm:$0xf] }
 0x495   : > { %v5626_v27 = vrot.slane %v5624_v50, 7  ;;  %v5969_v22 = vsel %vm12240_vm12, %v5964_v36, %v5968_v13  ;;  %6328 = vmatmul.bf16.gmra.mxu1 %v9727_v2  ;;  %v6438_v44 = vrot.slane %v13725_v17, 5  ;;  %v5118_v29 = vadd.f32 %v5100_v7, %v4701_v41  ;;  %7628 = vmatpush.bf16.msra.mxu2 %v10446_v1  ;;  %v5758_v21 = vld [vmem:[#allocation2 + $0x78] sm:$0xf]  ;;  %v5761_v57 = vld [vmem:[#allocation2 + $0x7c] sm:$0x1] }
 0x496   : > { %v5508_v5 = vadd.f32 %v5492_v55, %v13372_v8  ;;  %v6079_v4 = vunpack.c.l.b16 %v5969_v22  ;;  %v5410_v16 = vadd.f32 %v13668_v38, %v5390_v25  ;;  %v6435_v49 = vsel %vm12225_vm9, %v9778_v28, %v6434_v51  ;;  %v10429_v8 = vld [vmem:[%s14355_s12 + $0x170] sm:$0xff]  ;;  %v9838_v15 = vld [vmem:[#allocation2 + $0x68] sm:$0xf]  ;;  %v5764_v55 = vld [vmem:[#allocation2 + $0x80] sm:$0xf] }
 0x497   : > { %v5629_v46 = vor.u32 %v5627_v14, %v5626_v27  ;;  %v5630_v43 = vrot.slane %v5626_v27, 4  ;;  %v6439_v20 = vsel %vm12225_vm9, %v9779_v40, %v6438_v44  ;;  %v6482_v32 = vunpack.c.l.b16 %v6435_v49  ;;  %7436 = vmatpush.bf16.msra.mxu1 %v10429_v8  ;;  %v10428_v41 = vld [vmem:[%s14355_s12 + $0x168] sm:$0xff]  ;;  %v10453_v7 = vld [vmem:[%s14355_s12 + $0x1f0] sm:$0xff]  ;;  %v5767_v25 = vld [vmem:[#allocation2 + $0x84] sm:$0x1] }
 0x498   : > { %v5524_v6 = vpack.c.bf16 %v5508_v5, %v5508_v5  ;;  %v6090_v24 = vpack.c.b16 %v6079_v4, %v6078_v47  ;;  %v5427_v30 = vmax.f32 %v5410_v16, 0.0  ;;  %v6483_v13 = vunpack.c.l.b16 %v6439_v20  ;;  %v13780_v5 = vld [vmem:[#allocation2 + $0x74] sm:$0x1]  ;;  %8046 = vmatpush.bf16.msra.mxu3 %v10453_v7 }
 0x499   : > { %v5759_v19 = vsel %vm12192_vm5, %v5629_v46, %v5758_v21  ;;  %v5762_v48 = vsel %vm12200_vm6, %v5630_v43, %v5761_v57  ;;  %v5373_v59 = vpop.f32.mrf.mxu3  ;;  %v10404_v45 = vld [vmem:[#allocation2 + $0x6c] sm:$0xf0]  ;;  %v5971_v61 = vshrl.u32 %v5792_v12, 16  ;;  %v5974_v37 = vshll.u32 %v5792_v12, 16  ;;  %7629 = vmatpush.bf16.msra.mxu2 %v10445_v60 }
 0x49a   : > { %5763 = vst [vmem:[#allocation2 + $0x7c] sm:$0x1] %v5762_v48  ;;  %v5632_v26 = vshrl.u32 %v5524_v6, 16  ;;  %v5635_v3 = vshll.u32 %v5524_v6, 16  ;;  %6178 = vmatmul.bf16.gmra.mxu0 %v6090_v24  ;;  %v5444_v56 = vmul.f32 %v13235_v10, %v5427_v30  ;;  %v6493_v28 = vpack.c.b16 %v6483_v13, %v6482_v32  ;;  %v6356_v4 = vld [vmem:[#allocation2 + $0x70] sm:$0xe] }
 0x49b   : > { %5760 = vst [vmem:[#allocation2 + $0x78] sm:$0xf] %v5759_v19  ;;  %v5391_v47 = vadd.f32 %v5373_v59, %v5118_v29  ;;  %v9839_v53 = vor.u32 %v10404_v45, %v9838_v15  ;;  %v5973_v42 = vrot.slane %v5971_v61, 4  ;;  %v5976_v58 = vrot.slane %v5974_v37, 5  ;;  %7437 = vmatpush.bf16.msra.mxu1 %v10428_v41  ;;  %v9730_v8 = vld [vmem:[#allocation2 + $0x70] sm:$0xf] }
 0x49c   : > { %v5634_v50 = vrot.slane %v5632_v26, 7  ;;  %v5461_v14 = vadd.f32 %v13264_v62, %v5444_v56  ;;  %v5980_v36 = vshll.u32 %v13721_v39, 16  ;;  %v5985_v2 = vshrl.u32 %v5793_v31, 16  ;;  %v10444_v39 = vld [vmem:[%s14355_s12 + $0x1a8] sm:$0xff]  ;;  %v5794_v60 = vld [vmem:[#allocation2 + $0x70] sm:$0xf] }
 0x49d   : > { %6585 = vmatmul.bf16.gmra.mxu2 %v6493_v28  ;;  %v5411_v51 = vadd.f32 %v13668_v38, %v5391_v47  ;;  %v5977_v40 = vor.u32 %v5976_v58, %v5973_v42  ;;  %v5988_v27 = vshll.u32 %v5793_v31, 16  ;;  %v5994_v22 = vshll.u32 %v13725_v17, 16  ;;  %v10452_v38 = vld [vmem:[%s14355_s12 + $0x1e8] sm:$0xff]  ;;  %v10451_v13 = vld [vmem:[%s14355_s12 + $0x1e0] sm:$0xff]  ;;  %v14547_v19 = vld [vmem:[#allocation43_spill] sm:$0xff] }
 0x49e   : > { %6778 = vmatmul.bf16.gmra.mxu3 %v9839_v53  ;;  %v5637_v44 = vor.u32 %v5635_v3, %v5634_v50  ;;  %v5638_v29 = vrot.slane %v5634_v50, 4  ;;  %v5493_v18 = vmul.f32 %v13374_v0, %v5461_v14  ;;  %v5982_v1 = vrot.slane %v5980_v36, 5  ;;  %7630 = vmatpush.bf16.msra.mxu2 %v10444_v39  ;;  %v10443_v0 = vld [vmem:[%s14355_s12 + $0x1a0] sm:$0xff]  ;;  %v10426_v3 = vld [vmem:[%s14355_s12 + $0x158] sm:$0xff]  ;;  %v5770_v39 = vld [vmem:[#allocation2 + $0x88] sm:$0xf] }
 0x49f   : > { %v5428_v16 = vmax.f32 %v5411_v51, 0.0  ;;  %v5978_v17 = vrot.slane %v5977_v40, 4  ;;  %v5987_v49 = vrot.slane %v5985_v2, 4  ;;  %v5990_v12 = vrot.slane %v5988_v27, 5  ;;  %8047 = vmatpush.bf16.msra.mxu3 %v10452_v38  ;;  %7438 = vmatpush.bf16.msra.mxu1 %v10427_v63  ;;  %v10425_v51 = vld [vmem:[%s14355_s12 + $0x150] sm:$0xff] }
 0x4a0   : > { %v5765_v46 = vsel %vm12192_vm5, %v5637_v44, %v5764_v55  ;;  %v5768_v43 = vsel %vm12200_vm6, %v5638_v29, %v5767_v25  ;;  %v5509_v20 = vadd.f32 %v5493_v18, %v13378_v33  ;;  %v5996_v32 = vrot.slane %v5994_v22, 5  ;;  %v10441_v40 = vld [vmem:[%s14355_s12 + $0x190] sm:$0xff]  ;;  %v5773_v44 = vld [vmem:[#allocation2 + $0x8c] sm:$0x1] }
 0x4a1   : > { %5769 = vst [vmem:[#allocation2 + $0x84] sm:$0x1] %v5768_v43  ;;  %v5445_v21 = vmul.f32 %v13235_v10, %v5428_v16  ;;  %v5983_v57 = vsel %vm12240_vm12, %v5978_v17, %v5982_v1  ;;  %v5991_v6 = vor.u32 %v5990_v12, %v5987_v49  ;;  %v13799_v24 = vld [vmem:[#allocation2 + $0x7c] sm:$0x1]  ;;  %v9780_v30 = vrot.slane %v6356_v4, 9  ;;  %v10415_v43 = vld [vmem:[%s14355_s12 + $0x100] sm:$0xff] }
 0x4a2   : > { %v2415_v33 = vadd.f32 %v14547_v19, %v13172_v11  ;;  %5766 = vst [vmem:[#allocation2 + $0x80] sm:$0xf] %v5765_v46  ;;  %v5525_v48 = vpack.c.bf16 %v5509_v20, %v5509_v20  ;;  %v6080_v59 = vunpack.c.l.b16 %v5983_v57  ;;  %v10373_v45 = vld [vmem:[#allocation2 + $0x74] sm:$0xf0]  ;;  %v6442_v26 = vrot.slane %v13780_v5, 5  ;;  %7631 = vmatpush.bf16.msra.mxu2 %v10443_v0  ;;  %7169 = vmatpush.bf16.msrb.mxu0 %v10415_v43 }
 0x4a3   : > { %v6357_v31 = vld [vmem:[#allocation2 + $0x78] sm:$0xe]  ;;  %v5462_v10 = vadd.f32 %v13264_v62, %v5445_v21  ;;  %v5992_v61 = vrot.slane %v5991_v6, 4  ;;  %v9731_v37 = vor.u32 %v10373_v45, %v9730_v8  ;;  %v6446_v47 = vrot.slane %v13799_v24, 5  ;;  %8048 = vmatpush.bf16.msra.mxu3 %v10451_v13  ;;  %7439 = vmatpush.bf16.msra.mxu1 %v10426_v3  ;;  %v10440_v45 = vld [vmem:[%s14355_s12 + $0x188] sm:$0xff]  ;;  %v10423_v3 = vld [vmem:[%s14355_s12 + $0x140] sm:$0xff] }
 0x4a4   : > { %v10442_v11 = vld [vmem:[%s14355_s12 + $0x198] sm:$0xff]  ;;  %v5640_v56 = vshrl.u32 %v5525_v48, 16  ;;  %v5643_v28 = vshll.u32 %v5525_v48, 16  ;;  %v9781_v15 = vrot.slane %v6357_v31, 9  ;;  %v6443_v42 = vsel %vm12225_vm9, %v9780_v30, %v6442_v26  ;;  %v13879_v43 = vld [vmem:[#allocation2 + $0xc] sm:$0x1] }
 0x4a5   : > { %v5494_v62 = vmul.f32 %v13407_v52, %v5462_v10  ;;  %v5997_v53 = vsel %vm12240_vm12, %v5992_v61, %v5996_v32  ;;  %6333 = vmatmul.bf16.gmra.mxu1 %v9731_v37  ;;  %v5999_v58 = vshrl.u32 %v5794_v60, 16  ;;  %v6484_v36 = vunpack.c.l.b16 %v6443_v42  ;;  %v5795_v2 = vld [vmem:[#allocation2 + $0x78] sm:$0xf] }
 0x4a6   : > { %v5642_v41 = vrot.slane %v5640_v56, 7  ;;  %v6081_v50 = vunpack.c.l.b16 %v5997_v53  ;;  %v6447_v14 = vsel %vm12225_vm9, %v9781_v15, %v6446_v47  ;;  %v10450_v52 = vld [vmem:[%s14355_s12 + $0x1d8] sm:$0xff]  ;;  %v6002_v25 = vshll.u32 %v5794_v60, 16  ;;  %7632 = vmatpush.bf16.msra.mxu2 %v10442_v11  ;;  %v10424_v60 = vld [vmem:[%s14355_s12 + $0x148] sm:$0xff]  ;;  %v5779_v56 = vld [vmem:[#allocation2 + $0x94] sm:$0x1] }
 0x4a7   : > { %v5510_v23 = vadd.f32 %v5494_v62, %v2415_v33  ;;  %v6485_v7 = vunpack.c.l.b16 %v6447_v14  ;;  %v6001_v55 = vrot.slane %v5999_v58, 4  ;;  %v9842_v4 = vld [vmem:[#allocation2 + $0x78] sm:$0xf]  ;;  %v6013_v17 = vshrl.u32 %v5795_v2, 16  ;;  %8049 = vmatpush.bf16.msra.mxu3 %v10450_v52  ;;  %7440 = vmatpush.bf16.msra.mxu1 %v10425_v51  ;;  %v10448_v11 = vld [vmem:[%s14355_s12 + $0x1c8] sm:$0xff]  ;;  %v10439_v62 = vld [vmem:[%s14355_s12 + $0x180] sm:$0xff] }
 0x4a8   : > { %v5645_v27 = vor.u32 %v5643_v28, %v5642_v41  ;;  %v5646_v22 = vrot.slane %v5642_v41, 4  ;;  %v6091_v29 = vpack.c.b16 %v6081_v50, %v6080_v59  ;;  %v6004_v16 = vrot.slane %v6002_v25, 5  ;;  %v13835_v0 = vld [vmem:[#allocation2 + $0x84] sm:$0x1]  ;;  %v10449_v59 = vld [vmem:[%s14355_s12 + $0x1d0] sm:$0xff] }
 0x4a9   : > { %v5526_v18 = vpack.c.bf16 %v5510_v23, %v5510_v23  ;;  %v6494_v1 = vpack.c.b16 %v6485_v7, %v6484_v36  ;;  %v10405_v38 = vld [vmem:[#allocation2 + $0x7c] sm:$0xf0]  ;;  %v6008_v21 = vshll.u32 %v13780_v5, 16  ;;  %v6015_v57 = vrot.slane %v6013_v17, 4  ;;  %v5776_v5 = vld [vmem:[#allocation2 + $0x90] sm:$0xf] }
 0x4aa   : > { %v5771_v49 = vsel %vm12192_vm5, %v5645_v27, %v5770_v39  ;;  %v5774_v12 = vsel %vm12200_vm6, %v5646_v22, %v5773_v44  ;;  %6183 = vmatmul.bf16.gmra.mxu0 %v6091_v29  ;;  %v9843_v63 = vor.u32 %v10405_v38, %v9842_v4  ;;  %v5796_v46 = vld [vmem:[#allocation2 + $0x80] sm:$0xf]  ;;  %v6005_v32 = vor.u32 %v6004_v16, %v6001_v55  ;;  %v13874_v27 = vld [vmem:[#allocation2 + $0x14] sm:$0x1]  ;;  %v7693_v17 = vld [vmem:[#allocation2 + $0x10] sm:$0xf] }
 0x4ab   : > { %5775 = vst [vmem:[#allocation2 + $0x8c] sm:$0x1] %v5774_v12  ;;  %v5648_v20 = vshrl.u32 %v5526_v18, 16  ;;  %v6358_v8 = vld [vmem:[#allocation2 + $0x80] sm:$0xe]  ;;  %7633 = vmatpush.bf16.msra.mxu2 %v10441_v40  ;;  %v6016_v6 = vshll.u32 %v5795_v2, 16  ;;  %7441 = vmatpush.bf16.msra.mxu1 %v10424_v60 }
 0x4ac   : > { %5772 = vst [vmem:[#allocation2 + $0x88] sm:$0xf] %v5771_v49  ;;  %v6022_v30 = vshll.u32 %v13799_v24, 16  ;;  %v5651_v19 = vshll.u32 %v5526_v18, 16  ;;  %v6027_v33 = vshrl.u32 %v5796_v46, 16  ;;  %v6030_v48 = vshll.u32 %v5796_v46, 16  ;;  %8050 = vmatpush.bf16.msra.mxu3 %v10449_v59 }
 0x4ad   : > { %v5650_v13 = vrot.slane %v5648_v20, 7  ;;  %6590 = vmatmul.bf16.gmra.mxu2 %v6494_v1  ;;  %v6006_v31 = vrot.slane %v6005_v32, 4  ;;  %v6018_v10 = vrot.slane %v6016_v6, 5  ;;  %v9782_v37 = vrot.slane %v6358_v8, 9  ;;  %v9734_v58 = vld [vmem:[#allocation2 + $0x80] sm:$0xf] }
 0x4ae   : > { %6783 = vmatmul.bf16.gmra.mxu3 %v9843_v63  ;;  %v6450_v26 = vrot.slane %v13835_v0, 5  ;;  %v6010_v28 = vrot.slane %v6008_v21, 5  ;;  %v6024_v47 = vrot.slane %v6022_v30, 5  ;;  %v6029_v41 = vrot.slane %v6027_v33, 4  ;;  %v10447_v52 = vld [vmem:[%s14355_s12 + $0x1c0] sm:$0xff] }
 0x4af   : > { %v5653_v61 = vor.u32 %v5651_v19, %v5650_v13  ;;  %v5654_v24 = vrot.slane %v5650_v13, 4  ;;  %v6019_v15 = vor.u32 %v6018_v10, %v6015_v57  ;;  %7634 = vmatpush.bf16.msra.mxu2 %v10440_v45  ;;  %v6032_v50 = vrot.slane %v6030_v48, 5  ;;  %7442 = vmatpush.bf16.msra.mxu1 %v10423_v3  ;;  %v7227_v18 = vld [vmem:[#allocation2 + $0x8] sm:$0xe]  ;;  %v7228_v1 = vld [vmem:[#allocation2 + $0x10] sm:$0xe] }
 0x4b0   : > { %v6011_v14 = vsel %vm12240_vm12, %v6006_v31, %v6010_v28  ;;  %v6451_v9 = vsel %vm12225_vm9, %v9782_v37, %v6450_v26  ;;  %8051 = vmatpush.bf16.msra.mxu3 %v10448_v11  ;;  %v6036_v16 = vshll.u32 %v13835_v0, 16  ;;  %v7695_v20 = vld [vmem:[#allocation2 + $0x18] sm:$0xf]  ;;  %v9912_v8 = vrot.slane %v7227_v18, 9  ;;  %v7694_v10 = vld [vmem:[#allocation2 + $0x14] sm:$0x1] }
 0x4b1   : > { %v5777_v53 = vsel %vm12192_vm5, %v5653_v61, %v5776_v5  ;;  %v5780_v42 = vsel %vm12200_vm6, %v5654_v24, %v5779_v56  ;;  %v6020_v36 = vrot.slane %v6019_v15, 4  ;;  %v6082_v22 = vunpack.c.l.b16 %v6011_v14  ;;  %v10462_v5 = vld [vmem:[%s14355_s12 + $0x238] sm:$0xff] }
 0x4b2   : > { %5781 = vst [vmem:[#allocation2 + $0x94] sm:$0x1] %v5780_v42  ;;  %v5829_v2 = vld [vmem:[#allocation2 + $0x8c] sm:$0x1]  ;;  %v6033_v38 = vor.u32 %v6032_v50, %v6029_v41  ;;  %v6486_v12 = vunpack.c.l.b16 %v6451_v9  ;;  %v9913_v60 = vrot.slane %v7228_v1, 9  ;;  %v7281_v21 = vrot.slane %v13874_v27, 5  ;;  %8318 = vmatpush.bf16.msra.mxu0 %v10462_v5 }
 0x4b3   : > { %5778 = vst [vmem:[#allocation2 + $0x90] sm:$0xf] %v5777_v53  ;;  %v10374_v23 = vld [vmem:[#allocation2 + $0x84] sm:$0xf0]  ;;  %v6025_v7 = vsel %vm12240_vm12, %v6020_v36, %v6024_v47  ;;  %v6454_v51 = vrot.slane %v5829_v2, 5  ;;  %7635 = vmatpush.bf16.msra.mxu2 %v10439_v62  ;;  %v6050_v30 = vshll.u32 %v5829_v2, 16 }
 0x4b4   : > { %v6359_v54 = vld [vmem:[#allocation2 + $0x88] sm:$0xe]  ;;  %v9735_v55 = vor.u32 %v10374_v23, %v9734_v58  ;;  %v6083_v39 = vunpack.c.l.b16 %v6025_v7  ;;  %8052 = vmatpush.bf16.msra.mxu3 %v10447_v52  ;;  %v7726_v13 = vshrl.u32 %v7693_v17, 16  ;;  %v7729_v19 = vshll.u32 %v7693_v17, 16  ;;  %v7696_v61 = vld [vmem:[#allocation2 + $0x1c] sm:$0x1] }
 0x4b5   : > { %v9783_v25 = vrot.slane %v6359_v54, 9  ;;  %v5797_v40 = vld [vmem:[#allocation2 + $0x88] sm:$0xf]  ;;  %v6034_v33 = vrot.slane %v6033_v38, 4  ;;  %v7277_v59 = vrot.slane %v13879_v43, 5  ;;  %v7740_v45 = vshrl.u32 %v7695_v20, 16 }
 0x4b6   : > { %v6041_v44 = vshrl.u32 %v5797_v40, 16  ;;  %v6044_v29 = vshll.u32 %v5797_v40, 16  ;;  %6338 = vmatmul.bf16.gmra.mxu1 %v9735_v55  ;;  %v6092_v49 = vpack.c.b16 %v6083_v39, %v6082_v22  ;;  %v9846_v6 = vld [vmem:[#allocation2 + $0x88] sm:$0xf]  ;;  %v7728_v24 = vrot.slane %v7726_v13, 4 }
 0x4b7   : > { %v6455_v4 = vsel %vm12225_vm9, %v9783_v25, %v6454_v51  ;;  %v7731_v37 = vrot.slane %v7729_v19, 5  ;;  %v7282_v3 = vsel %vm12225_vm9, %v9913_v60, %v7281_v21  ;;  %v7742_v11 = vrot.slane %v7740_v45, 4  ;;  %v6812_v62 = vld [vmem:[#allocation2 + $0x10] sm:$0xf]  ;;  %v6810_v50 = vld [vmem:[#allocation2 + $0x8] sm:$0xf] }
 0x4b8   : > { %v6487_v63 = vunpack.c.l.b16 %v6455_v4  ;;  %v6043_v46 = vrot.slane %v6041_v44, 4  ;;  %v6046_v32 = vrot.slane %v6044_v29, 5  ;;  %v7743_v56 = vshll.u32 %v7695_v20, 16  ;;  %v13900_v17 = vld [vmem:[#allocation2 + $0x24] sm:$0x1] }
 0x4b9   : > { %v6038_v28 = vrot.slane %v6036_v16, 5  ;;  %v6052_v15 = vrot.slane %v6050_v30, 5  ;;  %v7732_v47 = vor.u32 %v7731_v37, %v7728_v24  ;;  %v7278_v53 = vsel %vm12225_vm9, %v9912_v8, %v7277_v59  ;;  %v7229_v20 = vld [vmem:[#allocation2 + $0x18] sm:$0xe]  ;;  %v7697_v60 = vld [vmem:[#allocation2 + $0x20] sm:$0xf] }
 0x4ba   : > { %v6495_v57 = vpack.c.b16 %v6487_v63, %v6486_v12  ;;  %6188 = vmatmul.bf16.gmra.mxu0 %v6092_v49  ;;  %v10406_v0 = vld [vmem:[#allocation2 + $0x8c] sm:$0xf0]  ;;  %v6047_v48 = vor.u32 %v6046_v32, %v6043_v46  ;;  %v7735_v42 = vshll.u32 %v7694_v10, 16  ;;  %v7745_v58 = vrot.slane %v7743_v56, 5  ;;  %v7230_v49 = vld [vmem:[#allocation2 + $0x20] sm:$0xe] }
 0x4bb   : > { %v9847_v31 = vor.u32 %v10406_v0, %v9846_v6  ;;  %v7749_v41 = vshll.u32 %v7696_v61, 16  ;;  %v7356_v36 = vunpack.c.l.b16 %v7282_v3  ;;  %v6039_v2 = vsel %vm12240_vm12, %v6034_v33, %v6038_v28  ;;  %v13902_v46 = vld [vmem:[#allocation2 + $0x1c] sm:$0x1]  ;;  %v7699_v21 = vld [vmem:[#allocation2 + $0x28] sm:$0xf]  ;;  %v10461_v3 = vld [vmem:[%s14355_s12 + $0x230] sm:$0xff] }
 0x4bc   : > { %v6048_v26 = vrot.slane %v6047_v48, 4  ;;  %v7733_v23 = vrot.slane %v7732_v47, 4  ;;  %v7746_v54 = vor.u32 %v7745_v58, %v7742_v11  ;;  %v6857_v9 = vshrl.u32 %v6812_v62, 16  ;;  %v10431_v0 = vld [vmem:[#allocation2 + $0x14] sm:$0xf0]  ;;  %8319 = vmatpush.bf16.msra.mxu0 %v10461_v3 }
 0x4bd   : > { %6595 = vmatmul.bf16.gmra.mxu2 %v6495_v57  ;;  %v7355_v7 = vunpack.c.l.b16 %v7278_v53  ;;  %v6843_v55 = vshrl.u32 %v6810_v50, 16  ;;  %v6846_v25 = vshll.u32 %v6810_v50, 16  ;;  %v6860_v51 = vshll.u32 %v6812_v62, 16  ;;  %v7700_v28 = vld [vmem:[#allocation2 + $0x2c] sm:$0x1] }
 0x4be   : > { %6788 = vmatmul.bf16.gmra.mxu3 %v9847_v31  ;;  %v6053_v14 = vsel %vm12240_vm12, %v6048_v26, %v6052_v15  ;;  %v7737_v22 = vrot.slane %v7735_v42, 5  ;;  %v7747_v39 = vrot.slane %v7746_v54, 4  ;;  %v7751_v44 = vrot.slane %v7749_v41, 5  ;;  %v6816_v62 = vld [vmem:[#allocation2 + $0x20] sm:$0xf] }
 0x4bf   : > { %v6085_v40 = vunpack.c.l.b16 %v6053_v14  ;;  %v6084_v29 = vunpack.c.l.b16 %v6039_v2  ;;  %v7371_v18 = vpack.c.b16 %v7356_v36, %v7355_v7  ;;  %v6859_v38 = vrot.slane %v6857_v9, 4  ;;  %v7698_v58 = vld [vmem:[#allocation2 + $0x24] sm:$0x1]  ;;  %v6814_v36 = vld [vmem:[#allocation2 + $0x18] sm:$0xf] }
 0x4c0   : > { %v7738_v1 = vsel %vm12240_vm12, %v7733_v23, %v7737_v22  ;;  %v7752_v4 = vsel %vm12240_vm12, %v7747_v39, %v7751_v44  ;;  %v6862_v16 = vrot.slane %v6860_v51, 5  ;;  %v6845_v12 = vrot.slane %v6843_v55, 4 }
 0x4c1   : > { %v13894_v52 = vpop.f32.mrf.mxu1  ;;  %v6848_v63 = vrot.slane %v6846_v25, 5  ;;  %v6093_v32 = vpack.c.b16 %v6085_v40, %v6084_v29  ;;  %v6866_v8 = vshll.u32 %v13874_v27, 16  ;;  %v7965_v57 = vunpack.c.l.b16 %v7738_v1  ;;  %v9962_v27 = vld [vmem:[#allocation2 + $0x10] sm:$0xf] }
 0x4c2   : > { %v7966_v6 = vunpack.c.l.b16 %v7752_v4  ;;  %v9915_v30 = vrot.slane %v7230_v49, 9  ;;  %v7289_v13 = vrot.slane %v13900_v17, 5  ;;  %v6863_v33 = vor.u32 %v6862_v16, %v6859_v38 }
 0x4c3   : > { %v7754_v48 = vshrl.u32 %v7697_v60, 16  ;;  %v7757_v59 = vshll.u32 %v7697_v60, 16  ;;  %v7768_v45 = vshrl.u32 %v7699_v21, 16  ;;  %v6849_v5 = vor.u32 %v6848_v63, %v6845_v12 }
 0x4c4   : > { %v9914_v31 = vrot.slane %v7229_v20, 9  ;;  %v7285_v10 = vrot.slane %v13902_v46, 5  ;;  %v7771_v61 = vshll.u32 %v7699_v21, 16  ;;  %v6852_v24 = vshll.u32 %v13879_v43, 16 }
 0x4c5   : > { %v7756_v37 = vrot.slane %v7754_v48, 4  ;;  %v7759_v26 = vrot.slane %v7757_v59, 5  ;;  %v9963_v11 = vor.u32 %v10431_v0, %v9962_v27  ;;  %v7981_v56 = vpack.c.b16 %v7966_v6, %v7965_v57  ;;  %v13927_v0 = vld [vmem:[#allocation2 + $0x34] sm:$0x1]  ;;  %v7231_v27 = vld [vmem:[#allocation2 + $0x28] sm:$0xe] }
 0x4c6   : > { %7443 = vmatmul.bf16.vlgmr.msra.gmra.mxu1 %v7371_v18  ;;  %v7770_v15 = vrot.slane %v7768_v45, 4  ;;  %v7773_v47 = vrot.slane %v7771_v61, 5  ;;  %v6864_v53 = vrot.slane %v6863_v33, 4  ;;  %v7290_v42 = vsel %vm12225_vm9, %v9915_v30, %v7289_v13  ;;  %v7232_v33 = vld [vmem:[#allocation2 + $0x30] sm:$0xe] }
 0x4c7   : > { %v6850_v43 = vrot.slane %v6849_v5, 4  ;;  %v6868_v41 = vrot.slane %v6866_v8, 5  ;;  %v7286_v50 = vsel %vm12225_vm9, %v9914_v31, %v7285_v10  ;;  %v7760_v23 = vor.u32 %v7759_v26, %v7756_v37  ;;  %v13931_v31 = vld [vmem:[#allocation2 + $0x2c] sm:$0x1]  ;;  %v10432_v10 = vld [vmem:[#allocation2 + $0x24] sm:$0xf0] }
 0x4c8   : > { %v7774_v14 = vor.u32 %v7773_v47, %v7770_v15  ;;  %v7777_v54 = vshll.u32 %v7700_v28, 16  ;;  %v6885_v9 = vshrl.u32 %v6816_v62, 16  ;;  %v6888_v7 = vshll.u32 %v6816_v62, 16 }
 0x4c9   : > { %v13906_v19 = vpop.f32.mrf.mxu1  ;;  %v6854_v55 = vrot.slane %v6852_v24, 5  ;;  %v7358_v25 = vunpack.c.l.b16 %v7290_v42  ;;  %v7763_v51 = vshll.u32 %v7698_v58, 16  ;;  %v6869_v22 = vsel %vm12240_vm12, %v6864_v53, %v6868_v41  ;;  %v7703_v41 = vld [vmem:[#allocation2 + $0x38] sm:$0xf] }
 0x4ca   : > { %6193 = vmatmul.bf16.gmra.mxu0 %v6093_v32  ;;  %v7775_v39 = vrot.slane %v7774_v14, 4  ;;  %v6871_v44 = vshrl.u32 %v6814_v36, 16  ;;  %v6874_v29 = vshll.u32 %v6814_v36, 16  ;;  %v7357_v1 = vunpack.c.l.b16 %v7286_v50  ;;  %v7704_v36 = vld [vmem:[#allocation2 + $0x3c] sm:$0x1] }
 0x4cb   : > { %v6855_v18 = vsel %vm12240_vm12, %v6850_v43, %v6854_v55  ;;  %v7761_v38 = vrot.slane %v7760_v23, 4  ;;  %v7779_v16 = vrot.slane %v7777_v54, 5  ;;  %v6887_v49 = vrot.slane %v6885_v9, 4  ;;  %v7701_v43 = vld [vmem:[#allocation2 + $0x30] sm:$0xf] }
 0x4cc   : > { %v6890_v12 = vrot.slane %v6888_v7, 5  ;;  %v7083_v20 = vunpack.c.l.b16 %v6869_v22  ;;  %v7372_v32 = vpack.c.b16 %v7358_v25, %v7357_v1  ;;  %v7765_v8 = vrot.slane %v7763_v51, 5  ;;  %v7702_v55 = vld [vmem:[#allocation2 + $0x34] sm:$0x1]  ;;  %v6820_v51 = vld [vmem:[#allocation2 + $0x30] sm:$0xf] }
 0x4cd   : > { %7636 = vmatmul.bf16.vlgmr.msra.gmra.mxu2 %v9963_v11  ;;  %v7780_v21 = vsel %vm12240_vm12, %v7775_v39, %v7779_v16  ;;  %v6873_v57 = vrot.slane %v6871_v44, 4  ;;  %v6876_v6 = vrot.slane %v6874_v29, 5  ;;  %v7082_v30 = vunpack.c.l.b16 %v6855_v18  ;;  %v9966_v11 = vld [vmem:[#allocation2 + $0x20] sm:$0xf]  ;;  %v10460_v29 = vld [vmem:[%s14355_s12 + $0x228] sm:$0xff] }
 0x4ce   : > { %8053 = vmatmul.bf16.vlgmr.msra.gmra.mxu3 %v7981_v56  ;;  %v6561_v2 = vpop.f32.mrf.mxu2  ;;  %v6894_v13 = vshll.u32 %v13900_v17, 16  ;;  %v7766_v45 = vsel %vm12240_vm12, %v7761_v38, %v7765_v8  ;;  %v6891_v5 = vor.u32 %v6890_v12, %v6887_v49  ;;  %v7968_v61 = vunpack.c.l.b16 %v7780_v21  ;;  %8320 = vmatpush.bf16.msra.mxu0 %v10460_v29  ;;  %v7705_v29 = vld [vmem:[#allocation2 + $0x40] sm:$0xf] }
 0x4cf   : > { %v6877_v17 = vor.u32 %v6876_v6, %v6873_v57  ;;  %v9917_v26 = vrot.slane %v7232_v33, 9  ;;  %v7297_v3 = vrot.slane %v13927_v0, 5  ;;  %v7967_v56 = vunpack.c.l.b16 %v7766_v45 }
 0x4d0   : > { %v6880_v28 = vshll.u32 %v13902_v46, 16  ;;  %v6896_v15 = vrot.slane %v6894_v13, 5  ;;  %v7293_v47 = vrot.slane %v13931_v31, 5  ;;  %v9967_v53 = vor.u32 %v10432_v10, %v9966_v11 }
 0x4d1   : > { %v6754_v40 = vpop.f32.mrf.mxu3  ;;  %v13921_v4 = vpop.f32.mrf.mxu1  ;;  %v6892_v42 = vrot.slane %v6891_v5, 4  ;;  %v9916_v58 = vrot.slane %v7231_v27, 9  ;;  %v7982_v14 = vpack.c.b16 %v7968_v61, %v7967_v56  ;;  %v7785_v23 = vshll.u32 %v7701_v43, 16 }
 0x4d2   : > { %v7796_v54 = vshrl.u32 %v7703_v41, 16  ;;  %v6878_v46 = vrot.slane %v6877_v17, 4  ;;  %v7298_v7 = vsel %vm12225_vm9, %v9917_v26, %v7297_v3  ;;  %v7799_v25 = vshll.u32 %v7703_v41, 16 }
 0x4d3   : > { %v6159_v63 = vpop.f32.mrf.mxu0  ;;  %v7787_v22 = vrot.slane %v7785_v23, 5  ;;  %v7805_v44 = vshll.u32 %v7704_v36, 16  ;;  %v7294_v38 = vsel %vm12225_vm9, %v9916_v58, %v7293_v47  ;;  %v6897_v49 = vsel %vm12240_vm12, %v6892_v42, %v6896_v15  ;;  %v13960_v15 = vld [vmem:[#allocation2 + $0x44] sm:$0x1]  ;;  %v7234_v47 = vld [vmem:[#allocation2 + $0x40] sm:$0xe] }
 0x4d4   : > { %v6305_v60 = vadd.f32 %v13894_v52, %v6159_v63  ;;  %v7098_v52 = vpack.c.b16 %v7083_v20, %v7082_v30  ;;  %v7798_v39 = vrot.slane %v7796_v54, 4  ;;  %v7801_v16 = vrot.slane %v7799_v25, 5  ;;  %v6818_v20 = vld [vmem:[#allocation2 + $0x28] sm:$0xf] }
 0x4d5   : > { %v7360_v12 = vunpack.c.l.b16 %v7298_v7  ;;  %v7791_v21 = vshll.u32 %v7702_v55, 16  ;;  %v6916_v6 = vshll.u32 %v6820_v51, 16  ;;  %v7359_v13 = vunpack.c.l.b16 %v7294_v38  ;;  %v9970_v7 = vld [vmem:[#allocation2 + $0x30] sm:$0xf] }
 0x4d6   : > { %v6601_v48 = vadd.f32 %v6561_v2, %v6305_v60  ;;  %v6563_v59 = vpop.f32.mrf.mxu2  ;;  %7448 = vmatmul.bf16.gmra.mxu1 %v7372_v32  ;;  %v7782_v2 = vshrl.u32 %v7701_v43, 16  ;;  %v6913_v32 = vshrl.u32 %v6820_v51, 16  ;;  %v7802_v57 = vor.u32 %v7801_v16, %v7798_v39 }
 0x4d7   : > { %v7807_v33 = vrot.slane %v7805_v44, 5  ;;  %v6899_v5 = vshrl.u32 %v6818_v20, 16  ;;  %v7085_v61 = vunpack.c.l.b16 %v6897_v49  ;;  %v7373_v26 = vpack.c.b16 %v7360_v12, %v7359_v13  ;;  %v13973_v49 = vld [vmem:[#allocation2 + $0x44] sm:$0x1] }
 0x4d8   : > { %v13933_v24 = vadd.f32 %v6754_v40, %v6601_v48  ;;  %v7784_v40 = vrot.slane %v7782_v2, 4  ;;  %v7803_v45 = vrot.slane %v7802_v57, 4  ;;  %v6915_v27 = vrot.slane %v6913_v32, 4 }
 0x4d9   : > { %v6756_v37 = vpop.f32.mrf.mxu3  ;;  %v13938_v62 = vpop.f32.mrf.mxu1  ;;  %v7793_v3 = vrot.slane %v7791_v21, 5  ;;  %v6901_v43 = vrot.slane %v6899_v5, 4  ;;  %v6922_v44 = vshll.u32 %v13927_v0, 16  ;;  %v7810_v12 = vshrl.u32 %v7705_v29, 16 }
 0x4da   : > { %7170 = vmatmul.bf16.vlgmr.msrb.gmra.mxu0 %v7098_v52  ;;  %v7788_v63 = vor.u32 %v7787_v22, %v7784_v40  ;;  %v6902_v52 = vshll.u32 %v6818_v20, 16  ;;  %v7808_v11 = vsel %vm12240_vm12, %v7803_v45, %v7807_v33  ;;  %v6824_v33 = vld [vmem:[#allocation2 + $0x40] sm:$0xf]  ;;  %v7819_v5 = vshll.u32 %v13973_v49, 16 }
 0x4db   : > { %v6161_v50 = vpop.f32.mrf.mxu0  ;;  %v7970_v36 = vunpack.c.l.b16 %v7808_v11 }
 0x4dc   : > { %v6307_v9 = vadd.f32 %v13906_v19, %v6161_v50  ;;  %v6882_v19 = vrot.slane %v6880_v28, 5  ;;  %v6908_v28 = vshll.u32 %v13931_v31, 16  ;;  %v6904_v41 = vrot.slane %v6902_v52, 5  ;;  %v7233_v50 = vld [vmem:[#allocation2 + $0x38] sm:$0xe] }
 0x4dd   : > { %7641 = vmatmul.bf16.gmra.mxu2 %v9967_v53  ;;  %v9918_v25 = vrot.slane %v7233_v50, 9 }
 0x4de   : > { %8058 = vmatmul.bf16.gmra.mxu3 %v7982_v14  ;;  %v6602_v18 = vadd.f32 %v6563_v59, %v6307_v9  ;;  %v6566_v1 = vpop.f32.mrf.mxu2  ;;  %v6883_v30 = vsel %vm12240_vm12, %v6878_v46, %v6882_v19  ;;  %v7789_v59 = vrot.slane %v7788_v63, 4  ;;  %v10433_v14 = vld [vmem:[#allocation2 + $0x34] sm:$0xf0]  ;;  %v9919_v9 = vrot.slane %v7234_v47, 9 }
 0x4df   : > { %v7084_v56 = vunpack.c.l.b16 %v6883_v30  ;;  %v7305_v46 = vrot.slane %v13960_v15, 5  ;;  %v9971_v40 = vor.u32 %v10433_v14, %v9970_v7  ;;  %v6905_v22 = vor.u32 %v6904_v41, %v6901_v43 }
 0x4e0   : > { %v13950_v8 = vadd.f32 %v6756_v37, %v6602_v18  ;;  %v6918_v37 = vrot.slane %v6916_v6, 5  ;;  %v7794_v58 = vsel %vm12240_vm12, %v7789_v59, %v7793_v3  ;;  %v6910_v39 = vrot.slane %v6908_v28, 5  ;;  %v7707_v18 = vld [vmem:[#allocation2 + $0x48] sm:$0xf] }
 0x4e1   : > { %v6759_v60 = vpop.f32.mrf.mxu3  ;;  %v7099_v31 = vpack.c.b16 %v7085_v61, %v7084_v56  ;;  %v7969_v55 = vunpack.c.l.b16 %v7794_v58  ;;  %v7813_v63 = vshll.u32 %v7705_v29, 16  ;;  %v7306_v32 = vsel %vm12225_vm9, %v9919_v9, %v7305_v46 }
 0x4e2   : > { %v13954_v48 = vpop.f32.mrf.mxu1  ;;  %v6919_v2 = vor.u32 %v6918_v37, %v6915_v27  ;;  %v7824_v21 = vshrl.u32 %v7707_v18, 16  ;;  %v7827_v0 = vshll.u32 %v7707_v18, 16  ;;  %v7812_v6 = vrot.slane %v7810_v12, 4  ;;  %v14001_v18 = vld [vmem:[#allocation2 + $0x64] sm:$0x1] }
 0x4e3   : > { %v6164_v10 = vpop.f32.mrf.mxu0  ;;  %v7983_v38 = vpack.c.b16 %v7970_v36, %v7969_v55  ;;  %v7815_v30 = vrot.slane %v7813_v63, 5  ;;  %v6906_v61 = vrot.slane %v6905_v22, 4  ;;  %v6924_v27 = vrot.slane %v6922_v44, 5 }
 0x4e4   : > { %v6310_v17 = vadd.f32 %v13921_v4, %v6164_v10  ;;  %v13964_v4 = vld [vmem:[#allocation2 + $0x3c] sm:$0x1]  ;;  %v6920_v16 = vrot.slane %v6919_v2, 4  ;;  %v7826_v52 = vrot.slane %v7824_v21, 4  ;;  %v7829_v10 = vrot.slane %v7827_v0, 5 }
 0x4e5   : > { %v7301_v51 = vrot.slane %v13964_v4, 5  ;;  %v7362_v37 = vunpack.c.l.b16 %v7306_v32  ;;  %v6941_v47 = vshrl.u32 %v6824_v33, 16  ;;  %v6944_v43 = vshll.u32 %v6824_v33, 16  ;;  %v7235_v32 = vld [vmem:[#allocation2 + $0x58] sm:$0xe] }
 0x4e6   : > { %v6603_v53 = vadd.f32 %v6566_v1, %v6310_v17  ;;  %v6568_v42 = vpop.f32.mrf.mxu2  ;;  %7453 = vmatmul.bf16.gmra.mxu1 %v7373_v26  ;;  %v7816_v17 = vor.u32 %v7815_v30, %v7812_v6  ;;  %v6822_v26 = vld [vmem:[#allocation2 + $0x38] sm:$0xf]  ;;  %v7830_v56 = vor.u32 %v7829_v10, %v7826_v52  ;;  %v7821_v41 = vrot.slane %v7819_v5, 5 }
 0x4e7   : > { %v7302_v57 = vsel %vm12225_vm9, %v9918_v25, %v7301_v51  ;;  %v6927_v14 = vshrl.u32 %v6822_v26, 16  ;;  %v6930_v36 = vshll.u32 %v6822_v26, 16  ;;  %v6911_v2 = vsel %vm12240_vm12, %v6906_v61, %v6910_v39  ;;  %v9974_v51 = vld [vmem:[#allocation2 + $0x40] sm:$0xf] }
 0x4e8   : > { %v13966_v23 = vadd.f32 %v6759_v60, %v6603_v53  ;;  %v13978_v60 = vld [vmem:[#allocation2 + $0x4c] sm:$0x1]  ;;  %v6925_v53 = vsel %vm12240_vm12, %v6920_v16, %v6924_v27  ;;  %v7817_v58 = vrot.slane %v7816_v17, 4  ;;  %v7831_v50 = vrot.slane %v7830_v56, 4  ;;  %v7709_v61 = vld [vmem:[#allocation2 + $0x60] sm:$0xf] }
 0x4e9   : > { %v6761_v54 = vpop.f32.mrf.mxu3  ;;  %v7833_v13 = vshll.u32 %v13978_v60, 16  ;;  %v7087_v9 = vunpack.c.l.b16 %v6925_v53  ;;  %v7086_v22 = vunpack.c.l.b16 %v6911_v2  ;;  %v6929_v29 = vrot.slane %v6927_v14, 4  ;;  %v7711_v27 = vld [vmem:[#allocation2 + $0x68] sm:$0xf]  ;;  %v14010_v17 = vld [vmem:[#allocation2 + $0x6c] sm:$0x1] }
 0x4ea   : > { %7175 = vmatmul.bf16.gmra.mxu0 %v7099_v31  ;;  %v13971_v19 = vpop.f32.mrf.mxu1  ;;  %v6943_v31 = vrot.slane %v6941_v47, 4  ;;  %v7822_v7 = vsel %vm12240_vm12, %v7817_v58, %v7821_v41  ;;  %v6932_v39 = vrot.slane %v6930_v36, 5  ;;  %v6936_v6 = vshll.u32 %v13964_v4, 16  ;;  %v6828_v53 = vld [vmem:[#allocation2 + $0x60] sm:$0xf] }
 0x4eb   : > { %v6166_v1 = vpop.f32.mrf.mxu0  ;;  %v7835_v28 = vrot.slane %v7833_v13, 5  ;;  %v7971_v16 = vunpack.c.l.b16 %v7822_v7  ;;  %v7100_v0 = vpack.c.b16 %v7087_v9, %v7086_v22  ;;  %v6950_v13 = vshll.u32 %v13960_v15, 16  ;;  %v14016_v58 = vld [vmem:[#allocation2 + $0x64] sm:$0x1] }
 0x4ec   : > { %v6312_v20 = vadd.f32 %v13938_v62, %v6166_v1  ;;  %v10459_v62 = vld [vmem:[%s14355_s12 + $0x220] sm:$0xff]  ;;  %v6933_v5 = vor.u32 %v6932_v39, %v6929_v29  ;;  %v9920_v52 = vrot.slane %v7235_v32, 9  ;;  %v7838_v26 = vshrl.u32 %v7709_v61, 16 }
 0x4ed   : > { %7646 = vmatmul.bf16.gmra.mxu2 %v9971_v40  ;;  %8321 = vmatpush.bf16.msra.mxu0 %v10459_v62  ;;  %v7836_v55 = vsel %vm12240_vm12, %v7831_v50, %v7835_v28  ;;  %v10434_v40 = vld [vmem:[#allocation2 + $0x44] sm:$0xf0]  ;;  %v7236_v1 = vld [vmem:[#allocation2 + $0x60] sm:$0xe]  ;;  %v7313_v62 = vrot.slane %v14001_v18, 5  ;;  %v7841_v4 = vshll.u32 %v7709_v61, 16 }
 0x4ee   : > { %8063 = vmatmul.bf16.gmra.mxu3 %v7983_v38  ;;  %v6604_v59 = vadd.f32 %v6568_v42, %v6312_v20  ;;  %v6571_v45 = vpop.f32.mrf.mxu2  ;;  %v7361_v42 = vunpack.c.l.b16 %v7302_v57  ;;  %v7972_v12 = vunpack.c.l.b16 %v7836_v55  ;;  %v14003_v20 = vld [vmem:[#allocation2 + $0x5c] sm:$0x1]  ;;  %v9975_v30 = vor.u32 %v10434_v40, %v9974_v51  ;;  %v10435_v61 = vld [vmem:[#allocation2 + $0x64] sm:$0xf0] }
 0x4ef   : > { %v9921_v33 = vrot.slane %v7236_v1, 9  ;;  %v7309_v10 = vrot.slane %v14003_v20, 5  ;;  %v6938_v15 = vrot.slane %v6936_v6, 5  ;;  %v7852_v28 = vshrl.u32 %v7711_v27, 16  ;;  %v10458_v50 = vld [vmem:[%s14355_s12 + $0x218] sm:$0xff] }
 0x4f0   : > { %v13987_v3 = vadd.f32 %v6761_v54, %v6604_v59  ;;  %v6946_v54 = vrot.slane %v6944_v43, 5  ;;  %v7374_v46 = vpack.c.b16 %v7362_v37, %v7361_v42  ;;  %v7984_v37 = vpack.c.b16 %v7972_v12, %v7971_v16 }
 0x4f1   : > { %v6764_v11 = vpop.f32.mrf.mxu3  ;;  %v7855_v47 = vshll.u32 %v7711_v27, 16  ;;  %v7314_v42 = vsel %vm12225_vm9, %v9921_v33, %v7313_v62  ;;  %v7840_v43 = vrot.slane %v7838_v26, 4  ;;  %v7843_v41 = vrot.slane %v7841_v4, 5  ;;  %8322 = vmatpush.bf16.msra.mxu0 %v10458_v50  ;;  %v14039_v26 = vld [vmem:[#allocation2 + $0x74] sm:$0x1] }
 0x4f2   : > { %v13997_v25 = vpop.f32.mrf.mxu1  ;;  %v6947_v63 = vor.u32 %v6946_v54, %v6943_v31  ;;  %v7854_v14 = vrot.slane %v7852_v28, 4  ;;  %v7861_v2 = vshll.u32 %v14010_v17, 16  ;;  %v6826_v31 = vld [vmem:[#allocation2 + $0x58] sm:$0xf]  ;;  %v6969_v51 = vshrl.u32 %v6828_v53, 16 }
 0x4f3   : > { %v7857_v36 = vrot.slane %v7855_v47, 5  ;;  %v7844_v55 = vor.u32 %v7843_v41, %v7840_v43  ;;  %v7364_v39 = vunpack.c.l.b16 %v7314_v42  ;;  %v7847_v1 = vshll.u32 %v14016_v58, 16  ;;  %v7238_v4 = vld [vmem:[#allocation2 + $0x70] sm:$0xe]  ;;  %v9978_v28 = vld [vmem:[#allocation2 + $0x60] sm:$0xf] }
 0x4f4   : > { %v6955_v12 = vshrl.u32 %v6826_v31, 16  ;;  %v6972_v32 = vshll.u32 %v6828_v53, 16  ;;  %v14041_v53 = vld [vmem:[#allocation2 + $0x6c] sm:$0x1] }
 0x4f6   : > { %v13999_v44 = vpop.f32.mrf.mxu2  ;;  %7458 = vmatmul.bf16.gmra.mxu1 %v7374_v46  ;;  %v6934_v46 = vrot.slane %v6933_v5, 4  ;;  %v6974_v62 = vrot.slane %v6972_v32, 5 }
 0x4f7   : > { %v6169_v38 = vpop.f32.mrf.mxu0 }
 0x4f8   : > { %v6315_v21 = vadd.f32 %v13954_v48, %v6169_v38  ;;  %v6948_v48 = vrot.slane %v6947_v63, 4  ;;  %v7858_v38 = vor.u32 %v7857_v36, %v7854_v14  ;;  %v6958_v63 = vshll.u32 %v6826_v31, 16 }
 0x4f9   : > { %v6766_v57 = vpop.f32.mrf.mxu3  ;;  %v6964_v14 = vshll.u32 %v14003_v20, 16  ;;  %v6978_v31 = vshll.u32 %v14001_v18, 16 }
 0x4fa   : > { %v6605_v59 = vadd.f32 %v6571_v45, %v6315_v21  ;;  %7180 = vmatmul.bf16.gmra.mxu0 %v7100_v0  ;;  %v6952_v45 = vrot.slane %v6950_v13, 5  ;;  %v14024_v9 = vpop.f32.mrf.mxu1  ;;  %v7845_v0 = vrot.slane %v7844_v55, 4  ;;  %v7859_v6 = vrot.slane %v7858_v38, 4 }
 0x4fb   : > { %v6939_v13 = vsel %vm12240_vm12, %v6934_v46, %v6938_v15  ;;  %v7321_v46 = vrot.slane %v14039_v26, 5  ;;  %v6966_v18 = vrot.slane %v6964_v14, 5 }
 0x4fc   : > { %v14012_v56 = vadd.f32 %v6764_v11, %v6605_v59  ;;  %v7310_v11 = vsel %vm12225_vm9, %v9920_v52, %v7309_v10  ;;  %v6953_v7 = vsel %vm12240_vm12, %v6948_v48, %v6952_v45  ;;  %v7849_v52 = vrot.slane %v7847_v1, 5  ;;  %v7237_v45 = vld [vmem:[#allocation2 + $0x68] sm:$0xe] }
 0x4fd   : > { %7651 = vmatmul.bf16.gmra.mxu2 %v9975_v30  ;;  %v7363_v16 = vunpack.c.l.b16 %v7310_v11  ;;  %v7863_v30 = vrot.slane %v7861_v2, 5  ;;  %v7089_v33 = vunpack.c.l.b16 %v6953_v7  ;;  %v7088_v27 = vunpack.c.l.b16 %v6939_v13 }
 0x4fe   : > { %8068 = vmatmul.bf16.gmra.mxu3 %v7984_v37  ;;  %v6957_v37 = vrot.slane %v6955_v12, 4  ;;  %v6960_v48 = vrot.slane %v6958_v63, 5  ;;  %v9979_v11 = vor.u32 %v10435_v61, %v9978_v28 }
 0x4ff   : > { %v6171_v54 = vpop.f32.mrf.mxu0  ;;  %v7375_v5 = vpack.c.b16 %v7364_v39, %v7363_v16  ;;  %v7864_v10 = vsel %vm12240_vm12, %v7859_v6, %v7863_v30  ;;  %v7101_v43 = vpack.c.b16 %v7089_v33, %v7088_v27  ;;  %v7715_v39 = vld [vmem:[#allocation2 + $0x78] sm:$0xf]  ;;  %v14052_v16 = vld [vmem:[#allocation2 + $0x7c] sm:$0x1]  ;;  %v14058_v30 = vld [vmem:[#allocation2 + $0x74] sm:$0x1] }
 0x500   : > { %v6317_v40 = vadd.f32 %v13971_v19, %v6171_v54  ;;  %v6576_v22 = vpop.f32.mrf.mxu2  ;;  %v6971_v19 = vrot.slane %v6969_v51, 4  ;;  %v9923_v54 = vrot.slane %v7238_v4, 9  ;;  %v6961_v55 = vor.u32 %v6960_v48, %v6957_v37 }
 0x501   : > { %v6769_v29 = vpop.f32.mrf.mxu3  ;;  %v9922_v51 = vrot.slane %v7237_v45, 9  ;;  %v7880_v32 = vshrl.u32 %v7715_v39, 16 }
 0x502   : > { %v6606_v21 = vadd.f32 %v13999_v44, %v6317_v40  ;;  %v7850_v44 = vsel %vm12240_vm12, %v7845_v0, %v7849_v52  ;;  %v6975_v47 = vor.u32 %v6974_v62, %v6971_v19  ;;  %v14047_v36 = vpop.f32.mrf.mxu1  ;;  %v7713_v40 = vld [vmem:[#allocation2 + $0x70] sm:$0xf]  ;;  %v7322_v6 = vsel %vm12225_vm9, %v9923_v54, %v7321_v46 }
 0x503   : > { %v7973_v2 = vunpack.c.l.b16 %v7850_v44  ;;  %v7866_v20 = vshrl.u32 %v7713_v40, 16  ;;  %v7869_v12 = vshll.u32 %v7713_v40, 16  ;;  %v6832_v0 = vld [vmem:[#allocation2 + $0x70] sm:$0xf]  ;;  %v7882_v62 = vrot.slane %v7880_v32, 4 }
 0x504   : > { %v14033_v59 = vadd.f32 %v6766_v57, %v6606_v21  ;;  %v7974_v57 = vunpack.c.l.b16 %v7864_v10  ;;  %v6976_v38 = vrot.slane %v6975_v47, 4  ;;  %v7883_v21 = vshll.u32 %v7715_v39, 16  ;;  %v10457_v19 = vld [vmem:[%s14355_s12 + $0x210] sm:$0xff]  ;;  %v6830_v10 = vld [vmem:[#allocation2 + $0x68] sm:$0xf] }
 0x505   : > { %v7868_v13 = vrot.slane %v7866_v20, 4  ;;  %v7871_v33 = vrot.slane %v7869_v12, 5  ;;  %v7889_v52 = vshll.u32 %v14052_v16, 16  ;;  %v6962_v27 = vrot.slane %v6961_v55, 4  ;;  %8323 = vmatpush.bf16.msra.mxu0 %v10457_v19  ;;  %v7239_v19 = vld [vmem:[#allocation2 + $0x78] sm:$0xe] }
 0x506   : > { %7463 = vmatmul.bf16.gmra.mxu1 %v7375_v5  ;;  %v7985_v1 = vpack.c.b16 %v7974_v57, %v7973_v2  ;;  %v7885_v5 = vrot.slane %v7883_v21, 5  ;;  %v6997_v48 = vshrl.u32 %v6832_v0, 16  ;;  %v7366_v57 = vunpack.c.l.b16 %v7322_v6  ;;  %v9982_v6 = vld [vmem:[#allocation2 + $0x70] sm:$0xf] }
 0x507   : > { %v6174_v15 = vpop.f32.mrf.mxu0  ;;  %v7872_v37 = vor.u32 %v7871_v33, %v7868_v13  ;;  %v7875_v47 = vshll.u32 %v14058_v30, 16  ;;  %v7000_v14 = vshll.u32 %v6832_v0, 16  ;;  %v7891_v46 = vrot.slane %v7889_v52, 5  ;;  %v7240_v0 = vld [vmem:[#allocation2 + $0x80] sm:$0xe] }
 0x508   : > { %v6320_v42 = vadd.f32 %v13997_v25, %v6174_v15  ;;  %v6578_v41 = vpop.f32.mrf.mxu2  ;;  %v7317_v25 = vrot.slane %v14041_v53, 5  ;;  %v7886_v45 = vor.u32 %v7885_v5, %v7882_v62  ;;  %v6967_v55 = vsel %vm12240_vm12, %v6962_v27, %v6966_v18  ;;  %v14081_v18 = vld [vmem:[#allocation2 + $0x84] sm:$0x1]  ;;  %v14083_v33 = vld [vmem:[#allocation2 + $0x7c] sm:$0x1] }
 0x509   : > { %v14044_v50 = vpop.f32.mrf.mxu3  ;;  %v7090_v20 = vunpack.c.l.b16 %v6967_v55  ;;  %v6836_v55 = vld [vmem:[#allocation2 + $0x80] sm:$0xf] }
 0x50a   : > { %v6607_v7 = vadd.f32 %v6576_v22, %v6320_v42  ;;  %7185 = vmatmul.bf16.gmra.mxu0 %v7101_v43  ;;  %v6980_v22 = vrot.slane %v6978_v31, 5  ;;  %v6983_v43 = vshrl.u32 %v6830_v10, 16  ;;  %v7873_v31 = vrot.slane %v7872_v37, 4 }
 0x50b   : > { %v7887_v54 = vrot.slane %v7886_v45, 4  ;;  %v9925_v37 = vrot.slane %v7240_v0, 9  ;;  %v7325_v45 = vrot.slane %v14083_v33, 5 }
 0x50c   : > { %v14054_v63 = vadd.f32 %v6769_v29, %v6607_v7  ;;  %v7318_v29 = vsel %vm12225_vm9, %v9922_v51, %v7317_v25  ;;  %v6981_v44 = vsel %vm12240_vm12, %v6976_v38, %v6980_v22  ;;  %v14070_v7 = vpop.f32.mrf.mxu1  ;;  %v6999_v51 = vrot.slane %v6997_v48, 4 }
 0x50d   : > { %7656 = vmatmul.bf16.gmra.mxu2 %v9979_v11  ;;  %v7365_v42 = vunpack.c.l.b16 %v7318_v29  ;;  %v6986_v11 = vshll.u32 %v6830_v10, 16  ;;  %v7002_v25 = vrot.slane %v7000_v14, 5  ;;  %v7892_v38 = vsel %vm12240_vm12, %v7887_v54, %v7891_v46  ;;  %v14090_v14 = vld [vmem:[#allocation2 + $0x8c] sm:$0x1] }
 0x50e   : > { %8073 = vmatmul.bf16.gmra.mxu3 %v7985_v1  ;;  %v7877_v1 = vrot.slane %v7875_v47, 5  ;;  %v6985_v32 = vrot.slane %v6983_v43, 4  ;;  %v7329_v48 = vrot.slane %v14081_v18, 5  ;;  %v9924_v47 = vrot.slane %v7239_v19, 9 }
 0x50f   : > { %v6176_v61 = vpop.f32.mrf.mxu0  ;;  %v7376_v39 = vpack.c.b16 %v7366_v57, %v7365_v42  ;;  %v6988_v21 = vrot.slane %v6986_v11, 5  ;;  %v7003_v13 = vor.u32 %v7002_v25, %v6999_v51  ;;  %v7717_v42 = vld [vmem:[#allocation2 + $0x80] sm:$0xf]  ;;  %v14096_v25 = vld [vmem:[#allocation2 + $0x84] sm:$0x1] }
 0x510   : > { %v6322_v4 = vadd.f32 %v14024_v9, %v6176_v61  ;;  %v6581_v15 = vpop.f32.mrf.mxu2  ;;  %v7091_v9 = vunpack.c.l.b16 %v6981_v44  ;;  %v7878_v12 = vsel %vm12240_vm12, %v7873_v31, %v7877_v1  ;;  %v6992_v61 = vshll.u32 %v14041_v53, 16 }
 0x511   : > { %v6774_v28 = vpop.f32.mrf.mxu3  ;;  %v7975_v27 = vunpack.c.l.b16 %v7878_v12  ;;  %v7006_v44 = vshll.u32 %v14039_v26, 16  ;;  %v6989_v57 = vor.u32 %v6988_v21, %v6985_v32  ;;  %v7004_v11 = vrot.slane %v7003_v13, 4  ;;  %v6834_v32 = vld [vmem:[#allocation2 + $0x78] sm:$0xf] }
 0x512   : > { %v6608_v2 = vadd.f32 %v6578_v41, %v6322_v4  ;;  %v10436_v41 = vld [vmem:[#allocation2 + $0x74] sm:$0xf0]  ;;  %v7102_v62 = vpack.c.b16 %v7091_v9, %v7090_v20  ;;  %v7897_v53 = vshll.u32 %v7717_v42, 16  ;;  %v6994_v26 = vrot.slane %v6992_v61, 5 }
 0x513   : > { %v9983_v10 = vor.u32 %v10436_v41, %v9982_v6  ;;  %v7008_v9 = vrot.slane %v7006_v44, 5  ;;  %v7330_v51 = vsel %vm12225_vm9, %v9925_v37, %v7329_v48  ;;  %v7917_v12 = vshll.u32 %v14090_v14, 16 }
 0x514   : > { %v14075_v40 = vadd.f32 %v14044_v50, %v6608_v2  ;;  %v7976_v50 = vunpack.c.l.b16 %v7892_v38  ;;  %v7894_v2 = vshrl.u32 %v7717_v42, 16  ;;  %v7899_v1 = vrot.slane %v7897_v53, 5 }
 0x515   : > { %v7326_v38 = vsel %vm12225_vm9, %v9924_v47, %v7325_v45  ;;  %v6990_v0 = vrot.slane %v6989_v57, 4  ;;  %v7011_v44 = vshrl.u32 %v6834_v32, 16  ;;  %v7014_v37 = vshll.u32 %v6834_v32, 16 }
 0x516   : > { %7468 = vmatmul.bf16.gmra.mxu1 %v7376_v39  ;;  %v7986_v43 = vpack.c.b16 %v7976_v50, %v7975_v27  ;;  %v7896_v39 = vrot.slane %v7894_v2, 4  ;;  %v7025_v50 = vshrl.u32 %v6836_v55, 16  ;;  %v7367_v27 = vunpack.c.l.b16 %v7326_v38 }
 0x517   : > { %v6179_v22 = vpop.f32.mrf.mxu0  ;;  %v7028_v48 = vshll.u32 %v6836_v55, 16  ;;  %v7919_v45 = vrot.slane %v7917_v12, 5  ;;  %v6995_v42 = vsel %vm12240_vm12, %v6990_v0, %v6994_v26  ;;  %v7013_v55 = vrot.slane %v7011_v44, 4  ;;  %v7242_v26 = vld [vmem:[#allocation2 + $0x90] sm:$0xe] }
 0x518   : > { %v6325_v29 = vadd.f32 %v14047_v36, %v6179_v22  ;;  %v6583_v5 = vpop.f32.mrf.mxu2  ;;  %v7719_v36 = vld [vmem:[#allocation2 + $0x88] sm:$0xf]  ;;  %v7009_v22 = vsel %vm12240_vm12, %v7004_v11, %v7008_v9  ;;  %v7900_v6 = vor.u32 %v7899_v1, %v7896_v39  ;;  %v7092_v9 = vunpack.c.l.b16 %v6995_v42  ;;  %v14116_v39 = vld [vmem:[#allocation2 + $0x94] sm:$0x1] }
 0x519   : > { %v6776_v52 = vpop.f32.mrf.mxu3  ;;  %v7908_v54 = vshrl.u32 %v7719_v36, 16  ;;  %v7911_v46 = vshll.u32 %v7719_v36, 16  ;;  %v7093_v36 = vunpack.c.l.b16 %v7009_v22  ;;  %v7241_v12 = vld [vmem:[#allocation2 + $0x88] sm:$0xe] }
 0x51a   : > { %v6609_v4 = vadd.f32 %v6581_v15, %v6325_v29  ;;  %7190 = vmatmul.bf16.gmra.mxu0 %v7102_v62  ;;  %v6329_v15 = vpop.f32.mrf.mxu1  ;;  %v7368_v62 = vunpack.c.l.b16 %v7330_v51  ;;  %v7901_v57 = vrot.slane %v7900_v6, 4  ;;  %v7016_v51 = vrot.slane %v7014_v37, 5 }
 0x51b   : > { %v7910_v41 = vrot.slane %v7908_v54, 4  ;;  %v7913_v20 = vrot.slane %v7911_v46, 5  ;;  %v10437_v46 = vld [vmem:[#allocation2 + $0x84] sm:$0xf0]  ;;  %v7034_v6 = vshll.u32 %v14081_v18, 16  ;;  %v9926_v37 = vrot.slane %v7241_v12, 9 }
 0x51c   : > { %v14092_v31 = vadd.f32 %v6774_v28, %v6609_v4  ;;  %v10456_v28 = vld [vmem:[%s14355_s12 + $0x208] sm:$0xff]  ;;  %v7377_v2 = vpack.c.b16 %v7368_v62, %v7367_v27  ;;  %v7020_v62 = vshll.u32 %v14083_v33, 16  ;;  %v7017_v44 = vor.u32 %v7016_v51, %v7013_v55  ;;  %v6840_v51 = vld [vmem:[#allocation2 + $0x90] sm:$0xf] }
 0x51d   : > { %7661 = vmatmul.bf16.gmra.mxu2 %v9983_v10  ;;  %8324 = vmatpush.bf16.msra.mxu0 %v10456_v28  ;;  %v7903_v10 = vshll.u32 %v14096_v25, 16  ;;  %v7914_v61 = vor.u32 %v7913_v20, %v7910_v41  ;;  %v14118_v20 = vld [vmem:[#allocation2 + $0x8c] sm:$0x1]  ;;  %v7036_v33 = vrot.slane %v7034_v6, 5  ;;  %v6838_v6 = vld [vmem:[#allocation2 + $0x88] sm:$0xf] }
 0x51e   : > { %8078 = vmatmul.bf16.gmra.mxu3 %v7986_v43  ;;  %v7027_v43 = vrot.slane %v7025_v50, 4 }
 0x51f   : > { %v6181_v21 = vpop.f32.mrf.mxu0  ;;  %v7915_v47 = vrot.slane %v7914_v61, 4  ;;  %v7905_v53 = vrot.slane %v7903_v10, 5  ;;  %v9927_v10 = vrot.slane %v7242_v26, 9  ;;  %v7337_v61 = vrot.slane %v14116_v39, 5 }
 0x520   : > { %v6327_v13 = vadd.f32 %v14070_v7, %v6181_v21  ;;  %v6586_v19 = vpop.f32.mrf.mxu2  ;;  %v7030_v7 = vrot.slane %v7028_v48, 5  ;;  %v7103_v21 = vpack.c.b16 %v7093_v36, %v7092_v9  ;;  %v7333_v48 = vrot.slane %v14118_v20, 5  ;;  %v10455_v9 = vld [vmem:[%s14355_s12 + $0x200] sm:$0xff] }
 0x521   : > { %v6779_v29 = vpop.f32.mrf.mxu3  ;;  %v7920_v54 = vsel %vm12240_vm12, %v7915_v47, %v7919_v45  ;;  %v14124_v45 = vld [vmem:[#allocation2 + $0x94] sm:$0x1]  ;;  %8325 = vmatpush.bf16.msra.mxu0 %v10455_v9 }
 0x522   : > { %v6610_v4 = vadd.f32 %v6583_v5, %v6327_v13  ;;  %v7906_v5 = vsel %vm12240_vm12, %v7901_v57, %v7905_v53  ;;  %v6331_v1 = vpop.f32.mrf.mxu1  ;;  %v7978_v38 = vunpack.c.l.b16 %v7920_v54  ;;  %v7031_v41 = vor.u32 %v7030_v7, %v7027_v43  ;;  %v14128_v43 = vld [vmem:[#allocation2 + $0x9c] sm:$0x1] }
 0x523   : > { %v7977_v13 = vunpack.c.l.b16 %v7906_v5 }
 0x524   : > { %v14110_v11 = vadd.f32 %v6776_v52, %v6610_v4  ;;  %v9986_v52 = vld [vmem:[#allocation2 + $0x80] sm:$0xf]  ;;  %v7721_v4 = vld [vmem:[#allocation2 + $0x90] sm:$0xf]  ;;  %v7032_v47 = vrot.slane %v7031_v41, 4 }
 0x525   : > { %v9987_v22 = vor.u32 %v10437_v46, %v9986_v52  ;;  %v7987_v57 = vpack.c.b16 %v7978_v38, %v7977_v13  ;;  %v7922_v18 = vshrl.u32 %v7721_v4, 16  ;;  %v7925_v42 = vshll.u32 %v7721_v4, 16 }
 0x526   : > { %7473 = vmatmul.bf16.gmra.mxu1 %v7377_v2  ;;  %v7338_v2 = vsel %vm12225_vm9, %v9927_v10, %v7337_v61  ;;  %v7945_v46 = vshll.u32 %v14128_v43, 16  ;;  %v7037_v52 = vsel %vm12240_vm12, %v7032_v47, %v7036_v33  ;;  %v7334_v38 = vsel %vm12225_vm9, %v9926_v37, %v7333_v48 }
 0x527   : > { %v6184_v28 = vpop.f32.mrf.mxu0  ;;  %v7924_v53 = vrot.slane %v7922_v18, 4  ;;  %v7927_v54 = vrot.slane %v7925_v42, 5  ;;  %v7022_v10 = vrot.slane %v7020_v62, 5  ;;  %v7056_v4 = vshll.u32 %v6840_v51, 16 }
 0x528   : > { %v6330_v32 = vadd.f32 %v6329_v15, %v6184_v28  ;;  %v6588_v0 = vpop.f32.mrf.mxu2  ;;  %v7723_v15 = vld [vmem:[#allocation2 + $0x98] sm:$0xf]  ;;  %v7018_v28 = vrot.slane %v7017_v44, 4  ;;  %v7095_v48 = vunpack.c.l.b16 %v7037_v52  ;;  %v7042_v33 = vshll.u32 %v6838_v6, 16 }
 0x529   : > { %v6781_v50 = vpop.f32.mrf.mxu3  ;;  %v7936_v7 = vshrl.u32 %v7723_v15, 16  ;;  %v7928_v41 = vor.u32 %v7927_v54, %v7924_v53  ;;  %v7058_v53 = vrot.slane %v7056_v4, 5 }
 0x52a   : > { %v6611_v27 = vadd.f32 %v6586_v19, %v6330_v32  ;;  %7195 = vmatmul.bf16.gmra.mxu0 %v7103_v21  ;;  %v7939_v19 = vshll.u32 %v7723_v15, 16  ;;  %v7370_v32 = vunpack.c.l.b16 %v7338_v2  ;;  %v6334_v13 = vpop.f32.mrf.mxu1  ;;  %v7023_v37 = vsel %vm12240_vm12, %v7018_v28, %v7022_v10  ;;  %v10438_v28 = vld [vmem:[#allocation2 + $0x94] sm:$0xf0] }
 0x52b   : > { %v7938_v5 = vrot.slane %v7936_v7, 4  ;;  %v7929_v61 = vrot.slane %v7928_v41, 4  ;;  %v7094_v54 = vunpack.c.l.b16 %v7023_v37 }
 0x52c   : > { %v14126_v36 = vadd.f32 %v6779_v29, %v6611_v27  ;;  %v7931_v29 = vshll.u32 %v14124_v45, 16  ;;  %v7941_v55 = vrot.slane %v7939_v19, 5  ;;  %v7053_v27 = vshrl.u32 %v6840_v51, 16 }
 0x52d   : > { %7666 = vmatmul.bf16.gmra.mxu2 %v9987_v22  ;;  %v7947_v22 = vrot.slane %v7945_v46, 5 }
 0x52e   : > { %8083 = vmatmul.bf16.gmra.mxu3 %v7987_v57  ;;  %v7942_v21 = vor.u32 %v7941_v55, %v7938_v5  ;;  %v7369_v57 = vunpack.c.l.b16 %v7334_v38  ;;  %v7933_v18 = vrot.slane %v7931_v29, 5  ;;  %v7055_v2 = vrot.slane %v7053_v27, 4 }
 0x52f   : > { %v6186_v26 = vpop.f32.mrf.mxu0  ;;  %v7044_v55 = vrot.slane %v7042_v33, 5 }
 0x530   : > { %v6332_v12 = vadd.f32 %v6331_v1, %v6186_v26  ;;  %v6591_v44 = vpop.f32.mrf.mxu2  ;;  %v7943_v47 = vrot.slane %v7942_v21, 4  ;;  %v7039_v1 = vshrl.u32 %v6838_v6, 16  ;;  %v7378_v19 = vpack.c.b16 %v7370_v32, %v7369_v57 }
 0x531   : > { %v6784_v42 = vpop.f32.mrf.mxu3  ;;  %v7934_v62 = vsel %vm12240_vm12, %v7929_v61, %v7933_v18  ;;  %v7104_v26 = vpack.c.b16 %v7095_v48, %v7094_v54  ;;  %v7059_v52 = vor.u32 %v7058_v53, %v7055_v2  ;;  %v8111_v54 = vld [vmem:[#allocation2 + $0x18] sm:$0xe] }
 0x532   : > { %v6612_v15 = vadd.f32 %v6588_v0, %v6332_v12  ;;  %v7948_v0 = vsel %vm12240_vm12, %v7943_v47, %v7947_v22  ;;  %v7979_v9 = vunpack.c.l.b16 %v7934_v62  ;;  %v7041_v5 = vrot.slane %v7039_v1, 4  ;;  %v6336_v41 = vpop.f32.mrf.mxu1 }
 0x533   : > { %v7980_v29 = vunpack.c.l.b16 %v7948_v0  ;;  %v7062_v22 = vshll.u32 %v14116_v39, 16  ;;  %v7060_v27 = vrot.slane %v7059_v52, 4 }
 0x534   : > { %v14143_v7 = vadd.f32 %v6781_v50, %v6612_v15  ;;  %v9990_v50 = vld [vmem:[#allocation2 + $0x90] sm:$0xf]  ;;  %v7045_v21 = vor.u32 %v7044_v55, %v7041_v5  ;;  %v10677_v5 = vld [vmem:[#allocation2 + $0x1c] sm:$0x1] }
 0x535   : > { %v9991_v12 = vor.u32 %v10438_v28, %v9990_v50  ;;  %v7988_v32 = vpack.c.b16 %v7980_v29, %v7979_v9  ;;  %v7064_v57 = vrot.slane %v7062_v22, 5  ;;  %v8110_v9 = vld [vmem:[#allocation2 + $0x10] sm:$0xe]  ;;  %v10057_v29 = vrot.slane %v8111_v54, 9  ;;  %v10678_v50 = vld [vmem:[#allocation2 + $0x14] sm:$0x1] }
 0x536   : > { %7478 = vmatmul.bf16.gmra.mxu1 %v7378_v19  ;;  %v7046_v15 = vrot.slane %v7045_v21, 4  ;;  %v8164_v34 = vrot.slane %v10677_v5, 5  ;;  %v8160_v28 = vrot.slane %v10678_v50, 5  ;;  %v8124_v54 = vld [vmem:[#allocation2 + $0x90] sm:$0xe] }
 0x537   : > { %v6189_v46 = vpop.f32.mrf.mxu0  ;;  %v7065_v47 = vsel %vm12240_vm12, %v7060_v27, %v7064_v57  ;;  %v8112_v57 = vld [vmem:[#allocation2 + $0x20] sm:$0xe]  ;;  %v10070_v5 = vrot.slane %v8124_v54, 9 }
 0x538   : > { %v6335_v51 = vadd.f32 %v6334_v13, %v6189_v46  ;;  %v6593_v10 = vpop.f32.mrf.mxu2  ;;  %v7048_v13 = vshll.u32 %v14118_v20, 16  ;;  %v7097_v48 = vunpack.c.l.b16 %v7065_v47 }
 0x539   : > { %v6786_v61 = vpop.f32.mrf.mxu3 }
 0x53a   : > { %v6613_v38 = vadd.f32 %v6591_v44, %v6335_v51  ;;  %7200 = vmatmul.bf16.gmra.mxu0 %v7104_v26  ;;  %v7050_v18 = vrot.slane %v7048_v13, 5  ;;  %v6339_v1 = vpop.f32.mrf.mxu1  ;;  %v10056_v26 = vrot.slane %v8110_v9, 9  ;;  %v8125_v9 = vld [vmem:[#allocation2 + $0x98] sm:$0xe] }
 0x53c   : > { %v14150_v6 = vadd.f32 %v6784_v42, %v6613_v38  ;;  %v7051_v39 = vsel %vm12240_vm12, %v7046_v15, %v7050_v18  ;;  %v8161_v21 = vsel %vm12225_vm9, %v10056_v26, %v8160_v28  ;;  %v8113_v15 = vld [vmem:[#allocation2 + $0x28] sm:$0xe]  ;;  %v10679_v18 = vld [vmem:[#allocation2 + $0x2c] sm:$0x1]  ;;  %v10681_v28 = vld [vmem:[#allocation2 + $0x3c] sm:$0x1] }
 0x53d   : > { %7671 = vmatmul.bf16.gmra.mxu2 %v9991_v12  ;;  %v7096_v19 = vunpack.c.l.b16 %v7051_v39  ;;  %v8165_v12 = vsel %vm12225_vm9, %v10057_v29, %v8164_v34  ;;  %v8172_v47 = vrot.slane %v10679_v18, 5  ;;  %v10058_v39 = vrot.slane %v8112_v57, 9  ;;  %v8115_v29 = vld [vmem:[#allocation2 + $0x38] sm:$0xe] }
 0x53e   : > { %8088 = vmatmul.bf16.gmra.mxu3 %v7988_v32  ;;  %v10071_v34 = vrot.slane %v8125_v9, 9  ;;  %v10061_v50 = vrot.slane %v8115_v29, 9  ;;  %v8119_v9 = vld [vmem:[#allocation2 + $0x68] sm:$0xe] }
 0x53f   : > { %v6191_v4 = vpop.f32.mrf.mxu0  ;;  %v7105_v2 = vpack.c.b16 %v7097_v48, %v7096_v19  ;;  %v10680_v48 = vld [vmem:[#allocation2 + $0x24] sm:$0x1]  ;;  %v10065_v29 = vrot.slane %v8119_v9, 9 }
 0x540   : > { %v6337_v44 = vadd.f32 %v6336_v41, %v6191_v4  ;;  %v6596_v33 = vpop.f32.mrf.mxu2 }
 0x541   : > { %v6789_v62 = vpop.f32.mrf.mxu3 }
 0x542   : > { %v6614_v37 = vadd.f32 %v6593_v10, %v6337_v44  ;;  %v6341_v55 = vpop.f32.mrf.mxu1  ;;  %v8239_v10 = vunpack.c.l.b16 %v8165_v12  ;;  %v10059_v44 = vrot.slane %v8113_v15, 9 }
 0x544   : > { %v14157_v42 = vadd.f32 %v6786_v61, %v6614_v37  ;;  %v8238_v61 = vunpack.c.l.b16 %v8161_v21  ;;  %v8173_v19 = vsel %vm12225_vm9, %v10059_v44, %v8172_v47  ;;  %v10682_v21 = vld [vmem:[#allocation2 + $0x34] sm:$0x1]  ;;  %v8116_v47 = vld [vmem:[#allocation2 + $0x40] sm:$0xe] }
 0x546   : > { %v8254_v4 = vpack.c.b16 %v8239_v10, %v8238_v61  ;;  %v8176_v10 = vrot.slane %v10682_v21, 5 }
 0x547   : > { %v6194_v20 = vpop.f32.mrf.mxu0 }
 0x548   : > { %v6340_v0 = vadd.f32 %v6339_v1, %v6194_v20  ;;  %v6598_v38 = vpop.f32.mrf.mxu2  ;;  %v8168_v1 = vrot.slane %v10680_v48, 5  ;;  %v8241_v20 = vunpack.c.l.b16 %v8173_v19 }
 0x549   : > { %v6791_v41 = vpop.f32.mrf.mxu3 }
 0x54a   : > { %v6615_v53 = vadd.f32 %v6596_v33, %v6340_v0  ;;  %7205 = vmatmul.bf16.gmra.mxu0 %v7105_v2 }
 0x54c   : > { %v14159_v46 = vadd.f32 %v6789_v62, %v6615_v53 }
 0x54f   : > { %v6196_v51 = vpop.f32.mrf.mxu0 }
 0x550   : > { %v6342_v52 = vadd.f32 %v6341_v55, %v6196_v51  ;;  %v8220_v55 = vrot.slane %v14128_v43, 5  ;;  %v8114_v51 = vld [vmem:[#allocation2 + $0x30] sm:$0xe] }
 0x552   : > { %v6616_v32 = vadd.f32 %v6598_v38, %v6342_v52  ;;  %v8180_v52 = vrot.slane %v10681_v28, 5 }
 0x554   : > { %v14165_v22 = vadd.f32 %v6791_v41, %v6616_v32  ;;  %v10060_v32 = vrot.slane %v8114_v51, 9  ;;  %v8181_v61 = vsel %vm12225_vm9, %v10061_v50, %v8180_v52 }
 0x557   : > { %v7171_v13 = vpop.f32.mrf.mxu0 }
 0x558   : > { %v14168_v27 = vadd.f32 %v7171_v13, %v13933_v24  ;;  %v8169_v24 = vsel %vm12225_vm9, %v10058_v39, %v8168_v1  ;;  %v8177_v13 = vsel %vm12225_vm9, %v10060_v32, %v8176_v10  ;;  %v8184_v39 = vrot.slane %v13973_v49, 5 }
 0x559   : > { %v8240_v62 = vunpack.c.l.b16 %v8169_v24  ;;  %v8242_v15 = vunpack.c.l.b16 %v8177_v13  ;;  %v8188_v1 = vrot.slane %v13978_v60, 5  ;;  %v8118_v60 = vld [vmem:[#allocation2 + $0x60] sm:$0xe]  ;;  %v8200_v32 = vrot.slane %v14058_v30, 5 }
 0x55a   : > { %8326 = vmatmul.bf16.vlgmr.msra.gmra.mxu0 %v8254_v4  ;;  %v8243_v4 = vunpack.c.l.b16 %v8181_v61 }
 0x55b   : > { %v8255_v53 = vpack.c.b16 %v8241_v20, %v8240_v62 }
 0x55c   : > { %v8256_v18 = vpack.c.b16 %v8243_v4, %v8242_v15 }
 0x55f   : > { %v7173_v37 = vpop.f32.mrf.mxu0 }
 0x560   : > { %v14171_v33 = vadd.f32 %v7173_v37, %v13950_v8  ;;  %v8216_v8 = vrot.slane %v14124_v45, 5  ;;  %v8117_v37 = vld [vmem:[#allocation2 + $0x48] sm:$0xe] }
 0x561   : > { %v10063_v48 = vrot.slane %v8117_v37, 9 }
 0x562   : > { %v8217_v26 = vsel %vm12225_vm9, %v10070_v5, %v8216_v8  ;;  %v10064_v8 = vrot.slane %v8118_v60, 9 }
 0x563   : > { %v8252_v38 = vunpack.c.l.b16 %v8217_v26 }
 0x567   : > { %v7176_v0 = vpop.f32.mrf.mxu0 }
 0x568   : > { %v14178_v2 = vadd.f32 %v7176_v0, %v13966_v23  ;;  %v8221_v23 = vsel %vm12225_vm9, %v10071_v34, %v8220_v55  ;;  %v8192_v34 = vrot.slane %v14016_v58, 5 }
 0x569   : > { %v8253_v41 = vunpack.c.l.b16 %v8221_v23  ;;  %v8121_v23 = vld [vmem:[#allocation2 + $0x78] sm:$0xe] }
 0x56a   : > { %8331 = vmatmul.bf16.gmra.mxu0 %v8255_v53  ;;  %v10067_v58 = vrot.slane %v8121_v23, 9 }
 0x56b   : > { %v14189_v43 = vpack.c.b16 %v8253_v41, %v8252_v38  ;;  %v8120_v38 = vld [vmem:[#allocation2 + $0x70] sm:$0xe] }
 0x56f   : > { %v7178_v12 = vpop.f32.mrf.mxu0 }
 0x570   : > { %v14187_v45 = vadd.f32 %v7178_v12, %v13987_v3  ;;  %v10062_v3 = vrot.slane %v8116_v47, 9  ;;  %v10066_v12 = vrot.slane %v8120_v38, 9  ;;  %v7444_v47 = vpop.f32.mrf.mxu1 }
 0x572   : > { %v8185_v20 = vsel %vm12225_vm9, %v10062_v3, %v8184_v39  ;;  %v8208_v39 = vrot.slane %v14096_v25, 5 }
 0x573   : > { %v8244_v62 = vunpack.c.l.b16 %v8185_v20 }
 0x577   : > { %v7181_v57 = vpop.f32.mrf.mxu0 }
 0x578   : > { %v14196_v44 = vadd.f32 %v7181_v57, %v14012_v56  ;;  %v8189_v56 = vsel %vm12225_vm9, %v10063_v48, %v8188_v1  ;;  %v8123_v57 = vld [vmem:[#allocation2 + $0x88] sm:$0xe] }
 0x579   : > { %v8245_v0 = vunpack.c.l.b16 %v8189_v56  ;;  %v10069_v30 = vrot.slane %v8123_v57, 9 }
 0x57a   : > { %8336 = vmatmul.bf16.gmra.mxu0 %v8256_v18  ;;  %v8122_v18 = vld [vmem:[#allocation2 + $0x80] sm:$0xe] }
 0x57b   : > { %v8257_v49 = vpack.c.b16 %v8245_v0, %v8244_v62  ;;  %v10068_v3 = vrot.slane %v8122_v18, 9  ;;  %v8054_v62 = vpop.f32.mrf.mxu3 }
 0x57f   : > { %v7183_v19 = vpop.f32.mrf.mxu0 }
 0x580   : > { %v14201_v24 = vadd.f32 %v7183_v19, %v14033_v59  ;;  %v8196_v59 = vrot.slane %v14010_v17, 5  ;;  %v8209_v19 = vsel %vm12225_vm9, %v10068_v3, %v8208_v39 }
 0x581   : > { %v8250_v56 = vunpack.c.l.b16 %v8209_v19 }
 0x582   : > { %v8197_v51 = vsel %vm12225_vm9, %v10065_v29, %v8196_v59 }
 0x583   : > { %v8247_v26 = vunpack.c.l.b16 %v8197_v51  ;;  %v8056_v60 = vpop.f32.mrf.mxu3 }
 0x587   : > { %v7186_v53 = vpop.f32.mrf.mxu0 }
 0x588   : > { %v14208_v54 = vadd.f32 %v7186_v53, %v14054_v63  ;;  %v8193_v63 = vsel %vm12225_vm9, %v10064_v8, %v8192_v34 }
 0x589   : > { %v8246_v50 = vunpack.c.l.b16 %v8193_v63 }
 0x58a   : > { %8341 = vmatmul.bf16.gmra.mxu0 %v8257_v49  ;;  %v7446_v49 = vpop.f32.mrf.mxu1 }
 0x58b   : > { %v8258_v17 = vpack.c.b16 %v8247_v26, %v8246_v50  ;;  %v8059_v8 = vpop.f32.mrf.mxu3 }
 0x58f   : > { %v7188_v5 = vpop.f32.mrf.mxu0 }
 0x590   : > { %v14213_v55 = vadd.f32 %v7188_v5, %v14075_v40  ;;  %v8204_v40 = vrot.slane %v14052_v16, 5 }
 0x592   : > { %v8205_v10 = vsel %vm12225_vm9, %v10067_v58, %v8204_v40  ;;  %v7449_v29 = vpop.f32.mrf.mxu1  ;;  %v14261_v40 = vld [vmem:[%s14356_s13] ss:$0 sm:$0xff] }
 0x593   : > { %v8249_v61 = vunpack.c.l.b16 %v8205_v10  ;;  %v8061_v26 = vpop.f32.mrf.mxu3 }
 0x597   : > { %v7191_v28 = vpop.f32.mrf.mxu0 }
 0x598   : > { %v14220_v52 = vadd.f32 %v7191_v28, %v14092_v31  ;;  %v8201_v31 = vsel %vm12225_vm9, %v10066_v12, %v8200_v32  ;;  %v7485_v28 = vadd.f32 %v7446_v49, %v14171_v33  ;;  %v10506_v12 = vld [vmem:[%s11983_s21] sm:$0xff]  }
 0x599   : > { %v8248_v13 = vunpack.c.l.b16 %v8201_v31  ;;  %v7486_v31 = vadd.f32 %v7449_v29, %v14178_v2 }
 0x59a   : > { %8346 = vmatmul.bf16.gmra.mxu0 %v8258_v17 }
 0x59b   : > { %v8259_v16 = vpack.c.b16 %v8249_v61, %v8248_v13  ;;  %v10507_v61 = vunpack.c.l.bf16 %v10506_v12 }
 0x59f   : > { %v7193_v41 = vpop.f32.mrf.mxu0 }
 0x5a0   : > { %v14225_v21 = vadd.f32 %v7193_v41, %v14110_v11  ;;  %v8212_v11 = vrot.slane %v14090_v14, 5  ;;  %v8064_v41 = vpop.f32.mrf.mxu3 }
 0x5a2   : > { %v8213_v1 = vsel %vm12225_vm9, %v10069_v30, %v8212_v11 }
 0x5a3   : > { %v8251_v20 = vunpack.c.l.b16 %v8213_v1 }
 0x5a5   : > { %v8260_v53 = vpack.c.b16 %v8251_v20, %v8250_v56  ;;  %v10584_v56 = vld [vmem:[%s11983_s21 + $0x8] sm:$0xff]  }
 0x5a7   : > { %v7196_v4 = vpop.f32.mrf.mxu0 }
 0x5a8   : > { %v14232_v15 = vadd.f32 %v7196_v4, %v14126_v36  ;;  %v7637_v36 = vpop.f32.mrf.mxu2  ;;  %v10508_v4 = vunpack.c.h.bf16 %v10506_v12  ;;  %v8066_v3 = vpop.f32.mrf.mxu3 }
 0x5aa   : > { %8351 = vmatmul.bf16.gmra.mxu0 %v8259_v16 }
 0x5af   : > { %v7198_v37 = vpop.f32.mrf.mxu0 }
 0x5b0   : > { %v14237_v48 = vadd.f32 %v7198_v37, %v14143_v7  ;;  %v7639_v25 = vpop.f32.mrf.mxu2 }
 0x5b1   : > { %v7678_v38 = vadd.f32 %v7639_v25, %v7485_v28  ;;  %v10511_v25 = vunpack.c.l.bf16 %v10584_v56 }
 0x5b7   : > { %v7201_v0 = vpop.f32.mrf.mxu0 }
 0x5b8   : > { %v14244_v14 = vadd.f32 %v7201_v0, %v14150_v6  ;;  %v7642_v59 = vpop.f32.mrf.mxu2  ;;  %v7451_v6 = vpop.f32.mrf.mxu1 }
 0x5b9   : > { %v7679_v30 = vadd.f32 %v7642_v59, %v7486_v31  ;;  %v7487_v11 = vadd.f32 %v7451_v6, %v14187_v45 }
 0x5ba   : > { %8356 = vmatmul.bf16.gmra.mxu0 %v8260_v53 }
 0x5bb   : > { %v8096_v39 = vadd.f32 %v8059_v8, %v7679_v30 }
 0x5bf   : > { %v7203_v7 = vpop.f32.mrf.mxu0 }
 0x5c0   : > { %v14247_v9 = vadd.f32 %v7203_v7, %v14157_v42  ;;  %v7644_v63 = vpop.f32.mrf.mxu2  ;;  %v7484_v42 = vadd.f32 %v7444_v47, %v14168_v27  ;;  %v7454_v17 = vpop.f32.mrf.mxu1  ;;  %v10512_v7 = vunpack.c.h.bf16 %v10584_v56 }
 0x5c1   : > { %v7680_v1 = vadd.f32 %v7644_v63, %v7487_v11  ;;  %v7488_v49 = vadd.f32 %v7454_v17, %v14196_v44 }
 0x5c2   : > { %v7677_v50 = vadd.f32 %v7637_v36, %v7484_v42 }
 0x5c3   : > { %v8097_v2 = vadd.f32 %v8061_v26, %v7680_v1 }
 0x5c7   : > { %v7206_v35 = vpop.f32.mrf.mxu0 }
 0x5c8   : > { %v14250_v5 = vadd.f32 %v7206_v35, %v14159_v46  ;;  %v8094_v46 = vadd.f32 %v8054_v62, %v7677_v50  ;;  %v7647_v58 = vpop.f32.mrf.mxu2  ;;  %v7456_v33 = vpop.f32.mrf.mxu1 }
 0x5c9   : > { %v7681_v8 = vadd.f32 %v7647_v58, %v7488_v49  ;;  %v7489_v6 = vadd.f32 %v7456_v33, %v14201_v24 }
 0x5ca   : > { %8361 = vmatmul.bf16.gmra.mxu0 %v14189_v43 }
 0x5cb   : > { %v8098_v26 = vadd.f32 %v8064_v41, %v7681_v8  ;;  %v10587_v8 = vld [vmem:[%s11983_s21 + $0x20] sm:$0xff]  }
 0x5cf   : > { %v7208_v34 = vpop.f32.mrf.mxu0 }
 0x5d0   : > { %v14254_v51 = vadd.f32 %v7208_v34, %v14165_v22  ;;  %v8095_v22 = vadd.f32 %v8056_v60, %v7678_v38  ;;  %v7649_v18 = vpop.f32.mrf.mxu2  ;;  %v7459_v36 = vpop.f32.mrf.mxu1 }
 0x5d1   : > { %v8069_v60 = vpop.f32.mrf.mxu3  ;;  %v7682_v50 = vadd.f32 %v7649_v18, %v7489_v6  ;;  %v7490_v58 = vadd.f32 %v7459_v36, %v14208_v54 }
 0x5d3   : > { %v8099_v17 = vadd.f32 %v8066_v3, %v7682_v50 }
 0x5d7   : > { %v8327_v23 = vpop.f32.mrf.mxu0 }
 0x5d8   : > { %v8367_v43 = vadd.f32 %v8327_v23, %v8094_v46  ;;  %v7652_v20 = vpop.f32.mrf.mxu2  ;;  %v7461_v35 = vpop.f32.mrf.mxu1  ;;  %v10585_v46 = vld [vmem:[%s11983_s21 + $0x10] sm:$0xff]  }
 0x5d9   : > { %v8071_v44 = vpop.f32.mrf.mxu3  ;;  %v10515_v12 = vunpack.c.l.bf16 %v10585_v46  ;;  %v7683_v33 = vadd.f32 %v7652_v20, %v7490_v58  ;;  %v7491_v31 = vadd.f32 %v7461_v35, %v14213_v55 }
 0x5da   : > { %v8387_v32 = vadd.f32 %v14261_v40, %v8367_v43 }
 0x5dc   : > { %v8435_v16 = vadd.f32 %v10507_v61, %v8387_v32 }
 0x5df   : > { %v8329_v27 = vpop.f32.mrf.mxu0 }
 0x5e0   : > { %v8368_v10 = vadd.f32 %v8329_v27, %v8095_v22  ;;  %v7654_v42 = vpop.f32.mrf.mxu2  ;;  %v7464_v23 = vpop.f32.mrf.mxu1  ;;  %v10516_v27 = vunpack.c.h.bf16 %v10585_v46 }
 0x5e1   : > { %v7684_v18 = vadd.f32 %v7654_v42, %v7491_v31  ;;  %v7492_v36 = vadd.f32 %v7464_v23, %v14220_v52 }
 0x5e2   : > { %v8388_v13 = vadd.f32 %v14261_v40, %v8368_v10 }
 0x5e3   : > { %v8101_v11 = vadd.f32 %v8071_v44, %v7684_v18 }
 0x5e4   : > { %v8436_v57 = vadd.f32 %v10508_v4, %v8388_v13  ;;  %v8074_v13 = vpop.f32.mrf.mxu3 }
 0x5e6   : > { %v10540_v47 = vpack.c.bf16 %v8436_v57, %v8435_v16  ;;  %v8100_v57 = vadd.f32 %v8069_v60, %v7683_v33 }
 0x5e7   : > { %v8332_v37 = vpop.f32.mrf.mxu0 }
 0x5e8   : > { %10541 = vst [vmem:[%s11983_s21] sm:$0xff] %v10540_v47   ;;  %v8369_v19 = vadd.f32 %v8332_v37, %v8096_v39  ;;  %v7657_v32 = vpop.f32.mrf.mxu2  ;;  %v7466_v16 = vpop.f32.mrf.mxu1  ;;  %v10586_v47 = vld [vmem:[%s11983_s21 + $0x18] sm:$0xff]  }
 0x5e9   : > { %v10519_v55 = vunpack.c.l.bf16 %v10586_v47 }
 0x5ea   : > { %v8389_v0 = vadd.f32 %v14261_v40, %v8369_v19 }
 0x5ec   : > { %v8437_v29 = vadd.f32 %v10511_v25, %v8389_v0  ;;  %v8076_v1 = vpop.f32.mrf.mxu3  ;;  %v7685_v0 = vadd.f32 %v7657_v32, %v7492_v36 }
 0x5ef   : > { %v8334_v62 = vpop.f32.mrf.mxu0 }
 0x5f0   : > { %v8370_v53 = vadd.f32 %v8334_v62, %v8097_v2  ;;  %v7659_v54 = vpop.f32.mrf.mxu2  ;;  %v10520_v2 = vunpack.c.h.bf16 %v10586_v47  ;;  %v7469_v20 = vpop.f32.mrf.mxu1 }
 0x5f2   : > { %v8390_v45 = vadd.f32 %v14261_v40, %v8370_v53  ;;  %v7493_v53 = vadd.f32 %v7466_v16, %v14225_v21  ;;  %v10523_v21 = vunpack.c.l.bf16 %v10587_v8 }
 0x5f4   : > { %v8438_v59 = vadd.f32 %v10512_v7, %v8390_v45  ;;  %v8102_v7 = vadd.f32 %v8074_v13, %v7685_v0  ;;  %v7686_v60 = vadd.f32 %v7659_v54, %v7493_v53 }
 0x5f6   : > { %v10545_v34 = vpack.c.bf16 %v8438_v59, %v8437_v29  ;;  %v8079_v29 = vpop.f32.mrf.mxu3  ;;  %v8103_v35 = vadd.f32 %v8076_v1, %v7686_v60 }
 0x5f7   : > { %v8337_v63 = vpop.f32.mrf.mxu0 }
 0x5f8   : > { %10591 = vst [vmem:[%s11983_s21 + $0x8] sm:$0xff] %v10545_v34   ;;  %v8371_v28 = vadd.f32 %v8337_v63, %v8098_v26  ;;  %v7662_v25 = vpop.f32.mrf.mxu2  ;;  %v7471_v52 = vpop.f32.mrf.mxu1  ;;  %v7494_v26 = vadd.f32 %v7469_v20, %v14232_v15  ;;  %v10589_v20 = vld [vmem:[%s11983_s21 + $0x30] sm:$0xff]  }
 0x5fa   : > { %v8391_v43 = vadd.f32 %v14261_v40, %v8371_v28  ;;  %v10524_v28 = vunpack.c.h.bf16 %v10587_v8  ;;  %v7687_v46 = vadd.f32 %v7662_v25, %v7494_v26  ;;  %v10532_v25 = vunpack.c.h.bf16 %v10589_v20 }
 0x5fc   : > { %v8439_v41 = vadd.f32 %v10515_v12, %v8391_v43  ;;  %v8104_v12 = vadd.f32 %v8079_v29, %v7687_v46 }
 0x5fe   : > { %v8081_v23 = vpop.f32.mrf.mxu3 }
 0x5ff   : > { %v8339_v38 = vpop.f32.mrf.mxu0 }
 0x600   : > { %v8372_v22 = vadd.f32 %v8339_v38, %v8099_v17  ;;  %v7664_v42 = vpop.f32.mrf.mxu2  ;;  %v7495_v38 = vadd.f32 %v7471_v52, %v14237_v48 }
 0x602   : > { %v8392_v24 = vadd.f32 %v14261_v40, %v8372_v22  ;;  %v7474_v22 = vpop.f32.mrf.mxu1 }
 0x604   : > { %v8440_v10 = vadd.f32 %v10516_v27, %v8392_v24  ;;  %v7688_v24 = vadd.f32 %v7664_v42, %v7495_v38 }
 0x606   : > { %v10550_v61 = vpack.c.bf16 %v8440_v10, %v8439_v41  ;;  %v8105_v15 = vadd.f32 %v8081_v23, %v7688_v24  ;;  %v8084_v41 = vpop.f32.mrf.mxu3  ;;  %v10588_v10 = vld [vmem:[%s11983_s21 + $0x28] sm:$0xff]  }
 0x607   : > { %v8342_v4 = vpop.f32.mrf.mxu0  ;;  %v10527_v48 = vunpack.c.l.bf16 %v10588_v10 }
 0x608   : > { %10592 = vst [vmem:[%s11983_s21 + $0x10] sm:$0xff] %v10550_v61   ;;  %v8373_v30 = vadd.f32 %v8342_v4, %v8100_v57  ;;  %v7667_v27 = vpop.f32.mrf.mxu2  ;;  %v7496_v4 = vadd.f32 %v7474_v22, %v14244_v14  ;;  %v10528_v57 = vunpack.c.h.bf16 %v10588_v10 }
 0x60a   : > { %v8393_v3 = vadd.f32 %v14261_v40, %v8373_v30  ;;  %v7476_v13 = vpop.f32.mrf.mxu1 }
 0x60b   : > { %v7497_v47 = vadd.f32 %v7476_v13, %v14247_v9 }
 0x60c   : > { %v8441_v56 = vadd.f32 %v10519_v55, %v8393_v3 }
 0x60f   : > { %v8344_v37 = vpop.f32.mrf.mxu0 }
 0x610   : > { %v8374_v39 = vadd.f32 %v8344_v37, %v8101_v11  ;;  %v7669_v54 = vpop.f32.mrf.mxu2  ;;  %v7689_v11 = vadd.f32 %v7667_v27, %v7496_v4 }
 0x611   : > { %v7690_v36 = vadd.f32 %v7669_v54, %v7497_v47 }
 0x612   : > { %v8394_v19 = vadd.f32 %v14261_v40, %v8374_v39  ;;  %v8086_v39 = vpop.f32.mrf.mxu3  ;;  %v8106_v1 = vadd.f32 %v8084_v41, %v7689_v11  ;;  %v7479_v55 = vpop.f32.mrf.mxu1 }
 0x613   : > { %v8107_v14 = vadd.f32 %v8086_v39, %v7690_v36  ;;  %v7498_v53 = vadd.f32 %v7479_v55, %v14250_v5 }
 0x614   : > { %v8442_v62 = vadd.f32 %v10520_v2, %v8394_v19 }
 0x616   : > { %v10555_v49 = vpack.c.bf16 %v8442_v62, %v8441_v56 }
 0x617   : > { %v8347_v45 = vpop.f32.mrf.mxu0 }
 0x618   : > { %10593 = vst [vmem:[%s11983_s21 + $0x18] sm:$0xff] %v10555_v49   ;;  %v8375_v59 = vadd.f32 %v8347_v45, %v8102_v7  ;;  %v7672_v2 = vpop.f32.mrf.mxu2  ;;  %v10531_v49 = vunpack.c.l.bf16 %v10589_v20 }
 0x61a   : > { %v8395_v34 = vadd.f32 %v14261_v40, %v8375_v59  ;;  %v8089_v45 = vpop.f32.mrf.mxu3  ;;  %v7481_v29 = vpop.f32.mrf.mxu1  ;;  %v7691_v59 = vadd.f32 %v7672_v2, %v7498_v53 }
 0x61b   : > { %v7499_v52 = vadd.f32 %v7481_v29, %v14254_v51 }
 0x61c   : > { %v8443_v44 = vadd.f32 %v10523_v21, %v8395_v34  ;;  %v8108_v34 = vadd.f32 %v8089_v45, %v7691_v59  ;;  %v10590_v21 = vld [vmem:[%s11983_s21 + $0x38] sm:$0xff]  }
 0x61d   : > { %v10536_v23 = vunpack.c.h.bf16 %v10590_v21 }
 0x61f   : > { %v8349_v6 = vpop.f32.mrf.mxu0 }
 0x620   : > { %v8376_v63 = vadd.f32 %v8349_v6, %v8103_v35  ;;  %v7674_v6 = vpop.f32.mrf.mxu2 }
 0x621   : > { %v7692_v5 = vadd.f32 %v7674_v6, %v7499_v52 }
 0x622   : > { %v8396_v50 = vadd.f32 %v14261_v40, %v8376_v63  ;;  %v8091_v42 = vpop.f32.mrf.mxu3 }
 0x623   : > { %v8109_v26 = vadd.f32 %v8091_v42, %v7692_v5 }
 0x624   : > { %v8444_v17 = vadd.f32 %v10524_v28, %v8396_v50 }
 0x626   : > { %v10560_v43 = vpack.c.bf16 %v8444_v17, %v8443_v44  ;;  %v10535_v44 = vunpack.c.l.bf16 %v10590_v21 }
 0x627   : > { %v8352_v58 = vpop.f32.mrf.mxu0 }
 0x628   : > { %10594 = vst [vmem:[%s11983_s21 + $0x20] sm:$0xff] %v10560_v43   ;;  %v8377_v32 = vadd.f32 %v8352_v58, %v8104_v12 }
 0x62a   : > { %v8397_v31 = vadd.f32 %v14261_v40, %v8377_v32 }
 0x62c   : > { %v8445_v18 = vadd.f32 %v10527_v48, %v8397_v31 }
 0x62f   : > { %v8354_v33 = vpop.f32.mrf.mxu0 }
 0x630   : > { %v8378_v61 = vadd.f32 %v8354_v33, %v8105_v15 }
 0x632   : > { %v8398_v16 = vadd.f32 %v14261_v40, %v8378_v61 }
 0x634   : > { %v8446_v30 = vadd.f32 %v10528_v57, %v8398_v16 }
 0x636   : > { %v10565_v37 = vpack.c.bf16 %v8446_v30, %v8445_v18 }
 0x637   : > { %v8357_v3 = vpop.f32.mrf.mxu0 }
 0x638   : > { %10595 = vst [vmem:[%s11983_s21 + $0x28] sm:$0xff] %v10565_v37   ;;  %v8379_v19 = vadd.f32 %v8357_v3, %v8106_v1 }
 0x63a   : > { %v8399_v62 = vadd.f32 %v14261_v40, %v8379_v19 }
 0x63c   : > { %v8447_v7 = vadd.f32 %v10531_v49, %v8399_v62 }
 0x63f   : > { %v8359_v56 = vpop.f32.mrf.mxu0 }
 0x640   : > { %v8380_v0 = vadd.f32 %v8359_v56, %v8107_v14 }
 0x642   : > { %v8400_v9 = vadd.f32 %v14261_v40, %v8380_v0 }
 0x644   : > { %v8448_v60 = vadd.f32 %v10532_v25, %v8400_v9 }
 0x646   : > { %v10570_v35 = vpack.c.bf16 %v8448_v60, %v8447_v7 }
 0x647   : > { %v8362_v8 = vpop.f32.mrf.mxu0 }
 0x648   : > { %10596 = vst [vmem:[%s11983_s21 + $0x30] sm:$0xff] %v10570_v35   ;;  %v8381_v63 = vadd.f32 %v8362_v8, %v8108_v34 }
 0x64a   : > { %v8401_v51 = vadd.f32 %v14261_v40, %v8381_v63 }
 0x64c   : > { %v8449_v46 = vadd.f32 %v10535_v44, %v8401_v51 }
 0x64f   : > { %v8364_v50 = vpop.f32.mrf.mxu0 }
 0x650   : > { %v8382_v28 = vadd.f32 %v8364_v50, %v8109_v26 }
 0x652   : > { %v8402_v17 = vadd.f32 %v14261_v40, %v8382_v28 }
 0x654   : > { %v8450_v38 = vadd.f32 %v10536_v23, %v8402_v17 }
 0x656   : > { %v10575_v43 = vpack.c.bf16 %v8450_v38, %v8449_v46 }
 0x658   : > { %10597 = vst [vmem:[%s11983_s21 + $0x38] sm:$0xff] %v10575_v43  }
 0x659   : > { %10710 = shalt.err (!%p10707_p3)
}
 0x65a   : > { %s10748_s16 = smov 64   ;;  %s10749_s21 = smov 4  }
 0x65b   : > { %10623 = dma.vmem_to_hbm [thread:$0]  (%p10863_p5), %s8498_s20, 1024, %s8500_s17, %s8484_s26, %s10748_s16, %s10748_s16, %s10749_s21  }
 0x65c PF: > { %s14548_s18 = sld [smem:[#allocation8_spill]] }
 0x65d   : > { %s14549_s25 = sld [smem:[#allocation6_spill]] }
 0x662   : > { %p10629_p4 = scmp.ge.s32.totalorder %s14548_s18, 2 }
 0x663   : > { %s8514_s24 = sand.u32 1, %s14549_s25  }
 0x664   : > { %p10626_p7 = pnand %p10629_p4, %p10867_p6  ;;  %s8515_s15 = scalar_lea.sflag [#allocation4], %s8514_s24 }
 0x666   : > { %p10627_p8 = pneg %p10626_p7 }
 0x668   : > { %10728 = dma.done.wait (%p10627_p8), %s8515_s15, 1024  }
 0x669   : > { %10730 = vsyncadd (%p10627_p8), %s8515_s15, 4294966272  ;;  %s14551_s16 = sld [smem:[#allocation9_spill]]  ;;  %s14554_s29 = smov %s10737_s30 }
 0x66a   : > { %s14552_s0 = sld [smem:[#allocation7_spill]] }
 0x66b   : > { %s14553_s15 = sld [smem:[#allocation10_spill]] }
 0x66f   : > { %p24_p9 = scmp.ge.s32.totalorder %s14551_s16, 4  }
 0x670   : > { %s14555_s30 = smov %s14552_s0 }
 0x671   :  { %26 = sbr.rel (!%p24_p9) target bundleno = 5 (0x5), region = 116 }
 0x676   :  { %8521 = vsyncpa [#allocation4], 1 }
 0x677   :  { %8523 = vsyncpa [#allocation4 + $0x1], 1 }

</bundles_post_ra>
